<compile_context>
chip_gen: v5e
topology: v5e:2x2
jax: 0.10.0
libtpu: 0.0.40
codegen_flags: <defaults>
</compile_context>

<pallas_src>
import jax
import jax.numpy as jnp
from jax import lax
from jax.experimental import pallas as pl
from jax.experimental.pallas import tpu as pltpu

EPS = 1e-5
LANE = 128


def _round_up(x, m):
    return ((x + m - 1) // m) * m


# ------------------------------ fused dense layer ---------------------------- #

def _dense_layer_fused(buf, kp, c_in):
    """One dense layer, fully fused: bn1+relu+1x1+bn2+relu+3x3, concat in place."""
    n, h, w, cpad = buf.shape
    cmid_pad = kp["w1"].shape[1]
    growth = kp["w2"].shape[-1]
    cdt = kp["w1"].dtype            # MXU operand dtype (bf16 on v6e/v7x, f32 for exact)
    hw = h * w
    tail = cpad - c_in - growth
    assert tail >= 0

    def kernel(x_ref, bn1_ref, w1_ref, bn2_ref, w2_ref, out_ref, a2p_ref):
        x = x_ref[...].reshape(hw, cpad)                        # channels on lanes
        bn1 = bn1_ref[...]
        a1 = jnp.maximum(x * bn1[0:1, :] + bn1[1:2, :], 0.0)    # padded channels -> 0
        mid = jnp.dot(a1.astype(cdt), w1_ref[...],
                      preferred_element_type=jnp.float32)       # (hw, cmid_pad), f32
        bn2 = bn2_ref[...]
        a2 = jnp.maximum(mid * bn2[0:1, :] + bn2[1:2, :], 0.0)

        # a2 never touches HBM: keep its zero-padded copy in a VMEM scratch.
        a2p_ref[...] = jnp.zeros_like(a2p_ref)
        a2p_ref[pl.ds(1, h), pl.ds(1, w), :] = a2.reshape(h, w, cmid_pad)

        # 3x3 conv as 9 shifted (hw, cmid) @ (cmid, growth) MXU dots, f32 accumulate.
        acc = jnp.zeros((hw, growth), jnp.float32)
        for t in range(9):
            dy, dx = divmod(t, 3)
            win = a2p_ref[pl.ds(dy, h), pl.ds(dx, w), :].reshape(hw, cmid_pad)
            acc = acc + jnp.dot(win.astype(cdt), w2_ref[t],
                                preferred_element_type=jnp.float32)

        # Dense concat, in place: channels >= c_in of x are still zero, so just add
        # the new features placed at channel offset c_in and store the full
        # lane-dense (cpad-wide) tile back to the aliased buffer.
        pieces = [jnp.zeros((hw, c_in), jnp.float32), acc]
        if tail:
            pieces.append(jnp.zeros((hw, tail), jnp.float32))
        out_ref[...] = (x + jnp.concatenate(pieces, axis=-1)).reshape(1, h, w, cpad)

    # Explicit VMEM budget (double-buffered in/out tiles + resident weights + scratch).
    itemsize = jnp.dtype(cdt).itemsize
    tile_bytes = hw * cpad * 4
    weight_bytes = (cpad * cmid_pad + 9 * cmid_pad * growth) * itemsize \
        + (2 * cpad + 2 * cmid_pad) * 4
    scratch_bytes = (h + 2) * (w + 2) * cmid_pad * 4
    need = 4 * tile_bytes + 2 * weight_bytes + scratch_bytes + (4 << 20)
    vmem_limit = int(min(max(need, 16 << 20), 48 << 20))   # stays sane on v5e/v6e/v7x

    return pl.pallas_call(
        kernel,
        out_shape=jax.ShapeDtypeStruct((n, h, w, cpad), jnp.float32),
        grid=(n,),
        in_specs=[
            pl.BlockSpec((1, h, w, cpad), lambda i: (i, 0, 0, 0)),
            pl.BlockSpec((2, cpad), lambda i: (0, 0)),              # packed (s1, b1)
            pl.BlockSpec((cpad, cmid_pad), lambda i: (0, 0)),       # W1, VMEM-resident
            pl.BlockSpec((2, cmid_pad), lambda i: (0, 0)),          # packed (s2, b2)
            pl.BlockSpec((9, cmid_pad, growth), lambda i: (0, 0, 0)),  # W2 taps
        ],
        out_specs=pl.BlockSpec((1, h, w, cpad), lambda i: (i, 0, 0, 0)),
        scratch_shapes=[pltpu.VMEM((h + 2, w + 2, cmid_pad), jnp.float32)],
        input_output_aliases={0: 0},   # update the feature buffer in place (P8)
        compiler_params=pltpu.CompilerParams(
            dimension_semantics=("parallel",),
            vmem_limit_bytes=vmem_limit),
    )(buf, kp["bn1"], kp["w1"], kp["bn2"], kp["w2"])


def dense_block_pallas(x_nchw, kernel_params):
    n, c_in, h, w = x_nchw.shape
    cpad = kernel_params[0]["w1"].shape[0]
    # Single lane-dense feature buffer holding the growing concat (padded channels = 0).
    buf = jnp.zeros((n, h, w, cpad), jnp.float32)
    buf = buf.at[..., :c_in].set(jnp.transpose(x_nchw, (0, 2, 3, 1)))  # NCHW -> NHWC
    c = c_in
    for kp in kernel_params:
        buf = _dense_layer_fused(buf, kp, c)
        c += kp["w2"].shape[-1]
    return jnp.transpose(buf[..., :c], (0, 3, 1, 2))   # drop channel padding, -> NCHW


# --------------------------- parameter construction ------------------------- #

def init_dense_block_params(key, num_layers, in_channels, bn_size, growth_rate):
    """PyTorch-layout params (Conv OIHW, BN per-channel), deterministic."""
    params = []
    c = in_channels
    cmid = bn_size * growth_rate
    for i in range(num_layers):
        ks = jax.random.split(jax.random.fold_in(key, i), 10)
        p = dict(
            g1=jax.random.uniform(ks[0], (c,), minval=0.5, maxval=1.5),
            be1=0.1 * jax.random.normal(ks[1], (c,)),
            rm1=0.1 * jax.random.normal(ks[2], (c,)),
            rv1=jax.random.uniform(ks[3], (c,), minval=0.5, maxval=1.5),
            w1=jax.random.normal(ks[4], (cmid, c, 1, 1)) / jnp.sqrt(c),
            g2=jax.random.uniform(ks[5], (cmid,), minval=0.5, maxval=1.5),
            be2=0.1 * jax.random.normal(ks[6], (cmid,)),
            rm2=0.1 * jax.random.normal(ks[7], (cmid,)),
            rv2=jax.random.uniform(ks[8], (cmid,), minval=0.5, maxval=1.5),
            w2=jax.random.normal(ks[9], (growth_rate, cmid, 3, 3)) / jnp.sqrt(9 * cmid),
        )
        params.append(p)
        c += growth_rate
    return params


def to_kernel_params(params, compute_dtype=jnp.bfloat16):
    """Fold BN into packed (scale, shift), pad channels to lane multiples, and reshape
    conv weights for the fused kernel.  compute_dtype is the MXU operand dtype
    (bf16 recommended on v6e/v7x; f32 gives a bit-tight match to the reference)."""
    cin0 = params[0]["w1"].shape[1]
    c_total = cin0 + sum(p["w2"].shape[0] for p in params)
    cpad = _round_up(c_total, LANE)
    out = []
    for p in params:
        cmid, cin = p["w1"].shape[:2]
        g = p["w2"].shape[0]
        cmid_pad = _round_up(cmid, LANE)
        s1 = p["g1"] / jnp.sqrt(p["rv1"] + EPS)
        b1 = p["be1"] - p["rm1"] * s1
        s2 = p["g2"] / jnp.sqrt(p["rv2"] + EPS)
        b2 = p["be2"] - p["rm2"] * s2
        # padded channels get scale = shift = 0 (and zero weight rows/cols) so they
        # contribute exactly nothing.
        bn1 = jnp.zeros((2, cpad), jnp.float32).at[0, :cin].set(s1).at[1, :cin].set(b1)
        bn2 = jnp.zeros((2, cmid_pad), jnp.float32).at[0, :cmid].set(s2).at[1, :cmid].set(b2)
        w1 = jnp.zeros((cpad, cmid_pad), compute_dtype)
        w1 = w1.at[:cin, :cmid].set(p["w1"].reshape(cmid, cin).T.astype(compute_dtype))
        w2t = jnp.transpose(p["w2"], (2, 3, 1, 0)).reshape(9, cmid, g)   # (tap, cmid, g)
        w2 = jnp.zeros((9, cmid_pad, g), compute_dtype)
        w2 = w2.at[:, :cmid, :].set(w2t.astype(compute_dtype))
        out.append(dict(bn1=bn1, bn2=bn2, w1=w1, w2=w2))
    return out


# -------------------------------- reference --------------------------------- #

def _bn_eval(x, g, be, rm, rv):
    return (x - rm[None, :, None, None]) / jnp.sqrt(rv[None, :, None, None] + EPS) \
        * g[None, :, None, None] + be[None, :, None, None]


def dense_block_ref(x_nchw, params):
    x = x_nchw
    dn = ("NCHW", "OIHW", "NCHW")
    for p in params:
        a1 = jax.nn.relu(_bn_eval(x, p["g1"], p["be1"], p["rm1"], p["rv1"]))
        mid = lax.conv_general_dilated(a1, p["w1"], (1, 1), "VALID",
                                       dimension_numbers=dn)
        a2 = jax.nn.relu(_bn_eval(mid, p["g2"], p["be2"], p["rm2"], p["rv2"]))
        new = lax.conv_general_dilated(a2, p["w2"], (1, 1), ((1, 1), (1, 1)),
                                       dimension_numbers=dn)
        x = jnp.concatenate([x, new], axis=1)
    return x


# ----------------------------------- main ------------------------------------ #

if __name__ == "__main__":
    num_layers, in_channels, bn_size, growth_rate, drop_rate = 3, 4, 2, 4, 0.0
    N, H, W = 2, 16, 16

    key = jax.random.PRNGKey(0)
    kx, kparam = jax.random.split(key)
    x = jax.random.normal(kx, (N, in_channels, H, W), dtype=jnp.float32)
    params = init_dense_block_params(kparam, num_layers, in_channels, bn_size, growth_rate)

    ref = jax.block_until_ready(dense_block_ref(x, params))
    c_out = in_channels + num_layers * growth_rate

    block_fn = jax.jit(dense_block_pallas)

    # 1) f32 MXU operands: tight correctness check against the XLA reference.
    out_f32 = jax.block_until_ready(block_fn(x, to_kernel_params(params, jnp.float32)))
    assert out_f32.shape == (N, c_out, H, W), out_f32.shape
    assert jnp.allclose(out_f32, ref, rtol=1e-4, atol=1e-4), \
        float(jnp.max(jnp.abs(out_f32 - ref)))

    # 2) bf16 MXU operands (recommended perf config on v6e/v7x; f32 accumulation,
    #    f32 BN/feature buffer).  Loose sanity bound only: bf16 rounding of matmul
    #    operands moves outputs by O(1e-2).
    out_bf16 = jax.block_until_ready(block_fn(x, to_kernel_params(params, jnp.bfloat16)))
    assert out_bf16.shape == (N, c_out, H, W), out_bf16.shape
    assert bool(jnp.all(jnp.isfinite(out_bf16)))
    assert float(jnp.max(jnp.abs(out_bf16 - ref))) < 0.5

    print("KERNEL_OK")
</pallas_src>

<mosaic_0001>
module attributes {stable_mosaic.version = 11 : i64} {
  func.func @kernel(%arg0: i32, %arg1: memref<1x16x16x128xf32, #tpu.memory_space<vmem>>, %arg2: memref<2x128xf32, #tpu.memory_space<vmem>>, %arg3: memref<128x128xf32, #tpu.memory_space<vmem>>, %arg4: memref<2x128xf32, #tpu.memory_space<vmem>>, %arg5: memref<9x128x4xf32, #tpu.memory_space<vmem>>, %arg6: memref<1x16x16x128xf32, #tpu.memory_space<vmem>>, %arg7: memref<18x18x128xf32, #tpu.memory_space<vmem>>) attributes {dimension_semantics = [#tpu.dimension_semantics<parallel>], iteration_bounds = array<i64: 2>, scalar_prefetch = 0 : i64, scratch_operands = 1 : i64, tpu.core_type = #tpu.core_type<tc>, window_params = [{transform_indices = @transform_0, window_bounds = array<i64: 1, 16, 16, 128>}, {pipeline_mode = #tpu.pipeline_mode<synchronous>, transform_indices = @transform_1, window_bounds = array<i64: 2, 128>}, {pipeline_mode = #tpu.pipeline_mode<synchronous>, transform_indices = @transform_2, window_bounds = array<i64: 128, 128>}, {pipeline_mode = #tpu.pipeline_mode<synchronous>, transform_indices = @transform_3, window_bounds = array<i64: 2, 128>}, {pipeline_mode = #tpu.pipeline_mode<synchronous>, transform_indices = @transform_4, window_bounds = array<i64: 9, 128, 4>}, {transform_indices = @transform_5, window_bounds = array<i64: 1, 16, 16, 128>}]} {
    %c0 = arith.constant 0 : index
    %c0_0 = arith.constant 0 : index
    %c0_1 = arith.constant 0 : index
    %c0_2 = arith.constant 0 : index
    %0 = vector.load %arg1[%c0, %c0_0, %c0_1, %c0_2] : memref<1x16x16x128xf32, #tpu.memory_space<vmem>>, vector<1x16x16x128xf32>
    %1 = vector.shape_cast %0 : vector<1x16x16x128xf32> to vector<256x128xf32>
    %c0_3 = arith.constant 0 : index
    %c0_4 = arith.constant 0 : index
    %2 = vector.load %arg2[%c0_3, %c0_4] : memref<2x128xf32, #tpu.memory_space<vmem>>, vector<2x128xf32>
    %3 = vector.extract_strided_slice %2 {offsets = [0, 0], sizes = [1, 128], strides = [1, 1]} : vector<2x128xf32> to vector<1x128xf32>
    %4 = vector.broadcast %3 : vector<1x128xf32> to vector<256x128xf32>
    %5 = arith.mulf %1, %4 : vector<256x128xf32>
    %6 = vector.extract_strided_slice %2 {offsets = [1, 0], sizes = [1, 128], strides = [1, 1]} : vector<2x128xf32> to vector<1x128xf32>
    %7 = vector.broadcast %6 : vector<1x128xf32> to vector<256x128xf32>
    %8 = arith.addf %5, %7 : vector<256x128xf32>
    %cst = arith.constant 0.000000e+00 : f32
    %9 = vector.broadcast %cst : f32 to vector<256x128xf32>
    %10 = arith.maximumf %8, %9 : vector<256x128xf32>
    %c0_5 = arith.constant 0 : index
    %c0_6 = arith.constant 0 : index
    %11 = vector.load %arg3[%c0_5, %c0_6] : memref<128x128xf32, #tpu.memory_space<vmem>>, vector<128x128xf32>
    %cst_7 = arith.constant dense<0.000000e+00> : vector<256x128xf32>
    %12 = tpu.matmul %10, %11, %cst_7 {dimension_numbers = #tpu.dot_dimension_numbers<[1], [0], [0], [1], [0, 0, 1, 1], [], []>} : vector<256x128xf32>, vector<128x128xf32>, vector<256x128xf32> -> vector<256x128xf32>
    %c0_8 = arith.constant 0 : index
    %c0_9 = arith.constant 0 : index
    %13 = vector.load %arg4[%c0_8, %c0_9] : memref<2x128xf32, #tpu.memory_space<vmem>>, vector<2x128xf32>
    %14 = vector.extract_strided_slice %13 {offsets = [0, 0], sizes = [1, 128], strides = [1, 1]} : vector<2x128xf32> to vector<1x128xf32>
    %15 = vector.broadcast %14 : vector<1x128xf32> to vector<256x128xf32>
    %16 = arith.mulf %12, %15 : vector<256x128xf32>
    %17 = vector.extract_strided_slice %13 {offsets = [1, 0], sizes = [1, 128], strides = [1, 1]} : vector<2x128xf32> to vector<1x128xf32>
    %18 = vector.broadcast %17 : vector<1x128xf32> to vector<256x128xf32>
    %19 = arith.addf %16, %18 : vector<256x128xf32>
    %cst_10 = arith.constant 0.000000e+00 : f32
    %20 = vector.broadcast %cst_10 : f32 to vector<256x128xf32>
    %21 = arith.maximumf %19, %20 : vector<256x128xf32>
    %cst_11 = arith.constant 0.000000e+00 : f32
    %22 = vector.broadcast %cst_11 : f32 to vector<18x18x128xf32>
    %c0_12 = arith.constant 0 : index
    %c0_13 = arith.constant 0 : index
    %c0_14 = arith.constant 0 : index
    %23 = vector.load %arg7[%c0_12, %c0_13, %c0_14] : memref<18x18x128xf32, #tpu.memory_space<vmem>>, vector<18x18x128xf32>
    tpu.vector_store %arg7[%c0_12, %c0_13, %c0_14], %22 {strides = array<i32>} : memref<18x18x128xf32, #tpu.memory_space<vmem>>, vector<18x18x128xf32>,
    %24 = vector.shape_cast %21 : vector<256x128xf32> to vector<16x16x128xf32>
    %c1 = arith.constant 1 : index
    %c1_15 = arith.constant 1 : index
    %c0_16 = arith.constant 0 : index
    %25 = vector.load %arg7[%c1, %c1_15, %c0_16] : memref<18x18x128xf32, #tpu.memory_space<vmem>>, vector<16x16x128xf32>
    tpu.vector_store %arg7[%c1, %c1_15, %c0_16], %24 {strides = array<i32>} : memref<18x18x128xf32, #tpu.memory_space<vmem>>, vector<16x16x128xf32>,
    %cst_17 = arith.constant 0.000000e+00 : f32
    %26 = vector.broadcast %cst_17 : f32 to vector<256x4xf32>
    %c0_18 = arith.constant 0 : index
    %c0_19 = arith.constant 0 : index
    %c0_20 = arith.constant 0 : index
    %27 = vector.load %arg7[%c0_18, %c0_19, %c0_20] : memref<18x18x128xf32, #tpu.memory_space<vmem>>, vector<16x16x128xf32>
    %28 = vector.shape_cast %27 : vector<16x16x128xf32> to vector<256x128xf32>
    %c0_21 = arith.constant 0 : index
    %c0_22 = arith.constant 0 : index
    %c0_23 = arith.constant 0 : index
    %29 = vector.load %arg5[%c0_21, %c0_22, %c0_23] : memref<9x128x4xf32, #tpu.memory_space<vmem>>, vector<1x128x4xf32>
    %30 = vector.shape_cast %29 : vector<1x128x4xf32> to vector<128x4xf32>
    %cst_24 = arith.constant dense<0.000000e+00> : vector<256x4xf32>
    %31 = tpu.matmul %28, %30, %cst_24 {dimension_numbers = #tpu.dot_dimension_numbers<[1], [0], [0], [1], [0, 0, 1, 1], [], []>} : vector<256x128xf32>, vector<128x4xf32>, vector<256x4xf32> -> vector<256x4xf32>
    %32 = arith.addf %26, %31 : vector<256x4xf32>
    %c0_25 = arith.constant 0 : index
    %c1_26 = arith.constant 1 : index
    %c0_27 = arith.constant 0 : index
    %33 = vector.load %arg7[%c0_25, %c1_26, %c0_27] : memref<18x18x128xf32, #tpu.memory_space<vmem>>, vector<16x16x128xf32>
    %34 = vector.shape_cast %33 : vector<16x16x128xf32> to vector<256x128xf32>
    %c1_28 = arith.constant 1 : index
    %c0_29 = arith.constant 0 : index
    %c0_30 = arith.constant 0 : index
    %35 = vector.load %arg5[%c1_28, %c0_29, %c0_30] : memref<9x128x4xf32, #tpu.memory_space<vmem>>, vector<1x128x4xf32>
    %36 = vector.shape_cast %35 : vector<1x128x4xf32> to vector<128x4xf32>
    %cst_31 = arith.constant dense<0.000000e+00> : vector<256x4xf32>
    %37 = tpu.matmul %34, %36, %cst_31 {dimension_numbers = #tpu.dot_dimension_numbers<[1], [0], [0], [1], [0, 0, 1, 1], [], []>} : vector<256x128xf32>, vector<128x4xf32>, vector<256x4xf32> -> vector<256x4xf32>
    %38 = arith.addf %32, %37 : vector<256x4xf32>
    %c0_32 = arith.constant 0 : index
    %c2 = arith.constant 2 : index
    %c0_33 = arith.constant 0 : index
    %39 = vector.load %arg7[%c0_32, %c2, %c0_33] : memref<18x18x128xf32, #tpu.memory_space<vmem>>, vector<16x16x128xf32>
    %40 = vector.shape_cast %39 : vector<16x16x128xf32> to vector<256x128xf32>
    %c2_34 = arith.constant 2 : index
    %c0_35 = arith.constant 0 : index
    %c0_36 = arith.constant 0 : index
    %41 = vector.load %arg5[%c2_34, %c0_35, %c0_36] : memref<9x128x4xf32, #tpu.memory_space<vmem>>, vector<1x128x4xf32>
    %42 = vector.shape_cast %41 : vector<1x128x4xf32> to vector<128x4xf32>
    %cst_37 = arith.constant dense<0.000000e+00> : vector<256x4xf32>
    %43 = tpu.matmul %40, %42, %cst_37 {dimension_numbers = #tpu.dot_dimension_numbers<[1], [0], [0], [1], [0, 0, 1, 1], [], []>} : vector<256x128xf32>, vector<128x4xf32>, vector<256x4xf32> -> vector<256x4xf32>
    %44 = arith.addf %38, %43 : vector<256x4xf32>
    %c1_38 = arith.constant 1 : index
    %c0_39 = arith.constant 0 : index
    %c0_40 = arith.constant 0 : index
    %45 = vector.load %arg7[%c1_38, %c0_39, %c0_40] : memref<18x18x128xf32, #tpu.memory_space<vmem>>, vector<16x16x128xf32>
    %46 = vector.shape_cast %45 : vector<16x16x128xf32> to vector<256x128xf32>
    %c3 = arith.constant 3 : index
    %c0_41 = arith.constant 0 : index
    %c0_42 = arith.constant 0 : index
    %47 = vector.load %arg5[%c3, %c0_41, %c0_42] : memref<9x128x4xf32, #tpu.memory_space<vmem>>, vector<1x128x4xf32>
    %48 = vector.shape_cast %47 : vector<1x128x4xf32> to vector<128x4xf32>
    %cst_43 = arith.constant dense<0.000000e+00> : vector<256x4xf32>
    %49 = tpu.matmul %46, %48, %cst_43 {dimension_numbers = #tpu.dot_dimension_numbers<[1], [0], [0], [1], [0, 0, 1, 1], [], []>} : vector<256x128xf32>, vector<128x4xf32>, vector<256x4xf32> -> vector<256x4xf32>
    %50 = arith.addf %44, %49 : vector<256x4xf32>
    %c1_44 = arith.constant 1 : index
    %c1_45 = arith.constant 1 : index
    %c0_46 = arith.constant 0 : index
    %51 = vector.load %arg7[%c1_44, %c1_45, %c0_46] : memref<18x18x128xf32, #tpu.memory_space<vmem>>, vector<16x16x128xf32>
    %52 = vector.shape_cast %51 : vector<16x16x128xf32> to vector<256x128xf32>
    %c4 = arith.constant 4 : index
    %c0_47 = arith.constant 0 : index
    %c0_48 = arith.constant 0 : index
    %53 = vector.load %arg5[%c4, %c0_47, %c0_48] : memref<9x128x4xf32, #tpu.memory_space<vmem>>, vector<1x128x4xf32>
    %54 = vector.shape_cast %53 : vector<1x128x4xf32> to vector<128x4xf32>
    %cst_49 = arith.constant dense<0.000000e+00> : vector<256x4xf32>
    %55 = tpu.matmul %52, %54, %cst_49 {dimension_numbers = #tpu.dot_dimension_numbers<[1], [0], [0], [1], [0, 0, 1, 1], [], []>} : vector<256x128xf32>, vector<128x4xf32>, vector<256x4xf32> -> vector<256x4xf32>
    %56 = arith.addf %50, %55 : vector<256x4xf32>
    %c1_50 = arith.constant 1 : index
    %c2_51 = arith.constant 2 : index
    %c0_52 = arith.constant 0 : index
    %57 = vector.load %arg7[%c1_50, %c2_51, %c0_52] : memref<18x18x128xf32, #tpu.memory_space<vmem>>, vector<16x16x128xf32>
    %58 = vector.shape_cast %57 : vector<16x16x128xf32> to vector<256x128xf32>
    %c5 = arith.constant 5 : index
    %c0_53 = arith.constant 0 : index
    %c0_54 = arith.constant 0 : index
    %59 = vector.load %arg5[%c5, %c0_53, %c0_54] : memref<9x128x4xf32, #tpu.memory_space<vmem>>, vector<1x128x4xf32>
    %60 = vector.shape_cast %59 : vector<1x128x4xf32> to vector<128x4xf32>
    %cst_55 = arith.constant dense<0.000000e+00> : vector<256x4xf32>
    %61 = tpu.matmul %58, %60, %cst_55 {dimension_numbers = #tpu.dot_dimension_numbers<[1], [0], [0], [1], [0, 0, 1, 1], [], []>} : vector<256x128xf32>, vector<128x4xf32>, vector<256x4xf32> -> vector<256x4xf32>
    %62 = arith.addf %56, %61 : vector<256x4xf32>
    %c2_56 = arith.constant 2 : index
    %c0_57 = arith.constant 0 : index
    %c0_58 = arith.constant 0 : index
    %63 = vector.load %arg7[%c2_56, %c0_57, %c0_58] : memref<18x18x128xf32, #tpu.memory_space<vmem>>, vector<16x16x128xf32>
    %64 = vector.shape_cast %63 : vector<16x16x128xf32> to vector<256x128xf32>
    %c6 = arith.constant 6 : index
    %c0_59 = arith.constant 0 : index
    %c0_60 = arith.constant 0 : index
    %65 = vector.load %arg5[%c6, %c0_59, %c0_60] : memref<9x128x4xf32, #tpu.memory_space<vmem>>, vector<1x128x4xf32>
    %66 = vector.shape_cast %65 : vector<1x128x4xf32> to vector<128x4xf32>
    %cst_61 = arith.constant dense<0.000000e+00> : vector<256x4xf32>
    %67 = tpu.matmul %64, %66, %cst_61 {dimension_numbers = #tpu.dot_dimension_numbers<[1], [0], [0], [1], [0, 0, 1, 1], [], []>} : vector<256x128xf32>, vector<128x4xf32>, vector<256x4xf32> -> vector<256x4xf32>
    %68 = arith.addf %62, %67 : vector<256x4xf32>
    %c2_62 = arith.constant 2 : index
    %c1_63 = arith.constant 1 : index
    %c0_64 = arith.constant 0 : index
    %69 = vector.load %arg7[%c2_62, %c1_63, %c0_64] : memref<18x18x128xf32, #tpu.memory_space<vmem>>, vector<16x16x128xf32>
    %70 = vector.shape_cast %69 : vector<16x16x128xf32> to vector<256x128xf32>
    %c7 = arith.constant 7 : index
    %c0_65 = arith.constant 0 : index
    %c0_66 = arith.constant 0 : index
    %71 = vector.load %arg5[%c7, %c0_65, %c0_66] : memref<9x128x4xf32, #tpu.memory_space<vmem>>, vector<1x128x4xf32>
    %72 = vector.shape_cast %71 : vector<1x128x4xf32> to vector<128x4xf32>
    %cst_67 = arith.constant dense<0.000000e+00> : vector<256x4xf32>
    %73 = tpu.matmul %70, %72, %cst_67 {dimension_numbers = #tpu.dot_dimension_numbers<[1], [0], [0], [1], [0, 0, 1, 1], [], []>} : vector<256x128xf32>, vector<128x4xf32>, vector<256x4xf32> -> vector<256x4xf32>
    %74 = arith.addf %68, %73 : vector<256x4xf32>
    %c2_68 = arith.constant 2 : index
    %c2_69 = arith.constant 2 : index
    %c0_70 = arith.constant 0 : index
    %75 = vector.load %arg7[%c2_68, %c2_69, %c0_70] : memref<18x18x128xf32, #tpu.memory_space<vmem>>, vector<16x16x128xf32>
    %76 = vector.shape_cast %75 : vector<16x16x128xf32> to vector<256x128xf32>
    %c8 = arith.constant 8 : index
    %c0_71 = arith.constant 0 : index
    %c0_72 = arith.constant 0 : index
    %77 = vector.load %arg5[%c8, %c0_71, %c0_72] : memref<9x128x4xf32, #tpu.memory_space<vmem>>, vector<1x128x4xf32>
    %78 = vector.shape_cast %77 : vector<1x128x4xf32> to vector<128x4xf32>
    %cst_73 = arith.constant dense<0.000000e+00> : vector<256x4xf32>
    %79 = tpu.matmul %76, %78, %cst_73 {dimension_numbers = #tpu.dot_dimension_numbers<[1], [0], [0], [1], [0, 0, 1, 1], [], []>} : vector<256x128xf32>, vector<128x4xf32>, vector<256x4xf32> -> vector<256x4xf32>
    %80 = arith.addf %74, %79 : vector<256x4xf32>
    %cst_74 = arith.constant 0.000000e+00 : f32
    %81 = vector.broadcast %cst_74 : f32 to vector<256x4xf32>
    %cst_75 = arith.constant 0.000000e+00 : f32
    %82 = vector.broadcast %cst_75 : f32 to vector<256x120xf32>
    %83 = tpu.concatenate %81, %80, %82 in 1 : vector<256x4xf32>, vector<256x4xf32>, vector<256x120xf32> -> vector<256x128xf32>
    %84 = arith.addf %1, %83 : vector<256x128xf32>
    %85 = vector.shape_cast %84 : vector<256x128xf32> to vector<1x16x16x128xf32>
    %c0_76 = arith.constant 0 : index
    %c0_77 = arith.constant 0 : index
    %c0_78 = arith.constant 0 : index
    %c0_79 = arith.constant 0 : index
    %86 = vector.load %arg6[%c0_76, %c0_77, %c0_78, %c0_79] : memref<1x16x16x128xf32, #tpu.memory_space<vmem>>, vector<1x16x16x128xf32>
    tpu.vector_store %arg6[%c0_76, %c0_77, %c0_78, %c0_79], %85 {strides = array<i32>} : memref<1x16x16x128xf32, #tpu.memory_space<vmem>>, vector<1x16x16x128xf32>,
    return
  }
  func.func @transform_0(%arg0: i32) -> (i32, i32, i32, i32) {
    %c0_i32 = arith.constant 0 : i32
    %c0_i32_0 = arith.constant 0 : i32
    %c0_i32_1 = arith.constant 0 : i32
    %c0_i32_2 = arith.constant 0 : i32
    return %arg0, %c0_i32, %c0_i32_0, %c0_i32_1 : i32, i32, i32, i32
  }
  func.func @transform_1(%arg0: i32) -> (i32, i32) {
    %c0_i32 = arith.constant 0 : i32
    %c0_i32_0 = arith.constant 0 : i32
    %c0_i32_1 = arith.constant 0 : i32
    return %c0_i32, %c0_i32_0 : i32, i32
  }
  func.func @transform_2(%arg0: i32) -> (i32, i32) {
    %c0_i32 = arith.constant 0 : i32
    %c0_i32_0 = arith.constant 0 : i32
    %c0_i32_1 = arith.constant 0 : i32
    return %c0_i32, %c0_i32_0 : i32, i32
  }
  func.func @transform_3(%arg0: i32) -> (i32, i32) {
    %c0_i32 = arith.constant 0 : i32
    %c0_i32_0 = arith.constant 0 : i32
    %c0_i32_1 = arith.constant 0 : i32
    return %c0_i32, %c0_i32_0 : i32, i32
  }
  func.func @transform_4(%arg0: i32) -> (i32, i32, i32) {
    %c0_i32 = arith.constant 0 : i32
    %c0_i32_0 = arith.constant 0 : i32
    %c0_i32_1 = arith.constant 0 : i32
    %c0_i32_2 = arith.constant 0 : i32
    return %c0_i32, %c0_i32_0, %c0_i32_1 : i32, i32, i32
  }
  func.func @transform_5(%arg0: i32) -> (i32, i32, i32, i32) {
    %c0_i32 = arith.constant 0 : i32
    %c0_i32_0 = arith.constant 0 : i32
    %c0_i32_1 = arith.constant 0 : i32
    %c0_i32_2 = arith.constant 0 : i32
    return %arg0, %c0_i32, %c0_i32_0, %c0_i32_1 : i32, i32, i32, i32
  }
}

module attributes {stable_mosaic.version = 11 : i64} {
  func.func @kernel(%arg0: i32, %arg1: memref<1x16x16x128xf32, #tpu.memory_space<vmem>>, %arg2: memref<2x128xf32, #tpu.memory_space<vmem>>, %arg3: memref<128x128xf32, #tpu.memory_space<vmem>>, %arg4: memref<2x128xf32, #tpu.memory_space<vmem>>, %arg5: memref<9x128x4xf32, #tpu.memory_space<vmem>>, %arg6: memref<1x16x16x128xf32, #tpu.memory_space<vmem>>, %arg7: memref<18x18x128xf32, #tpu.memory_space<vmem>>) attributes {dimension_semantics = [#tpu.dimension_semantics<parallel>], iteration_bounds = array<i64: 2>, scalar_prefetch = 0 : i64, scratch_operands = 1 : i64, tpu.core_type = #tpu.core_type<tc>, window_params = [{transform_indices = @transform_0, window_bounds = array<i64: 1, 16, 16, 128>}, {pipeline_mode = #tpu.pipeline_mode<synchronous>, transform_indices = @transform_1, window_bounds = array<i64: 2, 128>}, {pipeline_mode = #tpu.pipeline_mode<synchronous>, transform_indices = @transform_2, window_bounds = array<i64: 128, 128>}, {pipeline_mode = #tpu.pipeline_mode<synchronous>, transform_indices = @transform_3, window_bounds = array<i64: 2, 128>}, {pipeline_mode = #tpu.pipeline_mode<synchronous>, transform_indices = @transform_4, window_bounds = array<i64: 9, 128, 4>}, {transform_indices = @transform_5, window_bounds = array<i64: 1, 16, 16, 128>}]} {
    %c0 = arith.constant 0 : index
    %c0_0 = arith.constant 0 : index
    %c0_1 = arith.constant 0 : index
    %c0_2 = arith.constant 0 : index
    %0 = vector.load %arg1[%c0, %c0_0, %c0_1, %c0_2] : memref<1x16x16x128xf32, #tpu.memory_space<vmem>>, vector<1x16x16x128xf32>
    %1 = vector.shape_cast %0 : vector<1x16x16x128xf32> to vector<256x128xf32>
    %c0_3 = arith.constant 0 : index
    %c0_4 = arith.constant 0 : index
    %2 = vector.load %arg2[%c0_3, %c0_4] : memref<2x128xf32, #tpu.memory_space<vmem>>, vector<2x128xf32>
    %3 = vector.extract_strided_slice %2 {offsets = [0, 0], sizes = [1, 128], strides = [1, 1]} : vector<2x128xf32> to vector<1x128xf32>
    %4 = vector.broadcast %3 : vector<1x128xf32> to vector<256x128xf32>
    %5 = arith.mulf %1, %4 : vector<256x128xf32>
    %6 = vector.extract_strided_slice %2 {offsets = [1, 0], sizes = [1, 128], strides = [1, 1]} : vector<2x128xf32> to vector<1x128xf32>
    %7 = vector.broadcast %6 : vector<1x128xf32> to vector<256x128xf32>
    %8 = arith.addf %5, %7 : vector<256x128xf32>
    %cst = arith.constant 0.000000e+00 : f32
    %9 = vector.broadcast %cst : f32 to vector<256x128xf32>
    %10 = arith.maximumf %8, %9 : vector<256x128xf32>
    %c0_5 = arith.constant 0 : index
    %c0_6 = arith.constant 0 : index
    %11 = vector.load %arg3[%c0_5, %c0_6] : memref<128x128xf32, #tpu.memory_space<vmem>>, vector<128x128xf32>
    %cst_7 = arith.constant dense<0.000000e+00> : vector<256x128xf32>
    %12 = tpu.matmul %10, %11, %cst_7 {dimension_numbers = #tpu.dot_dimension_numbers<[1], [0], [0], [1], [0, 0, 1, 1], [], []>} : vector<256x128xf32>, vector<128x128xf32>, vector<256x128xf32> -> vector<256x128xf32>
    %c0_8 = arith.constant 0 : index
    %c0_9 = arith.constant 0 : index
    %13 = vector.load %arg4[%c0_8, %c0_9] : memref<2x128xf32, #tpu.memory_space<vmem>>, vector<2x128xf32>
    %14 = vector.extract_strided_slice %13 {offsets = [0, 0], sizes = [1, 128], strides = [1, 1]} : vector<2x128xf32> to vector<1x128xf32>
    %15 = vector.broadcast %14 : vector<1x128xf32> to vector<256x128xf32>
    %16 = arith.mulf %12, %15 : vector<256x128xf32>
    %17 = vector.extract_strided_slice %13 {offsets = [1, 0], sizes = [1, 128], strides = [1, 1]} : vector<2x128xf32> to vector<1x128xf32>
    %18 = vector.broadcast %17 : vector<1x128xf32> to vector<256x128xf32>
    %19 = arith.addf %16, %18 : vector<256x128xf32>
    %cst_10 = arith.constant 0.000000e+00 : f32
    %20 = vector.broadcast %cst_10 : f32 to vector<256x128xf32>
    %21 = arith.maximumf %19, %20 : vector<256x128xf32>
    %cst_11 = arith.constant 0.000000e+00 : f32
    %22 = vector.broadcast %cst_11 : f32 to vector<18x18x128xf32>
    %c0_12 = arith.constant 0 : index
    %c0_13 = arith.constant 0 : index
    %c0_14 = arith.constant 0 : index
    %23 = vector.load %arg7[%c0_12, %c0_13, %c0_14] : memref<18x18x128xf32, #tpu.memory_space<vmem>>, vector<18x18x128xf32>
    tpu.vector_store %arg7[%c0_12, %c0_13, %c0_14], %22 {strides = array<i32>} : memref<18x18x128xf32, #tpu.memory_space<vmem>>, vector<18x18x128xf32>,
    %24 = vector.shape_cast %21 : vector<256x128xf32> to vector<16x16x128xf32>
    %c1 = arith.constant 1 : index
    %c1_15 = arith.constant 1 : index
    %c0_16 = arith.constant 0 : index
    %25 = vector.load %arg7[%c1, %c1_15, %c0_16] : memref<18x18x128xf32, #tpu.memory_space<vmem>>, vector<16x16x128xf32>
    tpu.vector_store %arg7[%c1, %c1_15, %c0_16], %24 {strides = array<i32>} : memref<18x18x128xf32, #tpu.memory_space<vmem>>, vector<16x16x128xf32>,
    %cst_17 = arith.constant 0.000000e+00 : f32
    %26 = vector.broadcast %cst_17 : f32 to vector<256x4xf32>
    %c0_18 = arith.constant 0 : index
    %c0_19 = arith.constant 0 : index
    %c0_20 = arith.constant 0 : index
    %27 = vector.load %arg7[%c0_18, %c0_19, %c0_20] : memref<18x18x128xf32, #tpu.memory_space<vmem>>, vector<16x16x128xf32>
    %28 = vector.shape_cast %27 : vector<16x16x128xf32> to vector<256x128xf32>
    %c0_21 = arith.constant 0 : index
    %c0_22 = arith.constant 0 : index
    %c0_23 = arith.constant 0 : index
    %29 = vector.load %arg5[%c0_21, %c0_22, %c0_23] : memref<9x128x4xf32, #tpu.memory_space<vmem>>, vector<1x128x4xf32>
    %30 = vector.shape_cast %29 : vector<1x128x4xf32> to vector<128x4xf32>
    %cst_24 = arith.constant dense<0.000000e+00> : vector<256x4xf32>
    %31 = tpu.matmul %28, %30, %cst_24 {dimension_numbers = #tpu.dot_dimension_numbers<[1], [0], [0], [1], [0, 0, 1, 1], [], []>} : vector<256x128xf32>, vector<128x4xf32>, vector<256x4xf32> -> vector<256x4xf32>
    %32 = arith.addf %26, %31 : vector<256x4xf32>
    %c0_25 = arith.constant 0 : index
    %c1_26 = arith.constant 1 : index
    %c0_27 = arith.constant 0 : index
    %33 = vector.load %arg7[%c0_25, %c1_26, %c0_27] : memref<18x18x128xf32, #tpu.memory_space<vmem>>, vector<16x16x128xf32>
    %34 = vector.shape_cast %33 : vector<16x16x128xf32> to vector<256x128xf32>
    %c1_28 = arith.constant 1 : index
    %c0_29 = arith.constant 0 : index
    %c0_30 = arith.constant 0 : index
    %35 = vector.load %arg5[%c1_28, %c0_29, %c0_30] : memref<9x128x4xf32, #tpu.memory_space<vmem>>, vector<1x128x4xf32>
    %36 = vector.shape_cast %35 : vector<1x128x4xf32> to vector<128x4xf32>
    %cst_31 = arith.constant dense<0.000000e+00> : vector<256x4xf32>
    %37 = tpu.matmul %34, %36, %cst_31 {dimension_numbers = #tpu.dot_dimension_numbers<[1], [0], [0], [1], [0, 0, 1, 1], [], []>} : vector<256x128xf32>, vector<128x4xf32>, vector<256x4xf32> -> vector<256x4xf32>
    %38 = arith.addf %32, %37 : vector<256x4xf32>
    %c0_32 = arith.constant 0 : index
    %c2 = arith.constant 2 : index
    %c0_33 = arith.constant 0 : index
    %39 = vector.load %arg7[%c0_32, %c2, %c0_33] : memref<18x18x128xf32, #tpu.memory_space<vmem>>, vector<16x16x128xf32>
    %40 = vector.shape_cast %39 : vector<16x16x128xf32> to vector<256x128xf32>
    %c2_34 = arith.constant 2 : index
    %c0_35 = arith.constant 0 : index
    %c0_36 = arith.constant 0 : index
    %41 = vector.load %arg5[%c2_34, %c0_35, %c0_36] : memref<9x128x4xf32, #tpu.memory_space<vmem>>, vector<1x128x4xf32>
    %42 = vector.shape_cast %41 : vector<1x128x4xf32> to vector<128x4xf32>
    %cst_37 = arith.constant dense<0.000000e+00> : vector<256x4xf32>
    %43 = tpu.matmul %40, %42, %cst_37 {dimension_numbers = #tpu.dot_dimension_numbers<[1], [0], [0], [1], [0, 0, 1, 1], [], []>} : vector<256x128xf32>, vector<128x4xf32>, vector<256x4xf32> -> vector<256x4xf32>
    %44 = arith.addf %38, %43 : vector<256x4xf32>
    %c1_38 = arith.constant 1 : index
    %c0_39 = arith.constant 0 : index
    %c0_40 = arith.constant 0 : index
    %45 = vector.load %arg7[%c1_38, %c0_39, %c0_40] : memref<18x18x128xf32, #tpu.memory_space<vmem>>, vector<16x16x128xf32>
    %46 = vector.shape_cast %45 : vector<16x16x128xf32> to vector<256x128xf32>
    %c3 = arith.constant 3 : index
    %c0_41 = arith.constant 0 : index
    %c0_42 = arith.constant 0 : index
    %47 = vector.load %arg5[%c3, %c0_41, %c0_42] : memref<9x128x4xf32, #tpu.memory_space<vmem>>, vector<1x128x4xf32>
    %48 = vector.shape_cast %47 : vector<1x128x4xf32> to vector<128x4xf32>
    %cst_43 = arith.constant dense<0.000000e+00> : vector<256x4xf32>
    %49 = tpu.matmul %46, %48, %cst_43 {dimension_numbers = #tpu.dot_dimension_numbers<[1], [0], [0], [1], [0, 0, 1, 1], [], []>} : vector<256x128xf32>, vector<128x4xf32>, vector<256x4xf32> -> vector<256x4xf32>
    %50 = arith.addf %44, %49 : vector<256x4xf32>
    %c1_44 = arith.constant 1 : index
    %c1_45 = arith.constant 1 : index
    %c0_46 = arith.constant 0 : index
    %51 = vector.load %arg7[%c1_44, %c1_45, %c0_46] : memref<18x18x128xf32, #tpu.memory_space<vmem>>, vector<16x16x128xf32>
    %52 = vector.shape_cast %51 : vector<16x16x128xf32> to vector<256x128xf32>
    %c4 = arith.constant 4 : index
    %c0_47 = arith.constant 0 : index
    %c0_48 = arith.constant 0 : index
    %53 = vector.load %arg5[%c4, %c0_47, %c0_48] : memref<9x128x4xf32, #tpu.memory_space<vmem>>, vector<1x128x4xf32>
    %54 = vector.shape_cast %53 : vector<1x128x4xf32> to vector<128x4xf32>
    %cst_49 = arith.constant dense<0.000000e+00> : vector<256x4xf32>
    %55 = tpu.matmul %52, %54, %cst_49 {dimension_numbers = #tpu.dot_dimension_numbers<[1], [0], [0], [1], [0, 0, 1, 1], [], []>} : vector<256x128xf32>, vector<128x4xf32>, vector<256x4xf32> -> vector<256x4xf32>
    %56 = arith.addf %50, %55 : vector<256x4xf32>
    %c1_50 = arith.constant 1 : index
    %c2_51 = arith.constant 2 : index
    %c0_52 = arith.constant 0 : index
    %57 = vector.load %arg7[%c1_50, %c2_51, %c0_52] : memref<18x18x128xf32, #tpu.memory_space<vmem>>, vector<16x16x128xf32>
    %58 = vector.shape_cast %57 : vector<16x16x128xf32> to vector<256x128xf32>
    %c5 = arith.constant 5 : index
    %c0_53 = arith.constant 0 : index
    %c0_54 = arith.constant 0 : index
    %59 = vector.load %arg5[%c5, %c0_53, %c0_54] : memref<9x128x4xf32, #tpu.memory_space<vmem>>, vector<1x128x4xf32>
    %60 = vector.shape_cast %59 : vector<1x128x4xf32> to vector<128x4xf32>
    %cst_55 = arith.constant dense<0.000000e+00> : vector<256x4xf32>
    %61 = tpu.matmul %58, %60, %cst_55 {dimension_numbers = #tpu.dot_dimension_numbers<[1], [0], [0], [1], [0, 0, 1, 1], [], []>} : vector<256x128xf32>, vector<128x4xf32>, vector<256x4xf32> -> vector<256x4xf32>
    %62 = arith.addf %56, %61 : vector<256x4xf32>
    %c2_56 = arith.constant 2 : index
    %c0_57 = arith.constant 0 : index
    %c0_58 = arith.constant 0 : index
    %63 = vector.load %arg7[%c2_56, %c0_57, %c0_58] : memref<18x18x128xf32, #tpu.memory_space<vmem>>, vector<16x16x128xf32>
    %64 = vector.shape_cast %63 : vector<16x16x128xf32> to vector<256x128xf32>
    %c6 = arith.constant 6 : index
    %c0_59 = arith.constant 0 : index
    %c0_60 = arith.constant 0 : index
    %65 = vector.load %arg5[%c6, %c0_59, %c0_60] : memref<9x128x4xf32, #tpu.memory_space<vmem>>, vector<1x128x4xf32>
    %66 = vector.shape_cast %65 : vector<1x128x4xf32> to vector<128x4xf32>
    %cst_61 = arith.constant dense<0.000000e+00> : vector<256x4xf32>
    %67 = tpu.matmul %64, %66, %cst_61 {dimension_numbers = #tpu.dot_dimension_numbers<[1], [0], [0], [1], [0, 0, 1, 1], [], []>} : vector<256x128xf32>, vector<128x4xf32>, vector<256x4xf32> -> vector<256x4xf32>
    %68 = arith.addf %62, %67 : vector<256x4xf32>
    %c2_62 = arith.constant 2 : index
    %c1_63 = arith.constant 1 : index
    %c0_64 = arith.constant 0 : index
    %69 = vector.load %arg7[%c2_62, %c1_63, %c0_64] : memref<18x18x128xf32, #tpu.memory_space<vmem>>, vector<16x16x128xf32>
    %70 = vector.shape_cast %69 : vector<16x16x128xf32> to vector<256x128xf32>
    %c7 = arith.constant 7 : index
    %c0_65 = arith.constant 0 : index
    %c0_66 = arith.constant 0 : index
    %71 = vector.load %arg5[%c7, %c0_65, %c0_66] : memref<9x128x4xf32, #tpu.memory_space<vmem>>, vector<1x128x4xf32>
    %72 = vector.shape_cast %71 : vector<1x128x4xf32> to vector<128x4xf32>
    %cst_67 = arith.constant dense<0.000000e+00> : vector<256x4xf32>
    %73 = tpu.matmul %70, %72, %cst_67 {dimension_numbers = #tpu.dot_dimension_numbers<[1], [0], [0], [1], [0, 0, 1, 1], [], []>} : vector<256x128xf32>, vector<128x4xf32>, vector<256x4xf32> -> vector<256x4xf32>
    %74 = arith.addf %68, %73 : vector<256x4xf32>
    %c2_68 = arith.constant 2 : index
    %c2_69 = arith.constant 2 : index
    %c0_70 = arith.constant 0 : index
    %75 = vector.load %arg7[%c2_68, %c2_69, %c0_70] : memref<18x18x128xf32, #tpu.memory_space<vmem>>, vector<16x16x128xf32>
    %76 = vector.shape_cast %75 : vector<16x16x128xf32> to vector<256x128xf32>
    %c8 = arith.constant 8 : index
    %c0_71 = arith.constant 0 : index
    %c0_72 = arith.constant 0 : index
    %77 = vector.load %arg5[%c8, %c0_71, %c0_72] : memref<9x128x4xf32, #tpu.memory_space<vmem>>, vector<1x128x4xf32>
    %78 = vector.shape_cast %77 : vector<1x128x4xf32> to vector<128x4xf32>
    %cst_73 = arith.constant dense<0.000000e+00> : vector<256x4xf32>
    %79 = tpu.matmul %76, %78, %cst_73 {dimension_numbers = #tpu.dot_dimension_numbers<[1], [0], [0], [1], [0, 0, 1, 1], [], []>} : vector<256x128xf32>, vector<128x4xf32>, vector<256x4xf32> -> vector<256x4xf32>
    %80 = arith.addf %74, %79 : vector<256x4xf32>
    %cst_74 = arith.constant 0.000000e+00 : f32
    %81 = vector.broadcast %cst_74 : f32 to vector<256x8xf32>
    %cst_75 = arith.constant 0.000000e+00 : f32
    %82 = vector.broadcast %cst_75 : f32 to vector<256x116xf32>
    %83 = tpu.concatenate %81, %80, %82 in 1 : vector<256x8xf32>, vector<256x4xf32>, vector<256x116xf32> -> vector<256x128xf32>
    %84 = arith.addf %1, %83 : vector<256x128xf32>
    %85 = vector.shape_cast %84 : vector<256x128xf32> to vector<1x16x16x128xf32>
    %c0_76 = arith.constant 0 : index
    %c0_77 = arith.constant 0 : index
    %c0_78 = arith.constant 0 : index
    %c0_79 = arith.constant 0 : index
    %86 = vector.load %arg6[%c0_76, %c0_77, %c0_78, %c0_79] : memref<1x16x16x128xf32, #tpu.memory_space<vmem>>, vector<1x16x16x128xf32>
    tpu.vector_store %arg6[%c0_76, %c0_77, %c0_78, %c0_79], %85 {strides = array<i32>} : memref<1x16x16x128xf32, #tpu.memory_space<vmem>>, vector<1x16x16x128xf32>,
    return
  }
  func.func @transform_0(%arg0: i32) -> (i32, i32, i32, i32) {
    %c0_i32 = arith.constant 0 : i32
    %c0_i32_0 = arith.constant 0 : i32
    %c0_i32_1 = arith.constant 0 : i32
    %c0_i32_2 = arith.constant 0 : i32
    return %arg0, %c0_i32, %c0_i32_0, %c0_i32_1 : i32, i32, i32, i32
  }
  func.func @transform_1(%arg0: i32) -> (i32, i32) {
    %c0_i32 = arith.constant 0 : i32
    %c0_i32_0 = arith.constant 0 : i32
    %c0_i32_1 = arith.constant 0 : i32
    return %c0_i32, %c0_i32_0 : i32, i32
  }
  func.func @transform_2(%arg0: i32) -> (i32, i32) {
    %c0_i32 = arith.constant 0 : i32
    %c0_i32_0 = arith.constant 0 : i32
    %c0_i32_1 = arith.constant 0 : i32
    return %c0_i32, %c0_i32_0 : i32, i32
  }
  func.func @transform_3(%arg0: i32) -> (i32, i32) {
    %c0_i32 = arith.constant 0 : i32
    %c0_i32_0 = arith.constant 0 : i32
    %c0_i32_1 = arith.constant 0 : i32
    return %c0_i32, %c0_i32_0 : i32, i32
  }
  func.func @transform_4(%arg0: i32) -> (i32, i32, i32) {
    %c0_i32 = arith.constant 0 : i32
    %c0_i32_0 = arith.constant 0 : i32
    %c0_i32_1 = arith.constant 0 : i32
    %c0_i32_2 = arith.constant 0 : i32
    return %c0_i32, %c0_i32_0, %c0_i32_1 : i32, i32, i32
  }
  func.func @transform_5(%arg0: i32) -> (i32, i32, i32, i32) {
    %c0_i32 = arith.constant 0 : i32
    %c0_i32_0 = arith.constant 0 : i32
    %c0_i32_1 = arith.constant 0 : i32
    %c0_i32_2 = arith.constant 0 : i32
    return %arg0, %c0_i32, %c0_i32_0, %c0_i32_1 : i32, i32, i32, i32
  }
}

module attributes {stable_mosaic.version = 11 : i64} {
  func.func @kernel(%arg0: i32, %arg1: memref<1x16x16x128xf32, #tpu.memory_space<vmem>>, %arg2: memref<2x128xf32, #tpu.memory_space<vmem>>, %arg3: memref<128x128xf32, #tpu.memory_space<vmem>>, %arg4: memref<2x128xf32, #tpu.memory_space<vmem>>, %arg5: memref<9x128x4xf32, #tpu.memory_space<vmem>>, %arg6: memref<1x16x16x128xf32, #tpu.memory_space<vmem>>, %arg7: memref<18x18x128xf32, #tpu.memory_space<vmem>>) attributes {dimension_semantics = [#tpu.dimension_semantics<parallel>], iteration_bounds = array<i64: 2>, scalar_prefetch = 0 : i64, scratch_operands = 1 : i64, tpu.core_type = #tpu.core_type<tc>, window_params = [{transform_indices = @transform_0, window_bounds = array<i64: 1, 16, 16, 128>}, {pipeline_mode = #tpu.pipeline_mode<synchronous>, transform_indices = @transform_1, window_bounds = array<i64: 2, 128>}, {pipeline_mode = #tpu.pipeline_mode<synchronous>, transform_indices = @transform_2, window_bounds = array<i64: 128, 128>}, {pipeline_mode = #tpu.pipeline_mode<synchronous>, transform_indices = @transform_3, window_bounds = array<i64: 2, 128>}, {pipeline_mode = #tpu.pipeline_mode<synchronous>, transform_indices = @transform_4, window_bounds = array<i64: 9, 128, 4>}, {transform_indices = @transform_5, window_bounds = array<i64: 1, 16, 16, 128>}]} {
    %c0 = arith.constant 0 : index
    %c0_0 = arith.constant 0 : index
    %c0_1 = arith.constant 0 : index
    %c0_2 = arith.constant 0 : index
    %0 = vector.load %arg1[%c0, %c0_0, %c0_1, %c0_2] : memref<1x16x16x128xf32, #tpu.memory_space<vmem>>, vector<1x16x16x128xf32>
    %1 = vector.shape_cast %0 : vector<1x16x16x128xf32> to vector<256x128xf32>
    %c0_3 = arith.constant 0 : index
    %c0_4 = arith.constant 0 : index
    %2 = vector.load %arg2[%c0_3, %c0_4] : memref<2x128xf32, #tpu.memory_space<vmem>>, vector<2x128xf32>
    %3 = vector.extract_strided_slice %2 {offsets = [0, 0], sizes = [1, 128], strides = [1, 1]} : vector<2x128xf32> to vector<1x128xf32>
    %4 = vector.broadcast %3 : vector<1x128xf32> to vector<256x128xf32>
    %5 = arith.mulf %1, %4 : vector<256x128xf32>
    %6 = vector.extract_strided_slice %2 {offsets = [1, 0], sizes = [1, 128], strides = [1, 1]} : vector<2x128xf32> to vector<1x128xf32>
    %7 = vector.broadcast %6 : vector<1x128xf32> to vector<256x128xf32>
    %8 = arith.addf %5, %7 : vector<256x128xf32>
    %cst = arith.constant 0.000000e+00 : f32
    %9 = vector.broadcast %cst : f32 to vector<256x128xf32>
    %10 = arith.maximumf %8, %9 : vector<256x128xf32>
    %c0_5 = arith.constant 0 : index
    %c0_6 = arith.constant 0 : index
    %11 = vector.load %arg3[%c0_5, %c0_6] : memref<128x128xf32, #tpu.memory_space<vmem>>, vector<128x128xf32>
    %cst_7 = arith.constant dense<0.000000e+00> : vector<256x128xf32>
    %12 = tpu.matmul %10, %11, %cst_7 {dimension_numbers = #tpu.dot_dimension_numbers<[1], [0], [0], [1], [0, 0, 1, 1], [], []>} : vector<256x128xf32>, vector<128x128xf32>, vector<256x128xf32> -> vector<256x128xf32>
    %c0_8 = arith.constant 0 : index
    %c0_9 = arith.constant 0 : index
    %13 = vector.load %arg4[%c0_8, %c0_9] : memref<2x128xf32, #tpu.memory_space<vmem>>, vector<2x128xf32>
    %14 = vector.extract_strided_slice %13 {offsets = [0, 0], sizes = [1, 128], strides = [1, 1]} : vector<2x128xf32> to vector<1x128xf32>
    %15 = vector.broadcast %14 : vector<1x128xf32> to vector<256x128xf32>
    %16 = arith.mulf %12, %15 : vector<256x128xf32>
    %17 = vector.extract_strided_slice %13 {offsets = [1, 0], sizes = [1, 128], strides = [1, 1]} : vector<2x128xf32> to vector<1x128xf32>
    %18 = vector.broadcast %17 : vector<1x128xf32> to vector<256x128xf32>
    %19 = arith.addf %16, %18 : vector<256x128xf32>
    %cst_10 = arith.constant 0.000000e+00 : f32
    %20 = vector.broadcast %cst_10 : f32 to vector<256x128xf32>
    %21 = arith.maximumf %19, %20 : vector<256x128xf32>
    %cst_11 = arith.constant 0.000000e+00 : f32
    %22 = vector.broadcast %cst_11 : f32 to vector<18x18x128xf32>
    %c0_12 = arith.constant 0 : index
    %c0_13 = arith.constant 0 : index
    %c0_14 = arith.constant 0 : index
    %23 = vector.load %arg7[%c0_12, %c0_13, %c0_14] : memref<18x18x128xf32, #tpu.memory_space<vmem>>, vector<18x18x128xf32>
    tpu.vector_store %arg7[%c0_12, %c0_13, %c0_14], %22 {strides = array<i32>} : memref<18x18x128xf32, #tpu.memory_space<vmem>>, vector<18x18x128xf32>,
    %24 = vector.shape_cast %21 : vector<256x128xf32> to vector<16x16x128xf32>
    %c1 = arith.constant 1 : index
    %c1_15 = arith.constant 1 : index
    %c0_16 = arith.constant 0 : index
    %25 = vector.load %arg7[%c1, %c1_15, %c0_16] : memref<18x18x128xf32, #tpu.memory_space<vmem>>, vector<16x16x128xf32>
    tpu.vector_store %arg7[%c1, %c1_15, %c0_16], %24 {strides = array<i32>} : memref<18x18x128xf32, #tpu.memory_space<vmem>>, vector<16x16x128xf32>,
    %cst_17 = arith.constant 0.000000e+00 : f32
    %26 = vector.broadcast %cst_17 : f32 to vector<256x4xf32>
    %c0_18 = arith.constant 0 : index
    %c0_19 = arith.constant 0 : index
    %c0_20 = arith.constant 0 : index
    %27 = vector.load %arg7[%c0_18, %c0_19, %c0_20] : memref<18x18x128xf32, #tpu.memory_space<vmem>>, vector<16x16x128xf32>
    %28 = vector.shape_cast %27 : vector<16x16x128xf32> to vector<256x128xf32>
    %c0_21 = arith.constant 0 : index
    %c0_22 = arith.constant 0 : index
    %c0_23 = arith.constant 0 : index
    %29 = vector.load %arg5[%c0_21, %c0_22, %c0_23] : memref<9x128x4xf32, #tpu.memory_space<vmem>>, vector<1x128x4xf32>
    %30 = vector.shape_cast %29 : vector<1x128x4xf32> to vector<128x4xf32>
    %cst_24 = arith.constant dense<0.000000e+00> : vector<256x4xf32>
    %31 = tpu.matmul %28, %30, %cst_24 {dimension_numbers = #tpu.dot_dimension_numbers<[1], [0], [0], [1], [0, 0, 1, 1], [], []>} : vector<256x128xf32>, vector<128x4xf32>, vector<256x4xf32> -> vector<256x4xf32>
    %32 = arith.addf %26, %31 : vector<256x4xf32>
    %c0_25 = arith.constant 0 : index
    %c1_26 = arith.constant 1 : index
    %c0_27 = arith.constant 0 : index
    %33 = vector.load %arg7[%c0_25, %c1_26, %c0_27] : memref<18x18x128xf32, #tpu.memory_space<vmem>>, vector<16x16x128xf32>
    %34 = vector.shape_cast %33 : vector<16x16x128xf32> to vector<256x128xf32>
    %c1_28 = arith.constant 1 : index
    %c0_29 = arith.constant 0 : index
    %c0_30 = arith.constant 0 : index
    %35 = vector.load %arg5[%c1_28, %c0_29, %c0_30] : memref<9x128x4xf32, #tpu.memory_space<vmem>>, vector<1x128x4xf32>
    %36 = vector.shape_cast %35 : vector<1x128x4xf32> to vector<128x4xf32>
    %cst_31 = arith.constant dense<0.000000e+00> : vector<256x4xf32>
    %37 = tpu.matmul %34, %36, %cst_31 {dimension_numbers = #tpu.dot_dimension_numbers<[1], [0], [0], [1], [0, 0, 1, 1], [], []>} : vector<256x128xf32>, vector<128x4xf32>, vector<256x4xf32> -> vector<256x4xf32>
    %38 = arith.addf %32, %37 : vector<256x4xf32>
    %c0_32 = arith.constant 0 : index
    %c2 = arith.constant 2 : index
    %c0_33 = arith.constant 0 : index
    %39 = vector.load %arg7[%c0_32, %c2, %c0_33] : memref<18x18x128xf32, #tpu.memory_space<vmem>>, vector<16x16x128xf32>
    %40 = vector.shape_cast %39 : vector<16x16x128xf32> to vector<256x128xf32>
    %c2_34 = arith.constant 2 : index
    %c0_35 = arith.constant 0 : index
    %c0_36 = arith.constant 0 : index
    %41 = vector.load %arg5[%c2_34, %c0_35, %c0_36] : memref<9x128x4xf32, #tpu.memory_space<vmem>>, vector<1x128x4xf32>
    %42 = vector.shape_cast %41 : vector<1x128x4xf32> to vector<128x4xf32>
    %cst_37 = arith.constant dense<0.000000e+00> : vector<256x4xf32>
    %43 = tpu.matmul %40, %42, %cst_37 {dimension_numbers = #tpu.dot_dimension_numbers<[1], [0], [0], [1], [0, 0, 1, 1], [], []>} : vector<256x128xf32>, vector<128x4xf32>, vector<256x4xf32> -> vector<256x4xf32>
    %44 = arith.addf %38, %43 : vector<256x4xf32>
    %c1_38 = arith.constant 1 : index
    %c0_39 = arith.constant 0 : index
    %c0_40 = arith.constant 0 : index
    %45 = vector.load %arg7[%c1_38, %c0_39, %c0_40] : memref<18x18x128xf32, #tpu.memory_space<vmem>>, vector<16x16x128xf32>
    %46 = vector.shape_cast %45 : vector<16x16x128xf32> to vector<256x128xf32>
    %c3 = arith.constant 3 : index
    %c0_41 = arith.constant 0 : index
    %c0_42 = arith.constant 0 : index
    %47 = vector.load %arg5[%c3, %c0_41, %c0_42] : memref<9x128x4xf32, #tpu.memory_space<vmem>>, vector<1x128x4xf32>
    %48 = vector.shape_cast %47 : vector<1x128x4xf32> to vector<128x4xf32>
    %cst_43 = arith.constant dense<0.000000e+00> : vector<256x4xf32>
    %49 = tpu.matmul %46, %48, %cst_43 {dimension_numbers = #tpu.dot_dimension_numbers<[1], [0], [0], [1], [0, 0, 1, 1], [], []>} : vector<256x128xf32>, vector<128x4xf32>, vector<256x4xf32> -> vector<256x4xf32>
    %50 = arith.addf %44, %49 : vector<256x4xf32>
    %c1_44 = arith.constant 1 : index
    %c1_45 = arith.constant 1 : index
    %c0_46 = arith.constant 0 : index
    %51 = vector.load %arg7[%c1_44, %c1_45, %c0_46] : memref<18x18x128xf32, #tpu.memory_space<vmem>>, vector<16x16x128xf32>
    %52 = vector.shape_cast %51 : vector<16x16x128xf32> to vector<256x128xf32>
    %c4 = arith.constant 4 : index
    %c0_47 = arith.constant 0 : index
    %c0_48 = arith.constant 0 : index
    %53 = vector.load %arg5[%c4, %c0_47, %c0_48] : memref<9x128x4xf32, #tpu.memory_space<vmem>>, vector<1x128x4xf32>
    %54 = vector.shape_cast %53 : vector<1x128x4xf32> to vector<128x4xf32>
    %cst_49 = arith.constant dense<0.000000e+00> : vector<256x4xf32>
    %55 = tpu.matmul %52, %54, %cst_49 {dimension_numbers = #tpu.dot_dimension_numbers<[1], [0], [0], [1], [0, 0, 1, 1], [], []>} : vector<256x128xf32>, vector<128x4xf32>, vector<256x4xf32> -> vector<256x4xf32>
    %56 = arith.addf %50, %55 : vector<256x4xf32>
    %c1_50 = arith.constant 1 : index
    %c2_51 = arith.constant 2 : index
    %c0_52 = arith.constant 0 : index
    %57 = vector.load %arg7[%c1_50, %c2_51, %c0_52] : memref<18x18x128xf32, #tpu.memory_space<vmem>>, vector<16x16x128xf32>
    %58 = vector.shape_cast %57 : vector<16x16x128xf32> to vector<256x128xf32>
    %c5 = arith.constant 5 : index
    %c0_53 = arith.constant 0 : index
    %c0_54 = arith.constant 0 : index
    %59 = vector.load %arg5[%c5, %c0_53, %c0_54] : memref<9x128x4xf32, #tpu.memory_space<vmem>>, vector<1x128x4xf32>
    %60 = vector.shape_cast %59 : vector<1x128x4xf32> to vector<128x4xf32>
    %cst_55 = arith.constant dense<0.000000e+00> : vector<256x4xf32>
    %61 = tpu.matmul %58, %60, %cst_55 {dimension_numbers = #tpu.dot_dimension_numbers<[1], [0], [0], [1], [0, 0, 1, 1], [], []>} : vector<256x128xf32>, vector<128x4xf32>, vector<256x4xf32> -> vector<256x4xf32>
    %62 = arith.addf %56, %61 : vector<256x4xf32>
    %c2_56 = arith.constant 2 : index
    %c0_57 = arith.constant 0 : index
    %c0_58 = arith.constant 0 : index
    %63 = vector.load %arg7[%c2_56, %c0_57, %c0_58] : memref<18x18x128xf32, #tpu.memory_space<vmem>>, vector<16x16x128xf32>
    %64 = vector.shape_cast %63 : vector<16x16x128xf32> to vector<256x128xf32>
    %c6 = arith.constant 6 : index
    %c0_59 = arith.constant 0 : index
    %c0_60 = arith.constant 0 : index
    %65 = vector.load %arg5[%c6, %c0_59, %c0_60] : memref<9x128x4xf32, #tpu.memory_space<vmem>>, vector<1x128x4xf32>
    %66 = vector.shape_cast %65 : vector<1x128x4xf32> to vector<128x4xf32>
    %cst_61 = arith.constant dense<0.000000e+00> : vector<256x4xf32>
    %67 = tpu.matmul %64, %66, %cst_61 {dimension_numbers = #tpu.dot_dimension_numbers<[1], [0], [0], [1], [0, 0, 1, 1], [], []>} : vector<256x128xf32>, vector<128x4xf32>, vector<256x4xf32> -> vector<256x4xf32>
    %68 = arith.addf %62, %67 : vector<256x4xf32>
    %c2_62 = arith.constant 2 : index
    %c1_63 = arith.constant 1 : index
    %c0_64 = arith.constant 0 : index
    %69 = vector.load %arg7[%c2_62, %c1_63, %c0_64] : memref<18x18x128xf32, #tpu.memory_space<vmem>>, vector<16x16x128xf32>
    %70 = vector.shape_cast %69 : vector<16x16x128xf32> to vector<256x128xf32>
    %c7 = arith.constant 7 : index
    %c0_65 = arith.constant 0 : index
    %c0_66 = arith.constant 0 : index
    %71 = vector.load %arg5[%c7, %c0_65, %c0_66] : memref<9x128x4xf32, #tpu.memory_space<vmem>>, vector<1x128x4xf32>
    %72 = vector.shape_cast %71 : vector<1x128x4xf32> to vector<128x4xf32>
    %cst_67 = arith.constant dense<0.000000e+00> : vector<256x4xf32>
    %73 = tpu.matmul %70, %72, %cst_67 {dimension_numbers = #tpu.dot_dimension_numbers<[1], [0], [0], [1], [0, 0, 1, 1], [], []>} : vector<256x128xf32>, vector<128x4xf32>, vector<256x4xf32> -> vector<256x4xf32>
    %74 = arith.addf %68, %73 : vector<256x4xf32>
    %c2_68 = arith.constant 2 : index
    %c2_69 = arith.constant 2 : index
    %c0_70 = arith.constant 0 : index
    %75 = vector.load %arg7[%c2_68, %c2_69, %c0_70] : memref<18x18x128xf32, #tpu.memory_space<vmem>>, vector<16x16x128xf32>
    %76 = vector.shape_cast %75 : vector<16x16x128xf32> to vector<256x128xf32>
    %c8 = arith.constant 8 : index
    %c0_71 = arith.constant 0 : index
    %c0_72 = arith.constant 0 : index
    %77 = vector.load %arg5[%c8, %c0_71, %c0_72] : memref<9x128x4xf32, #tpu.memory_space<vmem>>, vector<1x128x4xf32>
    %78 = vector.shape_cast %77 : vector<1x128x4xf32> to vector<128x4xf32>
    %cst_73 = arith.constant dense<0.000000e+00> : vector<256x4xf32>
    %79 = tpu.matmul %76, %78, %cst_73 {dimension_numbers = #tpu.dot_dimension_numbers<[1], [0], [0], [1], [0, 0, 1, 1], [], []>} : vector<256x128xf32>, vector<128x4xf32>, vector<256x4xf32> -> vector<256x4xf32>
    %80 = arith.addf %74, %79 : vector<256x4xf32>
    %cst_74 = arith.constant 0.000000e+00 : f32
    %81 = vector.broadcast %cst_74 : f32 to vector<256x12xf32>
    %cst_75 = arith.constant 0.000000e+00 : f32
    %82 = vector.broadcast %cst_75 : f32 to vector<256x112xf32>
    %83 = tpu.concatenate %81, %80, %82 in 1 : vector<256x12xf32>, vector<256x4xf32>, vector<256x112xf32> -> vector<256x128xf32>
    %84 = arith.addf %1, %83 : vector<256x128xf32>
    %85 = vector.shape_cast %84 : vector<256x128xf32> to vector<1x16x16x128xf32>
    %c0_76 = arith.constant 0 : index
    %c0_77 = arith.constant 0 : index
    %c0_78 = arith.constant 0 : index
    %c0_79 = arith.constant 0 : index
    %86 = vector.load %arg6[%c0_76, %c0_77, %c0_78, %c0_79] : memref<1x16x16x128xf32, #tpu.memory_space<vmem>>, vector<1x16x16x128xf32>
    tpu.vector_store %arg6[%c0_76, %c0_77, %c0_78, %c0_79], %85 {strides = array<i32>} : memref<1x16x16x128xf32, #tpu.memory_space<vmem>>, vector<1x16x16x128xf32>,
    return
  }
  func.func @transform_0(%arg0: i32) -> (i32, i32, i32, i32) {
    %c0_i32 = arith.constant 0 : i32
    %c0_i32_0 = arith.constant 0 : i32
    %c0_i32_1 = arith.constant 0 : i32
    %c0_i32_2 = arith.constant 0 : i32
    return %arg0, %c0_i32, %c0_i32_0, %c0_i32_1 : i32, i32, i32, i32
  }
  func.func @transform_1(%arg0: i32) -> (i32, i32) {
    %c0_i32 = arith.constant 0 : i32
    %c0_i32_0 = arith.constant 0 : i32
    %c0_i32_1 = arith.constant 0 : i32
    return %c0_i32, %c0_i32_0 : i32, i32
  }
  func.func @transform_2(%arg0: i32) -> (i32, i32) {
    %c0_i32 = arith.constant 0 : i32
    %c0_i32_0 = arith.constant 0 : i32
    %c0_i32_1 = arith.constant 0 : i32
    return %c0_i32, %c0_i32_0 : i32, i32
  }
  func.func @transform_3(%arg0: i32) -> (i32, i32) {
    %c0_i32 = arith.constant 0 : i32
    %c0_i32_0 = arith.constant 0 : i32
    %c0_i32_1 = arith.constant 0 : i32
    return %c0_i32, %c0_i32_0 : i32, i32
  }
  func.func @transform_4(%arg0: i32) -> (i32, i32, i32) {
    %c0_i32 = arith.constant 0 : i32
    %c0_i32_0 = arith.constant 0 : i32
    %c0_i32_1 = arith.constant 0 : i32
    %c0_i32_2 = arith.constant 0 : i32
    return %c0_i32, %c0_i32_0, %c0_i32_1 : i32, i32, i32
  }
  func.func @transform_5(%arg0: i32) -> (i32, i32, i32, i32) {
    %c0_i32 = arith.constant 0 : i32
    %c0_i32_0 = arith.constant 0 : i32
    %c0_i32_1 = arith.constant 0 : i32
    %c0_i32_2 = arith.constant 0 : i32
    return %arg0, %c0_i32, %c0_i32_0, %c0_i32_1 : i32, i32, i32, i32
  }
}

</mosaic_0001>

<bundles_post_ra>
// kernel: dense_block_pallas.3
= control target key start
LH: loop header
LB: loop body
LE: loop exit
PB: predicated region body
PF: predicated region fallthrough
CT: control target
= control target key end

     0   :  { %s2891_s18 = smov 0   ;;  %s4737_s0 = inlined_call_operand.vmem [shape: f32[2,16,16,128], index: 0, kind: input, shape index: {}, may-alias: {0,5}]   ;;  %s4738_s1 = inlined_call_operand.vmem [shape: f32[2,128], index: 1, kind: input, shape index: {}]   ;;  %s4739_s2 = inlined_call_operand.vmem [shape: f32[128,128], index: 2, kind: input, shape index: {}]   ;;  %s4740_s3 = inlined_call_operand.vmem [shape: f32[2,128], index: 3, kind: input, shape index: {}]   ;;  %s4741_s4 = inlined_call_operand.vmem [shape: f32[9,128,4], index: 4, kind: input, shape index: {}]   ;;  %s4742_s5 = inlined_call_operand.vmem [shape: f32[2,16,16,128], index: 5, kind: output, shape index: {}, may-alias: {0,5}]  }
   0x1 LB: > { %s2666_s19 = sadd.s32 4294967295, %s2857_s18   ;;  %p2670_p0 = scmp.ge.s32.totalorder %s2857_s18, 1  ;;  %s2857_s18 = sphi %s2891_s18, %s15_s18  }
   0x2   : > { %p187_p1 = scmp.lt.s32.totalorder %s2857_s18, 3 }
   0x4   : > { %p188_p2 = pnand %p2670_p0, %p187_p1 }
   0x6   : > { %191 = sbr.rel (%p188_p2) target bundleno = 1177 (0x499), region = 40 }
   0xb   : > { %v371_v0 = vld [vmem:[%s4739_s2 + $0x78] sm:$0xff]  ;;  %v370_v1 = vld [vmem:[%s4739_s2 + $0x70] sm:$0xff]  ;;  %v369_v2 = vld [vmem:[%s4739_s2 + $0x68] sm:$0xff]  ;;  %p215_p3 = scmp.lt.s32.totalorder %s2666_s19, 1  ;;  %s2860_s6 = smov 4   ;;  %vm2481_vm0 = vcmask 31744  }
   0xc   : > { %372 = vmatpush.msra.mxu0 %v371_v0  ;;  %2807 = vmatpush.msra.mxu2 %v371_v0  ;;  %v368_v3 = vld [vmem:[%s4739_s2 + $0x60] sm:$0xff]  ;;  %v367_v4 = vld [vmem:[%s4739_s2 + $0x58] sm:$0xff]  ;;  %v366_v5 = vld [vmem:[%s4739_s2 + $0x50] sm:$0xff]  ;;  %vm2514_vm1 = vcmask 64512  }
   0xd   : > { %s5002_s19 = smov (!%p215_p3, %s2666_s19), 1  ;;  %v365_v6 = vld [vmem:[%s4739_s2 + $0x48] sm:$0xff]  ;;  %v364_v7 = vld [vmem:[%s4739_s2 + $0x40] sm:$0xff]  ;;  %v363_v9 = vld [vmem:[%s4739_s2 + $0x38] sm:$0xff] }
   0xe   : > { %373 = vmatpush.msra.mxu0 %v370_v1  ;;  %2808 = vmatpush.msra.mxu2 %v370_v1  ;;  %s2805_s9 = sshll.u32 %s5002_s19, 8  ;;  %v257_v8 = vld [vmem:[%s4738_s1] sm:$0x3]  ;;  %v362_v10 = vld [vmem:[%s4739_s2 + $0x30] sm:$0xff]  ;;  %v361_v14 = vld [vmem:[%s4739_s2 + $0x28] sm:$0xff] }
   0xf   : > { %s2937_s20 = scalar_lea.vmem %s4737_s0, %s2805_s9  ;;  %v2942_v11 = vperm.slane %v257_v8, 0  ;;  %v360_v15 = vld [vmem:[%s4739_s2 + $0x20] sm:$0xff]  ;;  %v2955_v17 = vperm.slane %v257_v8, 1  ;;  %v359_v19 = vld [vmem:[%s4739_s2 + $0x18] sm:$0xff]  ;;  %v358_v20 = vld [vmem:[%s4739_s2 + $0x10] sm:$0xff]  ;;  %s4537_s10 = scalar_lea.vmem %s4742_s5, %s2805_s9 }
  0x10   : > { %374 = vmatpush.msra.mxu0 %v369_v2  ;;  %2809 = vmatpush.msra.mxu2 %v369_v2  ;;  %v225_v12 = vld [vmem:[%s2937_s20] sm:$0xff]  ;;  %v2968_v23 = vld [vmem:[%s2937_s20 + $0x8] sm:$0xff]  ;;  %v2986_v33 = vld [vmem:[%s2937_s20 + $0x10] sm:$0xff] }
  0x11   : > { %v2946_v13 = vld [vmem:[%s2937_s20 + $0x80] sm:$0xff]  ;;  %v259_v16 = vmul.f32 %v2942_v11, %v225_v12  ;;  %4794 = vst [vmem:[#allocation4_spill] sm:$0xff] %v2968_v23  ;;  %v2971_v24 = vld [vmem:[%s2937_s20 + $0x88] sm:$0xff]  ;;  %v260_v29 = vmul.f32 %v2942_v11, %v2968_v23  ;;  %v2989_v34 = vld [vmem:[%s2937_s20 + $0x90] sm:$0xff]  ;;  %v261_v37 = vmul.f32 %v2942_v11, %v2986_v33 }
  0x12   : > { %375 = vmatpush.msra.mxu0 %v368_v3  ;;  %2810 = vmatpush.msra.mxu2 %v368_v3  ;;  %4793 = vst [vmem:[#allocation3_spill] sm:$0xff] %v2946_v13  ;;  %v275_v18 = vmul.f32 %v2942_v11, %v2946_v13  ;;  %v357_v25 = vld [vmem:[%s4739_s2 + $0x8] sm:$0xff]  ;;  %v356_v26 = vld [vmem:[%s4739_s2] sm:$0xff]  ;;  %v276_v30 = vmul.f32 %v2942_v11, %v2971_v24  ;;  %v2998_v41 = vld [vmem:[%s2937_s20 + $0x18] sm:$0xff] }
  0x13   : > { %v292_v21 = vadd.f32 %v2955_v17, %v259_v16  ;;  %4795 = vst [vmem:[#allocation5_spill] sm:$0xff] %v2971_v24  ;;  %v293_v31 = vadd.f32 %v2955_v17, %v260_v29  ;;  %v277_v38 = vmul.f32 %v2942_v11, %v2989_v34  ;;  %v294_v39 = vadd.f32 %v2955_v17, %v261_v37  ;;  %v3001_v42 = vld [vmem:[%s2937_s20 + $0x98] sm:$0xff]  ;;  %v3010_v49 = vld [vmem:[%s2937_s20 + $0x20] sm:$0xff]  ;;  %v3022_v57 = vld [vmem:[%s2937_s20 + $0x28] sm:$0xff] }
  0x14   : > { %376 = vmatpush.msra.mxu0 %v367_v4  ;;  %2811 = vmatpush.msra.mxu2 %v367_v4  ;;  %v308_v22 = vadd.f32 %v2955_v17, %v275_v18  ;;  %v309_v32 = vadd.f32 %v2955_v17, %v276_v30  ;;  %4796 = vst [vmem:[#allocation6_spill] sm:$0xff] %v2986_v33  ;;  %v3013_v50 = vld [vmem:[%s2937_s20 + $0xa0] sm:$0xff]  ;;  %v3025_v58 = vld [vmem:[%s2937_s20 + $0xa8] sm:$0xff]  ;;  %v3034_v1 = vld [vmem:[%s2937_s20 + $0x30] sm:$0xff] }
  0x15   : > { %v324_v27 = vmax.f32 %v292_v21, 0.0  ;;  %4797 = vst [vmem:[#allocation7_spill] sm:$0xff] %v2989_v34  ;;  %v325_v35 = vmax.f32 %v293_v31, 0.0  ;;  %v310_v40 = vadd.f32 %v2955_v17, %v277_v38  ;;  %v326_v43 = vmax.f32 %v294_v39, 0.0  ;;  %v3037_v2 = vld [vmem:[%s2937_s20 + $0xb0] sm:$0xff]  ;;  %v3061_v21 = vld [vmem:[%s2937_s20 + $0xc0] sm:$0xff] }
  0x16   : > { %377 = vmatpush.msra.mxu0 %v366_v5  ;;  %2812 = vmatpush.msra.mxu2 %v366_v5  ;;  %v340_v28 = vmax.f32 %v308_v22, 0.0  ;;  %v341_v36 = vmax.f32 %v309_v32, 0.0  ;;  %4798 = vst [vmem:[#allocation8_spill] sm:$0xff] %v2998_v41  ;;  %v262_v45 = vmul.f32 %v2942_v11, %v2998_v41  ;;  %v278_v46 = vmul.f32 %v2942_v11, %v3001_v42  ;;  %v2689_v29 = vld [vmem:[%s4741_s4 + $0xf0] sm:$0xff]  ;;  %v2688_v32 = vld [vmem:[%s4741_s4 + $0xe8] sm:$0xff]  ;;  %v2687_v37 = vld [vmem:[%s4741_s4 + $0xe0] sm:$0xff] }
  0x17   : > { %4799 = vst [vmem:[#allocation9_spill] sm:$0xff] %v3001_v42  ;;  %v342_v44 = vmax.f32 %v310_v40, 0.0  ;;  %v263_v53 = vmul.f32 %v2942_v11, %v3010_v49  ;;  %v279_v54 = vmul.f32 %v2942_v11, %v3013_v50  ;;  %v264_v61 = vmul.f32 %v2942_v11, %v3022_v57 }
  0x18   : > { %378 = vmatpush.msra.mxu0 %v365_v6  ;;  %2813 = vmatpush.msra.mxu2 %v365_v6  ;;  %v295_v47 = vadd.f32 %v2955_v17, %v262_v45  ;;  %v311_v48 = vadd.f32 %v2955_v17, %v278_v46  ;;  %4800 = vst [vmem:[#allocation10_spill] sm:$0xff] %v3010_v49  ;;  %v2685_v45 = vld [vmem:[%s4741_s4 + $0xd0] sm:$0xff] }
  0x19   : > { %4801 = vst [vmem:[#allocation11_spill] sm:$0xff] %v3013_v50  ;;  %v296_v55 = vadd.f32 %v2955_v17, %v263_v53  ;;  %v312_v56 = vadd.f32 %v2955_v17, %v279_v54  ;;  %v280_v62 = vmul.f32 %v2942_v11, %v3025_v58  ;;  %v297_v63 = vadd.f32 %v2955_v17, %v264_v61  ;;  %v3109_v53 = vld [vmem:[%s2937_s20 + $0xd0] sm:$0xff]  ;;  %v716_v54 = vld [vmem:[%s4741_s4 + $0x68] sm:$0xff] }
  0x1a   : > { %379 = vmatpush.msra.mxu0 %v364_v7  ;;  %2814 = vmatpush.msra.mxu2 %v364_v7  ;;  %v327_v51 = vmax.f32 %v295_v47, 0.0  ;;  %v343_v52 = vmax.f32 %v311_v48, 0.0  ;;  %4802 = vst [vmem:[#allocation12_spill] sm:$0xff] %v3022_v57  ;;  %v265_v5 = vmul.f32 %v2942_v11, %v3034_v1  ;;  %v281_v6 = vmul.f32 %v2942_v11, %v3037_v2  ;;  %v718_v48 = vld [vmem:[%s4741_s4 + $0x78] sm:$0xff] }
  0x1b   : > { %4803 = vst [vmem:[#allocation13_spill] sm:$0xff] %v3025_v58  ;;  %v328_v59 = vmax.f32 %v296_v55, 0.0  ;;  %v344_v60 = vmax.f32 %v312_v56, 0.0  ;;  %v313_v0 = vadd.f32 %v2955_v17, %v280_v62  ;;  %v329_v3 = vmax.f32 %v297_v63, 0.0  ;;  %v2684_v55 = vld [vmem:[%s4741_s4 + $0xc8] sm:$0xff]  ;;  %v2683_v56 = vld [vmem:[%s4741_s4 + $0xc0] sm:$0xff] }
  0x1c   : > { %380 = vmatpush.msra.mxu0 %v363_v9  ;;  %2815 = vmatpush.msra.mxu2 %v363_v9  ;;  %4804 = vst [vmem:[#allocation14_spill] sm:$0xff] %v3034_v1  ;;  %v298_v7 = vadd.f32 %v2955_v17, %v265_v5  ;;  %v314_v8 = vadd.f32 %v2955_v17, %v281_v6  ;;  %v3046_v9 = vld [vmem:[%s2937_s20 + $0x38] sm:$0xff]  ;;  %v715_v63 = vld [vmem:[%s4741_s4 + $0x60] sm:$0xff] }
  0x1d   : > { %4805 = vst [vmem:[#allocation15_spill] sm:$0xff] %v3037_v2  ;;  %v345_v4 = vmax.f32 %v313_v0, 0.0  ;;  %v285_v62 = vmul.f32 %v2942_v11, %v3109_v53  ;;  %v2682_v0 = vld [vmem:[%s4741_s4 + $0xb8] sm:$0xff] }
  0x1e   : > { %381 = vmatpush.msra.mxu0 %v362_v10  ;;  %2816 = vmatpush.msra.mxu2 %v362_v10  ;;  %4806 = vst [vmem:[#allocation16_spill] sm:$0xff] %v3046_v9  ;;  %v3049_v10 = vld [vmem:[%s2937_s20 + $0xb8] sm:$0xff]  ;;  %v330_v12 = vmax.f32 %v298_v7, 0.0 }
  0x1f   : > { %4807 = vst [vmem:[#allocation17_spill] sm:$0xff] %v3049_v10  ;;  %v282_v16 = vmul.f32 %v2942_v11, %v3049_v10  ;;  %v318_v5 = vadd.f32 %v2955_v17, %v285_v62  ;;  %v3136_v6 = vld [vmem:[%s2937_s20 + $0x58] sm:$0xff] }
  0x20   : > { %382 = vmatpush.msra.mxu0 %v361_v14  ;;  %2817 = vmatpush.msra.mxu2 %v361_v14  ;;  %v346_v14 = vmax.f32 %v314_v8, 0.0  ;;  %4809 = vst [vmem:[#allocation19_spill] sm:$0xff] %v3061_v21  ;;  %v714_v7 = vld [vmem:[%s4741_s4 + $0x58] sm:$0xff]  ;;  %v713_v8 = vld [vmem:[%s4741_s4 + $0x50] sm:$0xff] }
  0x21   : > { %4813 = vst [vmem:[#allocation23_spill] sm:$0xff] %v3109_v53 }
  0x22   : > { %383 = vmatpush.msra.mxu0 %v360_v15  ;;  %2818 = vmatpush.msra.mxu2 %v360_v15  ;;  %v266_v15 = vmul.f32 %v2942_v11, %v3046_v9  ;;  %4814 = vst [vmem:[#allocation24_spill] sm:$0xff] %v3136_v6 }
  0x24   : > { %384 = vmatpush.msra.mxu0 %v359_v19  ;;  %2819 = vmatpush.msra.mxu2 %v359_v19  ;;  %v299_v18 = vadd.f32 %v2955_v17, %v266_v15  ;;  %v315_v19 = vadd.f32 %v2955_v17, %v282_v16  ;;  %v2721_v15 = vld [vmem:[%s4741_s4 + $0x1f0] sm:$0xff]  ;;  %v712_v16 = vld [vmem:[%s4741_s4 + $0x48] sm:$0xff] }
  0x26   : > { %385 = vmatpush.msra.mxu0 %v358_v20  ;;  %2820 = vmatpush.msra.mxu2 %v358_v20  ;;  %v3058_v20 = vld [vmem:[%s2937_s20 + $0x40] sm:$0xff]  ;;  %v331_v22 = vmax.f32 %v299_v18, 0.0  ;;  %v2680_v18 = vld [vmem:[%s4741_s4 + $0xa8] sm:$0xff] }
  0x27   : > { %4808 = vst [vmem:[#allocation18_spill] sm:$0xff] %v3058_v20 }
  0x28   : > { %386 = vmatpush.msra.mxu0 %v357_v25  ;;  %2821 = vmatpush.msra.mxu2 %v357_v25  ;;  %v347_v25 = vmax.f32 %v315_v19, 0.0  ;;  %v2679_v19 = vld [vmem:[%s4741_s4 + $0xa0] sm:$0xff] }
  0x2a   : > { %387 = vmatpush.msra.mxu0 %v356_v26  ;;  %2822 = vmatpush.msra.mxu2 %v356_v26  ;;  %v267_v26 = vmul.f32 %v2942_v11, %v3058_v20 }
  0x2b   : > { %388 = vmatmul.f32.vlgmr.msra.gmra.mxu0 %v324_v27  ;;  %436 = vmatmul.f32.vlgmr.msra.gmra.mxu2 %v340_v28  ;;  %v283_v27 = vmul.f32 %v2942_v11, %v3061_v21  ;;  %v2690_v28 = vld [vmem:[%s4741_s4 + $0xf8] sm:$0xff] }
  0x2c   : > { %768 = vmatpush.msra.mxu1 %v2690_v28  ;;  %2823 = vmatpush.msra.mxu3 %v2690_v28  ;;  %v300_v30 = vadd.f32 %v2955_v17, %v267_v26  ;;  %v270_v26 = vmul.f32 %v2942_v11, %v3136_v6  ;;  %v711_v28 = vld [vmem:[%s4741_s4 + $0x40] sm:$0xff] }
  0x2d   : > { %v316_v31 = vadd.f32 %v2955_v17, %v283_v27  ;;  %881 = vmatpush.msrb.mxu2 %v718_v48  ;;  %v2676_v48 = vld [vmem:[%s4741_s4 + $0x88] sm:$0xff] }
  0x2e   : > { %769 = vmatpush.msra.mxu1 %v2689_v29  ;;  %2824 = vmatpush.msra.mxu3 %v2689_v29  ;;  %v332_v38 = vmax.f32 %v300_v30, 0.0  ;;  %v2678_v29 = vld [vmem:[%s4741_s4 + $0x98] sm:$0xff]  ;;  %v2859_v30 = vmov 0.0  }
  0x2f   : > { %v348_v39 = vmax.f32 %v316_v31, 0.0  ;;  %584 = vst [vmem:[#allocation2] sm:$0xff] %v2859_v30  ;;  %v2677_v31 = vld [vmem:[%s4741_s4 + $0x90] sm:$0xff] }
  0x30   : > { %770 = vmatpush.msra.mxu1 %v2688_v32  ;;  %2825 = vmatpush.msra.mxu3 %v2688_v32  ;;  %585 = vst [vmem:[#allocation2 + $0x8] sm:$0xff] %v2859_v30  ;;  %v303_v32 = vadd.f32 %v2955_v17, %v270_v26  ;;  %v703_v26 = vld [vmem:[%s4741_s4] sm:$0xff] }
  0x31   : > { %586 = vst [vmem:[#allocation2 + $0x10] sm:$0x3] %v2859_v30 }
  0x32   : > { %771 = vmatpush.msra.mxu1 %v2687_v37  ;;  %2826 = vmatpush.msra.mxu3 %v2687_v37  ;;  %587 = vst [vmem:[#allocation2 + $0x18] sm:$0xff] %v2859_v30 }
  0x33   : > { %391 = vmatmul.f32.gmra.mxu0 %v325_v35  ;;  %439 = vmatmul.f32.gmra.mxu2 %v341_v36  ;;  %v3079_v35 = vld [vmem:[%s2937_s20 + $0x48] sm:$0xff]  ;;  %588 = vst [vmem:[#allocation2 + $0x20] sm:$0xff] %v2859_v30 }
  0x34   : > { %4810 = vst [vmem:[#allocation20_spill] sm:$0xff] %v3079_v35  ;;  %v3082_v36 = vld [vmem:[%s2937_s20 + $0xc8] sm:$0xff]  ;;  %v268_v40 = vmul.f32 %v2942_v11, %v3079_v35 }
  0x35   : > { %4811 = vst [vmem:[#allocation21_spill] sm:$0xff] %v3082_v36 }
  0x36   : > { %v301_v46 = vadd.f32 %v2955_v17, %v268_v40  ;;  %v709_v40 = vld [vmem:[%s4741_s4 + $0x30] sm:$0xff]  ;;  %589 = vst [vmem:[#allocation2 + $0x28] sm:$0x3] %v2859_v30 }
  0x37   : > { %590 = vst [vmem:[#allocation2 + $0x30] sm:$0xff] %v2859_v30  ;;  %v719_v62 = vld [vmem:[#allocation2 + $0x1] sm:$0xff] }
  0x38   : > { %591 = vst [vmem:[#allocation2 + $0x38] sm:$0xff] %v2859_v30 }
  0x39   : > { %592 = vst [vmem:[#allocation2 + $0x40] sm:$0x3] %v2859_v30 }
  0x3a   : > { %593 = vst [vmem:[#allocation2 + $0x48] sm:$0xff] %v2859_v30 }
  0x3b   : > { %394 = vmatmul.f32.gmra.mxu0 %v326_v43  ;;  %442 = vmatmul.f32.gmra.mxu2 %v342_v44  ;;  %v284_v43 = vmul.f32 %v2942_v11, %v3082_v36  ;;  %v2686_v44 = vld [vmem:[%s4741_s4 + $0xd8] sm:$0xff]  ;;  %594 = vst [vmem:[#allocation2 + $0x50] sm:$0xff] %v2859_v30 }
  0x3c   : > { %772 = vmatpush.msra.mxu1 %v2686_v44  ;;  %2827 = vmatpush.msra.mxu3 %v2686_v44  ;;  %v3195_v44 = vld [vmem:[%s2937_s20 + $0xe0] sm:$0xff]  ;;  %595 = vst [vmem:[#allocation2 + $0x58] sm:$0x3] %v2859_v30 }
  0x3d   : > { %v317_v47 = vadd.f32 %v2955_v17, %v284_v43  ;;  %v3192_v43 = vld [vmem:[%s2937_s20 + $0x60] sm:$0xff]  ;;  %4817 = vst [vmem:[#allocation27_spill] sm:$0xff] %v3195_v44 }
  0x3e   : > { %773 = vmatpush.msra.mxu1 %v2685_v45  ;;  %2828 = vmatpush.msra.mxu3 %v2685_v45  ;;  %4816 = vst [vmem:[#allocation26_spill] sm:$0xff] %v3192_v43  ;;  %v2719_v45 = vld [vmem:[%s4741_s4 + $0x1e0] sm:$0xff] }
  0x3f   : > { %596 = vst [vmem:[#allocation2 + $0x60] sm:$0xff] %v2859_v30 }
  0x40   : > { %774 = vmatpush.msra.mxu1 %v2684_v55  ;;  %2829 = vmatpush.msra.mxu3 %v2684_v55  ;;  %597 = vst [vmem:[#allocation2 + $0x68] sm:$0xff] %v2859_v30 }
  0x41   : > { %598 = vst [vmem:[#allocation2 + $0x70] sm:$0x3] %v2859_v30 }
  0x42   : > { %775 = vmatpush.msra.mxu1 %v2683_v56  ;;  %2830 = vmatpush.msra.mxu3 %v2683_v56  ;;  %v271_v56 = vmul.f32 %v2942_v11, %v3192_v43  ;;  %599 = vst [vmem:[#allocation2 + $0x78] sm:$0xff] %v2859_v30 }
  0x43   : > { %397 = vmatmul.f32.gmra.mxu0 %v327_v51  ;;  %445 = vmatmul.f32.gmra.mxu2 %v343_v52  ;;  %v717_v51 = vld [vmem:[%s4741_s4 + $0x70] sm:$0xff]  ;;  %600 = vst [vmem:[#allocation2 + $0x80] sm:$0xff] %v2859_v30 }
  0x44   : > { %v3106_v52 = vld [vmem:[%s2937_s20 + $0x50] sm:$0xff]  ;;  %882 = vmatpush.msrb.mxu2 %v717_v51  ;;  %776 = vmatpush.msra.mxu1 %v2682_v0  ;;  %v2675_v51 = vld [vmem:[%s4741_s4 + $0x80] sm:$0xff]  ;;  %601 = vst [vmem:[#allocation2 + $0x88] sm:$0x3] %v2859_v30 }
  0x45   : > { %4812 = vst [vmem:[#allocation22_spill] sm:$0xff] %v3106_v52  ;;  %v269_v61 = vmul.f32 %v2942_v11, %v3106_v52  ;;  %2831 = vmatpush.msra.mxu3 %v2682_v0 }
  0x46   : > { %883 = vmatpush.msrb.mxu2 %v716_v54  ;;  %v335_v54 = vmax.f32 %v303_v32, 0.0  ;;  %602 = vst [vmem:[#allocation2 + $0x90] sm:$0xff] %v2859_v30  ;;  %v2712_v32 = vld [vmem:[%s4741_s4 + $0x1a8] sm:$0xff] }
  0x47   : > { %603 = vst [vmem:[#allocation2 + $0x98] sm:$0xff] %v2859_v30 }
  0x48   : > { %884 = vmatpush.msrb.mxu2 %v715_v63  ;;  %v304_v63 = vadd.f32 %v2955_v17, %v271_v56  ;;  %604 = vst [vmem:[#allocation2 + $0xa0] sm:$0x3] %v2859_v30  ;;  %v2708_v56 = vld [vmem:[%s4741_s4 + $0x188] sm:$0xff] }
  0x49   : > { %605 = vst [vmem:[#allocation2 + $0xa8] sm:$0xff] %v2859_v30 }
  0x4a   : > { %885 = vmatpush.msrb.mxu2 %v714_v7  ;;  %v3242_v7 = vld [vmem:[%s2937_s20 + $0x68] sm:$0xff]  ;;  %606 = vst [vmem:[#allocation2 + $0xb0] sm:$0xff] %v2859_v30 }
  0x4b   : > { %400 = vmatmul.f32.gmra.mxu0 %v328_v59  ;;  %448 = vmatmul.f32.gmra.mxu2 %v344_v60  ;;  %v333_v59 = vmax.f32 %v301_v46, 0.0  ;;  %v349_v60 = vmax.f32 %v317_v47, 0.0  ;;  %v708_v46 = vld [vmem:[%s4741_s4 + $0x28] sm:$0xff]  ;;  %v2718_v47 = vld [vmem:[%s4741_s4 + $0x1d8] sm:$0xff]  ;;  %4818 = vst [vmem:[#allocation28_spill] sm:$0xff] %v3242_v7 }
  0x4c   : > { %886 = vmatpush.msrb.mxu2 %v713_v8  ;;  %v3245_v8 = vld [vmem:[%s2937_s20 + $0xe8] sm:$0xff]  ;;  %607 = vst [vmem:[#allocation2 + $0xb8] sm:$0x3] %v2859_v30 }
  0x4d   : > { %4819 = vst [vmem:[#allocation29_spill] sm:$0xff] %v3245_v8 }
  0x4e   : > { %887 = vmatpush.msrb.mxu2 %v712_v16  ;;  %608 = vst [vmem:[#allocation2 + $0xc0] sm:$0xff] %v2859_v30 }
  0x4f   : > { %609 = vst [vmem:[#allocation2 + $0xc8] sm:$0xff] %v2859_v30 }
  0x50   : > { %888 = vmatpush.msrb.mxu2 %v711_v28  ;;  %v720_v28 = vld [vmem:[#allocation2 + $0x9] sm:$0xff]  ;;  %610 = vst [vmem:[#allocation2 + $0xd0] sm:$0x3] %v2859_v30 }
  0x51   : > { %611 = vst [vmem:[#allocation2 + $0xd8] sm:$0xff] %v2859_v30 }
  0x52   : > { %612 = vst [vmem:[#allocation2 + $0xe0] sm:$0xff] %v2859_v30 }
  0x53   : > { %403 = vmatmul.f32.gmra.mxu0 %v329_v3  ;;  %451 = vmatmul.f32.gmra.mxu2 %v345_v4  ;;  %v2681_v3 = vld [vmem:[%s4741_s4 + $0xb0] sm:$0xff]  ;;  %v302_v4 = vadd.f32 %v2955_v17, %v269_v61  ;;  %613 = vst [vmem:[#allocation2 + $0xe8] sm:$0x3] %v2859_v30 }
  0x54   : > { %777 = vmatpush.msra.mxu1 %v2681_v3  ;;  %2832 = vmatpush.msra.mxu3 %v2681_v3  ;;  %v2717_v61 = vld [vmem:[%s4741_s4 + $0x1d0] sm:$0xff]  ;;  %v706_v3 = vld [vmem:[%s4741_s4 + $0x18] sm:$0xff]  ;;  %614 = vst [vmem:[#allocation2 + $0xf0] sm:$0xff] %v2859_v30 }
  0x55   : > { %615 = vst [vmem:[#allocation2 + $0xf8] sm:$0xff] %v2859_v30 }
  0x56   : > { %778 = vmatpush.msra.mxu1 %v2680_v18  ;;  %2833 = vmatpush.msra.mxu3 %v2680_v18  ;;  %v272_v18 = vmul.f32 %v2942_v11, %v3242_v7  ;;  %616 = vst [vmem:[#allocation2 + $0x100] sm:$0x3] %v2859_v30 }
  0x57   : > { %617 = vst [vmem:[#allocation2 + $0x108] sm:$0xff] %v2859_v30 }
  0x58   : > { %779 = vmatpush.msra.mxu1 %v2679_v19  ;;  %2834 = vmatpush.msra.mxu3 %v2679_v19  ;;  %v288_v19 = vmul.f32 %v2942_v11, %v3245_v8  ;;  %618 = vst [vmem:[#allocation2 + $0x110] sm:$0xff] %v2859_v30 }
  0x59   : > { %619 = vst [vmem:[#allocation2 + $0x118] sm:$0x3] %v2859_v30 }
  0x5a   : > { %780 = vmatpush.msra.mxu1 %v2678_v29  ;;  %2835 = vmatpush.msra.mxu3 %v2678_v29  ;;  %v305_v29 = vadd.f32 %v2955_v17, %v272_v18  ;;  %620 = vst [vmem:[#allocation2 + $0x120] sm:$0xff] %v2859_v30 }
  0x5b   : > { %406 = vmatmul.f32.gmra.mxu0 %v330_v12  ;;  %454 = vmatmul.f32.gmra.mxu2 %v346_v14  ;;  %v3145_v12 = vld [vmem:[%s2937_s20 + $0xd8] sm:$0xff]  ;;  %621 = vst [vmem:[#allocation2 + $0x128] sm:$0xff] %v2859_v30 }
  0x5c   : > { %4815 = vst [vmem:[#allocation25_spill] sm:$0xff] %v3145_v12  ;;  %v2722_v14 = vld [vmem:[%s4741_s4 + $0x1f8] sm:$0xff]  ;;  %v286_v27 = vmul.f32 %v2942_v11, %v3145_v12  ;;  %781 = vmatpush.msra.mxu1 %v2677_v31  ;;  %2836 = vmatpush.msra.mxu3 %v2677_v31  ;;  %v321_v31 = vadd.f32 %v2955_v17, %v288_v19 }
  0x5d   : > { %1237 = vmatpush.msrb.mxu0 %v2722_v14  ;;  %v2715_v14 = vld [vmem:[%s4741_s4 + $0x1c0] sm:$0xff]  ;;  %622 = vst [vmem:[#allocation2 + $0x130] sm:$0x3] %v2859_v30 }
  0x5e   : > { %v319_v37 = vadd.f32 %v2955_v17, %v286_v27  ;;  %782 = vmatpush.msra.mxu1 %v2676_v48  ;;  %2837 = vmatpush.msra.mxu3 %v2676_v48  ;;  %v2713_v27 = vld [vmem:[%s4741_s4 + $0x1b0] sm:$0xff]  ;;  %v2710_v48 = vld [vmem:[%s4741_s4 + $0x198] sm:$0xff]  ;;  %623 = vst [vmem:[#allocation2 + $0x138] sm:$0xff] %v2859_v30 }
  0x5f   : > { %1238 = vmatpush.msrb.mxu0 %v2721_v15  ;;  %v336_v15 = vmax.f32 %v304_v63, 0.0  ;;  %624 = vst [vmem:[#allocation2 + $0x140] sm:$0xff] %v2859_v30 }
  0x60   : > { %v351_v55 = vmax.f32 %v319_v37, 0.0  ;;  %783 = vmatpush.msra.mxu1 %v2675_v51  ;;  %2838 = vmatpush.msra.mxu3 %v2675_v51  ;;  %v3280_v37 = vld [vmem:[%s2937_s20 + $0x70] sm:$0xff]  ;;  %625 = vst [vmem:[#allocation2 + $0x148] sm:$0x3] %v2859_v30 }
  0x61   : > { %784 = vmatmul.f32.vlgmr.msra.gmra.mxu1 %v719_v62  ;;  %4820 = vst [vmem:[#allocation30_spill] sm:$0xff] %v3280_v37  ;;  %v2709_v51 = vld [vmem:[%s4741_s4 + $0x190] sm:$0xff] }
  0x62   : > { %626 = vst [vmem:[#allocation2 + $0x150] sm:$0xff] %v2859_v30 }
  0x63   : > { %409 = vmatmul.f32.gmra.mxu0 %v331_v22  ;;  %457 = vmatmul.f32.gmra.mxu2 %v347_v25  ;;  %v334_v22 = vmax.f32 %v302_v4, 0.0  ;;  %v350_v25 = vmax.f32 %v318_v5, 0.0  ;;  %v2716_v4 = vld [vmem:[%s4741_s4 + $0x1c8] sm:$0xff]  ;;  %v705_v5 = vld [vmem:[%s4741_s4 + $0x10] sm:$0xff]  ;;  %627 = vst [vmem:[#allocation2 + $0x158] sm:$0xff] %v2859_v30 }
  0x64   : > { %628 = vst [vmem:[#allocation2 + $0x160] sm:$0x3] %v2859_v30 }
  0x65   : > { %629 = vst [vmem:[#allocation2 + $0x168] sm:$0xff] %v2859_v30 }
  0x66   : > { %630 = vst [vmem:[#allocation2 + $0x170] sm:$0xff] %v2859_v30 }
  0x67   : > { %631 = vst [vmem:[#allocation2 + $0x178] sm:$0x3] %v2859_v30 }
  0x68   : > { %632 = vst [vmem:[#allocation2 + $0x180] sm:$0xff] %v2859_v30 }
  0x69   : > { %787 = vmatmul.f32.gmra.mxu1 %v720_v28  ;;  %633 = vst [vmem:[#allocation2 + $0x188] sm:$0xff] %v2859_v30 }
  0x6a   : > { %634 = vst [vmem:[#allocation2 + $0x190] sm:$0x3] %v2859_v30 }
  0x6b   : > { %412 = vmatmul.f32.gmra.mxu0 %v332_v38  ;;  %460 = vmatmul.f32.gmra.mxu2 %v348_v39  ;;  %v710_v38 = vld [vmem:[%s4741_s4 + $0x38] sm:$0xff]  ;;  %v2720_v39 = vld [vmem:[%s4741_s4 + $0x1e8] sm:$0xff]  ;;  %635 = vst [vmem:[#allocation2 + $0x198] sm:$0xff] %v2859_v30 }
  0x6c   : > { %889 = vmatpush.msrb.mxu2 %v710_v38  ;;  %1239 = vmatpush.msrb.mxu0 %v2720_v39  ;;  %v3283_v38 = vld [vmem:[%s2937_s20 + $0xf0] sm:$0xff]  ;;  %v2711_v39 = vld [vmem:[%s4741_s4 + $0x1a0] sm:$0xff]  ;;  %636 = vst [vmem:[#allocation2 + $0x1a0] sm:$0xff] %v2859_v30 }
  0x6d   : > { %4821 = vst [vmem:[#allocation31_spill] sm:$0xff] %v3283_v38 }
  0x6e   : > { %890 = vmatpush.msrb.mxu2 %v709_v40  ;;  %1240 = vmatpush.msrb.mxu0 %v2719_v45  ;;  %v337_v40 = vmax.f32 %v305_v29, 0.0  ;;  %v353_v45 = vmax.f32 %v321_v31, 0.0  ;;  %637 = vst [vmem:[#allocation2 + $0x1a8] sm:$0x3] %v2859_v30 }
  0x70   : > { %891 = vmatpush.msrb.mxu2 %v708_v46  ;;  %1241 = vmatpush.msrb.mxu0 %v2718_v47  ;;  %v273_v46 = vmul.f32 %v2942_v11, %v3280_v37  ;;  %v289_v47 = vmul.f32 %v2942_v11, %v3283_v38 }
  0x72   : > { %1242 = vmatpush.msrb.mxu0 %v2717_v61  ;;  %v2707_v61 = vld [vmem:[%s4741_s4 + $0x180] sm:$0xff] }
  0x73   : > { %415 = vmatmul.f32.gmra.mxu0 %v333_v59  ;;  %463 = vmatmul.f32.gmra.mxu2 %v349_v60  ;;  %v287_v59 = vmul.f32 %v2942_v11, %v3195_v44  ;;  %v707_v60 = vld [vmem:[%s4741_s4 + $0x20] sm:$0xff] }
  0x74   : > { %892 = vmatpush.msrb.mxu2 %v707_v60  ;;  %1243 = vmatpush.msrb.mxu0 %v2716_v4  ;;  %v3315_v60 = vld [vmem:[%s2937_s20 + $0xf8] sm:$0xff] }
  0x75   : > { %v320_v0 = vadd.f32 %v2955_v17, %v287_v59  ;;  %v3312_v59 = vld [vmem:[%s2937_s20 + $0x78] sm:$0xff]  ;;  %4823 = vst [vmem:[#allocation33_spill] sm:$0xff] %v3315_v60 }
  0x76   : > { %893 = vmatpush.msrb.mxu2 %v706_v3  ;;  %1244 = vmatpush.msrb.mxu0 %v2715_v14  ;;  %4822 = vst [vmem:[#allocation32_spill] sm:$0xff] %v3312_v59  ;;  %v290_v3 = vmul.f32 %v2942_v11, %v3315_v60 }
  0x77   : > { %v352_v16 = vmax.f32 %v320_v0, 0.0  ;;  %v274_v0 = vmul.f32 %v2942_v11, %v3312_v59 }
  0x78   : > { %894 = vmatpush.msrb.mxu2 %v705_v5  ;;  %v323_v5 = vadd.f32 %v2955_v17, %v290_v3 }
  0x79   : > { %v307_v4 = vadd.f32 %v2955_v17, %v274_v0 }
  0x7a   : > { %v355_v14 = vmax.f32 %v323_v5, 0.0 }
  0x7b   : > { %418 = vmatmul.f32.gmra.mxu0 %v334_v22  ;;  %466 = vmatmul.f32.gmra.mxu2 %v350_v25  ;;  %v704_v22 = vld [vmem:[%s4741_s4 + $0x8] sm:$0xff]  ;;  %v2714_v25 = vld [vmem:[%s4741_s4 + $0x1b8] sm:$0xff]  ;;  %v339_v11 = vmax.f32 %v307_v4, 0.0 }
  0x7c   : > { %895 = vmatpush.msrb.mxu2 %v704_v22  ;;  %1245 = vmatpush.msrb.mxu0 %v2714_v25 }
  0x7e   : > { %896 = vmatpush.msrb.mxu2 %v703_v26  ;;  %1246 = vmatpush.msrb.mxu0 %v2713_v27 }
  0x80   : > { %1247 = vmatpush.msrb.mxu0 %v2712_v32 }
  0x82   : > { %1248 = vmatpush.msrb.mxu0 %v2711_v39 }
  0x83   : > { %421 = vmatmul.f32.gmra.mxu0 %v335_v54  ;;  %469 = vmatmul.f32.gmra.mxu2 %v351_v55  ;;  %v306_v54 = vadd.f32 %v2955_v17, %v273_v46  ;;  %v322_v55 = vadd.f32 %v2955_v17, %v289_v47  ;;  %v485_v17 = vld [vmem:[%s4740_s3] sm:$0x3] }
  0x84   : > { %1249 = vmatpush.msrb.mxu0 %v2710_v48 }
  0x85   : > { %v338_v62 = vmax.f32 %v306_v54, 0.0  ;;  %v354_v63 = vmax.f32 %v322_v55, 0.0 }
  0x86   : > { %1250 = vmatpush.msrb.mxu0 %v2709_v51 }
  0x88   : > { %1251 = vmatpush.msrb.mxu0 %v2708_v56 }
  0x8a   : > { %1252 = vmatpush.msrb.mxu0 %v2707_v61 }
  0x8b   : > { %424 = vmatmul.f32.gmra.mxu0 %v336_v15  ;;  %472 = vmatmul.f32.gmra.mxu2 %v352_v16  ;;  %v3347_v15 = vperm.slane %v485_v17, 0  ;;  %v3351_v16 = vperm.slane %v485_v17, 1 }
  0x93   : > { %427 = vmatmul.f32.gmra.mxu0 %v337_v40  ;;  %475 = vmatmul.f32.gmra.mxu2 %v353_v45 }
  0x9b   : > { %430 = vmatmul.f32.gmra.mxu0 %v338_v62  ;;  %478 = vmatmul.f32.gmra.mxu2 %v354_v63 }
  0xa3   : > { %433 = vmatmul.f32.gmra.mxu0 %v339_v11  ;;  %481 = vmatmul.f32.gmra.mxu2 %v355_v14 }
  0xa8   : > { %v389_v18 = vpop.f32.mrf.mxu0 }
  0xa9   : > { %v487_v19 = vmul.f32 %v3347_v15, %v389_v18 }
  0xab   : > { %v520_v22 = vadd.f32 %v3351_v16, %v487_v19  ;;  %897 = vmatmul.f32.vlgmr.msrb.gmra.mxu2 %v2859_v30 }
  0xad   : > { %v3361_v25 = vmax.f32 %v520_v22, 0.0 }
  0xae   : > { %v437_v26 = vpop.f32.mrf.mxu2 }
  0xaf   : > { %639 = vst [vmem:[#allocation2 + $0x19] sm:$0xff] %v3361_v25  ;;  %v503_v27 = vmul.f32 %v3347_v15, %v437_v26  ;;  %790 = vmatmul.f32.gmra.mxu1 %v3361_v25 }
  0xb0   : > { %v392_v28 = vpop.f32.mrf.mxu0 }
  0xb1   : > { %v3367_v29 = vadd.f32 %v3351_v16, %v503_v27  ;;  %v488_v31 = vmul.f32 %v3347_v15, %v392_v28 }
  0xb3   : > { %v4752_v32 = vmax.f32 %v3367_v29, 0.0  ;;  %v521_v39 = vadd.f32 %v3351_v16, %v488_v31  ;;  %900 = vmatmul.f32.gmra.mxu2 %v2859_v30 }
  0xb5   : > { %655 = vst [vmem:[#allocation2 + $0xd9] sm:$0xff] %v4752_v32  ;;  %v3375_v40 = vmax.f32 %v521_v39, 0.0 }
  0xb6   : > { %v440_v45 = vpop.f32.mrf.mxu2  ;;  %v1188_v46 = vld [vmem:[#allocation2 + $0x18] sm:$0xff] }
  0xb7   : > { %640 = vst [vmem:[#allocation2 + $0x21] sm:$0xff] %v3375_v40  ;;  %v504_v47 = vmul.f32 %v3347_v15, %v440_v45  ;;  %1253 = vmatmul.f32.vlgmr.msrb.gmra.mxu0 %v1188_v46  ;;  %793 = vmatmul.f32.gmra.mxu1 %v3375_v40 }
  0xb8   : > { %v395_v48 = vpop.f32.mrf.mxu0 }
  0xb9   : > { %v3381_v51 = vadd.f32 %v3351_v16, %v504_v47  ;;  %v489_v30 = vmul.f32 %v3347_v15, %v395_v48 }
  0xbb   : > { %v4751_v54 = vmax.f32 %v3381_v51, 0.0  ;;  %v522_v55 = vadd.f32 %v3351_v16, %v489_v30  ;;  %903 = vmatmul.f32.gmra.mxu2 %v1188_v46 }
  0xbd   : > { %656 = vst [vmem:[#allocation2 + $0xe1] sm:$0xff] %v4751_v54  ;;  %v3388_v56 = vmax.f32 %v522_v55, 0.0 }
  0xbe   : > { %v443_v61 = vpop.f32.mrf.mxu2  ;;  %v1189_v62 = vld [vmem:[#allocation2 + $0x20] sm:$0xff] }
  0xbf   : > { %641 = vst [vmem:[#allocation2 + $0x31] sm:$0xff] %v3388_v56  ;;  %v505_v63 = vmul.f32 %v3347_v15, %v443_v61  ;;  %1256 = vmatmul.f32.gmra.mxu0 %v1189_v62  ;;  %796 = vmatmul.f32.gmra.mxu1 %v3388_v56 }
  0xc0   : > { %v398_v0 = vpop.f32.mrf.mxu0 }
  0xc1   : > { %v3394_v3 = vadd.f32 %v3351_v16, %v505_v63  ;;  %v490_v4 = vmul.f32 %v3347_v15, %v398_v0 }
  0xc3   : > { %v4749_v5 = vmax.f32 %v3394_v3, 0.0  ;;  %v523_v11 = vadd.f32 %v3351_v16, %v490_v4  ;;  %906 = vmatmul.f32.gmra.mxu2 %v1189_v62 }
  0xc5   : > { %657 = vst [vmem:[#allocation2 + $0xf1] sm:$0xff] %v4749_v5  ;;  %v3401_v14 = vmax.f32 %v523_v11, 0.0  ;;  %v2724_v5 = vld [vmem:[%s4741_s4 + $0x208] sm:$0xff] }
  0xc6   : > { %v446_v17 = vpop.f32.mrf.mxu2  ;;  %v1190_v18 = vld [vmem:[#allocation2 + $0x30] sm:$0xff] }
  0xc7   : > { %642 = vst [vmem:[#allocation2 + $0x39] sm:$0xff] %v3401_v14  ;;  %v506_v19 = vmul.f32 %v3347_v15, %v446_v17  ;;  %1259 = vmatmul.f32.gmra.mxu0 %v1190_v18  ;;  %799 = vmatmul.f32.gmra.mxu1 %v3401_v14  ;;  %v1965_v59 = vld [vmem:[#allocation2 + $0x31] sm:$0xff] }
  0xc8   : > { %v401_v22 = vpop.f32.mrf.mxu0 }
  0xc9   : > { %v3407_v26 = vadd.f32 %v3351_v16, %v506_v19  ;;  %v491_v27 = vmul.f32 %v3347_v15, %v401_v22 }
  0xcb   : > { %v4748_v28 = vmax.f32 %v3407_v26, 0.0  ;;  %v524_v31 = vadd.f32 %v3351_v16, %v491_v27  ;;  %909 = vmatmul.f32.gmra.mxu2 %v1190_v18 }
  0xcd   : > { %658 = vst [vmem:[#allocation2 + $0xf9] sm:$0xff] %v4748_v28  ;;  %v3414_v39 = vmax.f32 %v524_v31, 0.0 }
  0xce   : > { %v449_v45 = vpop.f32.mrf.mxu2  ;;  %v1191_v46 = vld [vmem:[#allocation2 + $0x38] sm:$0xff] }
  0xcf   : > { %643 = vst [vmem:[#allocation2 + $0x49] sm:$0xff] %v3414_v39  ;;  %v507_v47 = vmul.f32 %v3347_v15, %v449_v45  ;;  %1262 = vmatmul.f32.gmra.mxu0 %v1191_v46  ;;  %802 = vmatmul.f32.gmra.mxu1 %v3414_v39  ;;  %v3917_v43 = vld [vmem:[#allocation2 + $0x3a] sm:$0xff] }
  0xd0   : > { %v404_v48 = vpop.f32.mrf.mxu0 }
  0xd1   : > { %v3420_v30 = vadd.f32 %v3351_v16, %v507_v47  ;;  %v492_v55 = vmul.f32 %v3347_v15, %v404_v48  ;;  %v2738_v48 = vld [vmem:[%s4741_s4 + $0x278] sm:$0xff] }
  0xd2   : > { %1431 = vmatpush.msrb.mxu1 %v2738_v48 }
  0xd3   : > { %v4746_v61 = vmax.f32 %v3420_v30, 0.0  ;;  %v525_v62 = vadd.f32 %v3351_v16, %v492_v55  ;;  %912 = vmatmul.f32.gmra.mxu2 %v1191_v46 }
  0xd5   : > { %659 = vst [vmem:[#allocation2 + $0x109] sm:$0xff] %v4746_v61  ;;  %v3427_v63 = vmax.f32 %v525_v62, 0.0  ;;  %v2728_v61 = vld [vmem:[%s4741_s4 + $0x228] sm:$0xff] }
  0xd6   : > { %v452_v0 = vpop.f32.mrf.mxu2  ;;  %v1192_v4 = vld [vmem:[#allocation2 + $0x48] sm:$0xff] }
  0xd7   : > { %644 = vst [vmem:[#allocation2 + $0x51] sm:$0xff] %v3427_v63  ;;  %v508_v11 = vmul.f32 %v3347_v15, %v452_v0  ;;  %1265 = vmatmul.f32.gmra.mxu0 %v1192_v4  ;;  %805 = vmatmul.f32.gmra.mxu1 %v3427_v63 }
  0xd8   : > { %v407_v17 = vpop.f32.mrf.mxu0 }
  0xd9   : > { %v3433_v18 = vadd.f32 %v3351_v16, %v508_v11  ;;  %v493_v19 = vmul.f32 %v3347_v15, %v407_v17 }
  0xdb   : > { %v4745_v22 = vmax.f32 %v3433_v18, 0.0  ;;  %v526_v27 = vadd.f32 %v3351_v16, %v493_v19  ;;  %915 = vmatmul.f32.gmra.mxu2 %v1192_v4  ;;  %v2737_v4 = vld [vmem:[%s4741_s4 + $0x270] sm:$0xff]  ;;  %v2736_v19 = vld [vmem:[%s4741_s4 + $0x268] sm:$0xff] }
  0xdc   : > { %1432 = vmatpush.msrb.mxu1 %v2737_v4  ;;  %v3911_v7 = vld [vmem:[#allocation2 + $0x109] sm:$0xff] }
  0xdd   : > { %660 = vst [vmem:[#allocation2 + $0x111] sm:$0xff] %v4745_v22  ;;  %v3440_v31 = vmax.f32 %v526_v27, 0.0 }
  0xde   : > { %v455_v45 = vpop.f32.mrf.mxu2  ;;  %v1193_v46 = vld [vmem:[#allocation2 + $0x50] sm:$0xff]  ;;  %1433 = vmatpush.msrb.mxu1 %v2736_v19 }
  0xdf   : > { %645 = vst [vmem:[#allocation2 + $0x61] sm:$0xff] %v3440_v31  ;;  %v509_v47 = vmul.f32 %v3347_v15, %v455_v45  ;;  %1268 = vmatmul.f32.gmra.mxu0 %v1193_v46  ;;  %808 = vmatmul.f32.gmra.mxu1 %v3440_v31  ;;  %v2735_v45 = vld [vmem:[%s4741_s4 + $0x260] sm:$0xff]  ;;  %v2733_v19 = vld [vmem:[%s4741_s4 + $0x250] sm:$0xff] }
  0xe0   : > { %v410_v55 = vpop.f32.mrf.mxu0  ;;  %1434 = vmatpush.msrb.mxu1 %v2735_v45  ;;  %v3933_v9 = vld [vmem:[#allocation2 + $0x4a] sm:$0xff]  ;;  %v3947_v57 = vld [vmem:[#allocation2 + $0x52] sm:$0xff] }
  0xe1   : > { %v3449_v62 = vadd.f32 %v3351_v16, %v509_v47  ;;  %v494_v0 = vmul.f32 %v3347_v15, %v410_v55  ;;  %v2734_v55 = vld [vmem:[%s4741_s4 + $0x258] sm:$0xff] }
  0xe2   : > { %1435 = vmatpush.msrb.mxu1 %v2734_v55  ;;  %v2731_v55 = vld [vmem:[%s4741_s4 + $0x240] sm:$0xff] }
  0xe3   : > { %v4743_v11 = vmax.f32 %v3449_v62, 0.0  ;;  %v527_v17 = vadd.f32 %v3351_v16, %v494_v0  ;;  %918 = vmatmul.f32.gmra.mxu2 %v1193_v46 }
  0xe4   : > { %1436 = vmatpush.msrb.mxu1 %v2733_v19  ;;  %v3925_v35 = vld [vmem:[#allocation2 + $0x111] sm:$0xff] }
  0xe5   : > { %661 = vst [vmem:[#allocation2 + $0x121] sm:$0xff] %v4743_v11  ;;  %v3462_v27 = vmax.f32 %v527_v17, 0.0  ;;  %v2732_v11 = vld [vmem:[%s4741_s4 + $0x248] sm:$0xff] }
  0xe6   : > { %v458_v47 = vpop.f32.mrf.mxu2  ;;  %v1194_v48 = vld [vmem:[#allocation2 + $0x60] sm:$0xff]  ;;  %1437 = vmatpush.msrb.mxu1 %v2732_v11  ;;  %v2730_v11 = vld [vmem:[%s4741_s4 + $0x238] sm:$0xff] }
  0xe7   : > { %646 = vst [vmem:[#allocation2 + $0x69] sm:$0xff] %v3462_v27  ;;  %v510_v46 = vmul.f32 %v3347_v15, %v458_v47  ;;  %1271 = vmatmul.f32.gmra.mxu0 %v1194_v48  ;;  %811 = vmatmul.f32.gmra.mxu1 %v3462_v27 }
  0xe8   : > { %v413_v0 = vpop.f32.mrf.mxu0  ;;  %1438 = vmatpush.msrb.mxu1 %v2731_v55  ;;  %v2729_v55 = vld [vmem:[%s4741_s4 + $0x230] sm:$0xff] }
  0xe9   : > { %v3474_v4 = vadd.f32 %v3351_v16, %v510_v46  ;;  %v495_v17 = vmul.f32 %v3347_v15, %v413_v0 }
  0xea   : > { %1439 = vmatpush.msrb.mxu1 %v2730_v11  ;;  %v2727_v11 = vld [vmem:[%s4741_s4 + $0x220] sm:$0xff] }
  0xeb   : > { %v4744_v45 = vmax.f32 %v3474_v4, 0.0  ;;  %v528_v47 = vadd.f32 %v3351_v16, %v495_v17  ;;  %921 = vmatmul.f32.gmra.mxu2 %v1194_v48 }
  0xec   : > { %1440 = vmatpush.msrb.mxu1 %v2729_v55  ;;  %v3941_v41 = vld [vmem:[#allocation2 + $0x121] sm:$0xff] }
  0xed   : > { %662 = vst [vmem:[#allocation2 + $0x129] sm:$0xff] %v4744_v45  ;;  %v3487_v46 = vmax.f32 %v528_v47, 0.0 }
  0xee   : > { %v461_v0 = vpop.f32.mrf.mxu2  ;;  %v1195_v19 = vld [vmem:[#allocation2 + $0x68] sm:$0xff]  ;;  %1441 = vmatpush.msrb.mxu1 %v2728_v61  ;;  %v2726_v61 = vld [vmem:[%s4741_s4 + $0x218] sm:$0xff] }
  0xef   : > { %647 = vst [vmem:[#allocation2 + $0x79] sm:$0xff] %v3487_v46  ;;  %v511_v48 = vmul.f32 %v3347_v15, %v461_v0  ;;  %1274 = vmatmul.f32.gmra.mxu0 %v1195_v19  ;;  %814 = vmatmul.f32.gmra.mxu1 %v3487_v46 }
  0xf0   : > { %v416_v17 = vpop.f32.mrf.mxu0  ;;  %1442 = vmatpush.msrb.mxu1 %v2727_v11  ;;  %v2725_v11 = vld [vmem:[%s4741_s4 + $0x210] sm:$0xff] }
  0xf1   : > { %v3499_v47 = vadd.f32 %v3351_v16, %v511_v48  ;;  %v496_v45 = vmul.f32 %v3347_v15, %v416_v17 }
  0xf2   : > { %1443 = vmatpush.msrb.mxu1 %v2726_v61  ;;  %v2723_v61 = vld [vmem:[%s4741_s4 + $0x200] sm:$0xff] }
  0xf3   : > { %v4747_v0 = vmax.f32 %v3499_v47, 0.0  ;;  %v529_v22 = vadd.f32 %v3351_v16, %v496_v45  ;;  %924 = vmatmul.f32.gmra.mxu2 %v1195_v19 }
  0xf4   : > { %1444 = vmatpush.msrb.mxu1 %v2725_v11 }
  0xf5   : > { %663 = vst [vmem:[#allocation2 + $0x139] sm:$0xff] %v4747_v0  ;;  %v3512_v48 = vmax.f32 %v529_v22, 0.0 }
  0xf6   : > { %v464_v17 = vpop.f32.mrf.mxu2  ;;  %v1196_v55 = vld [vmem:[#allocation2 + $0x78] sm:$0xff]  ;;  %1445 = vmatpush.msrb.mxu1 %v2724_v5 }
  0xf7   : > { %648 = vst [vmem:[#allocation2 + $0x81] sm:$0xff] %v3512_v48  ;;  %v512_v45 = vmul.f32 %v3347_v15, %v464_v17  ;;  %1277 = vmatmul.f32.gmra.mxu0 %v1196_v55  ;;  %817 = vmatmul.f32.gmra.mxu1 %v3512_v48 }
  0xf8   : > { %v419_v22 = vpop.f32.mrf.mxu0  ;;  %1446 = vmatpush.msrb.mxu1 %v2723_v61 }
  0xf9   : > { %v3524_v19 = vadd.f32 %v3351_v16, %v512_v45  ;;  %v497_v0 = vmul.f32 %v3347_v15, %v419_v22 }
  0xfb   : > { %v4750_v17 = vmax.f32 %v3524_v19, 0.0  ;;  %v530_v28 = vadd.f32 %v3351_v16, %v497_v0  ;;  %927 = vmatmul.f32.gmra.mxu2 %v1196_v55 }
  0xfd   : > { %664 = vst [vmem:[#allocation2 + $0x141] sm:$0xff] %v4750_v17  ;;  %v3537_v45 = vmax.f32 %v530_v28, 0.0 }
  0xfe   : > { %v467_v22 = vpop.f32.mrf.mxu2  ;;  %v1197_v11 = vld [vmem:[#allocation2 + $0x80] sm:$0xff] }
  0xff   : > { %649 = vst [vmem:[#allocation2 + $0x91] sm:$0xff] %v3537_v45  ;;  %v513_v0 = vmul.f32 %v3347_v15, %v467_v22  ;;  %1280 = vmatmul.f32.gmra.mxu0 %v1197_v11  ;;  %820 = vmatmul.f32.gmra.mxu1 %v3537_v45 }
 0x100   : > { %v422_v5 = vpop.f32.mrf.mxu0 }
 0x101   : > { %v3546_v55 = vadd.f32 %v3351_v16, %v513_v0  ;;  %v498_v28 = vmul.f32 %v3347_v15, %v422_v5 }
 0x103   : > { %v4754_v17 = vmax.f32 %v3546_v55, 0.0  ;;  %v531_v54 = vadd.f32 %v3351_v16, %v498_v28  ;;  %930 = vmatmul.f32.gmra.mxu2 %v1197_v11 }
 0x105   : > { %665 = vst [vmem:[#allocation2 + $0x151] sm:$0xff] %v4754_v17  ;;  %v3553_v61 = vmax.f32 %v531_v54, 0.0 }
 0x106   : > { %v470_v22 = vpop.f32.mrf.mxu2  ;;  %v1198_v32 = vld [vmem:[#allocation2 + $0x90] sm:$0xff] }
 0x107   : > { %650 = vst [vmem:[#allocation2 + $0x99] sm:$0xff] %v3553_v61  ;;  %v514_v60 = vmul.f32 %v3347_v15, %v470_v22  ;;  %1283 = vmatmul.f32.gmra.mxu0 %v1198_v32  ;;  %823 = vmatmul.f32.gmra.mxu1 %v3553_v61  ;;  %v2706_v22 = vld [vmem:[%s4741_s4 + $0x178] sm:$0xff] }
 0x108   : > { %v425_v0 = vpop.f32.mrf.mxu0  ;;  %1043 = vmatpush.msrb.mxu3 %v2706_v22 }
 0x109   : > { %v3559_v5 = vadd.f32 %v3351_v16, %v514_v60  ;;  %v499_v11 = vmul.f32 %v3347_v15, %v425_v0 }
 0x10b   : > { %v4757_v28 = vmax.f32 %v3559_v5, 0.0  ;;  %v532_v54 = vadd.f32 %v3351_v16, %v499_v11  ;;  %933 = vmatmul.f32.gmra.mxu2 %v1198_v32  ;;  %v2705_v32 = vld [vmem:[%s4741_s4 + $0x170] sm:$0xff] }
 0x10c   : > { %1044 = vmatpush.msrb.mxu3 %v2705_v32 }
 0x10d   : > { %666 = vst [vmem:[#allocation2 + $0x159] sm:$0xff] %v4757_v28  ;;  %v3566_v17 = vmax.f32 %v532_v54, 0.0 }
 0x10e   : > { %v473_v38 = vpop.f32.mrf.mxu2  ;;  %v1199_v44 = vld [vmem:[#allocation2 + $0x98] sm:$0xff] }
 0x10f   : > { %651 = vst [vmem:[#allocation2 + $0xa9] sm:$0xff] %v3566_v17  ;;  %v515_v60 = vmul.f32 %v3347_v15, %v473_v38  ;;  %1286 = vmatmul.f32.gmra.mxu0 %v1199_v44  ;;  %826 = vmatmul.f32.gmra.mxu1 %v3566_v17 }
 0x110   : > { %v428_v0 = vpop.f32.mrf.mxu0 }
 0x111   : > { %v3578_v11 = vadd.f32 %v3351_v16, %v515_v60  ;;  %v500_v54 = vmul.f32 %v3347_v15, %v428_v0  ;;  %v2704_v60 = vld [vmem:[%s4741_s4 + $0x168] sm:$0xff] }
 0x112   : > { %1045 = vmatpush.msrb.mxu3 %v2704_v60 }
 0x113   : > { %v4760_v22 = vmax.f32 %v3578_v11, 0.0  ;;  %v533_v28 = vadd.f32 %v3351_v16, %v500_v54  ;;  %936 = vmatmul.f32.gmra.mxu2 %v1199_v44  ;;  %v3593_v44 = vpop.f32.mrf.mxu1 }
 0x115   : > { %667 = vst [vmem:[#allocation2 + $0x169] sm:$0xff] %v4760_v22  ;;  %v3585_v38 = vmax.f32 %v533_v28, 0.0 }
 0x116   : > { %v476_v12 = vpop.f32.mrf.mxu2  ;;  %v1200_v8 = vld [vmem:[#allocation2 + $0xa8] sm:$0xff] }
 0x117   : > { %652 = vst [vmem:[#allocation2 + $0xb1] sm:$0xff] %v3585_v38  ;;  %v516_v32 = vmul.f32 %v3347_v15, %v476_v12  ;;  %1289 = vmatmul.f32.gmra.mxu0 %v1200_v8  ;;  %829 = vmatmul.f32.gmra.mxu1 %v3585_v38 }
 0x118   : > { %v431_v0 = vpop.f32.mrf.mxu0 }
 0x119   : > { %v3596_v28 = vadd.f32 %v3351_v16, %v516_v32  ;;  %v501_v54 = vmul.f32 %v3347_v15, %v431_v0  ;;  %v2703_v32 = vld [vmem:[%s4741_s4 + $0x160] sm:$0xff] }
 0x11a   : > { %1046 = vmatpush.msrb.mxu3 %v2703_v32 }
 0x11b   : > { %v4764_v22 = vmax.f32 %v3596_v28, 0.0  ;;  %v534_v12 = vadd.f32 %v3351_v16, %v501_v54  ;;  %939 = vmatmul.f32.gmra.mxu2 %v1200_v8 }
 0x11d   : > { %668 = vst [vmem:[#allocation2 + $0x171] sm:$0xff] %v4764_v22  ;;  %v3603_v36 = vmax.f32 %v534_v12, 0.0  ;;  %v788_v12 = vpop.f32.mrf.mxu1 }
 0x11e   : > { %v479_v21 = vpop.f32.mrf.mxu2  ;;  %v1201_v53 = vld [vmem:[#allocation2 + $0xb0] sm:$0xff] }
 0x11f   : > { %653 = vst [vmem:[#allocation2 + $0xc1] sm:$0xff] %v3603_v36  ;;  %v517_v60 = vmul.f32 %v3347_v15, %v479_v21  ;;  %1292 = vmatmul.f32.gmra.mxu0 %v1201_v53  ;;  %832 = vmatmul.f32.vlgmr.msra.gmra.mxu3 %v3603_v36 }
 0x120   : > { %v434_v0 = vpop.f32.mrf.mxu0  ;;  %1447 = vmatmul.f32.vlgmr.msrb.gmra.mxu1 %v3361_v25  ;;  %v2702_v25 = vld [vmem:[%s4741_s4 + $0x158] sm:$0xff] }
 0x121   : > { %v550_v8 = vadd.f32 %v3351_v16, %v517_v60  ;;  %v502_v54 = vmul.f32 %v3347_v15, %v434_v0  ;;  %1047 = vmatpush.msrb.mxu3 %v2702_v25 }
 0x123   : > { %v582_v22 = vmax.f32 %v550_v8, 0.0  ;;  %v535_v2 = vadd.f32 %v3351_v16, %v502_v54  ;;  %942 = vmatmul.f32.gmra.mxu2 %v1201_v53  ;;  %v4825_v8 = vmax.f32 %v3381_v51, 0.0  ;;  %v2699_v51 = vld [vmem:[%s4741_s4 + $0x140] sm:$0xff] }
 0x125   : > { %669 = vst [vmem:[#allocation2 + $0x181] sm:$0xff] %v582_v22  ;;  %v3615_v21 = vmax.f32 %v535_v2, 0.0 }
 0x126   : > { %v482_v58 = vpop.f32.mrf.mxu2  ;;  %v1202_v10 = vld [vmem:[#allocation2 + $0xc0] sm:$0xff] }
 0x127   : > { %654 = vst [vmem:[#allocation2 + $0xc9] sm:$0xff] %v3615_v21  ;;  %v518_v42 = vmul.f32 %v3347_v15, %v482_v58  ;;  %1295 = vmatmul.f32.gmra.mxu0 %v1202_v10  ;;  %835 = vmatmul.f32.gmra.mxu3 %v3615_v21  ;;  %v4824_v58 = vmax.f32 %v3367_v29, 0.0  ;;  %v2701_v15 = vld [vmem:[%s4741_s4 + $0x150] sm:$0xff]  ;;  %v2700_v29 = vld [vmem:[%s4741_s4 + $0x148] sm:$0xff] }
 0x128   : > { %1450 = vmatmul.f32.gmra.mxu1 %v3375_v40  ;;  %1048 = vmatpush.msrb.mxu3 %v2701_v15 }
 0x129   : > { %v551_v53 = vadd.f32 %v3351_v16, %v518_v42 }
 0x12a   : > { %1049 = vmatpush.msrb.mxu3 %v2700_v29  ;;  %v1207_v29 = vld [vmem:[#allocation2 + $0xf8] sm:$0xff] }
 0x12b   : > { %v583_v2 = vmax.f32 %v551_v53, 0.0  ;;  %945 = vmatmul.f32.gmra.mxu2 %v1202_v10  ;;  %v1204_v10 = vld [vmem:[#allocation2 + $0xd8] sm:$0xff]  ;;  %v1205_v53 = vld [vmem:[#allocation2 + $0xe0] sm:$0xff] }
 0x12c   : > { %v791_v22 = vpop.f32.mrf.mxu1  ;;  %1050 = vmatpush.msrb.mxu3 %v2699_v51 }
 0x12d   : > { %670 = vst [vmem:[#allocation2 + $0x189] sm:$0xff] %v583_v2 }
 0x12e   : > { %v3625_v60 = vpop.f32.mrf.mxu2  ;;  %v1203_v32 = vld [vmem:[#allocation2 + $0xc8] sm:$0xff] }
 0x12f   : > { %1298 = vmatmul.f32.gmra.mxu0 %v1203_v32  ;;  %838 = vmatmul.f32.gmra.mxu3 %v4824_v58 }
 0x130   : > { %1453 = vmatmul.f32.gmra.mxu1 %v3388_v56 }
 0x133   : > { %948 = vmatmul.f32.gmra.mxu2 %v1203_v32  ;;  %v1206_v32 = vld [vmem:[#allocation2 + $0xf0] sm:$0xff] }
 0x134   : > { %v3633_v42 = vpop.f32.mrf.mxu0  ;;  %v794_v16 = vpop.f32.mrf.mxu1 }
 0x136   : > { %v901_v40 = vpop.f32.mrf.mxu2 }
 0x137   : > { %v3635_v0 = vadd.f32 %v901_v40, %v788_v12  ;;  %1301 = vmatmul.f32.gmra.mxu0 %v1204_v10  ;;  %841 = vmatmul.f32.gmra.mxu3 %v4825_v8  ;;  %v4826_v12 = vmax.f32 %v3394_v3, 0.0  ;;  %v2698_v3 = vld [vmem:[%s4741_s4 + $0x138] sm:$0xff] }
 0x138   : > { %1456 = vmatmul.f32.gmra.mxu1 %v3401_v14  ;;  %1051 = vmatpush.msrb.mxu3 %v2698_v3 }
 0x13b   : > { %951 = vmatmul.f32.gmra.mxu2 %v1204_v10 }
 0x13c   : > { %v3643_v56 = vpop.f32.mrf.mxu0  ;;  %v797_v54 = vpop.f32.mrf.mxu1 }
 0x13e   : > { %v904_v25 = vpop.f32.mrf.mxu2 }
 0x13f   : > { %v3645_v2 = vadd.f32 %v904_v25, %v791_v22  ;;  %1304 = vmatmul.f32.gmra.mxu0 %v1205_v53  ;;  %844 = vmatmul.f32.gmra.mxu3 %v4826_v12  ;;  %v4827_v22 = vmax.f32 %v3407_v26, 0.0  ;;  %v2697_v26 = vld [vmem:[%s4741_s4 + $0x130] sm:$0xff] }
 0x140   : > { %1459 = vmatmul.f32.gmra.mxu1 %v3414_v39  ;;  %1052 = vmatpush.msrb.mxu3 %v2697_v26 }
 0x143   : > { %954 = vmatmul.f32.gmra.mxu2 %v1205_v53 }
 0x144   : > { %v3653_v14 = vpop.f32.mrf.mxu0  ;;  %v800_v58 = vpop.f32.mrf.mxu1 }
 0x146   : > { %v907_v15 = vpop.f32.mrf.mxu2 }
 0x147   : > { %v3655_v10 = vadd.f32 %v907_v15, %v794_v16  ;;  %1307 = vmatmul.f32.gmra.mxu0 %v1206_v32  ;;  %847 = vmatmul.f32.gmra.mxu3 %v4827_v22  ;;  %v4828_v16 = vmax.f32 %v3420_v30, 0.0  ;;  %v2696_v30 = vld [vmem:[%s4741_s4 + $0x128] sm:$0xff]  ;;  %v1209_v22 = vld [vmem:[#allocation2 + $0x110] sm:$0xff] }
 0x148   : > { %1462 = vmatmul.f32.gmra.mxu1 %v3427_v63  ;;  %v1208_v63 = vld [vmem:[#allocation2 + $0x108] sm:$0xff]  ;;  %1053 = vmatpush.msrb.mxu3 %v2696_v30 }
 0x14b   : > { %957 = vmatmul.f32.gmra.mxu2 %v1206_v32 }
 0x14c   : > { %v3663_v39 = vpop.f32.mrf.mxu0  ;;  %v803_v40 = vpop.f32.mrf.mxu1 }
 0x14e   : > { %v910_v8 = vpop.f32.mrf.mxu2 }
 0x14f   : > { %v3665_v25 = vadd.f32 %v910_v8, %v797_v54  ;;  %1310 = vmatmul.f32.gmra.mxu0 %v1207_v29  ;;  %850 = vmatmul.f32.gmra.mxu3 %v4828_v16  ;;  %v4829_v54 = vmax.f32 %v3433_v18, 0.0  ;;  %v2695_v18 = vld [vmem:[%s4741_s4 + $0x120] sm:$0xff] }
 0x150   : > { %1465 = vmatmul.f32.gmra.mxu1 %v3440_v31  ;;  %1054 = vmatpush.msrb.mxu3 %v2695_v18 }
 0x153   : > { %960 = vmatmul.f32.gmra.mxu2 %v1207_v29 }
 0x154   : > { %v806_v53 = vpop.f32.mrf.mxu1  ;;  %v3673_v12 = vpop.f32.mrf.mxu0 }
 0x156   : > { %v913_v51 = vpop.f32.mrf.mxu2 }
 0x157   : > { %v3675_v32 = vadd.f32 %v913_v51, %v800_v58  ;;  %1313 = vmatmul.f32.gmra.mxu0 %v1208_v63  ;;  %853 = vmatmul.f32.gmra.mxu3 %v4829_v54  ;;  %v4830_v58 = vmax.f32 %v3449_v62, 0.0  ;;  %v2694_v62 = vld [vmem:[%s4741_s4 + $0x118] sm:$0xff]  ;;  %v1211_v54 = vld [vmem:[#allocation2 + $0x128] sm:$0xff] }
 0x158   : > { %1468 = vmatmul.f32.gmra.mxu1 %v3462_v27  ;;  %v1210_v27 = vld [vmem:[#allocation2 + $0x120] sm:$0xff]  ;;  %1055 = vmatpush.msrb.mxu3 %v2694_v62  ;;  %v4833_v62 = vmax.f32 %v3524_v19, 0.0  ;;  %v2785_v19 = vld [vmem:[%s4741_s4 + $0x3f0] sm:$0xff] }
 0x15b   : > { %963 = vmatmul.f32.gmra.mxu2 %v1208_v63 }
 0x15c   : > { %v809_v31 = vpop.f32.mrf.mxu1  ;;  %v3683_v3 = vpop.f32.mrf.mxu0 }
 0x15e   : > { %v916_v15 = vpop.f32.mrf.mxu2 }
 0x15f   : > { %v3685_v8 = vadd.f32 %v916_v15, %v803_v40  ;;  %1316 = vmatmul.f32.gmra.mxu0 %v1209_v22  ;;  %856 = vmatmul.f32.gmra.mxu3 %v4830_v58  ;;  %v4831_v40 = vmax.f32 %v3474_v4, 0.0  ;;  %v2753_v4 = vld [vmem:[%s4741_s4 + $0x2f0] sm:$0xff] }
 0x160   : > { %1471 = vmatmul.f32.gmra.mxu1 %v3487_v46  ;;  %v2693_v15 = vld [vmem:[%s4741_s4 + $0x110] sm:$0xff] }
 0x161   : > { %1056 = vmatpush.msrb.mxu3 %v2693_v15 }
 0x163   : > { %966 = vmatmul.f32.gmra.mxu2 %v1209_v22  ;;  %v2752_v22 = vld [vmem:[%s4741_s4 + $0x2e8] sm:$0xff] }
 0x164   : > { %v812_v29 = vpop.f32.mrf.mxu1  ;;  %v3701_v63 = vpop.f32.mrf.mxu0 }
 0x166   : > { %v919_v16 = vpop.f32.mrf.mxu2 }
 0x167   : > { %v3693_v26 = vadd.f32 %v919_v16, %v806_v53  ;;  %1319 = vmatmul.f32.gmra.mxu0 %v1210_v27  ;;  %859 = vmatmul.f32.gmra.mxu3 %v4831_v40  ;;  %v2754_v53 = vld [vmem:[%s4741_s4 + $0x2f8] sm:$0xff] }
 0x168   : > { %1474 = vmatmul.f32.gmra.mxu1 %v3512_v48  ;;  %1625 = vmatpush.msra.mxu2 %v2754_v53  ;;  %v4832_v48 = vmax.f32 %v3499_v47, 0.0  ;;  %v1212_v47 = vld [vmem:[#allocation2 + $0x138] sm:$0xff]  ;;  %v2692_v53 = vld [vmem:[%s4741_s4 + $0x108] sm:$0xff] }
 0x169   : > { %1057 = vmatpush.msrb.mxu3 %v2692_v53  ;;  %v2744_v53 = vld [vmem:[%s4741_s4 + $0x2a8] sm:$0xff] }
 0x16a   : > { %1626 = vmatpush.msra.mxu2 %v2753_v4 }
 0x16b   : > { %969 = vmatmul.f32.gmra.mxu2 %v1210_v27  ;;  %v2750_v27 = vld [vmem:[%s4741_s4 + $0x2d8] sm:$0xff] }
 0x16c   : > { %v815_v46 = vpop.f32.mrf.mxu1  ;;  %1627 = vmatpush.msra.mxu2 %v2752_v22  ;;  %v3723_v58 = vpop.f32.mrf.mxu0  ;;  %v1213_v22 = vld [vmem:[#allocation2 + $0x140] sm:$0xff] }
 0x16e   : > { %v922_v51 = vpop.f32.mrf.mxu2 }
 0x16f   : > { %v3709_v30 = vadd.f32 %v922_v51, %v809_v31  ;;  %1322 = vmatmul.f32.gmra.mxu0 %v1211_v54  ;;  %862 = vmatmul.f32.gmra.mxu3 %v4832_v48  ;;  %v2751_v31 = vld [vmem:[%s4741_s4 + $0x2e0] sm:$0xff]  ;;  %v2748_v51 = vld [vmem:[%s4741_s4 + $0x2c8] sm:$0xff] }
 0x170   : > { %1477 = vmatmul.f32.gmra.mxu1 %v3537_v45  ;;  %1628 = vmatpush.msra.mxu2 %v2751_v31  ;;  %v2749_v45 = vld [vmem:[%s4741_s4 + $0x2d0] sm:$0xff]  ;;  %v2784_v48 = vld [vmem:[%s4741_s4 + $0x3e8] sm:$0xff] }
 0x172   : > { %1629 = vmatpush.msra.mxu2 %v2750_v27  ;;  %v2783_v27 = vld [vmem:[%s4741_s4 + $0x3e0] sm:$0xff] }
 0x173   : > { %972 = vmatmul.f32.gmra.mxu2 %v1211_v54  ;;  %v2747_v54 = vld [vmem:[%s4741_s4 + $0x2c0] sm:$0xff] }
 0x174   : > { %v818_v18 = vpop.f32.mrf.mxu1  ;;  %1630 = vmatpush.msra.mxu2 %v2749_v45  ;;  %v3757_v15 = vpop.f32.mrf.mxu0 }
 0x175   : > { %4834 = vst [vmem:[#allocation34_spill] sm:$0xff] %v3757_v15  ;;  %v3987_v15 = vld [vmem:[#allocation2 + $0x141] sm:$0xff] }
 0x176   : > { %v925_v16 = vpop.f32.mrf.mxu2  ;;  %1631 = vmatpush.msra.mxu2 %v2748_v51  ;;  %v2782_v51 = vld [vmem:[%s4741_s4 + $0x3d8] sm:$0xff] }
 0x177   : > { %v3731_v40 = vadd.f32 %v925_v16, %v812_v29  ;;  %1325 = vmatmul.f32.gmra.mxu0 %v1212_v47  ;;  %865 = vmatmul.f32.gmra.mxu3 %v4833_v62  ;;  %v2786_v29 = vld [vmem:[%s4741_s4 + $0x3f8] sm:$0xff]  ;;  %v2691_v16 = vld [vmem:[%s4741_s4 + $0x100] sm:$0xff]  ;;  %v4835_v62 = vmax.f32 %v3546_v55, 0.0  ;;  %v2781_v55 = vld [vmem:[%s4741_s4 + $0x3d0] sm:$0xff] }
 0x178   : > { %1480 = vmatmul.f32.gmra.mxu1 %v3553_v61  ;;  %2014 = vmatpush.msra.mxu0 %v2786_v29  ;;  %v2746_v61 = vld [vmem:[%s4741_s4 + $0x2b8] sm:$0xff]  ;;  %v1214_v29 = vld [vmem:[#allocation2 + $0x150] sm:$0xff] }
 0x179   : > { %1632 = vmatpush.msra.mxu2 %v2747_v54  ;;  %1058 = vmatpush.msrb.mxu3 %v2691_v16  ;;  %v2780_v54 = vld [vmem:[%s4741_s4 + $0x3c8] sm:$0xff]  ;;  %v2770_v16 = vld [vmem:[%s4741_s4 + $0x378] sm:$0xff] }
 0x17a   : > { %2015 = vmatpush.msra.mxu0 %v2785_v19  ;;  %v2742_v19 = vld [vmem:[%s4741_s4 + $0x298] sm:$0xff] }
 0x17b   : > { %975 = vmatmul.f32.gmra.mxu2 %v1212_v47  ;;  %v2745_v47 = vld [vmem:[%s4741_s4 + $0x2b0] sm:$0xff]  ;;  %1820 = vmatpush.msra.mxu3 %v2770_v16 }
 0x17c   : > { %v821_v4 = vpop.f32.mrf.mxu1  ;;  %2016 = vmatpush.msra.mxu0 %v2784_v48  ;;  %1633 = vmatpush.msra.mxu2 %v2746_v61  ;;  %v2741_v48 = vld [vmem:[%s4741_s4 + $0x290] sm:$0xff] }
 0x17e   : > { %v928_v31 = vpop.f32.mrf.mxu2  ;;  %1634 = vmatpush.msra.mxu2 %v2745_v47  ;;  %2017 = vmatpush.msra.mxu0 %v2783_v27  ;;  %v4838_v47 = vmax.f32 %v3559_v5, 0.0  ;;  %v2779_v27 = vld [vmem:[%s4741_s4 + $0x3c0] sm:$0xff]  ;;  %v2778_v5 = vld [vmem:[%s4741_s4 + $0x3b8] sm:$0xff] }
 0x17f   : > { %v3768_v45 = vadd.f32 %v928_v31, %v815_v46  ;;  %1328 = vmatmul.f32.gmra.mxu0 %v1213_v22  ;;  %868 = vmatmul.f32.gmra.mxu3 %v4835_v62  ;;  %v2743_v46 = vld [vmem:[%s4741_s4 + $0x2a0] sm:$0xff] }
 0x180   : > { %1483 = vmatmul.f32.gmra.mxu1 %v3566_v17  ;;  %1635 = vmatpush.msra.mxu2 %v2744_v53  ;;  %v2739_v62 = vld [vmem:[%s4741_s4 + $0x280] sm:$0xff] }
 0x181   : > { %2018 = vmatpush.msra.mxu0 %v2782_v51  ;;  %v2776_v51 = vld [vmem:[%s4741_s4 + $0x3a8] sm:$0xff] }
 0x182   : > { %1636 = vmatpush.msra.mxu2 %v2743_v46 }
 0x183   : > { %978 = vmatmul.f32.gmra.mxu2 %v1213_v22  ;;  %2019 = vmatpush.msra.mxu0 %v2781_v55  ;;  %v3794_v22 = vpop.f32.mrf.mxu0  ;;  %v1215_v55 = vld [vmem:[#allocation2 + $0x158] sm:$0xff] }
 0x184   : > { %v824_v17 = vpop.f32.mrf.mxu1  ;;  %1637 = vmatpush.msra.mxu2 %v2742_v19  ;;  %4836 = vst [vmem:[#allocation35_spill] sm:$0xff] %v3794_v22  ;;  %v4840_v19 = vmax.f32 %v3578_v11, 0.0  ;;  %v2773_v11 = vld [vmem:[%s4741_s4 + $0x390] sm:$0xff] }
 0x185   : > { %2020 = vmatpush.msra.mxu0 %v2780_v54  ;;  %v2775_v54 = vld [vmem:[%s4741_s4 + $0x3a0] sm:$0xff] }
 0x186   : > { %v931_v61 = vpop.f32.mrf.mxu2  ;;  %1638 = vmatpush.msra.mxu2 %v2741_v48 }
 0x187   : > { %v3796_v31 = vadd.f32 %v931_v61, %v818_v18  ;;  %1331 = vmatmul.f32.gmra.mxu0 %v1214_v29  ;;  %871 = vmatmul.f32.gmra.mxu3 %v4838_v47  ;;  %v2740_v18 = vld [vmem:[%s4741_s4 + $0x288] sm:$0xff]  ;;  %v2802_v61 = vld [vmem:[%s4741_s4 + $0x478] sm:$0xff] }
 0x188   : > { %1486 = vmatmul.f32.gmra.mxu1 %v3585_v38  ;;  %2021 = vmatpush.msra.mxu0 %v2779_v27  ;;  %v2777_v38 = vld [vmem:[%s4741_s4 + $0x3b0] sm:$0xff]  ;;  %v1216_v47 = vld [vmem:[#allocation2 + $0x168] sm:$0xff] }
 0x189   : > { %4837 = vst [vmem:[#allocation36_spill] sm:$0xff] %v3796_v31  ;;  %1639 = vmatpush.msra.mxu2 %v2740_v18  ;;  %2208 = vmatpush.msra.mxu1 %v2802_v61 }
 0x18a   : > { %2022 = vmatpush.msra.mxu0 %v2778_v5  ;;  %v4843_v5 = vmax.f32 %v3596_v28, 0.0 }
 0x18b   : > { %981 = vmatmul.f32.gmra.mxu2 %v1214_v29  ;;  %v3833_v48 = vpop.f32.mrf.mxu0 }
 0x18c   : > { %v827_v53 = vpop.f32.mrf.mxu1  ;;  %1640 = vmatpush.msra.mxu2 %v2739_v62  ;;  %2023 = vmatpush.msra.mxu0 %v2777_v38  ;;  %4841 = vst [vmem:[#allocation38_spill] sm:$0xff] %v3833_v48  ;;  %v2771_v62 = vld [vmem:[%s4741_s4 + $0x380] sm:$0xff]  ;;  %v2769_v38 = vld [vmem:[%s4741_s4 + $0x370] sm:$0xff] }
 0x18d   : > { %1821 = vmatpush.msra.mxu3 %v2769_v38  ;;  %v1576_v38 = vld [vmem:[#allocation2 + $0x1a] sm:$0xff] }
 0x18e   : > { %v934_v46 = vpop.f32.mrf.mxu2  ;;  %2024 = vmatpush.msra.mxu0 %v2776_v51 }
 0x18f   : > { %v3822_v29 = vadd.f32 %v934_v46, %v821_v4  ;;  %1334 = vmatmul.f32.gmra.mxu0 %v1215_v55  ;;  %874 = vmatmul.f32.gmra.mxu3 %v4840_v19  ;;  %v2774_v4 = vld [vmem:[%s4741_s4 + $0x398] sm:$0xff] }
 0x190   : > { %1489 = vmatmul.f32.gmra.mxu1 %v3603_v36  ;;  %2025 = vmatpush.msra.mxu0 %v2775_v54  ;;  %v2772_v36 = vld [vmem:[%s4741_s4 + $0x388] sm:$0xff]  ;;  %v3861_v54 = vld [vmem:[#allocation2 + $0xd9] sm:$0xff] }
 0x191   : > { %4839 = vst [vmem:[#allocation37_spill] sm:$0xff] %v3822_v29 }
 0x192   : > { %2026 = vmatpush.msra.mxu0 %v2774_v4  ;;  %v1218_v4 = vld [vmem:[#allocation2 + $0x180] sm:$0xff] }
 0x193   : > { %984 = vmatmul.f32.gmra.mxu2 %v1215_v55  ;;  %v3855_v51 = vpop.f32.mrf.mxu0  ;;  %v1217_v55 = vld [vmem:[#allocation2 + $0x170] sm:$0xff] }
 0x194   : > { %v830_v27 = vpop.f32.mrf.mxu1  ;;  %2027 = vmatpush.msra.mxu0 %v2773_v11  ;;  %4844 = vst [vmem:[#allocation40_spill] sm:$0xff] %v3855_v51  ;;  %v995_v11 = vld [vmem:[#allocation2 + $0xa] sm:$0xff] }
 0x195   : > { %v3979_v51 = vld [vmem:[#allocation2 + $0x6a] sm:$0xff] }
 0x196   : > { %v937_v16 = vpop.f32.mrf.mxu2  ;;  %2028 = vmatpush.msra.mxu0 %v2772_v36 }
 0x197   : > { %v3844_v18 = vadd.f32 %v937_v16, %v824_v17  ;;  %1337 = vmatmul.f32.gmra.mxu0 %v1216_v47  ;;  %877 = vmatmul.f32.gmra.mxu3 %v4843_v5  ;;  %v994_v17 = vld [vmem:[#allocation2 + $0x2] sm:$0xff] }
 0x198   : > { %1492 = vmatmul.f32.gmra.mxu1 %v3615_v21  ;;  %2029 = vmatpush.msra.mxu0 %v2771_v62  ;;  %v2801_v21 = vld [vmem:[%s4741_s4 + $0x470] sm:$0xff]  ;;  %v3873_v5 = vld [vmem:[#allocation2 + $0xe1] sm:$0xff] }
 0x199   : > { %4842 = vst [vmem:[#allocation39_spill] sm:$0xff] %v3844_v18  ;;  %2209 = vmatpush.msra.mxu1 %v2801_v21  ;;  %v2768_v62 = vld [vmem:[%s4741_s4 + $0x368] sm:$0xff] }
 0x19a   : > { %1822 = vmatpush.msra.mxu3 %v2768_v62  ;;  %v1577_v62 = vld [vmem:[#allocation2 + $0x22] sm:$0xff] }
 0x19b   : > { %987 = vmatmul.f32.gmra.mxu2 %v1216_v47  ;;  %v3867_v47 = vpop.f32.mrf.mxu0 }
 0x19c   : > { %4846 = vst [vmem:[#allocation42_spill] sm:$0xff] %v3867_v47 }
 0x19d   : > { %v3857_v46 = vpop.f32.mrf.mxu1 }
 0x19e   : > { %v940_v28 = vpop.f32.mrf.mxu2 }
 0x19f   : > { %v3859_v19 = vadd.f32 %v940_v28, %v827_v53  ;;  %1340 = vmatmul.f32.gmra.mxu0 %v1217_v55  ;;  %1059 = vmatmul.f32.vlgmr.msrb.gmra.mxu3 %v994_v17  ;;  %v1219_v28 = vld [vmem:[#allocation2 + $0x188] sm:$0xff] }
 0x1a0   : > { %1495 = vmatmul.f32.gmra.mxu1 %v3861_v54 }
 0x1a1   : > { %4845 = vst [vmem:[#allocation41_spill] sm:$0xff] %v3859_v19  ;;  %v2762_v19 = vld [vmem:[%s4741_s4 + $0x338] sm:$0xff] }
 0x1a2   : > { %v833_v61 = vpop.f32.mrf.mxu3 }
 0x1a3   : > { %990 = vmatmul.f32.gmra.mxu2 %v1217_v55 }
 0x1a5   : > { %v3869_v36 = vpop.f32.mrf.mxu1 }
 0x1a6   : > { %v943_v53 = vpop.f32.mrf.mxu2 }
 0x1a7   : > { %v3871_v16 = vadd.f32 %v943_v53, %v830_v27  ;;  %1343 = vmatmul.f32.gmra.mxu0 %v1218_v4  ;;  %1062 = vmatmul.f32.gmra.mxu3 %v995_v11  ;;  %v3881_v27 = vpop.f32.mrf.mxu0  ;;  %v3885_v11 = vld [vmem:[#allocation2 + $0xf1] sm:$0xff]  ;;  %v2800_v53 = vld [vmem:[%s4741_s4 + $0x468] sm:$0xff] }
 0x1a8   : > { %1498 = vmatmul.f32.gmra.mxu1 %v3873_v5  ;;  %4848 = vst [vmem:[#allocation44_spill] sm:$0xff] %v3881_v27  ;;  %v3971_v27 = vld [vmem:[#allocation2 + $0x139] sm:$0xff] }
 0x1a9   : > { %4847 = vst [vmem:[#allocation43_spill] sm:$0xff] %v3871_v16  ;;  %2210 = vmatpush.msra.mxu1 %v2800_v53  ;;  %v3903_v53 = vld [vmem:[#allocation2 + $0x32] sm:$0xff] }
 0x1aa   : > { %v836_v17 = vpop.f32.mrf.mxu3 }
 0x1ab   : > { %1641 = vmatmul.f32.vlgmr.msra.gmra.mxu2 %v1576_v38 }
 0x1ad   : > { %v3879_v55 = vpop.f32.mrf.mxu1 }
 0x1ae   : > { %v946_v21 = vpop.f32.mrf.mxu2 }
 0x1af   : > { %v3883_v4 = vadd.f32 %v946_v21, %v833_v61  ;;  %1346 = vmatmul.f32.gmra.mxu0 %v1219_v28  ;;  %1065 = vmatmul.f32.gmra.mxu3 %v1576_v38  ;;  %v3895_v38 = vld [vmem:[#allocation2 + $0xf9] sm:$0xff]  ;;  %v3901_v21 = vpop.f32.mrf.mxu0 }
 0x1b0   : > { %1501 = vmatmul.f32.gmra.mxu1 %v3885_v11  ;;  %v2767_v28 = vld [vmem:[%s4741_s4 + $0x360] sm:$0xff]  ;;  %4851 = vst [vmem:[#allocation47_spill] sm:$0xff] %v3901_v21 }
 0x1b1   : > { %4849 = vst [vmem:[#allocation45_spill] sm:$0xff] %v3883_v4  ;;  %1823 = vmatpush.msra.mxu3 %v2767_v28  ;;  %v2799_v28 = vld [vmem:[%s4741_s4 + $0x460] sm:$0xff]  ;;  %v4054_v4 = vld [vmem:[#allocation2 + $0x169] sm:$0xff] }
 0x1b2   : > { %v839_v34 = vpop.f32.mrf.mxu3  ;;  %2211 = vmatpush.msra.mxu1 %v2799_v28  ;;  %v2766_v28 = vld [vmem:[%s4741_s4 + $0x358] sm:$0xff]  ;;  %4872 = vst [vmem:[#allocation68_spill] sm:$0xff] %v4054_v4 }
 0x1b3   : > { %1644 = vmatmul.f32.gmra.mxu2 %v1577_v62  ;;  %1824 = vmatpush.msra.mxu3 %v2766_v28  ;;  %v2798_v28 = vld [vmem:[%s4741_s4 + $0x458] sm:$0xff] }
 0x1b4   : > { %2212 = vmatpush.msra.mxu1 %v2798_v28  ;;  %v2765_v28 = vld [vmem:[%s4741_s4 + $0x350] sm:$0xff] }
 0x1b5   : > { %v3891_v50 = vpop.f32.mrf.mxu1  ;;  %1825 = vmatpush.msra.mxu3 %v2765_v28  ;;  %v2797_v28 = vld [vmem:[%s4741_s4 + $0x450] sm:$0xff] }
 0x1b6   : > { %v949_v13 = vpop.f32.mrf.mxu2  ;;  %2213 = vmatpush.msra.mxu1 %v2797_v28  ;;  %v2764_v28 = vld [vmem:[%s4741_s4 + $0x348] sm:$0xff] }
 0x1b7   : > { %v3893_v61 = vadd.f32 %v949_v13, %v836_v17  ;;  %2030 = vmatmul.f32.vlgmr.msra.gmra.mxu0 %v1965_v59  ;;  %1068 = vmatmul.f32.gmra.mxu3 %v1577_v62  ;;  %v1966_v17 = vld [vmem:[#allocation2 + $0x39] sm:$0xff]  ;;  %v3919_v52 = vpop.f32.mrf.mxu0 }
 0x1b8   : > { %1504 = vmatmul.f32.gmra.mxu1 %v3895_v38  ;;  %4853 = vst [vmem:[#allocation49_spill] sm:$0xff] %v3919_v52  ;;  %v3963_v52 = vld [vmem:[#allocation2 + $0x62] sm:$0xff]  ;;  %1826 = vmatpush.msra.mxu3 %v2764_v28  ;;  %v4007_v28 = vld [vmem:[#allocation2 + $0x151] sm:$0xff] }
 0x1b9   : > { %4850 = vst [vmem:[#allocation46_spill] sm:$0xff] %v3893_v61  ;;  %v2789_v61 = vld [vmem:[%s4741_s4 + $0x410] sm:$0xff] }
 0x1ba   : > { %v842_v24 = vpop.f32.mrf.mxu3 }
 0x1bb   : > { %1647 = vmatmul.f32.gmra.mxu2 %v3903_v53 }
 0x1bd   : > { %v3906_v59 = vpop.f32.mrf.mxu1 }
 0x1be   : > { %v952_v13 = vpop.f32.mrf.mxu2 }
 0x1bf   : > { %v3908_v62 = vadd.f32 %v952_v13, %v839_v34  ;;  %2033 = vmatmul.f32.gmra.mxu0 %v1966_v17  ;;  %1071 = vmatmul.f32.gmra.mxu3 %v3903_v53  ;;  %v1967_v13 = vld [vmem:[#allocation2 + $0x49] sm:$0xff] }
 0x1c0   : > { %1507 = vmatmul.f32.gmra.mxu1 %v3911_v7 }
 0x1c1   : > { %4852 = vst [vmem:[#allocation48_spill] sm:$0xff] %v3908_v62  ;;  %v4029_v62 = vld [vmem:[#allocation2 + $0x159] sm:$0xff] }
 0x1c2   : > { %v845_v37 = vpop.f32.mrf.mxu3  ;;  %4868 = vst [vmem:[#allocation64_spill] sm:$0xff] %v4029_v62 }
 0x1c3   : > { %1650 = vmatmul.f32.gmra.mxu2 %v3917_v43 }
 0x1c5   : > { %v3930_v6 = vpop.f32.mrf.mxu1 }
 0x1c6   : > { %v955_v34 = vpop.f32.mrf.mxu2 }
 0x1c7   : > { %v3922_v17 = vadd.f32 %v955_v34, %v842_v24  ;;  %2036 = vmatmul.f32.gmra.mxu0 %v1967_v13  ;;  %1074 = vmatmul.f32.gmra.mxu3 %v3917_v43  ;;  %v3936_v24 = vpop.f32.mrf.mxu0  ;;  %v1968_v13 = vld [vmem:[#allocation2 + $0x51] sm:$0xff] }
 0x1c8   : > { %1510 = vmatmul.f32.gmra.mxu1 %v3925_v35  ;;  %4855 = vst [vmem:[#allocation51_spill] sm:$0xff] %v3936_v24  ;;  %v3957_v24 = vld [vmem:[#allocation2 + $0x129] sm:$0xff] }
 0x1c9   : > { %4854 = vst [vmem:[#allocation50_spill] sm:$0xff] %v3922_v17 }
 0x1ca   : > { %v848_v1 = vpop.f32.mrf.mxu3 }
 0x1cb   : > { %1653 = vmatmul.f32.gmra.mxu2 %v3933_v9 }
 0x1cd   : > { %v3949_v33 = vpop.f32.mrf.mxu1 }
 0x1ce   : > { %v958_v34 = vpop.f32.mrf.mxu2 }
 0x1cf   : > { %v3938_v20 = vadd.f32 %v958_v34, %v845_v37  ;;  %2039 = vmatmul.f32.gmra.mxu0 %v1968_v13  ;;  %1077 = vmatmul.f32.gmra.mxu3 %v3933_v9  ;;  %v1969_v34 = vld [vmem:[#allocation2 + $0x61] sm:$0xff]  ;;  %v3952_v13 = vpop.f32.mrf.mxu0 }
 0x1d0   : > { %1513 = vmatmul.f32.gmra.mxu1 %v3941_v41  ;;  %4857 = vst [vmem:[#allocation53_spill] sm:$0xff] %v3952_v13 }
 0x1d1   : > { %4856 = vst [vmem:[#allocation52_spill] sm:$0xff] %v3938_v20  ;;  %v4015_v20 = vld [vmem:[#allocation2 + $0x82] sm:$0xff] }
 0x1d2   : > { %v851_v49 = vpop.f32.mrf.mxu3 }
 0x1d3   : > { %1656 = vmatmul.f32.gmra.mxu2 %v3947_v57 }
 0x1d5   : > { %v3966_v13 = vpop.f32.mrf.mxu1 }
 0x1d6   : > { %v961_v37 = vpop.f32.mrf.mxu2 }
 0x1d7   : > { %v3954_v23 = vadd.f32 %v961_v37, %v848_v1  ;;  %2042 = vmatmul.f32.gmra.mxu0 %v1969_v34  ;;  %1080 = vmatmul.f32.gmra.mxu3 %v3947_v57  ;;  %v1970_v37 = vld [vmem:[#allocation2 + $0x69] sm:$0xff]  ;;  %v3977_v47 = vpop.f32.mrf.mxu0 }
 0x1d8   : > { %1516 = vmatmul.f32.gmra.mxu1 %v3957_v24  ;;  %4860 = vst [vmem:[#allocation56_spill] sm:$0xff] %v3977_v47  ;;  %v3993_v47 = vld [vmem:[#allocation2 + $0x7a] sm:$0xff] }
 0x1d9   : > { %4858 = vst [vmem:[#allocation54_spill] sm:$0xff] %v3954_v23 }
 0x1da   : > { %v854_v21 = vpop.f32.mrf.mxu3 }
 0x1db   : > { %1659 = vmatmul.f32.gmra.mxu2 %v3963_v52 }
 0x1de   : > { %v964_v1 = vpop.f32.mrf.mxu2 }
 0x1df   : > { %v3968_v34 = vadd.f32 %v964_v1, %v851_v49  ;;  %2045 = vmatmul.f32.gmra.mxu0 %v1970_v37  ;;  %1083 = vmatmul.f32.gmra.mxu3 %v3963_v52  ;;  %v3982_v49 = vpop.f32.mrf.mxu1  ;;  %v1971_v37 = vld [vmem:[#allocation2 + $0x79] sm:$0xff] }
 0x1e0   : > { %1519 = vmatmul.f32.gmra.mxu1 %v3971_v27  ;;  %4861 = vst [vmem:[#allocation57_spill] sm:$0xff] %v3982_v49  ;;  %v3995_v49 = vpop.f32.mrf.mxu0 }
 0x1e1   : > { %4859 = vst [vmem:[#allocation55_spill] sm:$0xff] %v3968_v34 }
 0x1e2   : > { %v857_v48 = vpop.f32.mrf.mxu3  ;;  %4863 = vst [vmem:[#allocation59_spill] sm:$0xff] %v3995_v49 }
 0x1e3   : > { %1662 = vmatmul.f32.gmra.mxu2 %v3979_v51 }
 0x1e6   : > { %v967_v1 = vpop.f32.mrf.mxu2 }
 0x1e7   : > { %v3984_v22 = vadd.f32 %v967_v1, %v854_v21  ;;  %2048 = vmatmul.f32.gmra.mxu0 %v1971_v37  ;;  %1086 = vmatmul.f32.gmra.mxu3 %v3979_v51  ;;  %v2796_v21 = vld [vmem:[%s4741_s4 + $0x448] sm:$0xff]  ;;  %v4009_v49 = vpop.f32.mrf.mxu1 }
 0x1e8   : > { %1522 = vmatmul.f32.gmra.mxu1 %v3987_v15  ;;  %v1972_v37 = vld [vmem:[#allocation2 + $0x81] sm:$0xff]  ;;  %4865 = vst [vmem:[#allocation61_spill] sm:$0xff] %v4009_v49  ;;  %v1973_v49 = vld [vmem:[#allocation2 + $0x91] sm:$0xff] }
 0x1e9   : > { %4862 = vst [vmem:[#allocation58_spill] sm:$0xff] %v3984_v22  ;;  %2214 = vmatpush.msra.mxu1 %v2796_v21  ;;  %v2795_v22 = vld [vmem:[%s4741_s4 + $0x440] sm:$0xff]  ;;  %v2794_v21 = vld [vmem:[%s4741_s4 + $0x438] sm:$0xff] }
 0x1ea   : > { %v860_v34 = vpop.f32.mrf.mxu3 }
 0x1eb   : > { %1665 = vmatmul.f32.gmra.mxu2 %v3993_v47  ;;  %2215 = vmatpush.msra.mxu1 %v2795_v22 }
 0x1ed   : > { %2216 = vmatpush.msra.mxu1 %v2794_v21  ;;  %v2763_v21 = vld [vmem:[%s4741_s4 + $0x340] sm:$0xff] }
 0x1ee   : > { %v970_v1 = vpop.f32.mrf.mxu2  ;;  %1827 = vmatpush.msra.mxu3 %v2763_v21  ;;  %v1974_v21 = vld [vmem:[#allocation2 + $0x99] sm:$0xff] }
 0x1ef   : > { %v4004_v23 = vadd.f32 %v970_v1, %v857_v48  ;;  %2051 = vmatmul.f32.gmra.mxu0 %v1972_v37  ;;  %1089 = vmatmul.f32.gmra.mxu3 %v3993_v47  ;;  %v2793_v48 = vld [vmem:[%s4741_s4 + $0x430] sm:$0xff]  ;;  %v4021_v1 = vpop.f32.mrf.mxu0 }
 0x1f0   : > { %1525 = vmatmul.f32.gmra.mxu1 %v4007_v28  ;;  %4866 = vst [vmem:[#allocation62_spill] sm:$0xff] %v4021_v1  ;;  %v4038_v1 = vpop.f32.mrf.mxu1  ;;  %1828 = vmatpush.msra.mxu3 %v2762_v19  ;;  %v4090_v19 = vld [vmem:[#allocation2 + $0xb2] sm:$0xff] }
 0x1f1   : > { %4864 = vst [vmem:[#allocation60_spill] sm:$0xff] %v4004_v23  ;;  %2217 = vmatpush.msra.mxu1 %v2793_v48  ;;  %v2792_v23 = vld [vmem:[%s4741_s4 + $0x428] sm:$0xff]  ;;  %v2791_v48 = vld [vmem:[%s4741_s4 + $0x420] sm:$0xff] }
 0x1f2   : > { %v863_v17 = vpop.f32.mrf.mxu3  ;;  %4869 = vst [vmem:[#allocation65_spill] sm:$0xff] %v4038_v1 }
 0x1f3   : > { %1668 = vmatmul.f32.gmra.mxu2 %v4015_v20  ;;  %2218 = vmatpush.msra.mxu1 %v2792_v23 }
 0x1f5   : > { %2219 = vmatpush.msra.mxu1 %v2791_v48  ;;  %v2788_v48 = vld [vmem:[%s4741_s4 + $0x408] sm:$0xff] }
 0x1f6   : > { %v973_v37 = vpop.f32.mrf.mxu2 }
 0x1f7   : > { %v4026_v22 = vadd.f32 %v973_v37, %v860_v34  ;;  %2054 = vmatmul.f32.gmra.mxu0 %v1973_v49  ;;  %1092 = vmatmul.f32.gmra.mxu3 %v4015_v20  ;;  %v4040_v34 = vld [vmem:[#allocation2 + $0x92] sm:$0xff]  ;;  %v4049_v23 = vpop.f32.mrf.mxu0 }
 0x1f8   : > { %1528 = vmatmul.f32.gmra.mxu1 %v4029_v62  ;;  %v2790_v37 = vld [vmem:[%s4741_s4 + $0x418] sm:$0xff]  ;;  %4870 = vst [vmem:[#allocation66_spill] sm:$0xff] %v4049_v23  ;;  %v1975_v23 = vld [vmem:[#allocation2 + $0xa9] sm:$0xff] }
 0x1f9   : > { %4867 = vst [vmem:[#allocation63_spill] sm:$0xff] %v4026_v22  ;;  %2220 = vmatpush.msra.mxu1 %v2790_v37  ;;  %v4060_v37 = vld [vmem:[#allocation2 + $0x9a] sm:$0xff] }
 0x1fa   : > { %v866_v49 = vpop.f32.mrf.mxu3 }
 0x1fb   : > { %1671 = vmatmul.f32.gmra.mxu2 %v4040_v34  ;;  %2221 = vmatpush.msra.mxu1 %v2789_v61  ;;  %v4071_v61 = vld [vmem:[#allocation2 + $0x171] sm:$0xff] }
 0x1fc   : > { %4875 = vst [vmem:[#allocation71_spill] sm:$0xff] %v4071_v61 }
 0x1fd   : > { %2222 = vmatpush.msra.mxu1 %v2788_v48 }
 0x1fe   : > { %v976_v22 = vpop.f32.mrf.mxu2 }
 0x1ff   : > { %v4051_v1 = vadd.f32 %v976_v22, %v863_v17  ;;  %2057 = vmatmul.f32.gmra.mxu0 %v1974_v21  ;;  %1095 = vmatmul.f32.gmra.mxu3 %v4040_v34  ;;  %v2787_v17 = vld [vmem:[%s4741_s4 + $0x400] sm:$0xff]  ;;  %v4066_v22 = vpop.f32.mrf.mxu1  ;;  %v4077_v48 = vpop.f32.mrf.mxu0 }
 0x200   : > { %1531 = vmatmul.f32.gmra.mxu1 %v4054_v4  ;;  %4873 = vst [vmem:[#allocation69_spill] sm:$0xff] %v4066_v22  ;;  %v4079_v22 = vld [vmem:[#allocation2 + $0xaa] sm:$0xff] }
 0x201   : > { %4871 = vst [vmem:[#allocation67_spill] sm:$0xff] %v4051_v1  ;;  %2223 = vmatpush.msra.mxu1 %v2787_v17  ;;  %v4095_v4 = vld [vmem:[#allocation2 + $0x189] sm:$0xff] }
 0x202   : > { %v869_v16 = vpop.f32.mrf.mxu3  ;;  %4876 = vst [vmem:[#allocation72_spill] sm:$0xff] %v4077_v48 }
 0x203   : > { %1674 = vmatmul.f32.gmra.mxu2 %v4060_v37  ;;  %4881 = vst [vmem:[#allocation77_spill] sm:$0xff] %v4095_v4 }
 0x206   : > { %v979_v21 = vpop.f32.mrf.mxu2 }
 0x207   : > { %v4068_v1 = vadd.f32 %v979_v21, %v866_v49  ;;  %2060 = vmatmul.f32.gmra.mxu0 %v1975_v23  ;;  %1098 = vmatmul.f32.gmra.mxu3 %v4060_v37  ;;  %v4082_v49 = vld [vmem:[#allocation2 + $0x181] sm:$0xff]  ;;  %v4084_v23 = vpop.f32.mrf.mxu1 }
 0x208   : > { %1534 = vmatmul.f32.gmra.mxu1 %v4071_v61  ;;  %4877 = vst [vmem:[#allocation73_spill] sm:$0xff] %v4082_v49  ;;  %v4092_v61 = vpop.f32.mrf.mxu0 }
 0x209   : > { %4874 = vst [vmem:[#allocation70_spill] sm:$0xff] %v4068_v1  ;;  %v1976_v1 = vld [vmem:[#allocation2 + $0xb1] sm:$0xff] }
 0x20a   : > { %v872_v17 = vpop.f32.mrf.mxu3  ;;  %4878 = vst [vmem:[#allocation74_spill] sm:$0xff] %v4084_v23  ;;  %v1977_v23 = vld [vmem:[#allocation2 + $0xc1] sm:$0xff] }
 0x20b   : > { %1677 = vmatmul.f32.gmra.mxu2 %v4079_v22  ;;  %4880 = vst [vmem:[#allocation76_spill] sm:$0xff] %v4092_v61 }
 0x20e   : > { %v982_v21 = vpop.f32.mrf.mxu2 }
 0x20f   : > { %v4086_v18 = vadd.f32 %v982_v21, %v869_v16  ;;  %2063 = vmatmul.f32.gmra.mxu0 %v1976_v1  ;;  %1101 = vmatmul.f32.gmra.mxu3 %v4079_v22  ;;  %v2761_v16 = vld [vmem:[%s4741_s4 + $0x330] sm:$0xff]  ;;  %v4103_v1 = vpop.f32.mrf.mxu1  ;;  %v4106_v21 = vld [vmem:[#allocation2 + $0xc2] sm:$0xff] }
 0x210   : > { %1537 = vmatmul.f32.gmra.mxu1 %v4082_v49  ;;  %4883 = vst [vmem:[#allocation79_spill] sm:$0xff] %v4103_v1  ;;  %1829 = vmatpush.msra.mxu3 %v2761_v16  ;;  %v899_v1 = vadd.f32 %v3625_v60, %v3593_v44  ;;  %v2760_v44 = vld [vmem:[%s4741_s4 + $0x328] sm:$0xff] }
 0x211   : > { %4879 = vst [vmem:[#allocation75_spill] sm:$0xff] %v4086_v18  ;;  %v4109_v18 = vpop.f32.mrf.mxu0 }
 0x212   : > { %v875_v48 = vpop.f32.mrf.mxu3  ;;  %4884 = vst [vmem:[#allocation80_spill] sm:$0xff] %v4109_v18  ;;  %1830 = vmatpush.msra.mxu3 %v2760_v44 }
 0x213   : > { %1680 = vmatmul.f32.gmra.mxu2 %v4090_v19 }
 0x216   : > { %v985_v29 = vpop.f32.mrf.mxu2 }
 0x217   : > { %v4097_v62 = vadd.f32 %v985_v29, %v872_v17  ;;  %2066 = vmatmul.f32.gmra.mxu0 %v1977_v23  ;;  %1104 = vmatmul.f32.gmra.mxu3 %v4090_v19  ;;  %v1978_v17 = vld [vmem:[#allocation2 + $0xc9] sm:$0xff]  ;;  %v4117_v16 = vpop.f32.mrf.mxu1 }
 0x218   : > { %1540 = vmatmul.f32.gmra.mxu1 %v4095_v4 }
 0x219   : > { %4882 = vst [vmem:[#allocation78_spill] sm:$0xff] %v4097_v62  ;;  %v4119_v62 = vld [vmem:[#allocation2 + $0xca] sm:$0xff]  ;;  %v4122_v31 = vpop.f32.mrf.mxu0 }
 0x21a   : > { %v878_v61 = vpop.f32.mrf.mxu3  ;;  %4885 = vst [vmem:[#allocation81_spill] sm:$0xff] %v4122_v31 }
 0x21b   : > { %1683 = vmatmul.f32.gmra.mxu2 %v4106_v21 }
 0x21e   : > { %v988_v29 = vpop.f32.mrf.mxu2 }
 0x21f   : > { %v4111_v23 = vadd.f32 %v988_v29, %v875_v48  ;;  %2069 = vmatmul.f32.gmra.mxu0 %v1978_v17  ;;  %1107 = vmatmul.f32.gmra.mxu3 %v4106_v21 }
 0x220   : > { %2224 = vmatmul.f32.vlgmr.msra.gmra.mxu1 %v3903_v53  ;;  %v4133_v53 = vld [vmem:[#allocation2 + $0xda] sm:$0xff] }
 0x222   : > { %v1060_v4 = vpop.f32.mrf.mxu3 }
 0x223   : > { %1686 = vmatmul.f32.gmra.mxu2 %v4119_v62  ;;  %v1156_v18 = vadd.f32 %v1060_v4, %v899_v1 }
 0x225   : > { %v1350_v60 = vadd.f32 %v3633_v42, %v1156_v18  ;;  %v4148_v18 = vld [vmem:[#allocation2 + $0xe2] sm:$0xff] }
 0x226   : > { %v991_v49 = vpop.f32.mrf.mxu2 }
 0x227   : > { %v4124_v48 = vadd.f32 %v991_v49, %v878_v61  ;;  %2072 = vmatmul.f32.gmra.mxu0 %v3861_v54  ;;  %1110 = vmatmul.f32.gmra.mxu3 %v4119_v62  ;;  %v4137_v49 = vpop.f32.mrf.mxu1  ;;  %v1544_v54 = vadd.f32 %v3857_v46, %v1350_v60 }
 0x228   : > { %2227 = vmatmul.f32.gmra.mxu1 %v3917_v43  ;;  %v4145_v43 = vpop.f32.mrf.mxu0 }
 0x229   : > { %4886 = vst [vmem:[#allocation82_spill] sm:$0xff] %v4145_v43 }
 0x22a   : > { %v1063_v4 = vpop.f32.mrf.mxu3 }
 0x22b   : > { %1689 = vmatmul.f32.gmra.mxu2 %v4133_v53  ;;  %v1157_v61 = vadd.f32 %v1063_v4, %v3635_v0 }
 0x22d   : > { %v1351_v42 = vadd.f32 %v3643_v56, %v1157_v61 }
 0x22e   : > { %v1642_v1 = vpop.f32.mrf.mxu2 }
 0x22f   : > { %v4140_v29 = vadd.f32 %v1642_v1, %v1544_v54  ;;  %2075 = vmatmul.f32.gmra.mxu0 %v3873_v5  ;;  %1113 = vmatmul.f32.gmra.mxu3 %v4133_v53  ;;  %v1545_v17 = vadd.f32 %v3869_v36, %v1351_v42  ;;  %v4153_v44 = vpop.f32.mrf.mxu1  ;;  %v4179_v42 = vld [vmem:[#allocation2 + $0xfa] sm:$0xff] }
 0x230   : > { %2230 = vmatmul.f32.gmra.mxu1 %v3933_v9  ;;  %v2759_v9 = vld [vmem:[%s4741_s4 + $0x320] sm:$0xff]  ;;  %v4166_v4 = vpop.f32.mrf.mxu0 }
 0x231   : > { %1831 = vmatpush.msra.mxu3 %v2759_v9  ;;  %4887 = vst [vmem:[#allocation83_spill] sm:$0xff] %v4166_v4  ;;  %v4908_v4 = vld [vmem:[#allocation48_spill] sm:$0xff] }
 0x232   : > { %v1066_v0 = vpop.f32.mrf.mxu3 }
 0x233   : > { %1692 = vmatmul.f32.gmra.mxu2 %v4148_v18  ;;  %v1158_v46 = vadd.f32 %v1066_v0, %v3645_v2  ;;  %v4164_v2 = vld [vmem:[#allocation2 + $0xf2] sm:$0xff] }
 0x235   : > { %v1352_v56 = vadd.f32 %v3653_v14, %v1158_v46 }
 0x236   : > { %v1645_v5 = vpop.f32.mrf.mxu2 }
 0x237   : > { %v4155_v60 = vadd.f32 %v1645_v5, %v1545_v17  ;;  %2078 = vmatmul.f32.gmra.mxu0 %v3885_v11  ;;  %1116 = vmatmul.f32.gmra.mxu3 %v4148_v18  ;;  %v1546_v61 = vadd.f32 %v3879_v55, %v1352_v56  ;;  %v4197_v5 = vld [vmem:[#allocation2 + $0x10a] sm:$0xff] }
 0x238   : > { %2233 = vmatmul.f32.gmra.mxu1 %v3947_v57  ;;  %v4175_v57 = vpop.f32.mrf.mxu1  ;;  %v4183_v55 = vpop.f32.mrf.mxu0 }
 0x239   : > { %4888 = vst [vmem:[#allocation84_spill] sm:$0xff] %v4183_v55 }
 0x23a   : > { %v1069_v36 = vpop.f32.mrf.mxu3 }
 0x23b   : > { %1695 = vmatmul.f32.gmra.mxu2 %v4164_v2  ;;  %v1159_v11 = vadd.f32 %v1069_v36, %v3655_v10 }
 0x23d   : > { %v1353_v14 = vadd.f32 %v3663_v39, %v1159_v11 }
 0x23e   : > { %v1648_v54 = vpop.f32.mrf.mxu2 }
 0x23f   : > { %v4171_v1 = vadd.f32 %v1648_v54, %v1546_v61  ;;  %2081 = vmatmul.f32.gmra.mxu0 %v3895_v38  ;;  %1119 = vmatmul.f32.gmra.mxu3 %v4164_v2  ;;  %v1547_v46 = vadd.f32 %v3891_v50, %v1353_v14 }
 0x240   : > { %2236 = vmatmul.f32.gmra.mxu1 %v3963_v52  ;;  %v2758_v52 = vld [vmem:[%s4741_s4 + $0x318] sm:$0xff]  ;;  %v4202_v36 = vpop.f32.mrf.mxu0 }
 0x241   : > { %1832 = vmatpush.msra.mxu3 %v2758_v52  ;;  %4889 = vst [vmem:[#allocation85_spill] sm:$0xff] %v4202_v36  ;;  %v4906_v36 = vld [vmem:[#allocation46_spill] sm:$0xff] }
 0x242   : > { %v1072_v0 = vpop.f32.mrf.mxu3 }
 0x243   : > { %1698 = vmatmul.f32.gmra.mxu2 %v4179_v42  ;;  %v1160_v10 = vadd.f32 %v1072_v0, %v3665_v25  ;;  %v4195_v25 = vpop.f32.mrf.mxu1 }
 0x245   : > { %v1354_v39 = vadd.f32 %v3673_v12, %v1160_v10 }
 0x246   : > { %v1651_v38 = vpop.f32.mrf.mxu2 }
 0x247   : > { %v4186_v17 = vadd.f32 %v1651_v38, %v1547_v46  ;;  %2084 = vmatmul.f32.gmra.mxu0 %v3911_v7  ;;  %1122 = vmatmul.f32.gmra.mxu3 %v4179_v42  ;;  %v1548_v9 = vadd.f32 %v3906_v59, %v1354_v39 }
 0x248   : > { %2239 = vmatmul.f32.gmra.mxu1 %v3979_v51  ;;  %v4210_v51 = vld [vmem:[#allocation2 + $0x112] sm:$0xff] }
 0x24a   : > { %v1075_v50 = vpop.f32.mrf.mxu3 }
 0x24b   : > { %1701 = vmatmul.f32.gmra.mxu2 %v4197_v5  ;;  %v1161_v7 = vadd.f32 %v1075_v50, %v3675_v32  ;;  %v4214_v59 = vpop.f32.mrf.mxu1 }
 0x24d   : > { %v1355_v12 = vadd.f32 %v3683_v3, %v1161_v7  ;;  %v4225_v3 = vpop.f32.mrf.mxu0 }
 0x24e   : > { %v1654_v56 = vpop.f32.mrf.mxu2  ;;  %4890 = vst [vmem:[#allocation86_spill] sm:$0xff] %v4225_v3 }
 0x24f   : > { %v4204_v11 = vadd.f32 %v1654_v56, %v1548_v9  ;;  %2087 = vmatmul.f32.gmra.mxu0 %v3925_v35  ;;  %1125 = vmatmul.f32.gmra.mxu3 %v4197_v5  ;;  %v1549_v54 = vadd.f32 %v3930_v6, %v1355_v12  ;;  %v2757_v35 = vld [vmem:[%s4741_s4 + $0x310] sm:$0xff] }
 0x250   : > { %2242 = vmatmul.f32.gmra.mxu1 %v3993_v47  ;;  %1833 = vmatpush.msra.mxu3 %v2757_v35  ;;  %v4228_v47 = vld [vmem:[#allocation2 + $0x122] sm:$0xff] }
 0x252   : > { %v1078_v61 = vpop.f32.mrf.mxu3 }
 0x253   : > { %1704 = vmatmul.f32.gmra.mxu2 %v4210_v51  ;;  %v1162_v32 = vadd.f32 %v1078_v61, %v3685_v8  ;;  %v4233_v46 = vpop.f32.mrf.mxu1 }
 0x255   : > { %v1356_v8 = vadd.f32 %v3701_v63, %v1162_v32  ;;  %v4241_v63 = vld [vmem:[#allocation2 + $0x12a] sm:$0xff]  ;;  %v4243_v50 = vpop.f32.mrf.mxu0 }
 0x256   : > { %v1657_v14 = vpop.f32.mrf.mxu2  ;;  %4891 = vst [vmem:[#allocation87_spill] sm:$0xff] %v4243_v50 }
 0x257   : > { %v4217_v0 = vadd.f32 %v1657_v14, %v1549_v54  ;;  %2090 = vmatmul.f32.gmra.mxu0 %v3941_v41  ;;  %1128 = vmatmul.f32.gmra.mxu3 %v4210_v51  ;;  %v1550_v10 = vadd.f32 %v3949_v33, %v1356_v8 }
 0x258   : > { %2245 = vmatmul.f32.gmra.mxu1 %v4015_v20 }
 0x25a   : > { %v1081_v6 = vpop.f32.mrf.mxu3 }
 0x25b   : > { %1707 = vmatmul.f32.gmra.mxu2 %v4228_v47  ;;  %v1163_v41 = vadd.f32 %v1081_v6, %v3693_v26  ;;  %v4894_v6 = vld [vmem:[#allocation37_spill] sm:$0xff] }
 0x25d   : > { %v1357_v20 = vadd.f32 %v3723_v58, %v1163_v41  ;;  %v2756_v58 = vld [vmem:[%s4741_s4 + $0x308] sm:$0xff] }
 0x25e   : > { %v1660_v38 = vpop.f32.mrf.mxu2  ;;  %1834 = vmatpush.msra.mxu3 %v2756_v58  ;;  %v4897_v58 = vld [vmem:[#allocation71_spill] sm:$0xff] }
 0x25f   : > { %v4235_v52 = vadd.f32 %v1660_v38, %v1550_v10  ;;  %2093 = vmatmul.f32.gmra.mxu0 %v3957_v24  ;;  %1131 = vmatmul.f32.gmra.mxu3 %v4228_v47  ;;  %v1551_v26 = vadd.f32 %v3966_v13, %v1357_v20  ;;  %v4895_v38 = vld [vmem:[#allocation68_spill] sm:$0xff]  ;;  %v4311_v20 = vld [vmem:[#allocation2 + $0x16a] sm:$0xff] }
 0x260   : > { %2248 = vmatmul.f32.gmra.mxu1 %v4040_v34  ;;  %v4257_v34 = vpop.f32.mrf.mxu1 }
 0x262   : > { %v1084_v39 = vpop.f32.mrf.mxu3 }
 0x263   : > { %1710 = vmatmul.f32.gmra.mxu2 %v4241_v63  ;;  %v4247_v33 = vadd.f32 %v1084_v39, %v3709_v30  ;;  %v4260_v30 = vld [vmem:[#allocation2 + $0x13a] sm:$0xff] }
 0x266   : > { %v1663_v7 = vpop.f32.mrf.mxu2 }
 0x267   : > { %v4250_v24 = vadd.f32 %v1663_v7, %v1551_v26  ;;  %2096 = vmatmul.f32.gmra.mxu0 %v3971_v27  ;;  %1134 = vmatmul.f32.gmra.mxu3 %v4241_v63  ;;  %v4266_v27 = vpop.f32.mrf.mxu0  ;;  %v4896_v26 = vld [vmem:[#allocation39_spill] sm:$0xff] }
 0x268   : > { %2251 = vmatmul.f32.gmra.mxu1 %v4060_v37  ;;  %v4271_v56 = vpop.f32.mrf.mxu1  ;;  %v4273_v37 = vld [vmem:[#allocation2 + $0x142] sm:$0xff] }
 0x26a   : > { %v1087_v9 = vpop.f32.mrf.mxu3 }
 0x26b   : > { %1713 = vmatmul.f32.gmra.mxu2 %v4260_v30  ;;  %v4264_v13 = vadd.f32 %v1087_v9, %v3731_v40 }
 0x26f   : > { %2099 = vmatmul.f32.gmra.mxu0 %v3987_v15  ;;  %1137 = vmatmul.f32.gmra.mxu3 %v4260_v30  ;;  %v4279_v40 = vpop.f32.mrf.mxu0  ;;  %v2755_v15 = vld [vmem:[%s4741_s4 + $0x300] sm:$0xff] }
 0x270   : > { %2254 = vmatmul.f32.gmra.mxu1 %v4079_v22  ;;  %1835 = vmatpush.msra.mxu3 %v2755_v15  ;;  %v4287_v22 = vld [vmem:[#allocation2 + $0x152] sm:$0xff]  ;;  %v4293_v14 = vpop.f32.mrf.mxu1  ;;  %v4899_v15 = vld [vmem:[#allocation41_spill] sm:$0xff] }
 0x272   : > { %v1090_v12 = vpop.f32.mrf.mxu3 }
 0x273   : > { %1716 = vmatmul.f32.gmra.mxu2 %v4273_v37  ;;  %v4277_v61 = vadd.f32 %v1090_v12, %v3768_v45  ;;  %v4892_v45 = vld [vmem:[#allocation36_spill] sm:$0xff] }
 0x274   : > { %v4324_v12 = vld [vmem:[#allocation2 + $0x172] sm:$0xff] }
 0x277   : > { %2102 = vmatmul.f32.gmra.mxu0 %v4007_v28  ;;  %1140 = vmatmul.f32.gmra.mxu3 %v4273_v37  ;;  %v4893_v28 = vld [vmem:[#allocation64_spill] sm:$0xff]  ;;  %v4298_v35 = vpop.f32.mrf.mxu0 }
 0x278   : > { %2257 = vmatmul.f32.gmra.mxu1 %v4090_v19  ;;  %v4300_v19 = vld [vmem:[#allocation2 + $0x15a] sm:$0xff]  ;;  %v4306_v10 = vpop.f32.mrf.mxu1 }
 0x27a   : > { %v1093_v32 = vpop.f32.mrf.mxu3 }
 0x27b   : > { %1719 = vmatmul.f32.gmra.mxu2 %v4287_v22  ;;  %v4291_v54 = vadd.f32 %v1093_v32, %v4892_v45 }
 0x27f   : > { %2105 = vmatmul.f32.gmra.mxu0 %v4893_v28  ;;  %1143 = vmatmul.f32.gmra.mxu3 %v4287_v22  ;;  %v4313_v39 = vpop.f32.mrf.mxu0  ;;  %v4900_v28 = vld [vmem:[#allocation73_spill] sm:$0xff] }
 0x280   : > { %2260 = vmatmul.f32.gmra.mxu1 %v4106_v21  ;;  %v4321_v9 = vpop.f32.mrf.mxu1 }
 0x281   : > { %4898 = vst [vmem:[#allocation36_spill] sm:$0xff] %v4321_v9 }
 0x282   : > { %v1096_v8 = vpop.f32.mrf.mxu3 }
 0x283   : > { %1722 = vmatmul.f32.gmra.mxu2 %v4300_v19  ;;  %v4304_v41 = vadd.f32 %v1096_v8, %v4894_v6  ;;  %v4337_v6 = vld [vmem:[#allocation2 + $0x182] sm:$0xff] }
 0x287   : > { %2108 = vmatmul.f32.gmra.mxu0 %v4895_v38  ;;  %1146 = vmatmul.f32.gmra.mxu3 %v4300_v19  ;;  %v4330_v45 = vpop.f32.mrf.mxu0  ;;  %v4902_v38 = vld [vmem:[#allocation43_spill] sm:$0xff] }
 0x288   : > { %2263 = vmatmul.f32.gmra.mxu1 %v4119_v62  ;;  %v4335_v8 = vpop.f32.mrf.mxu1 }
 0x289   : > { %4901 = vst [vmem:[#allocation64_spill] sm:$0xff] %v4335_v8 }
 0x28a   : > { %v1099_v21 = vpop.f32.mrf.mxu3 }
 0x28b   : > { %1725 = vmatmul.f32.gmra.mxu2 %v4311_v20  ;;  %v4317_v7 = vadd.f32 %v1099_v21, %v4896_v26  ;;  %v1771_v26 = vld [vmem:[#allocation2 + $0x30] sm:$0xff] }
 0x28f   : > { %2111 = vmatmul.f32.gmra.mxu0 %v4897_v58  ;;  %1149 = vmatmul.f32.gmra.mxu3 %v4311_v20  ;;  %v4343_v58 = vpop.f32.mrf.mxu0 }
 0x290   : > { %2266 = vmatmul.f32.gmra.mxu1 %v4133_v53  ;;  %v4353_v3 = vpop.f32.mrf.mxu1 }
 0x291   : > { %4905 = vst [vmem:[#allocation37_spill] sm:$0xff] %v4353_v3 }
 0x292   : > { %v1102_v62 = vpop.f32.mrf.mxu3 }
 0x293   : > { %1728 = vmatmul.f32.gmra.mxu2 %v4324_v12  ;;  %v4328_v32 = vadd.f32 %v1102_v62, %v4899_v15  ;;  %v4903_v62 = vld [vmem:[#allocation77_spill] sm:$0xff]  ;;  %v4347_v15 = vld [vmem:[#allocation2 + $0x18a] sm:$0xff] }
 0x297   : > { %2114 = vmatmul.f32.gmra.mxu0 %v4900_v28  ;;  %1152 = vmatmul.f32.gmra.mxu3 %v4324_v12  ;;  %v4904_v28 = vld [vmem:[#allocation45_spill] sm:$0xff] }
 0x298   : > { %2269 = vmatmul.f32.gmra.mxu1 %v4148_v18 }
 0x29a   : > { %v1105_v53 = vpop.f32.mrf.mxu3 }
 0x29b   : > { %1731 = vmatmul.f32.gmra.mxu2 %v4337_v6  ;;  %v4341_v21 = vadd.f32 %v1105_v53, %v4902_v38  ;;  %v1772_v53 = vld [vmem:[#allocation2 + $0x38] sm:$0xff] }
 0x29f   : > { %2117 = vmatmul.f32.gmra.mxu0 %v4903_v62  ;;  %1836 = vmatmul.f32.vlgmr.msra.gmra.mxu3 %v1771_v26  ;;  %v4359_v26 = vpop.f32.mrf.mxu1 }
 0x2a0   : > { %2272 = vmatmul.f32.gmra.mxu1 %v4164_v2  ;;  %4907 = vst [vmem:[#allocation68_spill] sm:$0xff] %v4359_v26  ;;  %v1773_v2 = vld [vmem:[#allocation2 + $0x48] sm:$0xff]  ;;  %v4912_v26 = vld [vmem:[#allocation52_spill] sm:$0xff] }
 0x2a2   : > { %v1108_v18 = vpop.f32.mrf.mxu3 }
 0x2a3   : > { %1734 = vmatmul.f32.gmra.mxu2 %v4347_v15  ;;  %v4351_v50 = vadd.f32 %v1108_v18, %v4904_v28  ;;  %v1774_v28 = vld [vmem:[#allocation2 + $0x50] sm:$0xff] }
 0x2a7   : > { %1839 = vmatmul.f32.gmra.mxu3 %v1772_v53  ;;  %v4365_v3 = vpop.f32.mrf.mxu1  ;;  %v4910_v53 = vld [vmem:[#allocation50_spill] sm:$0xff] }
 0x2a8   : > { %2275 = vmatmul.f32.gmra.mxu1 %v4179_v42  ;;  %4909 = vst [vmem:[#allocation39_spill] sm:$0xff] %v4365_v3 }
 0x2aa   : > { %v1111_v38 = vpop.f32.mrf.mxu3 }
 0x2ab   : > { %v4357_v62 = vadd.f32 %v1111_v38, %v4906_v36  ;;  %v1775_v38 = vld [vmem:[#allocation2 + $0x60] sm:$0xff] }
 0x2af   : > { %1842 = vmatmul.f32.gmra.mxu3 %v1773_v2  ;;  %v4372_v2 = vpop.f32.mrf.mxu1 }
 0x2b0   : > { %2278 = vmatmul.f32.gmra.mxu1 %v4197_v5  ;;  %4911 = vst [vmem:[#allocation71_spill] sm:$0xff] %v4372_v2 }
 0x2b2   : > { %v1114_v55 = vpop.f32.mrf.mxu3 }
 0x2b3   : > { %v4363_v18 = vadd.f32 %v1114_v55, %v4908_v4  ;;  %v1776_v55 = vld [vmem:[#allocation2 + $0x68] sm:$0xff] }
 0x2b7   : > { %1845 = vmatmul.f32.gmra.mxu3 %v1774_v28 }
 0x2b8   : > { %2281 = vmatmul.f32.gmra.mxu1 %v4210_v51  ;;  %v4913_v51 = vld [vmem:[#allocation54_spill] sm:$0xff] }
 0x2ba   : > { %v1117_v42 = vpop.f32.mrf.mxu3 }
 0x2bb   : > { %v4369_v36 = vadd.f32 %v1117_v42, %v4910_v53  ;;  %v4381_v42 = vpop.f32.mrf.mxu1  ;;  %v1777_v53 = vld [vmem:[#allocation2 + $0x78] sm:$0xff] }
 0x2bc   : > { %4914 = vst [vmem:[#allocation41_spill] sm:$0xff] %v4381_v42 }
 0x2bf   : > { %1848 = vmatmul.f32.gmra.mxu3 %v1775_v38  ;;  %v4915_v38 = vld [vmem:[#allocation55_spill] sm:$0xff] }
 0x2c0   : > { %2284 = vmatmul.f32.gmra.mxu1 %v4228_v47 }
 0x2c2   : > { %v1120_v5 = vpop.f32.mrf.mxu3 }
 0x2c3   : > { %v4375_v4 = vadd.f32 %v1120_v5, %v4912_v26  ;;  %v2225_v26 = vpop.f32.mrf.mxu1  ;;  %v1778_v5 = vld [vmem:[#allocation2 + $0x80] sm:$0xff] }
 0x2c7   : > { %1851 = vmatmul.f32.gmra.mxu3 %v1776_v55  ;;  %v4916_v55 = vld [vmem:[#allocation58_spill] sm:$0xff] }
 0x2c8   : > { %2287 = vmatmul.f32.gmra.mxu1 %v4241_v63 }
 0x2ca   : > { %v1123_v28 = vpop.f32.mrf.mxu3 }
 0x2cb   : > { %v4379_v3 = vadd.f32 %v1123_v28, %v4913_v51  ;;  %v1779_v28 = vld [vmem:[#allocation2 + $0x90] sm:$0xff]  ;;  %v2228_v51 = vpop.f32.mrf.mxu1 }
 0x2cf   : > { %1854 = vmatmul.f32.gmra.mxu3 %v1777_v53 }
 0x2d0   : > { %2290 = vmatmul.f32.gmra.mxu1 %v4260_v30  ;;  %v4917_v30 = vld [vmem:[#allocation60_spill] sm:$0xff] }
 0x2d2   : > { %v1126_v47 = vpop.f32.mrf.mxu3 }
 0x2d3   : > { %v4385_v2 = vadd.f32 %v1126_v47, %v4915_v38  ;;  %v1780_v47 = vld [vmem:[#allocation2 + $0x98] sm:$0xff]  ;;  %v2231_v38 = vpop.f32.mrf.mxu1 }
 0x2d7   : > { %1857 = vmatmul.f32.gmra.mxu3 %v1778_v5 }
 0x2d8   : > { %2293 = vmatmul.f32.gmra.mxu1 %v4273_v37  ;;  %v4918_v37 = vld [vmem:[#allocation63_spill] sm:$0xff] }
 0x2da   : > { %v1129_v63 = vpop.f32.mrf.mxu3 }
 0x2db   : > { %v4389_v8 = vadd.f32 %v1129_v63, %v4916_v55  ;;  %v1781_v63 = vld [vmem:[#allocation2 + $0xa8] sm:$0xff]  ;;  %v4403_v9 = vpop.f32.mrf.mxu1 }
 0x2df   : > { %1860 = vmatmul.f32.gmra.mxu3 %v1779_v28  ;;  %v4919_v28 = vld [vmem:[#allocation67_spill] sm:$0xff] }
 0x2e0   : > { %2296 = vmatmul.f32.gmra.mxu1 %v4287_v22 }
 0x2e2   : > { %v1132_v53 = vpop.f32.mrf.mxu3 }
 0x2e3   : > { %v4393_v42 = vadd.f32 %v1132_v53, %v4917_v30  ;;  %v1782_v53 = vld [vmem:[#allocation2 + $0xb0] sm:$0xff]  ;;  %v4921_v30 = vld [vmem:[#allocation70_spill] sm:$0xff] }
 0x2e7   : > { %1863 = vmatmul.f32.gmra.mxu3 %v1780_v47 }
 0x2e8   : > { %2299 = vmatmul.f32.gmra.mxu1 %v4300_v19 }
 0x2ea   : > { %v1135_v5 = vpop.f32.mrf.mxu3 }
 0x2eb   : > { %v4397_v43 = vadd.f32 %v1135_v5, %v4918_v37  ;;  %v4409_v5 = vpop.f32.mrf.mxu1  ;;  %v1783_v37 = vld [vmem:[#allocation2 + $0xc0] sm:$0xff] }
 0x2ef   : > { %1866 = vmatmul.f32.gmra.mxu3 %v1781_v63  ;;  %v4923_v63 = vld [vmem:[#allocation75_spill] sm:$0xff] }
 0x2f0   : > { %2302 = vmatmul.f32.gmra.mxu1 %v4311_v20 }
 0x2f2   : > { %v1138_v55 = vpop.f32.mrf.mxu3 }
 0x2f3   : > { %v4401_v22 = vadd.f32 %v1138_v55, %v4919_v28  ;;  %v1784_v28 = vld [vmem:[#allocation2 + $0xc8] sm:$0xff] }
 0x2f5   : > { %4920 = vst [vmem:[#allocation73_spill] sm:$0xff] %v4401_v22  ;;  %v4415_v22 = vpop.f32.mrf.mxu1 }
 0x2f7   : > { %1869 = vmatmul.f32.gmra.mxu3 %v1782_v53  ;;  %v4925_v53 = vld [vmem:[#allocation78_spill] sm:$0xff] }
 0x2f8   : > { %2305 = vmatmul.f32.gmra.mxu1 %v4324_v12 }
 0x2fa   : > { %v1141_v19 = vpop.f32.mrf.mxu3 }
 0x2fb   : > { %v4407_v47 = vadd.f32 %v1141_v19, %v4921_v30  ;;  %v1785_v30 = vld [vmem:[#allocation2 + $0xd8] sm:$0xff] }
 0x2fd   : > { %4922 = vst [vmem:[#allocation43_spill] sm:$0xff] %v4407_v47 }
 0x2ff   : > { %1872 = vmatmul.f32.gmra.mxu3 %v1783_v37 }
 0x300   : > { %2308 = vmatmul.f32.gmra.mxu1 %v4337_v6  ;;  %v1786_v6 = vld [vmem:[#allocation2 + $0xe0] sm:$0xff] }
 0x302   : > { %v1144_v20 = vpop.f32.mrf.mxu3 }
 0x303   : > { %v4413_v55 = vadd.f32 %v1144_v20, %v4923_v63 }
 0x305   : > { %4924 = vst [vmem:[#allocation77_spill] sm:$0xff] %v4413_v55  ;;  %v2049_v55 = vpop.f32.mrf.mxu0 }
 0x307   : > { %1875 = vmatmul.f32.gmra.mxu3 %v1784_v28  ;;  %v1787_v28 = vld [vmem:[#allocation2 + $0xf0] sm:$0xff] }
 0x308   : > { %2311 = vmatmul.f32.gmra.mxu1 %v4347_v15 }
 0x30a   : > { %v1147_v12 = vpop.f32.mrf.mxu3 }
 0x30b   : > { %v4419_v19 = vadd.f32 %v1147_v12, %v4925_v53  ;;  %v2243_v12 = vpop.f32.mrf.mxu1 }
 0x30d   : > { %4926 = vst [vmem:[#allocation45_spill] sm:$0xff] %v4419_v19 }
 0x30f   : > { %1878 = vmatmul.f32.gmra.mxu3 %v1785_v30  ;;  %v1788_v30 = vld [vmem:[#allocation2 + $0xf8] sm:$0xff] }
 0x312   : > { %v1150_v47 = vpop.f32.mrf.mxu3 }
 0x313   : > { %v4422_v37 = vadd.f32 %v1150_v47, %v4111_v23 }
 0x317   : > { %1881 = vmatmul.f32.gmra.mxu3 %v1786_v6 }
 0x31a   : > { %v1153_v20 = vpop.f32.mrf.mxu3 }
 0x31b   : > { %v4425_v63 = vadd.f32 %v1153_v20, %v4124_v48  ;;  %v2052_v48 = vpop.f32.mrf.mxu0  ;;  %v2246_v20 = vpop.f32.mrf.mxu1 }
 0x31d   : > { %4927 = vst [vmem:[#allocation46_spill] sm:$0xff] %v4425_v63 }
 0x31f   : > { %1884 = vmatmul.f32.gmra.mxu3 %v1787_v28  ;;  %v1789_v28 = vld [vmem:[#allocation2 + $0x108] sm:$0xff] }
 0x322   : > { %v1837_v15 = vpop.f32.mrf.mxu3 }
 0x323   : > { %v1933_v31 = vadd.f32 %v1837_v15, %v4140_v29  ;;  %v1666_v29 = vpop.f32.mrf.mxu2  ;;  %v2055_v15 = vpop.f32.mrf.mxu0 }
 0x325   : > { %v2127_v53 = vadd.f32 %v4266_v27, %v1933_v31 }
 0x327   : > { %1887 = vmatmul.f32.gmra.mxu3 %v1788_v30  ;;  %v2321_v19 = vadd.f32 %v2225_v26, %v2127_v53 }
 0x329   : > { %2385 = vrot.lane.b32.xlu0 %v2321_v19, %s2860_s6  ;;  %v1790_v19 = vld [vmem:[#allocation2 + $0x110] sm:$0xff] }
 0x32a   : > { %v1840_v23 = vpop.f32.mrf.mxu3 }
 0x32b   : > { %v1934_v47 = vadd.f32 %v1840_v23, %v4155_v60  ;;  %v2249_v60 = vpop.f32.mrf.mxu1 }
 0x32d   : > { %v2128_v6 = vadd.f32 %v4279_v40, %v1934_v47  ;;  %v1669_v40 = vpop.f32.mrf.mxu2  ;;  %v1791_v47 = vld [vmem:[#allocation2 + $0x120] sm:$0xff] }
 0x32f   : > { %1890 = vmatmul.f32.gmra.mxu3 %v1789_v28  ;;  %v2322_v63 = vadd.f32 %v2228_v51, %v2128_v6 }
 0x331   : > { %2387 = vrot.lane.b32.xlu0 %v2322_v63, %s2860_s6 }
 0x332   : > { %v1843_v31 = vpop.f32.mrf.mxu3 }
 0x333   : > { %v1935_v27 = vadd.f32 %v1843_v31, %v4171_v1  ;;  %v2058_v1 = vpop.f32.mrf.mxu0 }
 0x335   : > { %v2129_v26 = vadd.f32 %v4298_v35, %v1935_v27  ;;  %v2252_v35 = vpop.f32.mrf.mxu1  ;;  %v1672_v28 = vpop.f32.mrf.mxu2  ;;  %v1792_v27 = vld [vmem:[#allocation2 + $0x128] sm:$0xff] }
 0x337   : > { %1893 = vmatmul.f32.gmra.mxu3 %v1790_v19  ;;  %v2323_v53 = vadd.f32 %v2231_v38, %v2129_v26 }
 0x339   : > { %2389 = vrot.lane.b32.xlu1 %v2323_v53, %s2860_s6 }
 0x33a   : > { %v1846_v30 = vpop.f32.mrf.mxu3 }
 0x33b   : > { %v1936_v23 = vadd.f32 %v1846_v30, %v4186_v17 }
 0x33d   : > { %v2130_v51 = vadd.f32 %v4313_v39, %v1936_v23  ;;  %v2061_v39 = vpop.f32.mrf.mxu0  ;;  %v4445_v19 = vpop.f32.mrf.mxu1 }
 0x33e   : > { %v4448_v30 = vpop.f32.mrf.mxu2 }
 0x33f   : > { %1896 = vmatmul.f32.gmra.mxu3 %v1791_v47  ;;  %v2324_v63 = vadd.f32 %v4403_v9, %v2130_v51 }
 0x341   : > { %2391 = vrot.lane.b32.xlu1 %v2324_v63, %s2860_s6 }
 0x342   : > { %v1849_v6 = vpop.f32.mrf.mxu3 }
 0x343   : > { %v1937_v38 = vadd.f32 %v1849_v6, %v4204_v11  ;;  %v1793_v11 = vld [vmem:[#allocation2 + $0x138] sm:$0xff] }
 0x345   : > { %v2131_v31 = vadd.f32 %v4330_v45, %v1937_v38  ;;  %v4453_v51 = vpop.f32.mrf.mxu0  ;;  %v4455_v63 = vpop.f32.mrf.mxu1 }
 0x347   : > { %1899 = vmatmul.f32.gmra.mxu3 %v1792_v27  ;;  %v2325_v17 = vadd.f32 %v4409_v5, %v2131_v31 }
 0x349   : > { %2393 = vrot.lane.b32.xlu2 %v2325_v17, %s2860_s6 }
 0x34a   : > { %v1852_v26 = vpop.f32.mrf.mxu3 }
 0x34b   : > { %v1938_v9 = vadd.f32 %v1852_v26, %v4217_v0  ;;  %v1794_v0 = vld [vmem:[#allocation2 + $0x140] sm:$0xff]  ;;  %v1795_v26 = vld [vmem:[#allocation2 + $0x150] sm:$0xff] }
 0x34d   : > { %v2132_v53 = vadd.f32 %v4343_v58, %v1938_v9  ;;  %v4457_v58 = vpop.f32.mrf.mxu2 }
 0x34f   : > { %1902 = vmatmul.f32.gmra.mxu3 %v1793_v11  ;;  %v2326_v45 = vadd.f32 %v4415_v22, %v2132_v53  ;;  %v4928_v22 = vld [vmem:[#allocation34_spill] sm:$0xff]  ;;  %v4466_v11 = vpop.f32.mrf.mxu1 }
 0x350   : > { %v1358_v31 = vadd.f32 %v4928_v22, %v4247_v33  ;;  %v4930_v33 = vld [vmem:[#allocation35_spill] sm:$0xff] }
 0x351   : > { %2395 = vrot.lane.b32.xlu2 %v2326_v45, %s2860_s6 }
 0x352   : > { %v1855_v23 = vpop.f32.mrf.mxu3 }
 0x353   : > { %v1939_v5 = vadd.f32 %v1855_v23, %v4235_v52  ;;  %v4463_v52 = vpop.f32.mrf.mxu0 }
 0x355   : > { %v2133_v47 = vadd.f32 %v2049_v55, %v1939_v5  ;;  %v4929_v55 = vld [vmem:[#allocation57_spill] sm:$0xff]  ;;  %v4469_v45 = vpop.f32.mrf.mxu2  ;;  %v1359_v5 = vadd.f32 %v4930_v33, %v4264_v13  ;;  %v4934_v33 = vld [vmem:[#allocation40_spill] sm:$0xff] }
 0x356   : > { %v1552_v9 = vadd.f32 %v4929_v55, %v1358_v31  ;;  %v1797_v55 = vld [vmem:[#allocation2 + $0x168] sm:$0xff] }
 0x357   : > { %1905 = vmatmul.f32.gmra.mxu3 %v1794_v0  ;;  %v2327_v6 = vadd.f32 %v2243_v12, %v2133_v47  ;;  %v1796_v47 = vld [vmem:[#allocation2 + $0x158] sm:$0xff]  ;;  %v4931_v0 = vld [vmem:[#allocation61_spill] sm:$0xff] }
 0x358   : > { %v1746_v12 = vadd.f32 %v1666_v29, %v1552_v9  ;;  %v4477_v29 = vpop.f32.mrf.mxu1  ;;  %v4933_v9 = vld [vmem:[#allocation65_spill] sm:$0xff] }
 0x359   : > { %2397 = vrot.lane.b32.xlu0 %v2327_v6, %s2860_s6  ;;  %v1553_v6 = vadd.f32 %v4931_v0, %v1359_v5  ;;  %v1361_v5 = vadd.f32 %v4934_v33, %v4291_v54  ;;  %v1798_v0 = vld [vmem:[#allocation2 + $0x170] sm:$0xff]  ;;  %v4936_v54 = vld [vmem:[#allocation42_spill] sm:$0xff] }
 0x35a   : > { %v1858_v38 = vpop.f32.mrf.mxu3 }
 0x35b   : > { %v1940_v27 = vadd.f32 %v1858_v38, %v4250_v24  ;;  %v4474_v22 = vpop.f32.mrf.mxu0 }
 0x35d   : > { %v2134_v17 = vadd.f32 %v2052_v48, %v1940_v27  ;;  %v4932_v27 = vld [vmem:[#allocation38_spill] sm:$0xff]  ;;  %v4481_v13 = vpop.f32.mrf.mxu2 }
 0x35f   : > { %1908 = vmatmul.f32.gmra.mxu3 %v1795_v26  ;;  %v2328_v53 = vadd.f32 %v2246_v20, %v2134_v17  ;;  %v1747_v20 = vadd.f32 %v1669_v40, %v1553_v6  ;;  %v1360_v17 = vadd.f32 %v4932_v27, %v4277_v61  ;;  %v1362_v27 = vadd.f32 %v4936_v54, %v4304_v41 }
 0x360   : > { %v2267_v61 = vpop.f32.mrf.mxu1 }
 0x361   : > { %2399 = vrot.lane.b32.xlu1 %v2328_v53, %s2860_s6  ;;  %v1554_v53 = vadd.f32 %v4933_v9, %v1360_v17 }
 0x362   : > { %v1861_v23 = vpop.f32.mrf.mxu3 }
 0x363   : > { %v1941_v24 = vadd.f32 %v1861_v23, %v1746_v12  ;;  %v1748_v12 = vadd.f32 %v1672_v28, %v1554_v53  ;;  %v4485_v40 = vpop.f32.mrf.mxu0  ;;  %v2189_v28 = vld [vmem:[#allocation2 + $0x19a] sm:$0xff] }
 0x364   : > { %2314 = vmatmul.f32.gmra.mxu1 %v2189_v28 }
 0x365   : > { %v2135_v48 = vadd.f32 %v2055_v15, %v1941_v24 }
 0x367   : > { %1911 = vmatmul.f32.gmra.mxu3 %v1796_v47  ;;  %v2329_v38 = vadd.f32 %v2249_v60, %v2135_v48  ;;  %v1687_v47 = vpop.f32.mrf.mxu2 }
 0x369   : > { %2401 = vrot.lane.b32.xlu2 %v2329_v38, %s2860_s6 }
 0x36a   : > { %v1864_v31 = vpop.f32.mrf.mxu3 }
 0x36b   : > { %v1942_v26 = vadd.f32 %v1864_v31, %v1747_v20  ;;  %v2076_v17 = vpop.f32.mrf.mxu0 }
 0x36d   : > { %v2136_v15 = vadd.f32 %v2058_v1, %v1942_v26  ;;  %v4935_v1 = vld [vmem:[#allocation69_spill] sm:$0xff] }
 0x36e   : > { %v1555_v6 = vadd.f32 %v4935_v1, %v1361_v5  ;;  %v4939_v1 = vld [vmem:[#allocation79_spill] sm:$0xff] }
 0x36f   : > { %1914 = vmatmul.f32.gmra.mxu3 %v1797_v55  ;;  %v2330_v60 = vadd.f32 %v2252_v35, %v2136_v15  ;;  %v1995_v35 = vld [vmem:[#allocation2 + $0x199] sm:$0xff]  ;;  %v4496_v15 = vpop.f32.mrf.mxu1 }
 0x370   : > { %2120 = vmatmul.f32.gmra.mxu0 %v1995_v35  ;;  %v1749_v20 = vadd.f32 %v4448_v30, %v1555_v6  ;;  %v1799_v55 = vld [vmem:[#allocation2 + $0x180] sm:$0xff] }
 0x371   : > { %2403 = vrot.lane.b32.xlu0 %v2330_v60, %s2860_s6  ;;  %v1690_v60 = vpop.f32.mrf.mxu2  ;;  %v1996_v30 = vld [vmem:[#allocation2 + $0x1a1] sm:$0xff] }
 0x372   : > { %v1867_v23 = vpop.f32.mrf.mxu3 }
 0x373   : > { %v1943_v24 = vadd.f32 %v1867_v23, %v1748_v12  ;;  %v2190_v12 = vld [vmem:[#allocation2 + $0x1a2] sm:$0xff] }
 0x374   : > { %2317 = vmatmul.f32.gmra.mxu1 %v2190_v12 }
 0x375   : > { %v2137_v48 = vadd.f32 %v2061_v39, %v1943_v24 }
 0x377   : > { %1917 = vmatmul.f32.gmra.mxu3 %v1798_v0  ;;  %v2331_v38 = vadd.f32 %v4445_v19, %v2137_v48  ;;  %v4937_v19 = vld [vmem:[#allocation74_spill] sm:$0xff]  ;;  %v2079_v48 = vpop.f32.mrf.mxu0 }
 0x378   : > { %v1556_v9 = vadd.f32 %v4937_v19, %v1362_v27  ;;  %2123 = vmatmul.f32.gmra.mxu0 %v1996_v30  ;;  %v1800_v0 = vld [vmem:[#allocation2 + $0x188] sm:$0xff]  ;;  %v2849_v27 = vld [vmem:[#allocation2] sm:$0xff] }
 0x379   : > { %2405 = vrot.lane.b32.xlu1 %v2331_v38, %s2860_s6  ;;  %v2273_v38 = vpop.f32.mrf.mxu1  ;;  %v1693_v35 = vpop.f32.mrf.mxu2  ;;  %v4941_v19 = vld [vmem:[#allocation49_spill] sm:$0xff] }
 0x37a   : > { %v1870_v31 = vpop.f32.mrf.mxu3  ;;  %v1750_v23 = vadd.f32 %v4457_v58, %v1556_v9 }
 0x37b   : > { %v1944_v39 = vadd.f32 %v1870_v31, %v1749_v20  ;;  %v4940_v20 = vld [vmem:[#allocation47_spill] sm:$0xff] }
 0x37d   : > { %v2138_v26 = vadd.f32 %v4453_v51, %v1944_v39  ;;  %v4938_v51 = vld [vmem:[#allocation44_spill] sm:$0xff] }
 0x37e   : > { %v1363_v33 = vadd.f32 %v4938_v51, %v4317_v7  ;;  %v1364_v7 = vadd.f32 %v4940_v20, %v4328_v32  ;;  %v1365_v32 = vadd.f32 %v4941_v19, %v4341_v21  ;;  %v4942_v21 = vld [vmem:[#allocation51_spill] sm:$0xff] }
 0x37f   : > { %1920 = vmatmul.f32.gmra.mxu3 %v1799_v55  ;;  %v2332_v53 = vadd.f32 %v4455_v63, %v2138_v26 }
 0x380   : > { %v1557_v63 = vadd.f32 %v4939_v1, %v1363_v33  ;;  %v1558_v54 = vadd.f32 %v4117_v16, %v1364_v7 }
 0x381   : > { %2407 = vrot.lane.b32.xlu2 %v2332_v53, %s2860_s6  ;;  %v4520_v53 = vpop.f32.mrf.mxu2 }
 0x382   : > { %v1873_v41 = vpop.f32.mrf.mxu3  ;;  %v1751_v58 = vadd.f32 %v4469_v45, %v1557_v63  ;;  %v1752_v26 = vadd.f32 %v4481_v13, %v1558_v54  ;;  %v4516_v45 = vpop.f32.mrf.mxu1 }
 0x383   : > { %v1945_v5 = vadd.f32 %v1873_v41, %v1750_v23  ;;  %v1366_v23 = vadd.f32 %v4942_v21, %v4351_v50 }
 0x385   : > { %v2139_v24 = vadd.f32 %v4463_v52, %v1945_v5  ;;  %v2850_v5 = vld [vmem:[%s2937_s20] sm:$0xff]  ;;  %v1560_v50 = vadd.f32 %v4153_v44, %v1366_v23 }
 0x387   : > { %1923 = vmatmul.f32.gmra.mxu3 %v1800_v0  ;;  %v2333_v6 = vadd.f32 %v4466_v11, %v2139_v24  ;;  %v2082_v11 = vpop.f32.mrf.mxu0  ;;  %v1754_v1 = vadd.f32 %v1690_v60, %v1560_v50 }
 0x389   : > { %2409 = vrot.lane.b32.xlu0 %v2333_v6, %s2860_s6  ;;  %v4943_v6 = vld [vmem:[#allocation53_spill] sm:$0xff] }
 0x38a   : > { %v1876_v28 = vpop.f32.mrf.mxu3  ;;  %v4529_v33 = vpop.f32.mrf.mxu1 }
 0x38b   : > { %v1946_v31 = vadd.f32 %v1876_v28, %v1751_v58  ;;  %v1367_v58 = vadd.f32 %v4943_v6, %v4357_v62 }
 0x38d   : > { %v2140_v52 = vadd.f32 %v4474_v22, %v1946_v31  ;;  %v1559_v22 = vadd.f32 %v4137_v49, %v1365_v32 }
 0x38f   : > { %1926 = vmatmul.f32.gmra.mxu3 %v2849_v27  ;;  %v2334_v39 = vadd.f32 %v4477_v29, %v2140_v52  ;;  %v1753_v13 = vadd.f32 %v1687_v47, %v1559_v22  ;;  %v4525_v30 = vpop.f32.mrf.mxu0  ;;  %v1699_v47 = vpop.f32.mrf.mxu2 }
 0x391   : > { %2411 = vrot.lane.b32.xlu1 %v2334_v39, %s2860_s6 }
 0x392   : > { %v1879_v55 = vpop.f32.mrf.mxu3  ;;  %v2282_v54 = vpop.f32.mrf.mxu1 }
 0x393   : > { %v1947_v9 = vadd.f32 %v1879_v55, %v1752_v26  ;;  %v4945_v26 = vld [vmem:[#allocation10_spill] sm:$0xff]  ;;  %v1561_v55 = vadd.f32 %v4175_v57, %v1367_v58 }
 0x395   : > { %v2141_v16 = vadd.f32 %v4485_v40, %v1947_v9  ;;  %v1755_v9 = vadd.f32 %v1693_v35, %v1561_v55 }
 0x397   : > { %1929 = vmatmul.f32.gmra.mxu3 %v2849_v27  ;;  %v2335_v29 = vadd.f32 %v2267_v61, %v2141_v16  ;;  %v2088_v7 = vpop.f32.mrf.mxu0  ;;  %v4944_v27 = vld [vmem:[#allocation4_spill] sm:$0xff]  ;;  %v1702_v32 = vpop.f32.mrf.mxu2 }
 0x399   : > { %2413 = vrot.lane.b32.xlu2 %v2335_v29, %s2860_s6 }
 0x39a   : > { %v1882_v12 = vpop.f32.mrf.mxu3 }
 0x39b   : > { %v1948_v41 = vadd.f32 %v1882_v12, %v1753_v13  ;;  %v2386_v51 = vpop.permute.xlu0 %2385 }
 0x39c   : > { %v2482_v49 = vsel %vm2481_vm0, 0.0, %v2386_v51  ;;  %v4947_v51 = vld [vmem:[#allocation6_spill] sm:$0xff] }
 0x39d   : > { %v2142_v40 = vadd.f32 %v2076_v17, %v1948_v41  ;;  %v2515_v61 = vsel %vm2514_vm1, %v2482_v49, 0.0 }
 0x39e   : > { %v2547_v24 = vadd.f32 %v2850_v5, %v2515_v61 }
 0x39f   : > { %v2336_v0 = vadd.f32 %v4496_v15, %v2142_v40  ;;  %v2091_v41 = vpop.f32.mrf.mxu0  ;;  %v4948_v40 = vld [vmem:[#allocation12_spill] sm:$0xff] }
 0x3a0   : > { %2579 = vst [vmem:[%s4537_s10] sm:$0xff] %v2547_v24  ;;  %v2285_v24 = vpop.f32.mrf.mxu1 }
 0x3a1   : > { %2415 = vrot.lane.b32.xlu0 %v2336_v0, %s2860_s6 }
 0x3a2   : > { %v1885_v63 = vpop.f32.mrf.mxu3 }
 0x3a3   : > { %v1949_v28 = vadd.f32 %v1885_v63, %v1754_v1  ;;  %v2388_v17 = vpop.permute.xlu0 %2387  ;;  %v2394_v20 = vpop.permute.xlu2 %2393  ;;  %v4949_v1 = vld [vmem:[#allocation59_spill] sm:$0xff] }
 0x3a4   : > { %v2483_v31 = vsel %vm2481_vm0, 0.0, %v2388_v17  ;;  %v2486_v44 = vsel %vm2481_vm0, 0.0, %v2394_v20  ;;  %v1369_v63 = vadd.f32 %v4949_v1, %v4369_v36  ;;  %v4950_v17 = vld [vmem:[#allocation8_spill] sm:$0xff] }
 0x3a5   : > { %v2143_v52 = vadd.f32 %v2079_v48, %v1949_v28  ;;  %v2516_v15 = vsel %vm2514_vm1, %v2483_v31, 0.0  ;;  %v2519_v60 = vsel %vm2514_vm1, %v2486_v44, 0.0  ;;  %v4946_v48 = vld [vmem:[#allocation56_spill] sm:$0xff] }
 0x3a6   : > { %v2548_v39 = vadd.f32 %v2516_v15, %v4944_v27  ;;  %v2551_v62 = vadd.f32 %v2519_v60, %v4945_v26  ;;  %v1368_v22 = vadd.f32 %v4946_v48, %v4363_v18  ;;  %v4951_v60 = vld [vmem:[#allocation62_spill] sm:$0xff] }
 0x3a7   : > { %v2337_v19 = vadd.f32 %v2273_v38, %v2143_v52  ;;  %v2094_v44 = vpop.f32.mrf.mxu0  ;;  %v1370_v27 = vadd.f32 %v4951_v60, %v4375_v4 }
 0x3a8   : > { %2580 = vst [vmem:[%s4537_s10 + $0x8] sm:$0xff] %v2548_v39  ;;  %v1562_v18 = vadd.f32 %v4195_v25, %v1368_v22  ;;  %v2288_v36 = vpop.f32.mrf.mxu1 }
 0x3a9   : > { %2583 = vst [vmem:[%s4537_s10 + $0x20] sm:$0xff] %v2551_v62  ;;  %2417 = vrot.lane.b32.xlu1 %v2337_v19, %s2860_s6  ;;  %v1564_v62 = vadd.f32 %v4233_v46, %v1370_v27  ;;  %v4953_v46 = vld [vmem:[#allocation18_spill] sm:$0xff] }
 0x3aa   : > { %v1888_v16 = vpop.f32.mrf.mxu3  ;;  %v1756_v50 = vadd.f32 %v4520_v53, %v1562_v18  ;;  %v1563_v53 = vadd.f32 %v4214_v59, %v1369_v63 }
 0x3ab   : > { %v1950_v29 = vadd.f32 %v1888_v16, %v1755_v9  ;;  %v2390_v13 = vpop.permute.xlu1 %2389  ;;  %v2396_v12 = vpop.permute.xlu2 %2395  ;;  %v1758_v59 = vadd.f32 %v1702_v32, %v1564_v62 }
 0x3ac   : > { %v2484_v21 = vsel %vm2481_vm0, 0.0, %v2390_v13  ;;  %v2487_v57 = vsel %vm2481_vm0, 0.0, %v2396_v12  ;;  %v1757_v52 = vadd.f32 %v1699_v47, %v1563_v53  ;;  %v4952_v47 = vld [vmem:[#allocation66_spill] sm:$0xff] }
 0x3ad   : > { %v2144_v38 = vadd.f32 %v2082_v11, %v1950_v29  ;;  %v2517_v23 = vsel %vm2514_vm1, %v2484_v21, 0.0  ;;  %v2520_v35 = vsel %vm2514_vm1, %v2487_v57, 0.0  ;;  %v1705_v11 = vpop.f32.mrf.mxu2  ;;  %v1371_v9 = vadd.f32 %v4952_v47, %v4379_v3  ;;  %v4954_v57 = vld [vmem:[#allocation72_spill] sm:$0xff] }
 0x3ae   : > { %v2549_v49 = vadd.f32 %v2517_v23, %v4947_v51  ;;  %v2552_v61 = vadd.f32 %v2520_v35, %v4948_v40 }
 0x3af   : > { %v2338_v5 = vadd.f32 %v4516_v45, %v2144_v38  ;;  %v1565_v32 = vadd.f32 %v4257_v34, %v1371_v9  ;;  %v1372_v38 = vadd.f32 %v4954_v57, %v4385_v2  ;;  %v4955_v34 = vld [vmem:[#allocation14_spill] sm:$0xff]  ;;  %v4960_v9 = vld [vmem:[#allocation81_spill] sm:$0xff] }
 0x3b0   : > { %2581 = vst [vmem:[%s4537_s10 + $0x10] sm:$0xff] %v2549_v49  ;;  %v2291_v22 = vpop.f32.mrf.mxu1  ;;  %v4963_v57 = vld [vmem:[#allocation73_spill] sm:$0xff] }
 0x3b1   : > { %2584 = vst [vmem:[%s4537_s10 + $0x28] sm:$0xff] %v2552_v61  ;;  %2419 = vrot.lane.b32.xlu2 %v2338_v5, %s2860_s6  ;;  %v1759_v21 = vadd.f32 %v1705_v11, %v1565_v32  ;;  %v1566_v5 = vadd.f32 %v4271_v56, %v1372_v38  ;;  %v4957_v56 = vld [vmem:[#allocation16_spill] sm:$0xff]  ;;  %v4964_v38 = vld [vmem:[#allocation82_spill] sm:$0xff] }
 0x3b2   : > { %v1891_v0 = vpop.f32.mrf.mxu3 }
 0x3b3   : > { %v1951_v6 = vadd.f32 %v1891_v0, %v1756_v50  ;;  %v2392_v58 = vpop.permute.xlu1 %2391  ;;  %v4956_v0 = vld [vmem:[#allocation76_spill] sm:$0xff] }
 0x3b4   : > { %v2485_v28 = vsel %vm2481_vm0, 0.0, %v2392_v58  ;;  %v1373_v1 = vadd.f32 %v4956_v0, %v4389_v8 }
 0x3b5   : > { %v2145_v25 = vadd.f32 %v4525_v30, %v1951_v6  ;;  %v2518_v45 = vsel %vm2514_vm1, %v2485_v28, 0.0  ;;  %v1708_v30 = vpop.f32.mrf.mxu2 }
 0x3b6   : > { %v2550_v20 = vadd.f32 %v2518_v45, %v4950_v17  ;;  %v1760_v11 = vadd.f32 %v1708_v30, %v1566_v5 }
 0x3b7   : > { %v2339_v31 = vadd.f32 %v4529_v33, %v2145_v25  ;;  %v2097_v33 = vpop.f32.mrf.mxu0 }
 0x3b8   : > { %2582 = vst [vmem:[%s4537_s10 + $0x18] sm:$0xff] %v2550_v20  ;;  %v2294_v61 = vpop.f32.mrf.mxu1  ;;  %v1567_v20 = vadd.f32 %v4293_v14, %v1373_v1  ;;  %v4959_v14 = vld [vmem:[#allocation24_spill] sm:$0xff]  ;;  %v4967_v1 = vld [vmem:[#allocation43_spill] sm:$0xff] }
 0x3b9   : > { %2421 = vrot.lane.b32.xlu0 %v2339_v31, %s2860_s6 }
 0x3ba   : > { %v1894_v15 = vpop.f32.mrf.mxu3 }
 0x3bb   : > { %v1952_v39 = vadd.f32 %v1894_v15, %v1757_v52 }
 0x3bd   : > { %v2146_v26 = vadd.f32 %v2088_v7, %v1952_v39  ;;  %v1711_v13 = vpop.f32.mrf.mxu2 }
 0x3bf   : > { %v2340_v55 = vadd.f32 %v2282_v54, %v2146_v26 }
 0x3c0   : > { %v2297_v31 = vpop.f32.mrf.mxu1 }
 0x3c1   : > { %2423 = vrot.lane.b32.xlu1 %v2340_v55, %s2860_s6 }
 0x3c2   : > { %v1897_v19 = vpop.f32.mrf.mxu3 }
 0x3c3   : > { %v1953_v16 = vadd.f32 %v1897_v19, %v1758_v59  ;;  %v2402_v48 = vpop.permute.xlu2 %2401 }
 0x3c4   : > { %v2490_v4 = vsel %vm2481_vm0, 0.0, %v2402_v48 }
 0x3c5   : > { %v2147_v29 = vadd.f32 %v2091_v41, %v1953_v16  ;;  %v2523_v7 = vsel %vm2514_vm1, %v2490_v4, 0.0  ;;  %v2100_v41 = vpop.f32.mrf.mxu0  ;;  %v1714_v50 = vpop.f32.mrf.mxu2  ;;  %v1375_v16 = vadd.f32 %v4960_v9, %v4397_v43 }
 0x3c6   : > { %v2555_v54 = vadd.f32 %v2523_v7, %v4953_v46 }
 0x3c7   : > { %v2341_v12 = vadd.f32 %v2285_v24, %v2147_v29 }
 0x3c8   : > { %2587 = vst [vmem:[%s4537_s10 + $0x40] sm:$0xff] %v2555_v54  ;;  %v2300_v47 = vpop.f32.mrf.mxu1  ;;  %v4962_v54 = vld [vmem:[#allocation36_spill] sm:$0xff] }
 0x3c9   : > { %2425 = vrot.lane.b32.xlu2 %v2341_v12, %s2860_s6  ;;  %v1569_v32 = vadd.f32 %v4962_v54, %v1375_v16 }
 0x3ca   : > { %v1900_v3 = vpop.f32.mrf.mxu3 }
 0x3cb   : > { %v1954_v23 = vadd.f32 %v1900_v3, %v1759_v21  ;;  %v2398_v35 = vpop.permute.xlu0 %2397 }
 0x3cc   : > { %v2488_v51 = vsel %vm2481_vm0, 0.0, %v2398_v35 }
 0x3cd   : > { %v2148_v49 = vadd.f32 %v2094_v44, %v1954_v23  ;;  %v2521_v40 = vsel %vm2514_vm1, %v2488_v51, 0.0  ;;  %v2103_v45 = vpop.f32.mrf.mxu0  ;;  %v1761_v44 = vadd.f32 %v1711_v13, %v1567_v20  ;;  %v1717_v8 = vpop.f32.mrf.mxu2  ;;  %v4961_v13 = vld [vmem:[#allocation20_spill] sm:$0xff]  ;;  %v1376_v23 = vadd.f32 %v4964_v38, %v4963_v57  ;;  %v4978_v57 = vld [vmem:[#allocation39_spill] sm:$0xff] }
 0x3ce   : > { %v2553_v18 = vadd.f32 %v2521_v40, %v4955_v34  ;;  %v1763_v21 = vadd.f32 %v1717_v8, %v1569_v32 }
 0x3cf   : > { %v2342_v24 = vadd.f32 %v2288_v36, %v2148_v49  ;;  %v4958_v36 = vld [vmem:[#allocation80_spill] sm:$0xff] }
 0x3d0   : > { %2585 = vst [vmem:[%s4537_s10 + $0x30] sm:$0xff] %v2553_v18  ;;  %v1374_v15 = vadd.f32 %v4958_v36, %v4393_v42  ;;  %v2303_v51 = vpop.f32.mrf.mxu1  ;;  %v4965_v18 = vld [vmem:[#allocation22_spill] sm:$0xff] }
 0x3d1   : > { %2427 = vrot.lane.b32.xlu0 %v2342_v24, %s2860_s6  ;;  %v4966_v24 = vld [vmem:[#allocation64_spill] sm:$0xff] }
 0x3d2   : > { %v1903_v2 = vpop.f32.mrf.mxu3  ;;  %v1568_v55 = vadd.f32 %v4306_v10, %v1374_v15 }
 0x3d3   : > { %v1955_v63 = vadd.f32 %v1903_v2, %v1760_v11  ;;  %v2400_v6 = vpop.permute.xlu1 %2399 }
 0x3d4   : > { %v2489_v58 = vsel %vm2481_vm0, 0.0, %v2400_v6  ;;  %v1762_v19 = vadd.f32 %v1714_v50, %v1568_v55  ;;  %v1570_v50 = vadd.f32 %v4966_v24, %v1376_v23 }
 0x3d5   : > { %v2149_v28 = vadd.f32 %v2097_v33, %v1955_v63  ;;  %v2522_v25 = vsel %vm2514_vm1, %v2489_v58, 0.0  ;;  %v2106_v33 = vpop.f32.mrf.mxu0  ;;  %v1720_v4 = vpop.f32.mrf.mxu2  ;;  %v4968_v63 = vld [vmem:[#allocation83_spill] sm:$0xff] }
 0x3d6   : > { %v2554_v17 = vadd.f32 %v2522_v25, %v4957_v56  ;;  %v1764_v2 = vadd.f32 %v1720_v4, %v1570_v50  ;;  %v1377_v6 = vadd.f32 %v4968_v63, %v4967_v1  ;;  %v4981_v1 = vld [vmem:[#allocation71_spill] sm:$0xff] }
 0x3d7   : > { %v2343_v53 = vadd.f32 %v2291_v22, %v2149_v28 }
 0x3d8   : > { %2586 = vst [vmem:[%s4537_s10 + $0x38] sm:$0xff] %v2554_v17  ;;  %v2306_v20 = vpop.f32.mrf.mxu1 }
 0x3d9   : > { %2429 = vrot.lane.b32.xlu1 %v2343_v53, %s2860_s6  ;;  %v4969_v53 = vld [vmem:[#allocation30_spill] sm:$0xff] }
 0x3da   : > { %v1906_v52 = vpop.f32.mrf.mxu3 }
 0x3db   : > { %v1956_v60 = vadd.f32 %v1906_v52, %v1761_v44  ;;  %v2408_v27 = vpop.permute.xlu2 %2407  ;;  %v4970_v44 = vld [vmem:[#allocation37_spill] sm:$0xff] }
 0x3dc   : > { %v2493_v39 = vsel %vm2481_vm0, 0.0, %v2408_v27  ;;  %v1571_v8 = vadd.f32 %v4970_v44, %v1377_v6  ;;  %v4971_v27 = vld [vmem:[#allocation77_spill] sm:$0xff] }
 0x3dd   : > { %v2150_v30 = vadd.f32 %v2100_v41, %v1956_v60  ;;  %v2526_v26 = vsel %vm2514_vm1, %v2493_v39, 0.0  ;;  %v2109_v3 = vpop.f32.mrf.mxu0  ;;  %v1723_v34 = vpop.f32.mrf.mxu2  ;;  %v4972_v39 = vld [vmem:[#allocation84_spill] sm:$0xff] }
 0x3de   : > { %v2558_v62 = vadd.f32 %v2526_v26, %v4959_v14  ;;  %v1765_v15 = vadd.f32 %v1723_v34, %v1571_v8 }
 0x3df   : > { %v2344_v59 = vadd.f32 %v2294_v61, %v2150_v30  ;;  %v1378_v30 = vadd.f32 %v4972_v39, %v4971_v27 }
 0x3e0   : > { %2590 = vst [vmem:[%s4537_s10 + $0x58] sm:$0xff] %v2558_v62 }
 0x3e1   : > { %2431 = vrot.lane.b32.xlu2 %v2344_v59, %s2860_s6 }
 0x3e2   : > { %v1909_v42 = vpop.f32.mrf.mxu3 }
 0x3e3   : > { %v1957_v48 = vadd.f32 %v1909_v42, %v1762_v19  ;;  %v2404_v22 = vpop.permute.xlu0 %2403  ;;  %v4973_v19 = vld [vmem:[#allocation26_spill] sm:$0xff]  ;;  %v4974_v42 = vld [vmem:[#allocation68_spill] sm:$0xff] }
 0x3e4   : > { %v2491_v29 = vsel %vm2481_vm0, 0.0, %v2404_v22  ;;  %v1572_v9 = vadd.f32 %v4974_v42, %v1378_v30  ;;  %v4986_v42 = vld [vmem:[#allocation3_spill] sm:$0xff] }
 0x3e5   : > { %v2151_v7 = vadd.f32 %v2103_v45, %v1957_v48  ;;  %v2524_v10 = vsel %vm2514_vm1, %v2491_v29, 0.0  ;;  %v2112_v25 = vpop.f32.mrf.mxu0  ;;  %v1726_v36 = vpop.f32.mrf.mxu2 }
 0x3e6   : > { %v2556_v46 = vadd.f32 %v2524_v10, %v4961_v13  ;;  %v2309_v48 = vpop.f32.mrf.mxu1  ;;  %v1766_v22 = vadd.f32 %v1726_v36, %v1572_v9  ;;  %v4976_v10 = vld [vmem:[#allocation85_spill] sm:$0xff]  ;;  %v4984_v36 = vld [vmem:[#allocation32_spill] sm:$0xff] }
 0x3e7   : > { %v2345_v12 = vadd.f32 %v2297_v31, %v2151_v7  ;;  %v4975_v7 = vld [vmem:[#allocation45_spill] sm:$0xff] }
 0x3e8   : > { %2588 = vst [vmem:[%s4537_s10 + $0x48] sm:$0xff] %v2556_v46  ;;  %v1379_v13 = vadd.f32 %v4976_v10, %v4975_v7 }
 0x3e9   : > { %2433 = vrot.lane.b32.xlu0 %v2345_v12, %s2860_s6 }
 0x3ea   : > { %v1912_v43 = vpop.f32.mrf.mxu3  ;;  %v1573_v38 = vadd.f32 %v4978_v57, %v1379_v13 }
 0x3eb   : > { %v1958_v35 = vadd.f32 %v1912_v43, %v1763_v21  ;;  %v2406_v41 = vpop.permute.xlu1 %2405 }
 0x3ec   : > { %v2492_v49 = vsel %vm2481_vm0, 0.0, %v2406_v41 }
 0x3ed   : > { %v2152_v40 = vadd.f32 %v2106_v33, %v1958_v35  ;;  %v2525_v61 = vsel %vm2514_vm1, %v2492_v49, 0.0  ;;  %v2115_v33 = vpop.f32.mrf.mxu0  ;;  %v1729_v4 = vpop.f32.mrf.mxu2 }
 0x3ee   : > { %v2557_v5 = vadd.f32 %v2525_v61, %v4965_v18  ;;  %v1767_v41 = vadd.f32 %v1729_v4, %v1573_v38 }
 0x3ef   : > { %v2346_v11 = vadd.f32 %v2300_v47, %v2152_v40  ;;  %v4979_v40 = vld [vmem:[#allocation86_spill] sm:$0xff] }
 0x3f0   : > { %2589 = vst [vmem:[%s4537_s10 + $0x50] sm:$0xff] %v2557_v5  ;;  %v1380_v61 = vadd.f32 %v4979_v40, %v4422_v37 }
 0x3f1   : > { %2435 = vrot.lane.b32.xlu1 %v2346_v11, %s2860_s6 }
 0x3f2   : > { %v1915_v0 = vpop.f32.mrf.mxu3  ;;  %v1574_v63 = vadd.f32 %v4981_v1, %v1380_v61 }
 0x3f3   : > { %v1959_v58 = vadd.f32 %v1915_v0, %v1764_v2  ;;  %v2414_v28 = vpop.permute.xlu2 %2413  ;;  %v4980_v2 = vld [vmem:[#allocation5_spill] sm:$0xff] }
 0x3f4   : > { %v2496_v45 = vsel %vm2481_vm0, 0.0, %v2414_v28 }
 0x3f5   : > { %v2153_v56 = vadd.f32 %v2109_v3, %v1959_v58  ;;  %v2529_v17 = vsel %vm2514_vm1, %v2496_v45, 0.0  ;;  %v4977_v3 = vld [vmem:[#allocation28_spill] sm:$0xff]  ;;  %v2118_v35 = vpop.f32.mrf.mxu0  ;;  %v1732_v5 = vpop.f32.mrf.mxu2  ;;  %v4982_v45 = vld [vmem:[#allocation46_spill] sm:$0xff] }
 0x3f6   : > { %v2561_v31 = vadd.f32 %v2529_v17, %v4969_v53  ;;  %v1768_v28 = vadd.f32 %v1732_v5, %v1574_v63 }
 0x3f7   : > { %v2347_v52 = vadd.f32 %v2303_v51, %v2153_v56  ;;  %v2312_v51 = vpop.f32.mrf.mxu1  ;;  %v4983_v56 = vld [vmem:[#allocation87_spill] sm:$0xff] }
 0x3f8   : > { %2593 = vst [vmem:[%s4537_s10 + $0x70] sm:$0xff] %v2561_v31  ;;  %v1381_v17 = vadd.f32 %v4983_v56, %v4982_v45  ;;  %v4994_v45 = vld [vmem:[#allocation19_spill] sm:$0xff] }
 0x3f9   : > { %2437 = vrot.lane.b32.xlu2 %v2347_v52, %s2860_s6 }
 0x3fa   : > { %v1918_v60 = vpop.f32.mrf.mxu3 }
 0x3fb   : > { %v1960_v26 = vadd.f32 %v1918_v60, %v1765_v15  ;;  %v2410_v14 = vpop.permute.xlu0 %2409  ;;  %v4985_v60 = vld [vmem:[#allocation41_spill] sm:$0xff] }
 0x3fc   : > { %v2494_v62 = vsel %vm2481_vm0, 0.0, %v2410_v14  ;;  %v1575_v27 = vadd.f32 %v4985_v60, %v1381_v17 }
 0x3fd   : > { %v2154_v55 = vadd.f32 %v2112_v25, %v1960_v26  ;;  %v2527_v59 = vsel %vm2514_vm1, %v2494_v62, 0.0  ;;  %v2121_v58 = vpop.f32.mrf.mxu0  ;;  %v1735_v52 = vpop.f32.mrf.mxu2 }
 0x3fe   : > { %v2559_v47 = vadd.f32 %v2527_v59, %v4973_v19  ;;  %v1769_v30 = vadd.f32 %v1735_v52, %v1575_v27 }
 0x3ff   : > { %v2348_v16 = vadd.f32 %v2306_v20, %v2154_v55  ;;  %v2315_v25 = vpop.f32.mrf.mxu1 }
 0x400   : > { %2591 = vst [vmem:[%s4537_s10 + $0x60] sm:$0xff] %v2559_v47 }
 0x401   : > { %2439 = vrot.lane.b32.xlu0 %v2348_v16, %s2860_s6 }
 0x402   : > { %v1921_v29 = vpop.f32.mrf.mxu3 }
 0x403   : > { %v1961_v46 = vadd.f32 %v1921_v29, %v1766_v22  ;;  %v2412_v54 = vpop.permute.xlu1 %2411  ;;  %v4987_v29 = vld [vmem:[#allocation11_spill] sm:$0xff] }
 0x404   : > { %v2495_v32 = vsel %vm2481_vm0, 0.0, %v2412_v54  ;;  %v4988_v54 = vld [vmem:[#allocation7_spill] sm:$0xff] }
 0x405   : > { %v2155_v12 = vadd.f32 %v2115_v33, %v1961_v46  ;;  %v2528_v21 = vsel %vm2514_vm1, %v2495_v32, 0.0  ;;  %v2124_v14 = vpop.f32.mrf.mxu0 }
 0x406   : > { %v2560_v43 = vadd.f32 %v2528_v21, %v4977_v3 }
 0x407   : > { %v2349_v23 = vadd.f32 %v2309_v48, %v2155_v12  ;;  %v2318_v33 = vpop.f32.mrf.mxu1 }
 0x408   : > { %2592 = vst [vmem:[%s4537_s10 + $0x68] sm:$0xff] %v2560_v43  ;;  %v4989_v43 = vld [vmem:[#allocation9_spill] sm:$0xff] }
 0x409   : > { %2441 = vrot.lane.b32.xlu1 %v2349_v23, %s2860_s6 }
 0x40a   : > { %v1924_v49 = vpop.f32.mrf.mxu3 }
 0x40b   : > { %v1962_v34 = vadd.f32 %v1924_v49, %v1767_v41  ;;  %v2420_v18 = vpop.permute.xlu2 %2419  ;;  %v4990_v41 = vld [vmem:[#allocation17_spill] sm:$0xff] }
 0x40c   : > { %v2499_v24 = vsel %vm2481_vm0, 0.0, %v2420_v18 }
 0x40d   : > { %v2156_v50 = vadd.f32 %v2118_v35, %v1962_v34  ;;  %v2532_v11 = vsel %vm2514_vm1, %v2499_v24, 0.0  ;;  %v4991_v34 = vld [vmem:[#allocation13_spill] sm:$0xff] }
 0x40e   : > { %v2564_v0 = vadd.f32 %v2532_v11, %v4980_v2  ;;  %v4992_v11 = vld [vmem:[#allocation15_spill] sm:$0xff] }
 0x40f   : > { %v2350_v6 = vadd.f32 %v2312_v51, %v2156_v50 }
 0x410   : > { %2596 = vst [vmem:[%s4537_s10 + $0x88] sm:$0xff] %v2564_v0 }
 0x411   : > { %2443 = vrot.lane.b32.xlu2 %v2350_v6, %s2860_s6  ;;  %v4993_v6 = vld [vmem:[#allocation23_spill] sm:$0xff] }
 0x412   : > { %v1927_v37 = vpop.f32.mrf.mxu3 }
 0x413   : > { %v1963_v20 = vadd.f32 %v1927_v37, %v1768_v28  ;;  %v2416_v53 = vpop.permute.xlu0 %2415 }
 0x414   : > { %v2497_v31 = vsel %vm2481_vm0, 0.0, %v2416_v53 }
 0x415   : > { %v2530_v44 = vsel %vm2514_vm1, %v2497_v31, 0.0  ;;  %v2157_v8 = vadd.f32 %v2121_v58, %v1963_v20  ;;  %v4995_v31 = vld [vmem:[#allocation21_spill] sm:$0xff] }
 0x416   : > { %v2562_v15 = vadd.f32 %v2530_v44, %v4984_v36 }
 0x417   : > { %v2351_v39 = vadd.f32 %v2315_v25, %v2157_v8 }
 0x418   : > { %2594 = vst [vmem:[%s4537_s10 + $0x78] sm:$0xff] %v2562_v15  ;;  %v4996_v15 = vld [vmem:[#allocation29_spill] sm:$0xff] }
 0x419   : > { %2445 = vrot.lane.b32.xlu0 %v2351_v39, %s2860_s6 }
 0x41a   : > { %v1930_v26 = vpop.f32.mrf.mxu3 }
 0x41b   : > { %v1964_v62 = vadd.f32 %v1930_v26, %v1769_v30  ;;  %v2418_v55 = vpop.permute.xlu1 %2417  ;;  %v4997_v26 = vld [vmem:[#allocation25_spill] sm:$0xff] }
 0x41c   : > { %v2498_v59 = vsel %vm2481_vm0, 0.0, %v2418_v55 }
 0x41d   : > { %v2531_v19 = vsel %vm2514_vm1, %v2498_v59, 0.0  ;;  %v2158_v47 = vadd.f32 %v2124_v14, %v1964_v62 }
 0x41e   : > { %v2563_v9 = vadd.f32 %v2531_v19, %v4986_v42 }
 0x41f   : > { %v2352_v16 = vadd.f32 %v2318_v33, %v2158_v47  ;;  %v4998_v33 = vld [vmem:[#allocation27_spill] sm:$0xff] }
 0x420   : > { %2595 = vst [vmem:[%s4537_s10 + $0x80] sm:$0xff] %v2563_v9 }
 0x421   : > { %2447 = vrot.lane.b32.xlu1 %v2352_v16, %s2860_s6  ;;  %v4999_v16 = vld [vmem:[#allocation31_spill] sm:$0xff] }
 0x423   : > { %v2426_v48 = vpop.permute.xlu2 %2425 }
 0x424   : > { %v2502_v22 = vsel %vm2481_vm0, 0.0, %v2426_v48 }
 0x425   : > { %v2535_v4 = vsel %vm2514_vm1, %v2502_v22, 0.0 }
 0x426   : > { %v2567_v7 = vadd.f32 %v2535_v4, %v4987_v29 }
 0x428   : > { %2599 = vst [vmem:[%s4537_s10 + $0xa0] sm:$0xff] %v2567_v7  ;;  %v5000_v7 = vld [vmem:[#allocation33_spill] sm:$0xff] }
 0x42b   : > { %v2422_v10 = vpop.permute.xlu0 %2421 }
 0x42c   : > { %v2500_v13 = vsel %vm2481_vm0, 0.0, %v2422_v10 }
 0x42d   : > { %v2533_v46 = vsel %vm2514_vm1, %v2500_v13, 0.0 }
 0x42e   : > { %v2565_v32 = vadd.f32 %v2533_v46, %v4988_v54 }
 0x430   : > { %2597 = vst [vmem:[%s4537_s10 + $0x90] sm:$0xff] %v2565_v32 }
 0x433   : > { %v2424_v12 = vpop.permute.xlu1 %2423 }
 0x434   : > { %v2501_v21 = vsel %vm2481_vm0, 0.0, %v2424_v12 }
 0x435   : > { %v2534_v3 = vsel %vm2514_vm1, %v2501_v21, 0.0 }
 0x436   : > { %v2566_v57 = vadd.f32 %v2534_v3, %v4989_v43 }
 0x438   : > { %2598 = vst [vmem:[%s4537_s10 + $0x98] sm:$0xff] %v2566_v57 }
 0x43b   : > { %v2432_v38 = vpop.permute.xlu2 %2431 }
 0x43c   : > { %v2505_v23 = vsel %vm2481_vm0, 0.0, %v2432_v38 }
 0x43d   : > { %v2538_v35 = vsel %vm2514_vm1, %v2505_v23, 0.0 }
 0x43e   : > { %v2570_v51 = vadd.f32 %v2538_v35, %v4990_v41 }
 0x440   : > { %2602 = vst [vmem:[%s4537_s10 + $0xb8] sm:$0xff] %v2570_v51 }
 0x443   : > { %v2428_v49 = vpop.permute.xlu0 %2427 }
 0x444   : > { %v2503_v40 = vsel %vm2481_vm0, 0.0, %v2428_v49 }
 0x445   : > { %v2536_v61 = vsel %vm2514_vm1, %v2503_v40, 0.0 }
 0x446   : > { %v2568_v18 = vadd.f32 %v2536_v61, %v4991_v34 }
 0x448   : > { %2600 = vst [vmem:[%s4537_s10 + $0xa8] sm:$0xff] %v2568_v18 }
 0x44b   : > { %v2430_v5 = vpop.permute.xlu1 %2429 }
 0x44c   : > { %v2504_v24 = vsel %vm2481_vm0, 0.0, %v2430_v5 }
 0x44d   : > { %v2537_v50 = vsel %vm2514_vm1, %v2504_v24, 0.0 }
 0x44e   : > { %v2569_v2 = vadd.f32 %v2537_v50, %v4992_v11 }
 0x450   : > { %2601 = vst [vmem:[%s4537_s10 + $0xb0] sm:$0xff] %v2569_v2 }
 0x453   : > { %v2438_v0 = vpop.permute.xlu2 %2437 }
 0x454   : > { %v2508_v1 = vsel %vm2481_vm0, 0.0, %v2438_v0 }
 0x455   : > { %v2541_v63 = vsel %vm2514_vm1, %v2508_v1, 0.0 }
 0x456   : > { %v2573_v58 = vadd.f32 %v2541_v63, %v4993_v6 }
 0x458   : > { %2605 = vst [vmem:[%s4537_s10 + $0xd0] sm:$0xff] %v2573_v58 }
 0x45b   : > { %v2434_v28 = vpop.permute.xlu0 %2433 }
 0x45c   : > { %v2506_v37 = vsel %vm2481_vm0, 0.0, %v2434_v28 }
 0x45d   : > { %v2539_v25 = vsel %vm2514_vm1, %v2506_v37, 0.0 }
 0x45e   : > { %v2571_v56 = vadd.f32 %v2539_v25, %v4994_v45 }
 0x460   : > { %2603 = vst [vmem:[%s4537_s10 + $0xc0] sm:$0xff] %v2571_v56 }
 0x463   : > { %v2436_v17 = vpop.permute.xlu1 %2435 }
 0x464   : > { %v2507_v20 = vsel %vm2481_vm0, 0.0, %v2436_v17 }
 0x465   : > { %v2540_v53 = vsel %vm2514_vm1, %v2507_v20, 0.0 }
 0x466   : > { %v2572_v44 = vadd.f32 %v2540_v53, %v4995_v31 }
 0x468   : > { %2604 = vst [vmem:[%s4537_s10 + $0xc8] sm:$0xff] %v2572_v44 }
 0x46b   : > { %v2444_v8 = vpop.permute.xlu2 %2443 }
 0x46c   : > { %v2511_v52 = vsel %vm2481_vm0, 0.0, %v2444_v8 }
 0x46d   : > { %v2544_v36 = vsel %vm2514_vm1, %v2511_v52, 0.0 }
 0x46e   : > { %v2576_v60 = vadd.f32 %v2544_v36, %v4996_v15 }
 0x470   : > { %2608 = vst [vmem:[%s4537_s10 + $0xe8] sm:$0xff] %v2576_v60 }
 0x473   : > { %v2440_v27 = vpop.permute.xlu0 %2439 }
 0x474   : > { %v2509_v39 = vsel %vm2481_vm0, 0.0, %v2440_v27 }
 0x475   : > { %v2542_v30 = vsel %vm2514_vm1, %v2509_v39, 0.0 }
 0x476   : > { %v2574_v14 = vadd.f32 %v2542_v30, %v4997_v26 }
 0x478   : > { %2606 = vst [vmem:[%s4537_s10 + $0xd8] sm:$0xff] %v2574_v14 }
 0x47b   : > { %v2442_v62 = vpop.permute.xlu1 %2441 }
 0x47c   : > { %v2510_v55 = vsel %vm2481_vm0, 0.0, %v2442_v62 }
 0x47d   : > { %v2543_v59 = vsel %vm2514_vm1, %v2510_v55, 0.0 }
 0x47e   : > { %v2575_v19 = vadd.f32 %v2543_v59, %v4998_v33 }
 0x480   : > { %2607 = vst [vmem:[%s4537_s10 + $0xe0] sm:$0xff] %v2575_v19 }
 0x48b   : > { %v2446_v47 = vpop.permute.xlu0 %2445 }
 0x48c   : > { %v2512_v42 = vsel %vm2481_vm0, 0.0, %v2446_v47 }
 0x48d   : > { %v2545_v9 = vsel %vm2514_vm1, %v2512_v42, 0.0 }
 0x48e   : > { %v2577_v48 = vadd.f32 %v2545_v9, %v4999_v16 }
 0x490   : > { %2609 = vst [vmem:[%s4537_s10 + $0xf0] sm:$0xff] %v2577_v48 }
 0x493   : > { %v2448_v22 = vpop.permute.xlu1 %2447 }
 0x494   : > { %v2513_v4 = vsel %vm2481_vm0, 0.0, %v2448_v22 }
 0x495   : > { %v2546_v29 = vsel %vm2514_vm1, %v2513_v4, 0.0 }
 0x496   : > { %v2578_v10 = vadd.f32 %v2546_v29, %v5000_v7 }
 0x498   : > { %2610 = vst [vmem:[%s4537_s10 + $0xf8] sm:$0xff] %v2578_v10 }
 0x499 PF: > { %s15_s18 = sadd.s32 1, %s2857_s18  }
 0x49a   : > { %p12_p4 = scmp.ge.s32.totalorder %s15_s18, 4  }
 0x49c   :  { %14 = sbr.rel (!%p12_p4) target bundleno = 1 (0x1), region = 80 }

// kernel: dense_block_pallas.4
= control target key start
LH: loop header
LB: loop body
LE: loop exit
PB: predicated region body
PF: predicated region fallthrough
CT: control target
= control target key end

     0   :  { %s2891_s18 = smov 0   ;;  %s4737_s0 = inlined_call_operand.vmem [shape: f32[2,16,16,128], index: 0, kind: input, shape index: {}, may-alias: {0,5}]   ;;  %s4738_s1 = inlined_call_operand.vmem [shape: f32[2,128], index: 1, kind: input, shape index: {}]   ;;  %s4739_s2 = inlined_call_operand.vmem [shape: f32[128,128], index: 2, kind: input, shape index: {}]   ;;  %s4740_s3 = inlined_call_operand.vmem [shape: f32[2,128], index: 3, kind: input, shape index: {}]   ;;  %s4741_s4 = inlined_call_operand.vmem [shape: f32[9,128,4], index: 4, kind: input, shape index: {}]   ;;  %s4742_s5 = inlined_call_operand.vmem [shape: f32[2,16,16,128], index: 5, kind: output, shape index: {}, may-alias: {0,5}]  }
   0x1 LB: > { %s2666_s19 = sadd.s32 4294967295, %s2857_s18   ;;  %p2670_p0 = scmp.ge.s32.totalorder %s2857_s18, 1  ;;  %s2857_s18 = sphi %s2891_s18, %s15_s18  }
   0x2   : > { %p187_p1 = scmp.lt.s32.totalorder %s2857_s18, 3 }
   0x4   : > { %p188_p2 = pnand %p2670_p0, %p187_p1 }
   0x6   : > { %191 = sbr.rel (%p188_p2) target bundleno = 1177 (0x499), region = 40 }
   0xb   : > { %v371_v0 = vld [vmem:[%s4739_s2 + $0x78] sm:$0xff]  ;;  %v370_v1 = vld [vmem:[%s4739_s2 + $0x70] sm:$0xff]  ;;  %v369_v2 = vld [vmem:[%s4739_s2 + $0x68] sm:$0xff]  ;;  %p215_p3 = scmp.lt.s32.totalorder %s2666_s19, 1  ;;  %s2860_s6 = smov 8   ;;  %vm2481_vm0 = vcmask 64512  }
   0xc   : > { %372 = vmatpush.msra.mxu0 %v371_v0  ;;  %2807 = vmatpush.msra.mxu2 %v371_v0  ;;  %v368_v3 = vld [vmem:[%s4739_s2 + $0x60] sm:$0xff]  ;;  %v367_v4 = vld [vmem:[%s4739_s2 + $0x58] sm:$0xff]  ;;  %v366_v5 = vld [vmem:[%s4739_s2 + $0x50] sm:$0xff]  ;;  %vm2514_vm1 = vcmask 97280  }
   0xd   : > { %s5002_s19 = smov (!%p215_p3, %s2666_s19), 1  ;;  %v365_v6 = vld [vmem:[%s4739_s2 + $0x48] sm:$0xff]  ;;  %v364_v7 = vld [vmem:[%s4739_s2 + $0x40] sm:$0xff]  ;;  %v363_v9 = vld [vmem:[%s4739_s2 + $0x38] sm:$0xff] }
   0xe   : > { %373 = vmatpush.msra.mxu0 %v370_v1  ;;  %2808 = vmatpush.msra.mxu2 %v370_v1  ;;  %s2805_s9 = sshll.u32 %s5002_s19, 8  ;;  %v257_v8 = vld [vmem:[%s4738_s1] sm:$0x3]  ;;  %v362_v10 = vld [vmem:[%s4739_s2 + $0x30] sm:$0xff]  ;;  %v361_v14 = vld [vmem:[%s4739_s2 + $0x28] sm:$0xff] }
   0xf   : > { %s2937_s20 = scalar_lea.vmem %s4737_s0, %s2805_s9  ;;  %v2942_v11 = vperm.slane %v257_v8, 0  ;;  %v360_v15 = vld [vmem:[%s4739_s2 + $0x20] sm:$0xff]  ;;  %v2955_v17 = vperm.slane %v257_v8, 1  ;;  %v359_v19 = vld [vmem:[%s4739_s2 + $0x18] sm:$0xff]  ;;  %v358_v20 = vld [vmem:[%s4739_s2 + $0x10] sm:$0xff]  ;;  %s4537_s10 = scalar_lea.vmem %s4742_s5, %s2805_s9 }
  0x10   : > { %374 = vmatpush.msra.mxu0 %v369_v2  ;;  %2809 = vmatpush.msra.mxu2 %v369_v2  ;;  %v225_v12 = vld [vmem:[%s2937_s20] sm:$0xff]  ;;  %v2968_v23 = vld [vmem:[%s2937_s20 + $0x8] sm:$0xff]  ;;  %v2986_v33 = vld [vmem:[%s2937_s20 + $0x10] sm:$0xff] }
  0x11   : > { %v2946_v13 = vld [vmem:[%s2937_s20 + $0x80] sm:$0xff]  ;;  %v259_v16 = vmul.f32 %v2942_v11, %v225_v12  ;;  %4794 = vst [vmem:[#allocation4_spill] sm:$0xff] %v2968_v23  ;;  %v2971_v24 = vld [vmem:[%s2937_s20 + $0x88] sm:$0xff]  ;;  %v260_v29 = vmul.f32 %v2942_v11, %v2968_v23  ;;  %v2989_v34 = vld [vmem:[%s2937_s20 + $0x90] sm:$0xff]  ;;  %v261_v37 = vmul.f32 %v2942_v11, %v2986_v33 }
  0x12   : > { %375 = vmatpush.msra.mxu0 %v368_v3  ;;  %2810 = vmatpush.msra.mxu2 %v368_v3  ;;  %4793 = vst [vmem:[#allocation3_spill] sm:$0xff] %v2946_v13  ;;  %v275_v18 = vmul.f32 %v2942_v11, %v2946_v13  ;;  %v357_v25 = vld [vmem:[%s4739_s2 + $0x8] sm:$0xff]  ;;  %v356_v26 = vld [vmem:[%s4739_s2] sm:$0xff]  ;;  %v276_v30 = vmul.f32 %v2942_v11, %v2971_v24  ;;  %v2998_v41 = vld [vmem:[%s2937_s20 + $0x18] sm:$0xff] }
  0x13   : > { %v292_v21 = vadd.f32 %v2955_v17, %v259_v16  ;;  %4795 = vst [vmem:[#allocation5_spill] sm:$0xff] %v2971_v24  ;;  %v293_v31 = vadd.f32 %v2955_v17, %v260_v29  ;;  %v277_v38 = vmul.f32 %v2942_v11, %v2989_v34  ;;  %v294_v39 = vadd.f32 %v2955_v17, %v261_v37  ;;  %v3001_v42 = vld [vmem:[%s2937_s20 + $0x98] sm:$0xff]  ;;  %v3010_v49 = vld [vmem:[%s2937_s20 + $0x20] sm:$0xff]  ;;  %v3022_v57 = vld [vmem:[%s2937_s20 + $0x28] sm:$0xff] }
  0x14   : > { %376 = vmatpush.msra.mxu0 %v367_v4  ;;  %2811 = vmatpush.msra.mxu2 %v367_v4  ;;  %v308_v22 = vadd.f32 %v2955_v17, %v275_v18  ;;  %v309_v32 = vadd.f32 %v2955_v17, %v276_v30  ;;  %4796 = vst [vmem:[#allocation6_spill] sm:$0xff] %v2986_v33  ;;  %v3013_v50 = vld [vmem:[%s2937_s20 + $0xa0] sm:$0xff]  ;;  %v3025_v58 = vld [vmem:[%s2937_s20 + $0xa8] sm:$0xff]  ;;  %v3034_v1 = vld [vmem:[%s2937_s20 + $0x30] sm:$0xff] }
  0x15   : > { %v324_v27 = vmax.f32 %v292_v21, 0.0  ;;  %4797 = vst [vmem:[#allocation7_spill] sm:$0xff] %v2989_v34  ;;  %v325_v35 = vmax.f32 %v293_v31, 0.0  ;;  %v310_v40 = vadd.f32 %v2955_v17, %v277_v38  ;;  %v326_v43 = vmax.f32 %v294_v39, 0.0  ;;  %v3037_v2 = vld [vmem:[%s2937_s20 + $0xb0] sm:$0xff]  ;;  %v3061_v21 = vld [vmem:[%s2937_s20 + $0xc0] sm:$0xff] }
  0x16   : > { %377 = vmatpush.msra.mxu0 %v366_v5  ;;  %2812 = vmatpush.msra.mxu2 %v366_v5  ;;  %v340_v28 = vmax.f32 %v308_v22, 0.0  ;;  %v341_v36 = vmax.f32 %v309_v32, 0.0  ;;  %4798 = vst [vmem:[#allocation8_spill] sm:$0xff] %v2998_v41  ;;  %v262_v45 = vmul.f32 %v2942_v11, %v2998_v41  ;;  %v278_v46 = vmul.f32 %v2942_v11, %v3001_v42  ;;  %v2689_v29 = vld [vmem:[%s4741_s4 + $0xf0] sm:$0xff]  ;;  %v2688_v32 = vld [vmem:[%s4741_s4 + $0xe8] sm:$0xff]  ;;  %v2687_v37 = vld [vmem:[%s4741_s4 + $0xe0] sm:$0xff] }
  0x17   : > { %4799 = vst [vmem:[#allocation9_spill] sm:$0xff] %v3001_v42  ;;  %v342_v44 = vmax.f32 %v310_v40, 0.0  ;;  %v263_v53 = vmul.f32 %v2942_v11, %v3010_v49  ;;  %v279_v54 = vmul.f32 %v2942_v11, %v3013_v50  ;;  %v264_v61 = vmul.f32 %v2942_v11, %v3022_v57 }
  0x18   : > { %378 = vmatpush.msra.mxu0 %v365_v6  ;;  %2813 = vmatpush.msra.mxu2 %v365_v6  ;;  %v295_v47 = vadd.f32 %v2955_v17, %v262_v45  ;;  %v311_v48 = vadd.f32 %v2955_v17, %v278_v46  ;;  %4800 = vst [vmem:[#allocation10_spill] sm:$0xff] %v3010_v49  ;;  %v2685_v45 = vld [vmem:[%s4741_s4 + $0xd0] sm:$0xff] }
  0x19   : > { %4801 = vst [vmem:[#allocation11_spill] sm:$0xff] %v3013_v50  ;;  %v296_v55 = vadd.f32 %v2955_v17, %v263_v53  ;;  %v312_v56 = vadd.f32 %v2955_v17, %v279_v54  ;;  %v280_v62 = vmul.f32 %v2942_v11, %v3025_v58  ;;  %v297_v63 = vadd.f32 %v2955_v17, %v264_v61  ;;  %v3109_v53 = vld [vmem:[%s2937_s20 + $0xd0] sm:$0xff]  ;;  %v716_v54 = vld [vmem:[%s4741_s4 + $0x68] sm:$0xff] }
  0x1a   : > { %379 = vmatpush.msra.mxu0 %v364_v7  ;;  %2814 = vmatpush.msra.mxu2 %v364_v7  ;;  %v327_v51 = vmax.f32 %v295_v47, 0.0  ;;  %v343_v52 = vmax.f32 %v311_v48, 0.0  ;;  %4802 = vst [vmem:[#allocation12_spill] sm:$0xff] %v3022_v57  ;;  %v265_v5 = vmul.f32 %v2942_v11, %v3034_v1  ;;  %v281_v6 = vmul.f32 %v2942_v11, %v3037_v2  ;;  %v718_v48 = vld [vmem:[%s4741_s4 + $0x78] sm:$0xff] }
  0x1b   : > { %4803 = vst [vmem:[#allocation13_spill] sm:$0xff] %v3025_v58  ;;  %v328_v59 = vmax.f32 %v296_v55, 0.0  ;;  %v344_v60 = vmax.f32 %v312_v56, 0.0  ;;  %v313_v0 = vadd.f32 %v2955_v17, %v280_v62  ;;  %v329_v3 = vmax.f32 %v297_v63, 0.0  ;;  %v2684_v55 = vld [vmem:[%s4741_s4 + $0xc8] sm:$0xff]  ;;  %v2683_v56 = vld [vmem:[%s4741_s4 + $0xc0] sm:$0xff] }
  0x1c   : > { %380 = vmatpush.msra.mxu0 %v363_v9  ;;  %2815 = vmatpush.msra.mxu2 %v363_v9  ;;  %4804 = vst [vmem:[#allocation14_spill] sm:$0xff] %v3034_v1  ;;  %v298_v7 = vadd.f32 %v2955_v17, %v265_v5  ;;  %v314_v8 = vadd.f32 %v2955_v17, %v281_v6  ;;  %v3046_v9 = vld [vmem:[%s2937_s20 + $0x38] sm:$0xff]  ;;  %v715_v63 = vld [vmem:[%s4741_s4 + $0x60] sm:$0xff] }
  0x1d   : > { %4805 = vst [vmem:[#allocation15_spill] sm:$0xff] %v3037_v2  ;;  %v345_v4 = vmax.f32 %v313_v0, 0.0  ;;  %v285_v62 = vmul.f32 %v2942_v11, %v3109_v53  ;;  %v2682_v0 = vld [vmem:[%s4741_s4 + $0xb8] sm:$0xff] }
  0x1e   : > { %381 = vmatpush.msra.mxu0 %v362_v10  ;;  %2816 = vmatpush.msra.mxu2 %v362_v10  ;;  %4806 = vst [vmem:[#allocation16_spill] sm:$0xff] %v3046_v9  ;;  %v3049_v10 = vld [vmem:[%s2937_s20 + $0xb8] sm:$0xff]  ;;  %v330_v12 = vmax.f32 %v298_v7, 0.0 }
  0x1f   : > { %4807 = vst [vmem:[#allocation17_spill] sm:$0xff] %v3049_v10  ;;  %v282_v16 = vmul.f32 %v2942_v11, %v3049_v10  ;;  %v318_v5 = vadd.f32 %v2955_v17, %v285_v62  ;;  %v3136_v6 = vld [vmem:[%s2937_s20 + $0x58] sm:$0xff] }
  0x20   : > { %382 = vmatpush.msra.mxu0 %v361_v14  ;;  %2817 = vmatpush.msra.mxu2 %v361_v14  ;;  %v346_v14 = vmax.f32 %v314_v8, 0.0  ;;  %4809 = vst [vmem:[#allocation19_spill] sm:$0xff] %v3061_v21  ;;  %v714_v7 = vld [vmem:[%s4741_s4 + $0x58] sm:$0xff]  ;;  %v713_v8 = vld [vmem:[%s4741_s4 + $0x50] sm:$0xff] }
  0x21   : > { %4813 = vst [vmem:[#allocation23_spill] sm:$0xff] %v3109_v53 }
  0x22   : > { %383 = vmatpush.msra.mxu0 %v360_v15  ;;  %2818 = vmatpush.msra.mxu2 %v360_v15  ;;  %v266_v15 = vmul.f32 %v2942_v11, %v3046_v9  ;;  %4814 = vst [vmem:[#allocation24_spill] sm:$0xff] %v3136_v6 }
  0x24   : > { %384 = vmatpush.msra.mxu0 %v359_v19  ;;  %2819 = vmatpush.msra.mxu2 %v359_v19  ;;  %v299_v18 = vadd.f32 %v2955_v17, %v266_v15  ;;  %v315_v19 = vadd.f32 %v2955_v17, %v282_v16  ;;  %v2721_v15 = vld [vmem:[%s4741_s4 + $0x1f0] sm:$0xff]  ;;  %v712_v16 = vld [vmem:[%s4741_s4 + $0x48] sm:$0xff] }
  0x26   : > { %385 = vmatpush.msra.mxu0 %v358_v20  ;;  %2820 = vmatpush.msra.mxu2 %v358_v20  ;;  %v3058_v20 = vld [vmem:[%s2937_s20 + $0x40] sm:$0xff]  ;;  %v331_v22 = vmax.f32 %v299_v18, 0.0  ;;  %v2680_v18 = vld [vmem:[%s4741_s4 + $0xa8] sm:$0xff] }
  0x27   : > { %4808 = vst [vmem:[#allocation18_spill] sm:$0xff] %v3058_v20 }
  0x28   : > { %386 = vmatpush.msra.mxu0 %v357_v25  ;;  %2821 = vmatpush.msra.mxu2 %v357_v25  ;;  %v347_v25 = vmax.f32 %v315_v19, 0.0  ;;  %v2679_v19 = vld [vmem:[%s4741_s4 + $0xa0] sm:$0xff] }
  0x2a   : > { %387 = vmatpush.msra.mxu0 %v356_v26  ;;  %2822 = vmatpush.msra.mxu2 %v356_v26  ;;  %v267_v26 = vmul.f32 %v2942_v11, %v3058_v20 }
  0x2b   : > { %388 = vmatmul.f32.vlgmr.msra.gmra.mxu0 %v324_v27  ;;  %436 = vmatmul.f32.vlgmr.msra.gmra.mxu2 %v340_v28  ;;  %v283_v27 = vmul.f32 %v2942_v11, %v3061_v21  ;;  %v2690_v28 = vld [vmem:[%s4741_s4 + $0xf8] sm:$0xff] }
  0x2c   : > { %768 = vmatpush.msra.mxu1 %v2690_v28  ;;  %2823 = vmatpush.msra.mxu3 %v2690_v28  ;;  %v300_v30 = vadd.f32 %v2955_v17, %v267_v26  ;;  %v270_v26 = vmul.f32 %v2942_v11, %v3136_v6  ;;  %v711_v28 = vld [vmem:[%s4741_s4 + $0x40] sm:$0xff] }
  0x2d   : > { %v316_v31 = vadd.f32 %v2955_v17, %v283_v27  ;;  %881 = vmatpush.msrb.mxu2 %v718_v48  ;;  %v2676_v48 = vld [vmem:[%s4741_s4 + $0x88] sm:$0xff] }
  0x2e   : > { %769 = vmatpush.msra.mxu1 %v2689_v29  ;;  %2824 = vmatpush.msra.mxu3 %v2689_v29  ;;  %v332_v38 = vmax.f32 %v300_v30, 0.0  ;;  %v2678_v29 = vld [vmem:[%s4741_s4 + $0x98] sm:$0xff]  ;;  %v2859_v30 = vmov 0.0  }
  0x2f   : > { %v348_v39 = vmax.f32 %v316_v31, 0.0  ;;  %584 = vst [vmem:[#allocation2] sm:$0xff] %v2859_v30  ;;  %v2677_v31 = vld [vmem:[%s4741_s4 + $0x90] sm:$0xff] }
  0x30   : > { %770 = vmatpush.msra.mxu1 %v2688_v32  ;;  %2825 = vmatpush.msra.mxu3 %v2688_v32  ;;  %585 = vst [vmem:[#allocation2 + $0x8] sm:$0xff] %v2859_v30  ;;  %v303_v32 = vadd.f32 %v2955_v17, %v270_v26  ;;  %v703_v26 = vld [vmem:[%s4741_s4] sm:$0xff] }
  0x31   : > { %586 = vst [vmem:[#allocation2 + $0x10] sm:$0x3] %v2859_v30 }
  0x32   : > { %771 = vmatpush.msra.mxu1 %v2687_v37  ;;  %2826 = vmatpush.msra.mxu3 %v2687_v37  ;;  %587 = vst [vmem:[#allocation2 + $0x18] sm:$0xff] %v2859_v30 }
  0x33   : > { %391 = vmatmul.f32.gmra.mxu0 %v325_v35  ;;  %439 = vmatmul.f32.gmra.mxu2 %v341_v36  ;;  %v3079_v35 = vld [vmem:[%s2937_s20 + $0x48] sm:$0xff]  ;;  %588 = vst [vmem:[#allocation2 + $0x20] sm:$0xff] %v2859_v30 }
  0x34   : > { %4810 = vst [vmem:[#allocation20_spill] sm:$0xff] %v3079_v35  ;;  %v3082_v36 = vld [vmem:[%s2937_s20 + $0xc8] sm:$0xff]  ;;  %v268_v40 = vmul.f32 %v2942_v11, %v3079_v35 }
  0x35   : > { %4811 = vst [vmem:[#allocation21_spill] sm:$0xff] %v3082_v36 }
  0x36   : > { %v301_v46 = vadd.f32 %v2955_v17, %v268_v40  ;;  %v709_v40 = vld [vmem:[%s4741_s4 + $0x30] sm:$0xff]  ;;  %589 = vst [vmem:[#allocation2 + $0x28] sm:$0x3] %v2859_v30 }
  0x37   : > { %590 = vst [vmem:[#allocation2 + $0x30] sm:$0xff] %v2859_v30  ;;  %v719_v62 = vld [vmem:[#allocation2 + $0x1] sm:$0xff] }
  0x38   : > { %591 = vst [vmem:[#allocation2 + $0x38] sm:$0xff] %v2859_v30 }
  0x39   : > { %592 = vst [vmem:[#allocation2 + $0x40] sm:$0x3] %v2859_v30 }
  0x3a   : > { %593 = vst [vmem:[#allocation2 + $0x48] sm:$0xff] %v2859_v30 }
  0x3b   : > { %394 = vmatmul.f32.gmra.mxu0 %v326_v43  ;;  %442 = vmatmul.f32.gmra.mxu2 %v342_v44  ;;  %v284_v43 = vmul.f32 %v2942_v11, %v3082_v36  ;;  %v2686_v44 = vld [vmem:[%s4741_s4 + $0xd8] sm:$0xff]  ;;  %594 = vst [vmem:[#allocation2 + $0x50] sm:$0xff] %v2859_v30 }
  0x3c   : > { %772 = vmatpush.msra.mxu1 %v2686_v44  ;;  %2827 = vmatpush.msra.mxu3 %v2686_v44  ;;  %v3195_v44 = vld [vmem:[%s2937_s20 + $0xe0] sm:$0xff]  ;;  %595 = vst [vmem:[#allocation2 + $0x58] sm:$0x3] %v2859_v30 }
  0x3d   : > { %v317_v47 = vadd.f32 %v2955_v17, %v284_v43  ;;  %v3192_v43 = vld [vmem:[%s2937_s20 + $0x60] sm:$0xff]  ;;  %4817 = vst [vmem:[#allocation27_spill] sm:$0xff] %v3195_v44 }
  0x3e   : > { %773 = vmatpush.msra.mxu1 %v2685_v45  ;;  %2828 = vmatpush.msra.mxu3 %v2685_v45  ;;  %4816 = vst [vmem:[#allocation26_spill] sm:$0xff] %v3192_v43  ;;  %v2719_v45 = vld [vmem:[%s4741_s4 + $0x1e0] sm:$0xff] }
  0x3f   : > { %596 = vst [vmem:[#allocation2 + $0x60] sm:$0xff] %v2859_v30 }
  0x40   : > { %774 = vmatpush.msra.mxu1 %v2684_v55  ;;  %2829 = vmatpush.msra.mxu3 %v2684_v55  ;;  %597 = vst [vmem:[#allocation2 + $0x68] sm:$0xff] %v2859_v30 }
  0x41   : > { %598 = vst [vmem:[#allocation2 + $0x70] sm:$0x3] %v2859_v30 }
  0x42   : > { %775 = vmatpush.msra.mxu1 %v2683_v56  ;;  %2830 = vmatpush.msra.mxu3 %v2683_v56  ;;  %v271_v56 = vmul.f32 %v2942_v11, %v3192_v43  ;;  %599 = vst [vmem:[#allocation2 + $0x78] sm:$0xff] %v2859_v30 }
  0x43   : > { %397 = vmatmul.f32.gmra.mxu0 %v327_v51  ;;  %445 = vmatmul.f32.gmra.mxu2 %v343_v52  ;;  %v717_v51 = vld [vmem:[%s4741_s4 + $0x70] sm:$0xff]  ;;  %600 = vst [vmem:[#allocation2 + $0x80] sm:$0xff] %v2859_v30 }
  0x44   : > { %v3106_v52 = vld [vmem:[%s2937_s20 + $0x50] sm:$0xff]  ;;  %882 = vmatpush.msrb.mxu2 %v717_v51  ;;  %776 = vmatpush.msra.mxu1 %v2682_v0  ;;  %v2675_v51 = vld [vmem:[%s4741_s4 + $0x80] sm:$0xff]  ;;  %601 = vst [vmem:[#allocation2 + $0x88] sm:$0x3] %v2859_v30 }
  0x45   : > { %4812 = vst [vmem:[#allocation22_spill] sm:$0xff] %v3106_v52  ;;  %v269_v61 = vmul.f32 %v2942_v11, %v3106_v52  ;;  %2831 = vmatpush.msra.mxu3 %v2682_v0 }
  0x46   : > { %883 = vmatpush.msrb.mxu2 %v716_v54  ;;  %v335_v54 = vmax.f32 %v303_v32, 0.0  ;;  %602 = vst [vmem:[#allocation2 + $0x90] sm:$0xff] %v2859_v30  ;;  %v2712_v32 = vld [vmem:[%s4741_s4 + $0x1a8] sm:$0xff] }
  0x47   : > { %603 = vst [vmem:[#allocation2 + $0x98] sm:$0xff] %v2859_v30 }
  0x48   : > { %884 = vmatpush.msrb.mxu2 %v715_v63  ;;  %v304_v63 = vadd.f32 %v2955_v17, %v271_v56  ;;  %604 = vst [vmem:[#allocation2 + $0xa0] sm:$0x3] %v2859_v30  ;;  %v2708_v56 = vld [vmem:[%s4741_s4 + $0x188] sm:$0xff] }
  0x49   : > { %605 = vst [vmem:[#allocation2 + $0xa8] sm:$0xff] %v2859_v30 }
  0x4a   : > { %885 = vmatpush.msrb.mxu2 %v714_v7  ;;  %v3242_v7 = vld [vmem:[%s2937_s20 + $0x68] sm:$0xff]  ;;  %606 = vst [vmem:[#allocation2 + $0xb0] sm:$0xff] %v2859_v30 }
  0x4b   : > { %400 = vmatmul.f32.gmra.mxu0 %v328_v59  ;;  %448 = vmatmul.f32.gmra.mxu2 %v344_v60  ;;  %v333_v59 = vmax.f32 %v301_v46, 0.0  ;;  %v349_v60 = vmax.f32 %v317_v47, 0.0  ;;  %v708_v46 = vld [vmem:[%s4741_s4 + $0x28] sm:$0xff]  ;;  %v2718_v47 = vld [vmem:[%s4741_s4 + $0x1d8] sm:$0xff]  ;;  %4818 = vst [vmem:[#allocation28_spill] sm:$0xff] %v3242_v7 }
  0x4c   : > { %886 = vmatpush.msrb.mxu2 %v713_v8  ;;  %v3245_v8 = vld [vmem:[%s2937_s20 + $0xe8] sm:$0xff]  ;;  %607 = vst [vmem:[#allocation2 + $0xb8] sm:$0x3] %v2859_v30 }
  0x4d   : > { %4819 = vst [vmem:[#allocation29_spill] sm:$0xff] %v3245_v8 }
  0x4e   : > { %887 = vmatpush.msrb.mxu2 %v712_v16  ;;  %608 = vst [vmem:[#allocation2 + $0xc0] sm:$0xff] %v2859_v30 }
  0x4f   : > { %609 = vst [vmem:[#allocation2 + $0xc8] sm:$0xff] %v2859_v30 }
  0x50   : > { %888 = vmatpush.msrb.mxu2 %v711_v28  ;;  %v720_v28 = vld [vmem:[#allocation2 + $0x9] sm:$0xff]  ;;  %610 = vst [vmem:[#allocation2 + $0xd0] sm:$0x3] %v2859_v30 }
  0x51   : > { %611 = vst [vmem:[#allocation2 + $0xd8] sm:$0xff] %v2859_v30 }
  0x52   : > { %612 = vst [vmem:[#allocation2 + $0xe0] sm:$0xff] %v2859_v30 }
  0x53   : > { %403 = vmatmul.f32.gmra.mxu0 %v329_v3  ;;  %451 = vmatmul.f32.gmra.mxu2 %v345_v4  ;;  %v2681_v3 = vld [vmem:[%s4741_s4 + $0xb0] sm:$0xff]  ;;  %v302_v4 = vadd.f32 %v2955_v17, %v269_v61  ;;  %613 = vst [vmem:[#allocation2 + $0xe8] sm:$0x3] %v2859_v30 }
  0x54   : > { %777 = vmatpush.msra.mxu1 %v2681_v3  ;;  %2832 = vmatpush.msra.mxu3 %v2681_v3  ;;  %v2717_v61 = vld [vmem:[%s4741_s4 + $0x1d0] sm:$0xff]  ;;  %v706_v3 = vld [vmem:[%s4741_s4 + $0x18] sm:$0xff]  ;;  %614 = vst [vmem:[#allocation2 + $0xf0] sm:$0xff] %v2859_v30 }
  0x55   : > { %615 = vst [vmem:[#allocation2 + $0xf8] sm:$0xff] %v2859_v30 }
  0x56   : > { %778 = vmatpush.msra.mxu1 %v2680_v18  ;;  %2833 = vmatpush.msra.mxu3 %v2680_v18  ;;  %v272_v18 = vmul.f32 %v2942_v11, %v3242_v7  ;;  %616 = vst [vmem:[#allocation2 + $0x100] sm:$0x3] %v2859_v30 }
  0x57   : > { %617 = vst [vmem:[#allocation2 + $0x108] sm:$0xff] %v2859_v30 }
  0x58   : > { %779 = vmatpush.msra.mxu1 %v2679_v19  ;;  %2834 = vmatpush.msra.mxu3 %v2679_v19  ;;  %v288_v19 = vmul.f32 %v2942_v11, %v3245_v8  ;;  %618 = vst [vmem:[#allocation2 + $0x110] sm:$0xff] %v2859_v30 }
  0x59   : > { %619 = vst [vmem:[#allocation2 + $0x118] sm:$0x3] %v2859_v30 }
  0x5a   : > { %780 = vmatpush.msra.mxu1 %v2678_v29  ;;  %2835 = vmatpush.msra.mxu3 %v2678_v29  ;;  %v305_v29 = vadd.f32 %v2955_v17, %v272_v18  ;;  %620 = vst [vmem:[#allocation2 + $0x120] sm:$0xff] %v2859_v30 }
  0x5b   : > { %406 = vmatmul.f32.gmra.mxu0 %v330_v12  ;;  %454 = vmatmul.f32.gmra.mxu2 %v346_v14  ;;  %v3145_v12 = vld [vmem:[%s2937_s20 + $0xd8] sm:$0xff]  ;;  %621 = vst [vmem:[#allocation2 + $0x128] sm:$0xff] %v2859_v30 }
  0x5c   : > { %4815 = vst [vmem:[#allocation25_spill] sm:$0xff] %v3145_v12  ;;  %v2722_v14 = vld [vmem:[%s4741_s4 + $0x1f8] sm:$0xff]  ;;  %v286_v27 = vmul.f32 %v2942_v11, %v3145_v12  ;;  %781 = vmatpush.msra.mxu1 %v2677_v31  ;;  %2836 = vmatpush.msra.mxu3 %v2677_v31  ;;  %v321_v31 = vadd.f32 %v2955_v17, %v288_v19 }
  0x5d   : > { %1237 = vmatpush.msrb.mxu0 %v2722_v14  ;;  %v2715_v14 = vld [vmem:[%s4741_s4 + $0x1c0] sm:$0xff]  ;;  %622 = vst [vmem:[#allocation2 + $0x130] sm:$0x3] %v2859_v30 }
  0x5e   : > { %v319_v37 = vadd.f32 %v2955_v17, %v286_v27  ;;  %782 = vmatpush.msra.mxu1 %v2676_v48  ;;  %2837 = vmatpush.msra.mxu3 %v2676_v48  ;;  %v2713_v27 = vld [vmem:[%s4741_s4 + $0x1b0] sm:$0xff]  ;;  %v2710_v48 = vld [vmem:[%s4741_s4 + $0x198] sm:$0xff]  ;;  %623 = vst [vmem:[#allocation2 + $0x138] sm:$0xff] %v2859_v30 }
  0x5f   : > { %1238 = vmatpush.msrb.mxu0 %v2721_v15  ;;  %v336_v15 = vmax.f32 %v304_v63, 0.0  ;;  %624 = vst [vmem:[#allocation2 + $0x140] sm:$0xff] %v2859_v30 }
  0x60   : > { %v351_v55 = vmax.f32 %v319_v37, 0.0  ;;  %783 = vmatpush.msra.mxu1 %v2675_v51  ;;  %2838 = vmatpush.msra.mxu3 %v2675_v51  ;;  %v3280_v37 = vld [vmem:[%s2937_s20 + $0x70] sm:$0xff]  ;;  %625 = vst [vmem:[#allocation2 + $0x148] sm:$0x3] %v2859_v30 }
  0x61   : > { %784 = vmatmul.f32.vlgmr.msra.gmra.mxu1 %v719_v62  ;;  %4820 = vst [vmem:[#allocation30_spill] sm:$0xff] %v3280_v37  ;;  %v2709_v51 = vld [vmem:[%s4741_s4 + $0x190] sm:$0xff] }
  0x62   : > { %626 = vst [vmem:[#allocation2 + $0x150] sm:$0xff] %v2859_v30 }
  0x63   : > { %409 = vmatmul.f32.gmra.mxu0 %v331_v22  ;;  %457 = vmatmul.f32.gmra.mxu2 %v347_v25  ;;  %v334_v22 = vmax.f32 %v302_v4, 0.0  ;;  %v350_v25 = vmax.f32 %v318_v5, 0.0  ;;  %v2716_v4 = vld [vmem:[%s4741_s4 + $0x1c8] sm:$0xff]  ;;  %v705_v5 = vld [vmem:[%s4741_s4 + $0x10] sm:$0xff]  ;;  %627 = vst [vmem:[#allocation2 + $0x158] sm:$0xff] %v2859_v30 }
  0x64   : > { %628 = vst [vmem:[#allocation2 + $0x160] sm:$0x3] %v2859_v30 }
  0x65   : > { %629 = vst [vmem:[#allocation2 + $0x168] sm:$0xff] %v2859_v30 }
  0x66   : > { %630 = vst [vmem:[#allocation2 + $0x170] sm:$0xff] %v2859_v30 }
  0x67   : > { %631 = vst [vmem:[#allocation2 + $0x178] sm:$0x3] %v2859_v30 }
  0x68   : > { %632 = vst [vmem:[#allocation2 + $0x180] sm:$0xff] %v2859_v30 }
  0x69   : > { %787 = vmatmul.f32.gmra.mxu1 %v720_v28  ;;  %633 = vst [vmem:[#allocation2 + $0x188] sm:$0xff] %v2859_v30 }
  0x6a   : > { %634 = vst [vmem:[#allocation2 + $0x190] sm:$0x3] %v2859_v30 }
  0x6b   : > { %412 = vmatmul.f32.gmra.mxu0 %v332_v38  ;;  %460 = vmatmul.f32.gmra.mxu2 %v348_v39  ;;  %v710_v38 = vld [vmem:[%s4741_s4 + $0x38] sm:$0xff]  ;;  %v2720_v39 = vld [vmem:[%s4741_s4 + $0x1e8] sm:$0xff]  ;;  %635 = vst [vmem:[#allocation2 + $0x198] sm:$0xff] %v2859_v30 }
  0x6c   : > { %889 = vmatpush.msrb.mxu2 %v710_v38  ;;  %1239 = vmatpush.msrb.mxu0 %v2720_v39  ;;  %v3283_v38 = vld [vmem:[%s2937_s20 + $0xf0] sm:$0xff]  ;;  %v2711_v39 = vld [vmem:[%s4741_s4 + $0x1a0] sm:$0xff]  ;;  %636 = vst [vmem:[#allocation2 + $0x1a0] sm:$0xff] %v2859_v30 }
  0x6d   : > { %4821 = vst [vmem:[#allocation31_spill] sm:$0xff] %v3283_v38 }
  0x6e   : > { %890 = vmatpush.msrb.mxu2 %v709_v40  ;;  %1240 = vmatpush.msrb.mxu0 %v2719_v45  ;;  %v337_v40 = vmax.f32 %v305_v29, 0.0  ;;  %v353_v45 = vmax.f32 %v321_v31, 0.0  ;;  %637 = vst [vmem:[#allocation2 + $0x1a8] sm:$0x3] %v2859_v30 }
  0x70   : > { %891 = vmatpush.msrb.mxu2 %v708_v46  ;;  %1241 = vmatpush.msrb.mxu0 %v2718_v47  ;;  %v273_v46 = vmul.f32 %v2942_v11, %v3280_v37  ;;  %v289_v47 = vmul.f32 %v2942_v11, %v3283_v38 }
  0x72   : > { %1242 = vmatpush.msrb.mxu0 %v2717_v61  ;;  %v2707_v61 = vld [vmem:[%s4741_s4 + $0x180] sm:$0xff] }
  0x73   : > { %415 = vmatmul.f32.gmra.mxu0 %v333_v59  ;;  %463 = vmatmul.f32.gmra.mxu2 %v349_v60  ;;  %v287_v59 = vmul.f32 %v2942_v11, %v3195_v44  ;;  %v707_v60 = vld [vmem:[%s4741_s4 + $0x20] sm:$0xff] }
  0x74   : > { %892 = vmatpush.msrb.mxu2 %v707_v60  ;;  %1243 = vmatpush.msrb.mxu0 %v2716_v4  ;;  %v3315_v60 = vld [vmem:[%s2937_s20 + $0xf8] sm:$0xff] }
  0x75   : > { %v320_v0 = vadd.f32 %v2955_v17, %v287_v59  ;;  %v3312_v59 = vld [vmem:[%s2937_s20 + $0x78] sm:$0xff]  ;;  %4823 = vst [vmem:[#allocation33_spill] sm:$0xff] %v3315_v60 }
  0x76   : > { %893 = vmatpush.msrb.mxu2 %v706_v3  ;;  %1244 = vmatpush.msrb.mxu0 %v2715_v14  ;;  %4822 = vst [vmem:[#allocation32_spill] sm:$0xff] %v3312_v59  ;;  %v290_v3 = vmul.f32 %v2942_v11, %v3315_v60 }
  0x77   : > { %v352_v16 = vmax.f32 %v320_v0, 0.0  ;;  %v274_v0 = vmul.f32 %v2942_v11, %v3312_v59 }
  0x78   : > { %894 = vmatpush.msrb.mxu2 %v705_v5  ;;  %v323_v5 = vadd.f32 %v2955_v17, %v290_v3 }
  0x79   : > { %v307_v4 = vadd.f32 %v2955_v17, %v274_v0 }
  0x7a   : > { %v355_v14 = vmax.f32 %v323_v5, 0.0 }
  0x7b   : > { %418 = vmatmul.f32.gmra.mxu0 %v334_v22  ;;  %466 = vmatmul.f32.gmra.mxu2 %v350_v25  ;;  %v704_v22 = vld [vmem:[%s4741_s4 + $0x8] sm:$0xff]  ;;  %v2714_v25 = vld [vmem:[%s4741_s4 + $0x1b8] sm:$0xff]  ;;  %v339_v11 = vmax.f32 %v307_v4, 0.0 }
  0x7c   : > { %895 = vmatpush.msrb.mxu2 %v704_v22  ;;  %1245 = vmatpush.msrb.mxu0 %v2714_v25 }
  0x7e   : > { %896 = vmatpush.msrb.mxu2 %v703_v26  ;;  %1246 = vmatpush.msrb.mxu0 %v2713_v27 }
  0x80   : > { %1247 = vmatpush.msrb.mxu0 %v2712_v32 }
  0x82   : > { %1248 = vmatpush.msrb.mxu0 %v2711_v39 }
  0x83   : > { %421 = vmatmul.f32.gmra.mxu0 %v335_v54  ;;  %469 = vmatmul.f32.gmra.mxu2 %v351_v55  ;;  %v306_v54 = vadd.f32 %v2955_v17, %v273_v46  ;;  %v322_v55 = vadd.f32 %v2955_v17, %v289_v47  ;;  %v485_v17 = vld [vmem:[%s4740_s3] sm:$0x3] }
  0x84   : > { %1249 = vmatpush.msrb.mxu0 %v2710_v48 }
  0x85   : > { %v338_v62 = vmax.f32 %v306_v54, 0.0  ;;  %v354_v63 = vmax.f32 %v322_v55, 0.0 }
  0x86   : > { %1250 = vmatpush.msrb.mxu0 %v2709_v51 }
  0x88   : > { %1251 = vmatpush.msrb.mxu0 %v2708_v56 }
  0x8a   : > { %1252 = vmatpush.msrb.mxu0 %v2707_v61 }
  0x8b   : > { %424 = vmatmul.f32.gmra.mxu0 %v336_v15  ;;  %472 = vmatmul.f32.gmra.mxu2 %v352_v16  ;;  %v3347_v15 = vperm.slane %v485_v17, 0  ;;  %v3351_v16 = vperm.slane %v485_v17, 1 }
  0x93   : > { %427 = vmatmul.f32.gmra.mxu0 %v337_v40  ;;  %475 = vmatmul.f32.gmra.mxu2 %v353_v45 }
  0x9b   : > { %430 = vmatmul.f32.gmra.mxu0 %v338_v62  ;;  %478 = vmatmul.f32.gmra.mxu2 %v354_v63 }
  0xa3   : > { %433 = vmatmul.f32.gmra.mxu0 %v339_v11  ;;  %481 = vmatmul.f32.gmra.mxu2 %v355_v14 }
  0xa8   : > { %v389_v18 = vpop.f32.mrf.mxu0 }
  0xa9   : > { %v487_v19 = vmul.f32 %v3347_v15, %v389_v18 }
  0xab   : > { %v520_v22 = vadd.f32 %v3351_v16, %v487_v19  ;;  %897 = vmatmul.f32.vlgmr.msrb.gmra.mxu2 %v2859_v30 }
  0xad   : > { %v3361_v25 = vmax.f32 %v520_v22, 0.0 }
  0xae   : > { %v437_v26 = vpop.f32.mrf.mxu2 }
  0xaf   : > { %639 = vst [vmem:[#allocation2 + $0x19] sm:$0xff] %v3361_v25  ;;  %v503_v27 = vmul.f32 %v3347_v15, %v437_v26  ;;  %790 = vmatmul.f32.gmra.mxu1 %v3361_v25 }
  0xb0   : > { %v392_v28 = vpop.f32.mrf.mxu0 }
  0xb1   : > { %v3367_v29 = vadd.f32 %v3351_v16, %v503_v27  ;;  %v488_v31 = vmul.f32 %v3347_v15, %v392_v28 }
  0xb3   : > { %v4752_v32 = vmax.f32 %v3367_v29, 0.0  ;;  %v521_v39 = vadd.f32 %v3351_v16, %v488_v31  ;;  %900 = vmatmul.f32.gmra.mxu2 %v2859_v30 }
  0xb5   : > { %655 = vst [vmem:[#allocation2 + $0xd9] sm:$0xff] %v4752_v32  ;;  %v3375_v40 = vmax.f32 %v521_v39, 0.0 }
  0xb6   : > { %v440_v45 = vpop.f32.mrf.mxu2  ;;  %v1188_v46 = vld [vmem:[#allocation2 + $0x18] sm:$0xff] }
  0xb7   : > { %640 = vst [vmem:[#allocation2 + $0x21] sm:$0xff] %v3375_v40  ;;  %v504_v47 = vmul.f32 %v3347_v15, %v440_v45  ;;  %1253 = vmatmul.f32.vlgmr.msrb.gmra.mxu0 %v1188_v46  ;;  %793 = vmatmul.f32.gmra.mxu1 %v3375_v40 }
  0xb8   : > { %v395_v48 = vpop.f32.mrf.mxu0 }
  0xb9   : > { %v3381_v51 = vadd.f32 %v3351_v16, %v504_v47  ;;  %v489_v30 = vmul.f32 %v3347_v15, %v395_v48 }
  0xbb   : > { %v4751_v54 = vmax.f32 %v3381_v51, 0.0  ;;  %v522_v55 = vadd.f32 %v3351_v16, %v489_v30  ;;  %903 = vmatmul.f32.gmra.mxu2 %v1188_v46 }
  0xbd   : > { %656 = vst [vmem:[#allocation2 + $0xe1] sm:$0xff] %v4751_v54  ;;  %v3388_v56 = vmax.f32 %v522_v55, 0.0 }
  0xbe   : > { %v443_v61 = vpop.f32.mrf.mxu2  ;;  %v1189_v62 = vld [vmem:[#allocation2 + $0x20] sm:$0xff] }
  0xbf   : > { %641 = vst [vmem:[#allocation2 + $0x31] sm:$0xff] %v3388_v56  ;;  %v505_v63 = vmul.f32 %v3347_v15, %v443_v61  ;;  %1256 = vmatmul.f32.gmra.mxu0 %v1189_v62  ;;  %796 = vmatmul.f32.gmra.mxu1 %v3388_v56 }
  0xc0   : > { %v398_v0 = vpop.f32.mrf.mxu0 }
  0xc1   : > { %v3394_v3 = vadd.f32 %v3351_v16, %v505_v63  ;;  %v490_v4 = vmul.f32 %v3347_v15, %v398_v0 }
  0xc3   : > { %v4749_v5 = vmax.f32 %v3394_v3, 0.0  ;;  %v523_v11 = vadd.f32 %v3351_v16, %v490_v4  ;;  %906 = vmatmul.f32.gmra.mxu2 %v1189_v62 }
  0xc5   : > { %657 = vst [vmem:[#allocation2 + $0xf1] sm:$0xff] %v4749_v5  ;;  %v3401_v14 = vmax.f32 %v523_v11, 0.0  ;;  %v2724_v5 = vld [vmem:[%s4741_s4 + $0x208] sm:$0xff] }
  0xc6   : > { %v446_v17 = vpop.f32.mrf.mxu2  ;;  %v1190_v18 = vld [vmem:[#allocation2 + $0x30] sm:$0xff] }
  0xc7   : > { %642 = vst [vmem:[#allocation2 + $0x39] sm:$0xff] %v3401_v14  ;;  %v506_v19 = vmul.f32 %v3347_v15, %v446_v17  ;;  %1259 = vmatmul.f32.gmra.mxu0 %v1190_v18  ;;  %799 = vmatmul.f32.gmra.mxu1 %v3401_v14  ;;  %v1965_v59 = vld [vmem:[#allocation2 + $0x31] sm:$0xff] }
  0xc8   : > { %v401_v22 = vpop.f32.mrf.mxu0 }
  0xc9   : > { %v3407_v26 = vadd.f32 %v3351_v16, %v506_v19  ;;  %v491_v27 = vmul.f32 %v3347_v15, %v401_v22 }
  0xcb   : > { %v4748_v28 = vmax.f32 %v3407_v26, 0.0  ;;  %v524_v31 = vadd.f32 %v3351_v16, %v491_v27  ;;  %909 = vmatmul.f32.gmra.mxu2 %v1190_v18 }
  0xcd   : > { %658 = vst [vmem:[#allocation2 + $0xf9] sm:$0xff] %v4748_v28  ;;  %v3414_v39 = vmax.f32 %v524_v31, 0.0 }
  0xce   : > { %v449_v45 = vpop.f32.mrf.mxu2  ;;  %v1191_v46 = vld [vmem:[#allocation2 + $0x38] sm:$0xff] }
  0xcf   : > { %643 = vst [vmem:[#allocation2 + $0x49] sm:$0xff] %v3414_v39  ;;  %v507_v47 = vmul.f32 %v3347_v15, %v449_v45  ;;  %1262 = vmatmul.f32.gmra.mxu0 %v1191_v46  ;;  %802 = vmatmul.f32.gmra.mxu1 %v3414_v39  ;;  %v3917_v43 = vld [vmem:[#allocation2 + $0x3a] sm:$0xff] }
  0xd0   : > { %v404_v48 = vpop.f32.mrf.mxu0 }
  0xd1   : > { %v3420_v30 = vadd.f32 %v3351_v16, %v507_v47  ;;  %v492_v55 = vmul.f32 %v3347_v15, %v404_v48  ;;  %v2738_v48 = vld [vmem:[%s4741_s4 + $0x278] sm:$0xff] }
  0xd2   : > { %1431 = vmatpush.msrb.mxu1 %v2738_v48 }
  0xd3   : > { %v4746_v61 = vmax.f32 %v3420_v30, 0.0  ;;  %v525_v62 = vadd.f32 %v3351_v16, %v492_v55  ;;  %912 = vmatmul.f32.gmra.mxu2 %v1191_v46 }
  0xd5   : > { %659 = vst [vmem:[#allocation2 + $0x109] sm:$0xff] %v4746_v61  ;;  %v3427_v63 = vmax.f32 %v525_v62, 0.0  ;;  %v2728_v61 = vld [vmem:[%s4741_s4 + $0x228] sm:$0xff] }
  0xd6   : > { %v452_v0 = vpop.f32.mrf.mxu2  ;;  %v1192_v4 = vld [vmem:[#allocation2 + $0x48] sm:$0xff] }
  0xd7   : > { %644 = vst [vmem:[#allocation2 + $0x51] sm:$0xff] %v3427_v63  ;;  %v508_v11 = vmul.f32 %v3347_v15, %v452_v0  ;;  %1265 = vmatmul.f32.gmra.mxu0 %v1192_v4  ;;  %805 = vmatmul.f32.gmra.mxu1 %v3427_v63 }
  0xd8   : > { %v407_v17 = vpop.f32.mrf.mxu0 }
  0xd9   : > { %v3433_v18 = vadd.f32 %v3351_v16, %v508_v11  ;;  %v493_v19 = vmul.f32 %v3347_v15, %v407_v17 }
  0xdb   : > { %v4745_v22 = vmax.f32 %v3433_v18, 0.0  ;;  %v526_v27 = vadd.f32 %v3351_v16, %v493_v19  ;;  %915 = vmatmul.f32.gmra.mxu2 %v1192_v4  ;;  %v2737_v4 = vld [vmem:[%s4741_s4 + $0x270] sm:$0xff]  ;;  %v2736_v19 = vld [vmem:[%s4741_s4 + $0x268] sm:$0xff] }
  0xdc   : > { %1432 = vmatpush.msrb.mxu1 %v2737_v4  ;;  %v3911_v7 = vld [vmem:[#allocation2 + $0x109] sm:$0xff] }
  0xdd   : > { %660 = vst [vmem:[#allocation2 + $0x111] sm:$0xff] %v4745_v22  ;;  %v3440_v31 = vmax.f32 %v526_v27, 0.0 }
  0xde   : > { %v455_v45 = vpop.f32.mrf.mxu2  ;;  %v1193_v46 = vld [vmem:[#allocation2 + $0x50] sm:$0xff]  ;;  %1433 = vmatpush.msrb.mxu1 %v2736_v19 }
  0xdf   : > { %645 = vst [vmem:[#allocation2 + $0x61] sm:$0xff] %v3440_v31  ;;  %v509_v47 = vmul.f32 %v3347_v15, %v455_v45  ;;  %1268 = vmatmul.f32.gmra.mxu0 %v1193_v46  ;;  %808 = vmatmul.f32.gmra.mxu1 %v3440_v31  ;;  %v2735_v45 = vld [vmem:[%s4741_s4 + $0x260] sm:$0xff]  ;;  %v2733_v19 = vld [vmem:[%s4741_s4 + $0x250] sm:$0xff] }
  0xe0   : > { %v410_v55 = vpop.f32.mrf.mxu0  ;;  %1434 = vmatpush.msrb.mxu1 %v2735_v45  ;;  %v3933_v9 = vld [vmem:[#allocation2 + $0x4a] sm:$0xff]  ;;  %v3947_v57 = vld [vmem:[#allocation2 + $0x52] sm:$0xff] }
  0xe1   : > { %v3449_v62 = vadd.f32 %v3351_v16, %v509_v47  ;;  %v494_v0 = vmul.f32 %v3347_v15, %v410_v55  ;;  %v2734_v55 = vld [vmem:[%s4741_s4 + $0x258] sm:$0xff] }
  0xe2   : > { %1435 = vmatpush.msrb.mxu1 %v2734_v55  ;;  %v2731_v55 = vld [vmem:[%s4741_s4 + $0x240] sm:$0xff] }
  0xe3   : > { %v4743_v11 = vmax.f32 %v3449_v62, 0.0  ;;  %v527_v17 = vadd.f32 %v3351_v16, %v494_v0  ;;  %918 = vmatmul.f32.gmra.mxu2 %v1193_v46 }
  0xe4   : > { %1436 = vmatpush.msrb.mxu1 %v2733_v19  ;;  %v3925_v35 = vld [vmem:[#allocation2 + $0x111] sm:$0xff] }
  0xe5   : > { %661 = vst [vmem:[#allocation2 + $0x121] sm:$0xff] %v4743_v11  ;;  %v3462_v27 = vmax.f32 %v527_v17, 0.0  ;;  %v2732_v11 = vld [vmem:[%s4741_s4 + $0x248] sm:$0xff] }
  0xe6   : > { %v458_v47 = vpop.f32.mrf.mxu2  ;;  %v1194_v48 = vld [vmem:[#allocation2 + $0x60] sm:$0xff]  ;;  %1437 = vmatpush.msrb.mxu1 %v2732_v11  ;;  %v2730_v11 = vld [vmem:[%s4741_s4 + $0x238] sm:$0xff] }
  0xe7   : > { %646 = vst [vmem:[#allocation2 + $0x69] sm:$0xff] %v3462_v27  ;;  %v510_v46 = vmul.f32 %v3347_v15, %v458_v47  ;;  %1271 = vmatmul.f32.gmra.mxu0 %v1194_v48  ;;  %811 = vmatmul.f32.gmra.mxu1 %v3462_v27 }
  0xe8   : > { %v413_v0 = vpop.f32.mrf.mxu0  ;;  %1438 = vmatpush.msrb.mxu1 %v2731_v55  ;;  %v2729_v55 = vld [vmem:[%s4741_s4 + $0x230] sm:$0xff] }
  0xe9   : > { %v3474_v4 = vadd.f32 %v3351_v16, %v510_v46  ;;  %v495_v17 = vmul.f32 %v3347_v15, %v413_v0 }
  0xea   : > { %1439 = vmatpush.msrb.mxu1 %v2730_v11  ;;  %v2727_v11 = vld [vmem:[%s4741_s4 + $0x220] sm:$0xff] }
  0xeb   : > { %v4744_v45 = vmax.f32 %v3474_v4, 0.0  ;;  %v528_v47 = vadd.f32 %v3351_v16, %v495_v17  ;;  %921 = vmatmul.f32.gmra.mxu2 %v1194_v48 }
  0xec   : > { %1440 = vmatpush.msrb.mxu1 %v2729_v55  ;;  %v3941_v41 = vld [vmem:[#allocation2 + $0x121] sm:$0xff] }
  0xed   : > { %662 = vst [vmem:[#allocation2 + $0x129] sm:$0xff] %v4744_v45  ;;  %v3487_v46 = vmax.f32 %v528_v47, 0.0 }
  0xee   : > { %v461_v0 = vpop.f32.mrf.mxu2  ;;  %v1195_v19 = vld [vmem:[#allocation2 + $0x68] sm:$0xff]  ;;  %1441 = vmatpush.msrb.mxu1 %v2728_v61  ;;  %v2726_v61 = vld [vmem:[%s4741_s4 + $0x218] sm:$0xff] }
  0xef   : > { %647 = vst [vmem:[#allocation2 + $0x79] sm:$0xff] %v3487_v46  ;;  %v511_v48 = vmul.f32 %v3347_v15, %v461_v0  ;;  %1274 = vmatmul.f32.gmra.mxu0 %v1195_v19  ;;  %814 = vmatmul.f32.gmra.mxu1 %v3487_v46 }
  0xf0   : > { %v416_v17 = vpop.f32.mrf.mxu0  ;;  %1442 = vmatpush.msrb.mxu1 %v2727_v11  ;;  %v2725_v11 = vld [vmem:[%s4741_s4 + $0x210] sm:$0xff] }
  0xf1   : > { %v3499_v47 = vadd.f32 %v3351_v16, %v511_v48  ;;  %v496_v45 = vmul.f32 %v3347_v15, %v416_v17 }
  0xf2   : > { %1443 = vmatpush.msrb.mxu1 %v2726_v61  ;;  %v2723_v61 = vld [vmem:[%s4741_s4 + $0x200] sm:$0xff] }
  0xf3   : > { %v4747_v0 = vmax.f32 %v3499_v47, 0.0  ;;  %v529_v22 = vadd.f32 %v3351_v16, %v496_v45  ;;  %924 = vmatmul.f32.gmra.mxu2 %v1195_v19 }
  0xf4   : > { %1444 = vmatpush.msrb.mxu1 %v2725_v11 }
  0xf5   : > { %663 = vst [vmem:[#allocation2 + $0x139] sm:$0xff] %v4747_v0  ;;  %v3512_v48 = vmax.f32 %v529_v22, 0.0 }
  0xf6   : > { %v464_v17 = vpop.f32.mrf.mxu2  ;;  %v1196_v55 = vld [vmem:[#allocation2 + $0x78] sm:$0xff]  ;;  %1445 = vmatpush.msrb.mxu1 %v2724_v5 }
  0xf7   : > { %648 = vst [vmem:[#allocation2 + $0x81] sm:$0xff] %v3512_v48  ;;  %v512_v45 = vmul.f32 %v3347_v15, %v464_v17  ;;  %1277 = vmatmul.f32.gmra.mxu0 %v1196_v55  ;;  %817 = vmatmul.f32.gmra.mxu1 %v3512_v48 }
  0xf8   : > { %v419_v22 = vpop.f32.mrf.mxu0  ;;  %1446 = vmatpush.msrb.mxu1 %v2723_v61 }
  0xf9   : > { %v3524_v19 = vadd.f32 %v3351_v16, %v512_v45  ;;  %v497_v0 = vmul.f32 %v3347_v15, %v419_v22 }
  0xfb   : > { %v4750_v17 = vmax.f32 %v3524_v19, 0.0  ;;  %v530_v28 = vadd.f32 %v3351_v16, %v497_v0  ;;  %927 = vmatmul.f32.gmra.mxu2 %v1196_v55 }
  0xfd   : > { %664 = vst [vmem:[#allocation2 + $0x141] sm:$0xff] %v4750_v17  ;;  %v3537_v45 = vmax.f32 %v530_v28, 0.0 }
  0xfe   : > { %v467_v22 = vpop.f32.mrf.mxu2  ;;  %v1197_v11 = vld [vmem:[#allocation2 + $0x80] sm:$0xff] }
  0xff   : > { %649 = vst [vmem:[#allocation2 + $0x91] sm:$0xff] %v3537_v45  ;;  %v513_v0 = vmul.f32 %v3347_v15, %v467_v22  ;;  %1280 = vmatmul.f32.gmra.mxu0 %v1197_v11  ;;  %820 = vmatmul.f32.gmra.mxu1 %v3537_v45 }
 0x100   : > { %v422_v5 = vpop.f32.mrf.mxu0 }
 0x101   : > { %v3546_v55 = vadd.f32 %v3351_v16, %v513_v0  ;;  %v498_v28 = vmul.f32 %v3347_v15, %v422_v5 }
 0x103   : > { %v4754_v17 = vmax.f32 %v3546_v55, 0.0  ;;  %v531_v54 = vadd.f32 %v3351_v16, %v498_v28  ;;  %930 = vmatmul.f32.gmra.mxu2 %v1197_v11 }
 0x105   : > { %665 = vst [vmem:[#allocation2 + $0x151] sm:$0xff] %v4754_v17  ;;  %v3553_v61 = vmax.f32 %v531_v54, 0.0 }
 0x106   : > { %v470_v22 = vpop.f32.mrf.mxu2  ;;  %v1198_v32 = vld [vmem:[#allocation2 + $0x90] sm:$0xff] }
 0x107   : > { %650 = vst [vmem:[#allocation2 + $0x99] sm:$0xff] %v3553_v61  ;;  %v514_v60 = vmul.f32 %v3347_v15, %v470_v22  ;;  %1283 = vmatmul.f32.gmra.mxu0 %v1198_v32  ;;  %823 = vmatmul.f32.gmra.mxu1 %v3553_v61  ;;  %v2706_v22 = vld [vmem:[%s4741_s4 + $0x178] sm:$0xff] }
 0x108   : > { %v425_v0 = vpop.f32.mrf.mxu0  ;;  %1043 = vmatpush.msrb.mxu3 %v2706_v22 }
 0x109   : > { %v3559_v5 = vadd.f32 %v3351_v16, %v514_v60  ;;  %v499_v11 = vmul.f32 %v3347_v15, %v425_v0 }
 0x10b   : > { %v4757_v28 = vmax.f32 %v3559_v5, 0.0  ;;  %v532_v54 = vadd.f32 %v3351_v16, %v499_v11  ;;  %933 = vmatmul.f32.gmra.mxu2 %v1198_v32  ;;  %v2705_v32 = vld [vmem:[%s4741_s4 + $0x170] sm:$0xff] }
 0x10c   : > { %1044 = vmatpush.msrb.mxu3 %v2705_v32 }
 0x10d   : > { %666 = vst [vmem:[#allocation2 + $0x159] sm:$0xff] %v4757_v28  ;;  %v3566_v17 = vmax.f32 %v532_v54, 0.0 }
 0x10e   : > { %v473_v38 = vpop.f32.mrf.mxu2  ;;  %v1199_v44 = vld [vmem:[#allocation2 + $0x98] sm:$0xff] }
 0x10f   : > { %651 = vst [vmem:[#allocation2 + $0xa9] sm:$0xff] %v3566_v17  ;;  %v515_v60 = vmul.f32 %v3347_v15, %v473_v38  ;;  %1286 = vmatmul.f32.gmra.mxu0 %v1199_v44  ;;  %826 = vmatmul.f32.gmra.mxu1 %v3566_v17 }
 0x110   : > { %v428_v0 = vpop.f32.mrf.mxu0 }
 0x111   : > { %v3578_v11 = vadd.f32 %v3351_v16, %v515_v60  ;;  %v500_v54 = vmul.f32 %v3347_v15, %v428_v0  ;;  %v2704_v60 = vld [vmem:[%s4741_s4 + $0x168] sm:$0xff] }
 0x112   : > { %1045 = vmatpush.msrb.mxu3 %v2704_v60 }
 0x113   : > { %v4760_v22 = vmax.f32 %v3578_v11, 0.0  ;;  %v533_v28 = vadd.f32 %v3351_v16, %v500_v54  ;;  %936 = vmatmul.f32.gmra.mxu2 %v1199_v44  ;;  %v3593_v44 = vpop.f32.mrf.mxu1 }
 0x115   : > { %667 = vst [vmem:[#allocation2 + $0x169] sm:$0xff] %v4760_v22  ;;  %v3585_v38 = vmax.f32 %v533_v28, 0.0 }
 0x116   : > { %v476_v12 = vpop.f32.mrf.mxu2  ;;  %v1200_v8 = vld [vmem:[#allocation2 + $0xa8] sm:$0xff] }
 0x117   : > { %652 = vst [vmem:[#allocation2 + $0xb1] sm:$0xff] %v3585_v38  ;;  %v516_v32 = vmul.f32 %v3347_v15, %v476_v12  ;;  %1289 = vmatmul.f32.gmra.mxu0 %v1200_v8  ;;  %829 = vmatmul.f32.gmra.mxu1 %v3585_v38 }
 0x118   : > { %v431_v0 = vpop.f32.mrf.mxu0 }
 0x119   : > { %v3596_v28 = vadd.f32 %v3351_v16, %v516_v32  ;;  %v501_v54 = vmul.f32 %v3347_v15, %v431_v0  ;;  %v2703_v32 = vld [vmem:[%s4741_s4 + $0x160] sm:$0xff] }
 0x11a   : > { %1046 = vmatpush.msrb.mxu3 %v2703_v32 }
 0x11b   : > { %v4764_v22 = vmax.f32 %v3596_v28, 0.0  ;;  %v534_v12 = vadd.f32 %v3351_v16, %v501_v54  ;;  %939 = vmatmul.f32.gmra.mxu2 %v1200_v8 }
 0x11d   : > { %668 = vst [vmem:[#allocation2 + $0x171] sm:$0xff] %v4764_v22  ;;  %v3603_v36 = vmax.f32 %v534_v12, 0.0  ;;  %v788_v12 = vpop.f32.mrf.mxu1 }
 0x11e   : > { %v479_v21 = vpop.f32.mrf.mxu2  ;;  %v1201_v53 = vld [vmem:[#allocation2 + $0xb0] sm:$0xff] }
 0x11f   : > { %653 = vst [vmem:[#allocation2 + $0xc1] sm:$0xff] %v3603_v36  ;;  %v517_v60 = vmul.f32 %v3347_v15, %v479_v21  ;;  %1292 = vmatmul.f32.gmra.mxu0 %v1201_v53  ;;  %832 = vmatmul.f32.vlgmr.msra.gmra.mxu3 %v3603_v36 }
 0x120   : > { %v434_v0 = vpop.f32.mrf.mxu0  ;;  %1447 = vmatmul.f32.vlgmr.msrb.gmra.mxu1 %v3361_v25  ;;  %v2702_v25 = vld [vmem:[%s4741_s4 + $0x158] sm:$0xff] }
 0x121   : > { %v550_v8 = vadd.f32 %v3351_v16, %v517_v60  ;;  %v502_v54 = vmul.f32 %v3347_v15, %v434_v0  ;;  %1047 = vmatpush.msrb.mxu3 %v2702_v25 }
 0x123   : > { %v582_v22 = vmax.f32 %v550_v8, 0.0  ;;  %v535_v2 = vadd.f32 %v3351_v16, %v502_v54  ;;  %942 = vmatmul.f32.gmra.mxu2 %v1201_v53  ;;  %v4825_v8 = vmax.f32 %v3381_v51, 0.0  ;;  %v2699_v51 = vld [vmem:[%s4741_s4 + $0x140] sm:$0xff] }
 0x125   : > { %669 = vst [vmem:[#allocation2 + $0x181] sm:$0xff] %v582_v22  ;;  %v3615_v21 = vmax.f32 %v535_v2, 0.0 }
 0x126   : > { %v482_v58 = vpop.f32.mrf.mxu2  ;;  %v1202_v10 = vld [vmem:[#allocation2 + $0xc0] sm:$0xff] }
 0x127   : > { %654 = vst [vmem:[#allocation2 + $0xc9] sm:$0xff] %v3615_v21  ;;  %v518_v42 = vmul.f32 %v3347_v15, %v482_v58  ;;  %1295 = vmatmul.f32.gmra.mxu0 %v1202_v10  ;;  %835 = vmatmul.f32.gmra.mxu3 %v3615_v21  ;;  %v4824_v58 = vmax.f32 %v3367_v29, 0.0  ;;  %v2701_v15 = vld [vmem:[%s4741_s4 + $0x150] sm:$0xff]  ;;  %v2700_v29 = vld [vmem:[%s4741_s4 + $0x148] sm:$0xff] }
 0x128   : > { %1450 = vmatmul.f32.gmra.mxu1 %v3375_v40  ;;  %1048 = vmatpush.msrb.mxu3 %v2701_v15 }
 0x129   : > { %v551_v53 = vadd.f32 %v3351_v16, %v518_v42 }
 0x12a   : > { %1049 = vmatpush.msrb.mxu3 %v2700_v29  ;;  %v1207_v29 = vld [vmem:[#allocation2 + $0xf8] sm:$0xff] }
 0x12b   : > { %v583_v2 = vmax.f32 %v551_v53, 0.0  ;;  %945 = vmatmul.f32.gmra.mxu2 %v1202_v10  ;;  %v1204_v10 = vld [vmem:[#allocation2 + $0xd8] sm:$0xff]  ;;  %v1205_v53 = vld [vmem:[#allocation2 + $0xe0] sm:$0xff] }
 0x12c   : > { %v791_v22 = vpop.f32.mrf.mxu1  ;;  %1050 = vmatpush.msrb.mxu3 %v2699_v51 }
 0x12d   : > { %670 = vst [vmem:[#allocation2 + $0x189] sm:$0xff] %v583_v2 }
 0x12e   : > { %v3625_v60 = vpop.f32.mrf.mxu2  ;;  %v1203_v32 = vld [vmem:[#allocation2 + $0xc8] sm:$0xff] }
 0x12f   : > { %1298 = vmatmul.f32.gmra.mxu0 %v1203_v32  ;;  %838 = vmatmul.f32.gmra.mxu3 %v4824_v58 }
 0x130   : > { %1453 = vmatmul.f32.gmra.mxu1 %v3388_v56 }
 0x133   : > { %948 = vmatmul.f32.gmra.mxu2 %v1203_v32  ;;  %v1206_v32 = vld [vmem:[#allocation2 + $0xf0] sm:$0xff] }
 0x134   : > { %v3633_v42 = vpop.f32.mrf.mxu0  ;;  %v794_v16 = vpop.f32.mrf.mxu1 }
 0x136   : > { %v901_v40 = vpop.f32.mrf.mxu2 }
 0x137   : > { %v3635_v0 = vadd.f32 %v901_v40, %v788_v12  ;;  %1301 = vmatmul.f32.gmra.mxu0 %v1204_v10  ;;  %841 = vmatmul.f32.gmra.mxu3 %v4825_v8  ;;  %v4826_v12 = vmax.f32 %v3394_v3, 0.0  ;;  %v2698_v3 = vld [vmem:[%s4741_s4 + $0x138] sm:$0xff] }
 0x138   : > { %1456 = vmatmul.f32.gmra.mxu1 %v3401_v14  ;;  %1051 = vmatpush.msrb.mxu3 %v2698_v3 }
 0x13b   : > { %951 = vmatmul.f32.gmra.mxu2 %v1204_v10 }
 0x13c   : > { %v3643_v56 = vpop.f32.mrf.mxu0  ;;  %v797_v54 = vpop.f32.mrf.mxu1 }
 0x13e   : > { %v904_v25 = vpop.f32.mrf.mxu2 }
 0x13f   : > { %v3645_v2 = vadd.f32 %v904_v25, %v791_v22  ;;  %1304 = vmatmul.f32.gmra.mxu0 %v1205_v53  ;;  %844 = vmatmul.f32.gmra.mxu3 %v4826_v12  ;;  %v4827_v22 = vmax.f32 %v3407_v26, 0.0  ;;  %v2697_v26 = vld [vmem:[%s4741_s4 + $0x130] sm:$0xff] }
 0x140   : > { %1459 = vmatmul.f32.gmra.mxu1 %v3414_v39  ;;  %1052 = vmatpush.msrb.mxu3 %v2697_v26 }
 0x143   : > { %954 = vmatmul.f32.gmra.mxu2 %v1205_v53 }
 0x144   : > { %v3653_v14 = vpop.f32.mrf.mxu0  ;;  %v800_v58 = vpop.f32.mrf.mxu1 }
 0x146   : > { %v907_v15 = vpop.f32.mrf.mxu2 }
 0x147   : > { %v3655_v10 = vadd.f32 %v907_v15, %v794_v16  ;;  %1307 = vmatmul.f32.gmra.mxu0 %v1206_v32  ;;  %847 = vmatmul.f32.gmra.mxu3 %v4827_v22  ;;  %v4828_v16 = vmax.f32 %v3420_v30, 0.0  ;;  %v2696_v30 = vld [vmem:[%s4741_s4 + $0x128] sm:$0xff]  ;;  %v1209_v22 = vld [vmem:[#allocation2 + $0x110] sm:$0xff] }
 0x148   : > { %1462 = vmatmul.f32.gmra.mxu1 %v3427_v63  ;;  %v1208_v63 = vld [vmem:[#allocation2 + $0x108] sm:$0xff]  ;;  %1053 = vmatpush.msrb.mxu3 %v2696_v30 }
 0x14b   : > { %957 = vmatmul.f32.gmra.mxu2 %v1206_v32 }
 0x14c   : > { %v3663_v39 = vpop.f32.mrf.mxu0  ;;  %v803_v40 = vpop.f32.mrf.mxu1 }
 0x14e   : > { %v910_v8 = vpop.f32.mrf.mxu2 }
 0x14f   : > { %v3665_v25 = vadd.f32 %v910_v8, %v797_v54  ;;  %1310 = vmatmul.f32.gmra.mxu0 %v1207_v29  ;;  %850 = vmatmul.f32.gmra.mxu3 %v4828_v16  ;;  %v4829_v54 = vmax.f32 %v3433_v18, 0.0  ;;  %v2695_v18 = vld [vmem:[%s4741_s4 + $0x120] sm:$0xff] }
 0x150   : > { %1465 = vmatmul.f32.gmra.mxu1 %v3440_v31  ;;  %1054 = vmatpush.msrb.mxu3 %v2695_v18 }
 0x153   : > { %960 = vmatmul.f32.gmra.mxu2 %v1207_v29 }
 0x154   : > { %v806_v53 = vpop.f32.mrf.mxu1  ;;  %v3673_v12 = vpop.f32.mrf.mxu0 }
 0x156   : > { %v913_v51 = vpop.f32.mrf.mxu2 }
 0x157   : > { %v3675_v32 = vadd.f32 %v913_v51, %v800_v58  ;;  %1313 = vmatmul.f32.gmra.mxu0 %v1208_v63  ;;  %853 = vmatmul.f32.gmra.mxu3 %v4829_v54  ;;  %v4830_v58 = vmax.f32 %v3449_v62, 0.0  ;;  %v2694_v62 = vld [vmem:[%s4741_s4 + $0x118] sm:$0xff]  ;;  %v1211_v54 = vld [vmem:[#allocation2 + $0x128] sm:$0xff] }
 0x158   : > { %1468 = vmatmul.f32.gmra.mxu1 %v3462_v27  ;;  %v1210_v27 = vld [vmem:[#allocation2 + $0x120] sm:$0xff]  ;;  %1055 = vmatpush.msrb.mxu3 %v2694_v62  ;;  %v4833_v62 = vmax.f32 %v3524_v19, 0.0  ;;  %v2785_v19 = vld [vmem:[%s4741_s4 + $0x3f0] sm:$0xff] }
 0x15b   : > { %963 = vmatmul.f32.gmra.mxu2 %v1208_v63 }
 0x15c   : > { %v809_v31 = vpop.f32.mrf.mxu1  ;;  %v3683_v3 = vpop.f32.mrf.mxu0 }
 0x15e   : > { %v916_v15 = vpop.f32.mrf.mxu2 }
 0x15f   : > { %v3685_v8 = vadd.f32 %v916_v15, %v803_v40  ;;  %1316 = vmatmul.f32.gmra.mxu0 %v1209_v22  ;;  %856 = vmatmul.f32.gmra.mxu3 %v4830_v58  ;;  %v4831_v40 = vmax.f32 %v3474_v4, 0.0  ;;  %v2753_v4 = vld [vmem:[%s4741_s4 + $0x2f0] sm:$0xff] }
 0x160   : > { %1471 = vmatmul.f32.gmra.mxu1 %v3487_v46  ;;  %v2693_v15 = vld [vmem:[%s4741_s4 + $0x110] sm:$0xff] }
 0x161   : > { %1056 = vmatpush.msrb.mxu3 %v2693_v15 }
 0x163   : > { %966 = vmatmul.f32.gmra.mxu2 %v1209_v22  ;;  %v2752_v22 = vld [vmem:[%s4741_s4 + $0x2e8] sm:$0xff] }
 0x164   : > { %v812_v29 = vpop.f32.mrf.mxu1  ;;  %v3701_v63 = vpop.f32.mrf.mxu0 }
 0x166   : > { %v919_v16 = vpop.f32.mrf.mxu2 }
 0x167   : > { %v3693_v26 = vadd.f32 %v919_v16, %v806_v53  ;;  %1319 = vmatmul.f32.gmra.mxu0 %v1210_v27  ;;  %859 = vmatmul.f32.gmra.mxu3 %v4831_v40  ;;  %v2754_v53 = vld [vmem:[%s4741_s4 + $0x2f8] sm:$0xff] }
 0x168   : > { %1474 = vmatmul.f32.gmra.mxu1 %v3512_v48  ;;  %1625 = vmatpush.msra.mxu2 %v2754_v53  ;;  %v4832_v48 = vmax.f32 %v3499_v47, 0.0  ;;  %v1212_v47 = vld [vmem:[#allocation2 + $0x138] sm:$0xff]  ;;  %v2692_v53 = vld [vmem:[%s4741_s4 + $0x108] sm:$0xff] }
 0x169   : > { %1057 = vmatpush.msrb.mxu3 %v2692_v53  ;;  %v2744_v53 = vld [vmem:[%s4741_s4 + $0x2a8] sm:$0xff] }
 0x16a   : > { %1626 = vmatpush.msra.mxu2 %v2753_v4 }
 0x16b   : > { %969 = vmatmul.f32.gmra.mxu2 %v1210_v27  ;;  %v2750_v27 = vld [vmem:[%s4741_s4 + $0x2d8] sm:$0xff] }
 0x16c   : > { %v815_v46 = vpop.f32.mrf.mxu1  ;;  %1627 = vmatpush.msra.mxu2 %v2752_v22  ;;  %v3723_v58 = vpop.f32.mrf.mxu0  ;;  %v1213_v22 = vld [vmem:[#allocation2 + $0x140] sm:$0xff] }
 0x16e   : > { %v922_v51 = vpop.f32.mrf.mxu2 }
 0x16f   : > { %v3709_v30 = vadd.f32 %v922_v51, %v809_v31  ;;  %1322 = vmatmul.f32.gmra.mxu0 %v1211_v54  ;;  %862 = vmatmul.f32.gmra.mxu3 %v4832_v48  ;;  %v2751_v31 = vld [vmem:[%s4741_s4 + $0x2e0] sm:$0xff]  ;;  %v2748_v51 = vld [vmem:[%s4741_s4 + $0x2c8] sm:$0xff] }
 0x170   : > { %1477 = vmatmul.f32.gmra.mxu1 %v3537_v45  ;;  %1628 = vmatpush.msra.mxu2 %v2751_v31  ;;  %v2749_v45 = vld [vmem:[%s4741_s4 + $0x2d0] sm:$0xff]  ;;  %v2784_v48 = vld [vmem:[%s4741_s4 + $0x3e8] sm:$0xff] }
 0x172   : > { %1629 = vmatpush.msra.mxu2 %v2750_v27  ;;  %v2783_v27 = vld [vmem:[%s4741_s4 + $0x3e0] sm:$0xff] }
 0x173   : > { %972 = vmatmul.f32.gmra.mxu2 %v1211_v54  ;;  %v2747_v54 = vld [vmem:[%s4741_s4 + $0x2c0] sm:$0xff] }
 0x174   : > { %v818_v18 = vpop.f32.mrf.mxu1  ;;  %1630 = vmatpush.msra.mxu2 %v2749_v45  ;;  %v3757_v15 = vpop.f32.mrf.mxu0 }
 0x175   : > { %4834 = vst [vmem:[#allocation34_spill] sm:$0xff] %v3757_v15  ;;  %v3987_v15 = vld [vmem:[#allocation2 + $0x141] sm:$0xff] }
 0x176   : > { %v925_v16 = vpop.f32.mrf.mxu2  ;;  %1631 = vmatpush.msra.mxu2 %v2748_v51  ;;  %v2782_v51 = vld [vmem:[%s4741_s4 + $0x3d8] sm:$0xff] }
 0x177   : > { %v3731_v40 = vadd.f32 %v925_v16, %v812_v29  ;;  %1325 = vmatmul.f32.gmra.mxu0 %v1212_v47  ;;  %865 = vmatmul.f32.gmra.mxu3 %v4833_v62  ;;  %v2786_v29 = vld [vmem:[%s4741_s4 + $0x3f8] sm:$0xff]  ;;  %v2691_v16 = vld [vmem:[%s4741_s4 + $0x100] sm:$0xff]  ;;  %v4835_v62 = vmax.f32 %v3546_v55, 0.0  ;;  %v2781_v55 = vld [vmem:[%s4741_s4 + $0x3d0] sm:$0xff] }
 0x178   : > { %1480 = vmatmul.f32.gmra.mxu1 %v3553_v61  ;;  %2014 = vmatpush.msra.mxu0 %v2786_v29  ;;  %v2746_v61 = vld [vmem:[%s4741_s4 + $0x2b8] sm:$0xff]  ;;  %v1214_v29 = vld [vmem:[#allocation2 + $0x150] sm:$0xff] }
 0x179   : > { %1632 = vmatpush.msra.mxu2 %v2747_v54  ;;  %1058 = vmatpush.msrb.mxu3 %v2691_v16  ;;  %v2780_v54 = vld [vmem:[%s4741_s4 + $0x3c8] sm:$0xff]  ;;  %v2770_v16 = vld [vmem:[%s4741_s4 + $0x378] sm:$0xff] }
 0x17a   : > { %2015 = vmatpush.msra.mxu0 %v2785_v19  ;;  %v2742_v19 = vld [vmem:[%s4741_s4 + $0x298] sm:$0xff] }
 0x17b   : > { %975 = vmatmul.f32.gmra.mxu2 %v1212_v47  ;;  %v2745_v47 = vld [vmem:[%s4741_s4 + $0x2b0] sm:$0xff]  ;;  %1820 = vmatpush.msra.mxu3 %v2770_v16 }
 0x17c   : > { %v821_v4 = vpop.f32.mrf.mxu1  ;;  %2016 = vmatpush.msra.mxu0 %v2784_v48  ;;  %1633 = vmatpush.msra.mxu2 %v2746_v61  ;;  %v2741_v48 = vld [vmem:[%s4741_s4 + $0x290] sm:$0xff] }
 0x17e   : > { %v928_v31 = vpop.f32.mrf.mxu2  ;;  %1634 = vmatpush.msra.mxu2 %v2745_v47  ;;  %2017 = vmatpush.msra.mxu0 %v2783_v27  ;;  %v4838_v47 = vmax.f32 %v3559_v5, 0.0  ;;  %v2779_v27 = vld [vmem:[%s4741_s4 + $0x3c0] sm:$0xff]  ;;  %v2778_v5 = vld [vmem:[%s4741_s4 + $0x3b8] sm:$0xff] }
 0x17f   : > { %v3768_v45 = vadd.f32 %v928_v31, %v815_v46  ;;  %1328 = vmatmul.f32.gmra.mxu0 %v1213_v22  ;;  %868 = vmatmul.f32.gmra.mxu3 %v4835_v62  ;;  %v2743_v46 = vld [vmem:[%s4741_s4 + $0x2a0] sm:$0xff] }
 0x180   : > { %1483 = vmatmul.f32.gmra.mxu1 %v3566_v17  ;;  %1635 = vmatpush.msra.mxu2 %v2744_v53  ;;  %v2739_v62 = vld [vmem:[%s4741_s4 + $0x280] sm:$0xff] }
 0x181   : > { %2018 = vmatpush.msra.mxu0 %v2782_v51  ;;  %v2776_v51 = vld [vmem:[%s4741_s4 + $0x3a8] sm:$0xff] }
 0x182   : > { %1636 = vmatpush.msra.mxu2 %v2743_v46 }
 0x183   : > { %978 = vmatmul.f32.gmra.mxu2 %v1213_v22  ;;  %2019 = vmatpush.msra.mxu0 %v2781_v55  ;;  %v3794_v22 = vpop.f32.mrf.mxu0  ;;  %v1215_v55 = vld [vmem:[#allocation2 + $0x158] sm:$0xff] }
 0x184   : > { %v824_v17 = vpop.f32.mrf.mxu1  ;;  %1637 = vmatpush.msra.mxu2 %v2742_v19  ;;  %4836 = vst [vmem:[#allocation35_spill] sm:$0xff] %v3794_v22  ;;  %v4840_v19 = vmax.f32 %v3578_v11, 0.0  ;;  %v2773_v11 = vld [vmem:[%s4741_s4 + $0x390] sm:$0xff] }
 0x185   : > { %2020 = vmatpush.msra.mxu0 %v2780_v54  ;;  %v2775_v54 = vld [vmem:[%s4741_s4 + $0x3a0] sm:$0xff] }
 0x186   : > { %v931_v61 = vpop.f32.mrf.mxu2  ;;  %1638 = vmatpush.msra.mxu2 %v2741_v48 }
 0x187   : > { %v3796_v31 = vadd.f32 %v931_v61, %v818_v18  ;;  %1331 = vmatmul.f32.gmra.mxu0 %v1214_v29  ;;  %871 = vmatmul.f32.gmra.mxu3 %v4838_v47  ;;  %v2740_v18 = vld [vmem:[%s4741_s4 + $0x288] sm:$0xff]  ;;  %v2802_v61 = vld [vmem:[%s4741_s4 + $0x478] sm:$0xff] }
 0x188   : > { %1486 = vmatmul.f32.gmra.mxu1 %v3585_v38  ;;  %2021 = vmatpush.msra.mxu0 %v2779_v27  ;;  %v2777_v38 = vld [vmem:[%s4741_s4 + $0x3b0] sm:$0xff]  ;;  %v1216_v47 = vld [vmem:[#allocation2 + $0x168] sm:$0xff] }
 0x189   : > { %4837 = vst [vmem:[#allocation36_spill] sm:$0xff] %v3796_v31  ;;  %1639 = vmatpush.msra.mxu2 %v2740_v18  ;;  %2208 = vmatpush.msra.mxu1 %v2802_v61 }
 0x18a   : > { %2022 = vmatpush.msra.mxu0 %v2778_v5  ;;  %v4843_v5 = vmax.f32 %v3596_v28, 0.0 }
 0x18b   : > { %981 = vmatmul.f32.gmra.mxu2 %v1214_v29  ;;  %v3833_v48 = vpop.f32.mrf.mxu0 }
 0x18c   : > { %v827_v53 = vpop.f32.mrf.mxu1  ;;  %1640 = vmatpush.msra.mxu2 %v2739_v62  ;;  %2023 = vmatpush.msra.mxu0 %v2777_v38  ;;  %4841 = vst [vmem:[#allocation38_spill] sm:$0xff] %v3833_v48  ;;  %v2771_v62 = vld [vmem:[%s4741_s4 + $0x380] sm:$0xff]  ;;  %v2769_v38 = vld [vmem:[%s4741_s4 + $0x370] sm:$0xff] }
 0x18d   : > { %1821 = vmatpush.msra.mxu3 %v2769_v38  ;;  %v1576_v38 = vld [vmem:[#allocation2 + $0x1a] sm:$0xff] }
 0x18e   : > { %v934_v46 = vpop.f32.mrf.mxu2  ;;  %2024 = vmatpush.msra.mxu0 %v2776_v51 }
 0x18f   : > { %v3822_v29 = vadd.f32 %v934_v46, %v821_v4  ;;  %1334 = vmatmul.f32.gmra.mxu0 %v1215_v55  ;;  %874 = vmatmul.f32.gmra.mxu3 %v4840_v19  ;;  %v2774_v4 = vld [vmem:[%s4741_s4 + $0x398] sm:$0xff] }
 0x190   : > { %1489 = vmatmul.f32.gmra.mxu1 %v3603_v36  ;;  %2025 = vmatpush.msra.mxu0 %v2775_v54  ;;  %v2772_v36 = vld [vmem:[%s4741_s4 + $0x388] sm:$0xff]  ;;  %v3861_v54 = vld [vmem:[#allocation2 + $0xd9] sm:$0xff] }
 0x191   : > { %4839 = vst [vmem:[#allocation37_spill] sm:$0xff] %v3822_v29 }
 0x192   : > { %2026 = vmatpush.msra.mxu0 %v2774_v4  ;;  %v1218_v4 = vld [vmem:[#allocation2 + $0x180] sm:$0xff] }
 0x193   : > { %984 = vmatmul.f32.gmra.mxu2 %v1215_v55  ;;  %v3855_v51 = vpop.f32.mrf.mxu0  ;;  %v1217_v55 = vld [vmem:[#allocation2 + $0x170] sm:$0xff] }
 0x194   : > { %v830_v27 = vpop.f32.mrf.mxu1  ;;  %2027 = vmatpush.msra.mxu0 %v2773_v11  ;;  %4844 = vst [vmem:[#allocation40_spill] sm:$0xff] %v3855_v51  ;;  %v995_v11 = vld [vmem:[#allocation2 + $0xa] sm:$0xff] }
 0x195   : > { %v3979_v51 = vld [vmem:[#allocation2 + $0x6a] sm:$0xff] }
 0x196   : > { %v937_v16 = vpop.f32.mrf.mxu2  ;;  %2028 = vmatpush.msra.mxu0 %v2772_v36 }
 0x197   : > { %v3844_v18 = vadd.f32 %v937_v16, %v824_v17  ;;  %1337 = vmatmul.f32.gmra.mxu0 %v1216_v47  ;;  %877 = vmatmul.f32.gmra.mxu3 %v4843_v5  ;;  %v994_v17 = vld [vmem:[#allocation2 + $0x2] sm:$0xff] }
 0x198   : > { %1492 = vmatmul.f32.gmra.mxu1 %v3615_v21  ;;  %2029 = vmatpush.msra.mxu0 %v2771_v62  ;;  %v2801_v21 = vld [vmem:[%s4741_s4 + $0x470] sm:$0xff]  ;;  %v3873_v5 = vld [vmem:[#allocation2 + $0xe1] sm:$0xff] }
 0x199   : > { %4842 = vst [vmem:[#allocation39_spill] sm:$0xff] %v3844_v18  ;;  %2209 = vmatpush.msra.mxu1 %v2801_v21  ;;  %v2768_v62 = vld [vmem:[%s4741_s4 + $0x368] sm:$0xff] }
 0x19a   : > { %1822 = vmatpush.msra.mxu3 %v2768_v62  ;;  %v1577_v62 = vld [vmem:[#allocation2 + $0x22] sm:$0xff] }
 0x19b   : > { %987 = vmatmul.f32.gmra.mxu2 %v1216_v47  ;;  %v3867_v47 = vpop.f32.mrf.mxu0 }
 0x19c   : > { %4846 = vst [vmem:[#allocation42_spill] sm:$0xff] %v3867_v47 }
 0x19d   : > { %v3857_v46 = vpop.f32.mrf.mxu1 }
 0x19e   : > { %v940_v28 = vpop.f32.mrf.mxu2 }
 0x19f   : > { %v3859_v19 = vadd.f32 %v940_v28, %v827_v53  ;;  %1340 = vmatmul.f32.gmra.mxu0 %v1217_v55  ;;  %1059 = vmatmul.f32.vlgmr.msrb.gmra.mxu3 %v994_v17  ;;  %v1219_v28 = vld [vmem:[#allocation2 + $0x188] sm:$0xff] }
 0x1a0   : > { %1495 = vmatmul.f32.gmra.mxu1 %v3861_v54 }
 0x1a1   : > { %4845 = vst [vmem:[#allocation41_spill] sm:$0xff] %v3859_v19  ;;  %v2762_v19 = vld [vmem:[%s4741_s4 + $0x338] sm:$0xff] }
 0x1a2   : > { %v833_v61 = vpop.f32.mrf.mxu3 }
 0x1a3   : > { %990 = vmatmul.f32.gmra.mxu2 %v1217_v55 }
 0x1a5   : > { %v3869_v36 = vpop.f32.mrf.mxu1 }
 0x1a6   : > { %v943_v53 = vpop.f32.mrf.mxu2 }
 0x1a7   : > { %v3871_v16 = vadd.f32 %v943_v53, %v830_v27  ;;  %1343 = vmatmul.f32.gmra.mxu0 %v1218_v4  ;;  %1062 = vmatmul.f32.gmra.mxu3 %v995_v11  ;;  %v3881_v27 = vpop.f32.mrf.mxu0  ;;  %v3885_v11 = vld [vmem:[#allocation2 + $0xf1] sm:$0xff]  ;;  %v2800_v53 = vld [vmem:[%s4741_s4 + $0x468] sm:$0xff] }
 0x1a8   : > { %1498 = vmatmul.f32.gmra.mxu1 %v3873_v5  ;;  %4848 = vst [vmem:[#allocation44_spill] sm:$0xff] %v3881_v27  ;;  %v3971_v27 = vld [vmem:[#allocation2 + $0x139] sm:$0xff] }
 0x1a9   : > { %4847 = vst [vmem:[#allocation43_spill] sm:$0xff] %v3871_v16  ;;  %2210 = vmatpush.msra.mxu1 %v2800_v53  ;;  %v3903_v53 = vld [vmem:[#allocation2 + $0x32] sm:$0xff] }
 0x1aa   : > { %v836_v17 = vpop.f32.mrf.mxu3 }
 0x1ab   : > { %1641 = vmatmul.f32.vlgmr.msra.gmra.mxu2 %v1576_v38 }
 0x1ad   : > { %v3879_v55 = vpop.f32.mrf.mxu1 }
 0x1ae   : > { %v946_v21 = vpop.f32.mrf.mxu2 }
 0x1af   : > { %v3883_v4 = vadd.f32 %v946_v21, %v833_v61  ;;  %1346 = vmatmul.f32.gmra.mxu0 %v1219_v28  ;;  %1065 = vmatmul.f32.gmra.mxu3 %v1576_v38  ;;  %v3895_v38 = vld [vmem:[#allocation2 + $0xf9] sm:$0xff]  ;;  %v3901_v21 = vpop.f32.mrf.mxu0 }
 0x1b0   : > { %1501 = vmatmul.f32.gmra.mxu1 %v3885_v11  ;;  %v2767_v28 = vld [vmem:[%s4741_s4 + $0x360] sm:$0xff]  ;;  %4851 = vst [vmem:[#allocation47_spill] sm:$0xff] %v3901_v21 }
 0x1b1   : > { %4849 = vst [vmem:[#allocation45_spill] sm:$0xff] %v3883_v4  ;;  %1823 = vmatpush.msra.mxu3 %v2767_v28  ;;  %v2799_v28 = vld [vmem:[%s4741_s4 + $0x460] sm:$0xff]  ;;  %v4054_v4 = vld [vmem:[#allocation2 + $0x169] sm:$0xff] }
 0x1b2   : > { %v839_v34 = vpop.f32.mrf.mxu3  ;;  %2211 = vmatpush.msra.mxu1 %v2799_v28  ;;  %v2766_v28 = vld [vmem:[%s4741_s4 + $0x358] sm:$0xff]  ;;  %4872 = vst [vmem:[#allocation68_spill] sm:$0xff] %v4054_v4 }
 0x1b3   : > { %1644 = vmatmul.f32.gmra.mxu2 %v1577_v62  ;;  %1824 = vmatpush.msra.mxu3 %v2766_v28  ;;  %v2798_v28 = vld [vmem:[%s4741_s4 + $0x458] sm:$0xff] }
 0x1b4   : > { %2212 = vmatpush.msra.mxu1 %v2798_v28  ;;  %v2765_v28 = vld [vmem:[%s4741_s4 + $0x350] sm:$0xff] }
 0x1b5   : > { %v3891_v50 = vpop.f32.mrf.mxu1  ;;  %1825 = vmatpush.msra.mxu3 %v2765_v28  ;;  %v2797_v28 = vld [vmem:[%s4741_s4 + $0x450] sm:$0xff] }
 0x1b6   : > { %v949_v13 = vpop.f32.mrf.mxu2  ;;  %2213 = vmatpush.msra.mxu1 %v2797_v28  ;;  %v2764_v28 = vld [vmem:[%s4741_s4 + $0x348] sm:$0xff] }
 0x1b7   : > { %v3893_v61 = vadd.f32 %v949_v13, %v836_v17  ;;  %2030 = vmatmul.f32.vlgmr.msra.gmra.mxu0 %v1965_v59  ;;  %1068 = vmatmul.f32.gmra.mxu3 %v1577_v62  ;;  %v1966_v17 = vld [vmem:[#allocation2 + $0x39] sm:$0xff]  ;;  %v3919_v52 = vpop.f32.mrf.mxu0 }
 0x1b8   : > { %1504 = vmatmul.f32.gmra.mxu1 %v3895_v38  ;;  %4853 = vst [vmem:[#allocation49_spill] sm:$0xff] %v3919_v52  ;;  %v3963_v52 = vld [vmem:[#allocation2 + $0x62] sm:$0xff]  ;;  %1826 = vmatpush.msra.mxu3 %v2764_v28  ;;  %v4007_v28 = vld [vmem:[#allocation2 + $0x151] sm:$0xff] }
 0x1b9   : > { %4850 = vst [vmem:[#allocation46_spill] sm:$0xff] %v3893_v61  ;;  %v2789_v61 = vld [vmem:[%s4741_s4 + $0x410] sm:$0xff] }
 0x1ba   : > { %v842_v24 = vpop.f32.mrf.mxu3 }
 0x1bb   : > { %1647 = vmatmul.f32.gmra.mxu2 %v3903_v53 }
 0x1bd   : > { %v3906_v59 = vpop.f32.mrf.mxu1 }
 0x1be   : > { %v952_v13 = vpop.f32.mrf.mxu2 }
 0x1bf   : > { %v3908_v62 = vadd.f32 %v952_v13, %v839_v34  ;;  %2033 = vmatmul.f32.gmra.mxu0 %v1966_v17  ;;  %1071 = vmatmul.f32.gmra.mxu3 %v3903_v53  ;;  %v1967_v13 = vld [vmem:[#allocation2 + $0x49] sm:$0xff] }
 0x1c0   : > { %1507 = vmatmul.f32.gmra.mxu1 %v3911_v7 }
 0x1c1   : > { %4852 = vst [vmem:[#allocation48_spill] sm:$0xff] %v3908_v62  ;;  %v4029_v62 = vld [vmem:[#allocation2 + $0x159] sm:$0xff] }
 0x1c2   : > { %v845_v37 = vpop.f32.mrf.mxu3  ;;  %4868 = vst [vmem:[#allocation64_spill] sm:$0xff] %v4029_v62 }
 0x1c3   : > { %1650 = vmatmul.f32.gmra.mxu2 %v3917_v43 }
 0x1c5   : > { %v3930_v6 = vpop.f32.mrf.mxu1 }
 0x1c6   : > { %v955_v34 = vpop.f32.mrf.mxu2 }
 0x1c7   : > { %v3922_v17 = vadd.f32 %v955_v34, %v842_v24  ;;  %2036 = vmatmul.f32.gmra.mxu0 %v1967_v13  ;;  %1074 = vmatmul.f32.gmra.mxu3 %v3917_v43  ;;  %v3936_v24 = vpop.f32.mrf.mxu0  ;;  %v1968_v13 = vld [vmem:[#allocation2 + $0x51] sm:$0xff] }
 0x1c8   : > { %1510 = vmatmul.f32.gmra.mxu1 %v3925_v35  ;;  %4855 = vst [vmem:[#allocation51_spill] sm:$0xff] %v3936_v24  ;;  %v3957_v24 = vld [vmem:[#allocation2 + $0x129] sm:$0xff] }
 0x1c9   : > { %4854 = vst [vmem:[#allocation50_spill] sm:$0xff] %v3922_v17 }
 0x1ca   : > { %v848_v1 = vpop.f32.mrf.mxu3 }
 0x1cb   : > { %1653 = vmatmul.f32.gmra.mxu2 %v3933_v9 }
 0x1cd   : > { %v3949_v33 = vpop.f32.mrf.mxu1 }
 0x1ce   : > { %v958_v34 = vpop.f32.mrf.mxu2 }
 0x1cf   : > { %v3938_v20 = vadd.f32 %v958_v34, %v845_v37  ;;  %2039 = vmatmul.f32.gmra.mxu0 %v1968_v13  ;;  %1077 = vmatmul.f32.gmra.mxu3 %v3933_v9  ;;  %v1969_v34 = vld [vmem:[#allocation2 + $0x61] sm:$0xff]  ;;  %v3952_v13 = vpop.f32.mrf.mxu0 }
 0x1d0   : > { %1513 = vmatmul.f32.gmra.mxu1 %v3941_v41  ;;  %4857 = vst [vmem:[#allocation53_spill] sm:$0xff] %v3952_v13 }
 0x1d1   : > { %4856 = vst [vmem:[#allocation52_spill] sm:$0xff] %v3938_v20  ;;  %v4015_v20 = vld [vmem:[#allocation2 + $0x82] sm:$0xff] }
 0x1d2   : > { %v851_v49 = vpop.f32.mrf.mxu3 }
 0x1d3   : > { %1656 = vmatmul.f32.gmra.mxu2 %v3947_v57 }
 0x1d5   : > { %v3966_v13 = vpop.f32.mrf.mxu1 }
 0x1d6   : > { %v961_v37 = vpop.f32.mrf.mxu2 }
 0x1d7   : > { %v3954_v23 = vadd.f32 %v961_v37, %v848_v1  ;;  %2042 = vmatmul.f32.gmra.mxu0 %v1969_v34  ;;  %1080 = vmatmul.f32.gmra.mxu3 %v3947_v57  ;;  %v1970_v37 = vld [vmem:[#allocation2 + $0x69] sm:$0xff]  ;;  %v3977_v47 = vpop.f32.mrf.mxu0 }
 0x1d8   : > { %1516 = vmatmul.f32.gmra.mxu1 %v3957_v24  ;;  %4860 = vst [vmem:[#allocation56_spill] sm:$0xff] %v3977_v47  ;;  %v3993_v47 = vld [vmem:[#allocation2 + $0x7a] sm:$0xff] }
 0x1d9   : > { %4858 = vst [vmem:[#allocation54_spill] sm:$0xff] %v3954_v23 }
 0x1da   : > { %v854_v21 = vpop.f32.mrf.mxu3 }
 0x1db   : > { %1659 = vmatmul.f32.gmra.mxu2 %v3963_v52 }
 0x1de   : > { %v964_v1 = vpop.f32.mrf.mxu2 }
 0x1df   : > { %v3968_v34 = vadd.f32 %v964_v1, %v851_v49  ;;  %2045 = vmatmul.f32.gmra.mxu0 %v1970_v37  ;;  %1083 = vmatmul.f32.gmra.mxu3 %v3963_v52  ;;  %v3982_v49 = vpop.f32.mrf.mxu1  ;;  %v1971_v37 = vld [vmem:[#allocation2 + $0x79] sm:$0xff] }
 0x1e0   : > { %1519 = vmatmul.f32.gmra.mxu1 %v3971_v27  ;;  %4861 = vst [vmem:[#allocation57_spill] sm:$0xff] %v3982_v49  ;;  %v3995_v49 = vpop.f32.mrf.mxu0 }
 0x1e1   : > { %4859 = vst [vmem:[#allocation55_spill] sm:$0xff] %v3968_v34 }
 0x1e2   : > { %v857_v48 = vpop.f32.mrf.mxu3  ;;  %4863 = vst [vmem:[#allocation59_spill] sm:$0xff] %v3995_v49 }
 0x1e3   : > { %1662 = vmatmul.f32.gmra.mxu2 %v3979_v51 }
 0x1e6   : > { %v967_v1 = vpop.f32.mrf.mxu2 }
 0x1e7   : > { %v3984_v22 = vadd.f32 %v967_v1, %v854_v21  ;;  %2048 = vmatmul.f32.gmra.mxu0 %v1971_v37  ;;  %1086 = vmatmul.f32.gmra.mxu3 %v3979_v51  ;;  %v2796_v21 = vld [vmem:[%s4741_s4 + $0x448] sm:$0xff]  ;;  %v4009_v49 = vpop.f32.mrf.mxu1 }
 0x1e8   : > { %1522 = vmatmul.f32.gmra.mxu1 %v3987_v15  ;;  %v1972_v37 = vld [vmem:[#allocation2 + $0x81] sm:$0xff]  ;;  %4865 = vst [vmem:[#allocation61_spill] sm:$0xff] %v4009_v49  ;;  %v1973_v49 = vld [vmem:[#allocation2 + $0x91] sm:$0xff] }
 0x1e9   : > { %4862 = vst [vmem:[#allocation58_spill] sm:$0xff] %v3984_v22  ;;  %2214 = vmatpush.msra.mxu1 %v2796_v21  ;;  %v2795_v22 = vld [vmem:[%s4741_s4 + $0x440] sm:$0xff]  ;;  %v2794_v21 = vld [vmem:[%s4741_s4 + $0x438] sm:$0xff] }
 0x1ea   : > { %v860_v34 = vpop.f32.mrf.mxu3 }
 0x1eb   : > { %1665 = vmatmul.f32.gmra.mxu2 %v3993_v47  ;;  %2215 = vmatpush.msra.mxu1 %v2795_v22 }
 0x1ed   : > { %2216 = vmatpush.msra.mxu1 %v2794_v21  ;;  %v2763_v21 = vld [vmem:[%s4741_s4 + $0x340] sm:$0xff] }
 0x1ee   : > { %v970_v1 = vpop.f32.mrf.mxu2  ;;  %1827 = vmatpush.msra.mxu3 %v2763_v21  ;;  %v1974_v21 = vld [vmem:[#allocation2 + $0x99] sm:$0xff] }
 0x1ef   : > { %v4004_v23 = vadd.f32 %v970_v1, %v857_v48  ;;  %2051 = vmatmul.f32.gmra.mxu0 %v1972_v37  ;;  %1089 = vmatmul.f32.gmra.mxu3 %v3993_v47  ;;  %v2793_v48 = vld [vmem:[%s4741_s4 + $0x430] sm:$0xff]  ;;  %v4021_v1 = vpop.f32.mrf.mxu0 }
 0x1f0   : > { %1525 = vmatmul.f32.gmra.mxu1 %v4007_v28  ;;  %4866 = vst [vmem:[#allocation62_spill] sm:$0xff] %v4021_v1  ;;  %v4038_v1 = vpop.f32.mrf.mxu1  ;;  %1828 = vmatpush.msra.mxu3 %v2762_v19  ;;  %v4090_v19 = vld [vmem:[#allocation2 + $0xb2] sm:$0xff] }
 0x1f1   : > { %4864 = vst [vmem:[#allocation60_spill] sm:$0xff] %v4004_v23  ;;  %2217 = vmatpush.msra.mxu1 %v2793_v48  ;;  %v2792_v23 = vld [vmem:[%s4741_s4 + $0x428] sm:$0xff]  ;;  %v2791_v48 = vld [vmem:[%s4741_s4 + $0x420] sm:$0xff] }
 0x1f2   : > { %v863_v17 = vpop.f32.mrf.mxu3  ;;  %4869 = vst [vmem:[#allocation65_spill] sm:$0xff] %v4038_v1 }
 0x1f3   : > { %1668 = vmatmul.f32.gmra.mxu2 %v4015_v20  ;;  %2218 = vmatpush.msra.mxu1 %v2792_v23 }
 0x1f5   : > { %2219 = vmatpush.msra.mxu1 %v2791_v48  ;;  %v2788_v48 = vld [vmem:[%s4741_s4 + $0x408] sm:$0xff] }
 0x1f6   : > { %v973_v37 = vpop.f32.mrf.mxu2 }
 0x1f7   : > { %v4026_v22 = vadd.f32 %v973_v37, %v860_v34  ;;  %2054 = vmatmul.f32.gmra.mxu0 %v1973_v49  ;;  %1092 = vmatmul.f32.gmra.mxu3 %v4015_v20  ;;  %v4040_v34 = vld [vmem:[#allocation2 + $0x92] sm:$0xff]  ;;  %v4049_v23 = vpop.f32.mrf.mxu0 }
 0x1f8   : > { %1528 = vmatmul.f32.gmra.mxu1 %v4029_v62  ;;  %v2790_v37 = vld [vmem:[%s4741_s4 + $0x418] sm:$0xff]  ;;  %4870 = vst [vmem:[#allocation66_spill] sm:$0xff] %v4049_v23  ;;  %v1975_v23 = vld [vmem:[#allocation2 + $0xa9] sm:$0xff] }
 0x1f9   : > { %4867 = vst [vmem:[#allocation63_spill] sm:$0xff] %v4026_v22  ;;  %2220 = vmatpush.msra.mxu1 %v2790_v37  ;;  %v4060_v37 = vld [vmem:[#allocation2 + $0x9a] sm:$0xff] }
 0x1fa   : > { %v866_v49 = vpop.f32.mrf.mxu3 }
 0x1fb   : > { %1671 = vmatmul.f32.gmra.mxu2 %v4040_v34  ;;  %2221 = vmatpush.msra.mxu1 %v2789_v61  ;;  %v4071_v61 = vld [vmem:[#allocation2 + $0x171] sm:$0xff] }
 0x1fc   : > { %4875 = vst [vmem:[#allocation71_spill] sm:$0xff] %v4071_v61 }
 0x1fd   : > { %2222 = vmatpush.msra.mxu1 %v2788_v48 }
 0x1fe   : > { %v976_v22 = vpop.f32.mrf.mxu2 }
 0x1ff   : > { %v4051_v1 = vadd.f32 %v976_v22, %v863_v17  ;;  %2057 = vmatmul.f32.gmra.mxu0 %v1974_v21  ;;  %1095 = vmatmul.f32.gmra.mxu3 %v4040_v34  ;;  %v2787_v17 = vld [vmem:[%s4741_s4 + $0x400] sm:$0xff]  ;;  %v4066_v22 = vpop.f32.mrf.mxu1  ;;  %v4077_v48 = vpop.f32.mrf.mxu0 }
 0x200   : > { %1531 = vmatmul.f32.gmra.mxu1 %v4054_v4  ;;  %4873 = vst [vmem:[#allocation69_spill] sm:$0xff] %v4066_v22  ;;  %v4079_v22 = vld [vmem:[#allocation2 + $0xaa] sm:$0xff] }
 0x201   : > { %4871 = vst [vmem:[#allocation67_spill] sm:$0xff] %v4051_v1  ;;  %2223 = vmatpush.msra.mxu1 %v2787_v17  ;;  %v4095_v4 = vld [vmem:[#allocation2 + $0x189] sm:$0xff] }
 0x202   : > { %v869_v16 = vpop.f32.mrf.mxu3  ;;  %4876 = vst [vmem:[#allocation72_spill] sm:$0xff] %v4077_v48 }
 0x203   : > { %1674 = vmatmul.f32.gmra.mxu2 %v4060_v37  ;;  %4881 = vst [vmem:[#allocation77_spill] sm:$0xff] %v4095_v4 }
 0x206   : > { %v979_v21 = vpop.f32.mrf.mxu2 }
 0x207   : > { %v4068_v1 = vadd.f32 %v979_v21, %v866_v49  ;;  %2060 = vmatmul.f32.gmra.mxu0 %v1975_v23  ;;  %1098 = vmatmul.f32.gmra.mxu3 %v4060_v37  ;;  %v4082_v49 = vld [vmem:[#allocation2 + $0x181] sm:$0xff]  ;;  %v4084_v23 = vpop.f32.mrf.mxu1 }
 0x208   : > { %1534 = vmatmul.f32.gmra.mxu1 %v4071_v61  ;;  %4877 = vst [vmem:[#allocation73_spill] sm:$0xff] %v4082_v49  ;;  %v4092_v61 = vpop.f32.mrf.mxu0 }
 0x209   : > { %4874 = vst [vmem:[#allocation70_spill] sm:$0xff] %v4068_v1  ;;  %v1976_v1 = vld [vmem:[#allocation2 + $0xb1] sm:$0xff] }
 0x20a   : > { %v872_v17 = vpop.f32.mrf.mxu3  ;;  %4878 = vst [vmem:[#allocation74_spill] sm:$0xff] %v4084_v23  ;;  %v1977_v23 = vld [vmem:[#allocation2 + $0xc1] sm:$0xff] }
 0x20b   : > { %1677 = vmatmul.f32.gmra.mxu2 %v4079_v22  ;;  %4880 = vst [vmem:[#allocation76_spill] sm:$0xff] %v4092_v61 }
 0x20e   : > { %v982_v21 = vpop.f32.mrf.mxu2 }
 0x20f   : > { %v4086_v18 = vadd.f32 %v982_v21, %v869_v16  ;;  %2063 = vmatmul.f32.gmra.mxu0 %v1976_v1  ;;  %1101 = vmatmul.f32.gmra.mxu3 %v4079_v22  ;;  %v2761_v16 = vld [vmem:[%s4741_s4 + $0x330] sm:$0xff]  ;;  %v4103_v1 = vpop.f32.mrf.mxu1  ;;  %v4106_v21 = vld [vmem:[#allocation2 + $0xc2] sm:$0xff] }
 0x210   : > { %1537 = vmatmul.f32.gmra.mxu1 %v4082_v49  ;;  %4883 = vst [vmem:[#allocation79_spill] sm:$0xff] %v4103_v1  ;;  %1829 = vmatpush.msra.mxu3 %v2761_v16  ;;  %v899_v1 = vadd.f32 %v3625_v60, %v3593_v44  ;;  %v2760_v44 = vld [vmem:[%s4741_s4 + $0x328] sm:$0xff] }
 0x211   : > { %4879 = vst [vmem:[#allocation75_spill] sm:$0xff] %v4086_v18  ;;  %v4109_v18 = vpop.f32.mrf.mxu0 }
 0x212   : > { %v875_v48 = vpop.f32.mrf.mxu3  ;;  %4884 = vst [vmem:[#allocation80_spill] sm:$0xff] %v4109_v18  ;;  %1830 = vmatpush.msra.mxu3 %v2760_v44 }
 0x213   : > { %1680 = vmatmul.f32.gmra.mxu2 %v4090_v19 }
 0x216   : > { %v985_v29 = vpop.f32.mrf.mxu2 }
 0x217   : > { %v4097_v62 = vadd.f32 %v985_v29, %v872_v17  ;;  %2066 = vmatmul.f32.gmra.mxu0 %v1977_v23  ;;  %1104 = vmatmul.f32.gmra.mxu3 %v4090_v19  ;;  %v1978_v17 = vld [vmem:[#allocation2 + $0xc9] sm:$0xff]  ;;  %v4117_v16 = vpop.f32.mrf.mxu1 }
 0x218   : > { %1540 = vmatmul.f32.gmra.mxu1 %v4095_v4 }
 0x219   : > { %4882 = vst [vmem:[#allocation78_spill] sm:$0xff] %v4097_v62  ;;  %v4119_v62 = vld [vmem:[#allocation2 + $0xca] sm:$0xff]  ;;  %v4122_v31 = vpop.f32.mrf.mxu0 }
 0x21a   : > { %v878_v61 = vpop.f32.mrf.mxu3  ;;  %4885 = vst [vmem:[#allocation81_spill] sm:$0xff] %v4122_v31 }
 0x21b   : > { %1683 = vmatmul.f32.gmra.mxu2 %v4106_v21 }
 0x21e   : > { %v988_v29 = vpop.f32.mrf.mxu2 }
 0x21f   : > { %v4111_v23 = vadd.f32 %v988_v29, %v875_v48  ;;  %2069 = vmatmul.f32.gmra.mxu0 %v1978_v17  ;;  %1107 = vmatmul.f32.gmra.mxu3 %v4106_v21 }
 0x220   : > { %2224 = vmatmul.f32.vlgmr.msra.gmra.mxu1 %v3903_v53  ;;  %v4133_v53 = vld [vmem:[#allocation2 + $0xda] sm:$0xff] }
 0x222   : > { %v1060_v4 = vpop.f32.mrf.mxu3 }
 0x223   : > { %1686 = vmatmul.f32.gmra.mxu2 %v4119_v62  ;;  %v1156_v18 = vadd.f32 %v1060_v4, %v899_v1 }
 0x225   : > { %v1350_v60 = vadd.f32 %v3633_v42, %v1156_v18  ;;  %v4148_v18 = vld [vmem:[#allocation2 + $0xe2] sm:$0xff] }
 0x226   : > { %v991_v49 = vpop.f32.mrf.mxu2 }
 0x227   : > { %v4124_v48 = vadd.f32 %v991_v49, %v878_v61  ;;  %2072 = vmatmul.f32.gmra.mxu0 %v3861_v54  ;;  %1110 = vmatmul.f32.gmra.mxu3 %v4119_v62  ;;  %v4137_v49 = vpop.f32.mrf.mxu1  ;;  %v1544_v54 = vadd.f32 %v3857_v46, %v1350_v60 }
 0x228   : > { %2227 = vmatmul.f32.gmra.mxu1 %v3917_v43  ;;  %v4145_v43 = vpop.f32.mrf.mxu0 }
 0x229   : > { %4886 = vst [vmem:[#allocation82_spill] sm:$0xff] %v4145_v43 }
 0x22a   : > { %v1063_v4 = vpop.f32.mrf.mxu3 }
 0x22b   : > { %1689 = vmatmul.f32.gmra.mxu2 %v4133_v53  ;;  %v1157_v61 = vadd.f32 %v1063_v4, %v3635_v0 }
 0x22d   : > { %v1351_v42 = vadd.f32 %v3643_v56, %v1157_v61 }
 0x22e   : > { %v1642_v1 = vpop.f32.mrf.mxu2 }
 0x22f   : > { %v4140_v29 = vadd.f32 %v1642_v1, %v1544_v54  ;;  %2075 = vmatmul.f32.gmra.mxu0 %v3873_v5  ;;  %1113 = vmatmul.f32.gmra.mxu3 %v4133_v53  ;;  %v1545_v17 = vadd.f32 %v3869_v36, %v1351_v42  ;;  %v4153_v44 = vpop.f32.mrf.mxu1  ;;  %v4179_v42 = vld [vmem:[#allocation2 + $0xfa] sm:$0xff] }
 0x230   : > { %2230 = vmatmul.f32.gmra.mxu1 %v3933_v9  ;;  %v2759_v9 = vld [vmem:[%s4741_s4 + $0x320] sm:$0xff]  ;;  %v4166_v4 = vpop.f32.mrf.mxu0 }
 0x231   : > { %1831 = vmatpush.msra.mxu3 %v2759_v9  ;;  %4887 = vst [vmem:[#allocation83_spill] sm:$0xff] %v4166_v4  ;;  %v4908_v4 = vld [vmem:[#allocation48_spill] sm:$0xff] }
 0x232   : > { %v1066_v0 = vpop.f32.mrf.mxu3 }
 0x233   : > { %1692 = vmatmul.f32.gmra.mxu2 %v4148_v18  ;;  %v1158_v46 = vadd.f32 %v1066_v0, %v3645_v2  ;;  %v4164_v2 = vld [vmem:[#allocation2 + $0xf2] sm:$0xff] }
 0x235   : > { %v1352_v56 = vadd.f32 %v3653_v14, %v1158_v46 }
 0x236   : > { %v1645_v5 = vpop.f32.mrf.mxu2 }
 0x237   : > { %v4155_v60 = vadd.f32 %v1645_v5, %v1545_v17  ;;  %2078 = vmatmul.f32.gmra.mxu0 %v3885_v11  ;;  %1116 = vmatmul.f32.gmra.mxu3 %v4148_v18  ;;  %v1546_v61 = vadd.f32 %v3879_v55, %v1352_v56  ;;  %v4197_v5 = vld [vmem:[#allocation2 + $0x10a] sm:$0xff] }
 0x238   : > { %2233 = vmatmul.f32.gmra.mxu1 %v3947_v57  ;;  %v4175_v57 = vpop.f32.mrf.mxu1  ;;  %v4183_v55 = vpop.f32.mrf.mxu0 }
 0x239   : > { %4888 = vst [vmem:[#allocation84_spill] sm:$0xff] %v4183_v55 }
 0x23a   : > { %v1069_v36 = vpop.f32.mrf.mxu3 }
 0x23b   : > { %1695 = vmatmul.f32.gmra.mxu2 %v4164_v2  ;;  %v1159_v11 = vadd.f32 %v1069_v36, %v3655_v10 }
 0x23d   : > { %v1353_v14 = vadd.f32 %v3663_v39, %v1159_v11 }
 0x23e   : > { %v1648_v54 = vpop.f32.mrf.mxu2 }
 0x23f   : > { %v4171_v1 = vadd.f32 %v1648_v54, %v1546_v61  ;;  %2081 = vmatmul.f32.gmra.mxu0 %v3895_v38  ;;  %1119 = vmatmul.f32.gmra.mxu3 %v4164_v2  ;;  %v1547_v46 = vadd.f32 %v3891_v50, %v1353_v14 }
 0x240   : > { %2236 = vmatmul.f32.gmra.mxu1 %v3963_v52  ;;  %v2758_v52 = vld [vmem:[%s4741_s4 + $0x318] sm:$0xff]  ;;  %v4202_v36 = vpop.f32.mrf.mxu0 }
 0x241   : > { %1832 = vmatpush.msra.mxu3 %v2758_v52  ;;  %4889 = vst [vmem:[#allocation85_spill] sm:$0xff] %v4202_v36  ;;  %v4906_v36 = vld [vmem:[#allocation46_spill] sm:$0xff] }
 0x242   : > { %v1072_v0 = vpop.f32.mrf.mxu3 }
 0x243   : > { %1698 = vmatmul.f32.gmra.mxu2 %v4179_v42  ;;  %v1160_v10 = vadd.f32 %v1072_v0, %v3665_v25  ;;  %v4195_v25 = vpop.f32.mrf.mxu1 }
 0x245   : > { %v1354_v39 = vadd.f32 %v3673_v12, %v1160_v10 }
 0x246   : > { %v1651_v38 = vpop.f32.mrf.mxu2 }
 0x247   : > { %v4186_v17 = vadd.f32 %v1651_v38, %v1547_v46  ;;  %2084 = vmatmul.f32.gmra.mxu0 %v3911_v7  ;;  %1122 = vmatmul.f32.gmra.mxu3 %v4179_v42  ;;  %v1548_v9 = vadd.f32 %v3906_v59, %v1354_v39 }
 0x248   : > { %2239 = vmatmul.f32.gmra.mxu1 %v3979_v51  ;;  %v4210_v51 = vld [vmem:[#allocation2 + $0x112] sm:$0xff] }
 0x24a   : > { %v1075_v50 = vpop.f32.mrf.mxu3 }
 0x24b   : > { %1701 = vmatmul.f32.gmra.mxu2 %v4197_v5  ;;  %v1161_v7 = vadd.f32 %v1075_v50, %v3675_v32  ;;  %v4214_v59 = vpop.f32.mrf.mxu1 }
 0x24d   : > { %v1355_v12 = vadd.f32 %v3683_v3, %v1161_v7  ;;  %v4225_v3 = vpop.f32.mrf.mxu0 }
 0x24e   : > { %v1654_v56 = vpop.f32.mrf.mxu2  ;;  %4890 = vst [vmem:[#allocation86_spill] sm:$0xff] %v4225_v3 }
 0x24f   : > { %v4204_v11 = vadd.f32 %v1654_v56, %v1548_v9  ;;  %2087 = vmatmul.f32.gmra.mxu0 %v3925_v35  ;;  %1125 = vmatmul.f32.gmra.mxu3 %v4197_v5  ;;  %v1549_v54 = vadd.f32 %v3930_v6, %v1355_v12  ;;  %v2757_v35 = vld [vmem:[%s4741_s4 + $0x310] sm:$0xff] }
 0x250   : > { %2242 = vmatmul.f32.gmra.mxu1 %v3993_v47  ;;  %1833 = vmatpush.msra.mxu3 %v2757_v35  ;;  %v4228_v47 = vld [vmem:[#allocation2 + $0x122] sm:$0xff] }
 0x252   : > { %v1078_v61 = vpop.f32.mrf.mxu3 }
 0x253   : > { %1704 = vmatmul.f32.gmra.mxu2 %v4210_v51  ;;  %v1162_v32 = vadd.f32 %v1078_v61, %v3685_v8  ;;  %v4233_v46 = vpop.f32.mrf.mxu1 }
 0x255   : > { %v1356_v8 = vadd.f32 %v3701_v63, %v1162_v32  ;;  %v4241_v63 = vld [vmem:[#allocation2 + $0x12a] sm:$0xff]  ;;  %v4243_v50 = vpop.f32.mrf.mxu0 }
 0x256   : > { %v1657_v14 = vpop.f32.mrf.mxu2  ;;  %4891 = vst [vmem:[#allocation87_spill] sm:$0xff] %v4243_v50 }
 0x257   : > { %v4217_v0 = vadd.f32 %v1657_v14, %v1549_v54  ;;  %2090 = vmatmul.f32.gmra.mxu0 %v3941_v41  ;;  %1128 = vmatmul.f32.gmra.mxu3 %v4210_v51  ;;  %v1550_v10 = vadd.f32 %v3949_v33, %v1356_v8 }
 0x258   : > { %2245 = vmatmul.f32.gmra.mxu1 %v4015_v20 }
 0x25a   : > { %v1081_v6 = vpop.f32.mrf.mxu3 }
 0x25b   : > { %1707 = vmatmul.f32.gmra.mxu2 %v4228_v47  ;;  %v1163_v41 = vadd.f32 %v1081_v6, %v3693_v26  ;;  %v4894_v6 = vld [vmem:[#allocation37_spill] sm:$0xff] }
 0x25d   : > { %v1357_v20 = vadd.f32 %v3723_v58, %v1163_v41  ;;  %v2756_v58 = vld [vmem:[%s4741_s4 + $0x308] sm:$0xff] }
 0x25e   : > { %v1660_v38 = vpop.f32.mrf.mxu2  ;;  %1834 = vmatpush.msra.mxu3 %v2756_v58  ;;  %v4897_v58 = vld [vmem:[#allocation71_spill] sm:$0xff] }
 0x25f   : > { %v4235_v52 = vadd.f32 %v1660_v38, %v1550_v10  ;;  %2093 = vmatmul.f32.gmra.mxu0 %v3957_v24  ;;  %1131 = vmatmul.f32.gmra.mxu3 %v4228_v47  ;;  %v1551_v26 = vadd.f32 %v3966_v13, %v1357_v20  ;;  %v4895_v38 = vld [vmem:[#allocation68_spill] sm:$0xff]  ;;  %v4311_v20 = vld [vmem:[#allocation2 + $0x16a] sm:$0xff] }
 0x260   : > { %2248 = vmatmul.f32.gmra.mxu1 %v4040_v34  ;;  %v4257_v34 = vpop.f32.mrf.mxu1 }
 0x262   : > { %v1084_v39 = vpop.f32.mrf.mxu3 }
 0x263   : > { %1710 = vmatmul.f32.gmra.mxu2 %v4241_v63  ;;  %v4247_v33 = vadd.f32 %v1084_v39, %v3709_v30  ;;  %v4260_v30 = vld [vmem:[#allocation2 + $0x13a] sm:$0xff] }
 0x266   : > { %v1663_v7 = vpop.f32.mrf.mxu2 }
 0x267   : > { %v4250_v24 = vadd.f32 %v1663_v7, %v1551_v26  ;;  %2096 = vmatmul.f32.gmra.mxu0 %v3971_v27  ;;  %1134 = vmatmul.f32.gmra.mxu3 %v4241_v63  ;;  %v4266_v27 = vpop.f32.mrf.mxu0  ;;  %v4896_v26 = vld [vmem:[#allocation39_spill] sm:$0xff] }
 0x268   : > { %2251 = vmatmul.f32.gmra.mxu1 %v4060_v37  ;;  %v4271_v56 = vpop.f32.mrf.mxu1  ;;  %v4273_v37 = vld [vmem:[#allocation2 + $0x142] sm:$0xff] }
 0x26a   : > { %v1087_v9 = vpop.f32.mrf.mxu3 }
 0x26b   : > { %1713 = vmatmul.f32.gmra.mxu2 %v4260_v30  ;;  %v4264_v13 = vadd.f32 %v1087_v9, %v3731_v40 }
 0x26f   : > { %2099 = vmatmul.f32.gmra.mxu0 %v3987_v15  ;;  %1137 = vmatmul.f32.gmra.mxu3 %v4260_v30  ;;  %v4279_v40 = vpop.f32.mrf.mxu0  ;;  %v2755_v15 = vld [vmem:[%s4741_s4 + $0x300] sm:$0xff] }
 0x270   : > { %2254 = vmatmul.f32.gmra.mxu1 %v4079_v22  ;;  %1835 = vmatpush.msra.mxu3 %v2755_v15  ;;  %v4287_v22 = vld [vmem:[#allocation2 + $0x152] sm:$0xff]  ;;  %v4293_v14 = vpop.f32.mrf.mxu1  ;;  %v4899_v15 = vld [vmem:[#allocation41_spill] sm:$0xff] }
 0x272   : > { %v1090_v12 = vpop.f32.mrf.mxu3 }
 0x273   : > { %1716 = vmatmul.f32.gmra.mxu2 %v4273_v37  ;;  %v4277_v61 = vadd.f32 %v1090_v12, %v3768_v45  ;;  %v4892_v45 = vld [vmem:[#allocation36_spill] sm:$0xff] }
 0x274   : > { %v4324_v12 = vld [vmem:[#allocation2 + $0x172] sm:$0xff] }
 0x277   : > { %2102 = vmatmul.f32.gmra.mxu0 %v4007_v28  ;;  %1140 = vmatmul.f32.gmra.mxu3 %v4273_v37  ;;  %v4893_v28 = vld [vmem:[#allocation64_spill] sm:$0xff]  ;;  %v4298_v35 = vpop.f32.mrf.mxu0 }
 0x278   : > { %2257 = vmatmul.f32.gmra.mxu1 %v4090_v19  ;;  %v4300_v19 = vld [vmem:[#allocation2 + $0x15a] sm:$0xff]  ;;  %v4306_v10 = vpop.f32.mrf.mxu1 }
 0x27a   : > { %v1093_v32 = vpop.f32.mrf.mxu3 }
 0x27b   : > { %1719 = vmatmul.f32.gmra.mxu2 %v4287_v22  ;;  %v4291_v54 = vadd.f32 %v1093_v32, %v4892_v45 }
 0x27f   : > { %2105 = vmatmul.f32.gmra.mxu0 %v4893_v28  ;;  %1143 = vmatmul.f32.gmra.mxu3 %v4287_v22  ;;  %v4313_v39 = vpop.f32.mrf.mxu0  ;;  %v4900_v28 = vld [vmem:[#allocation73_spill] sm:$0xff] }
 0x280   : > { %2260 = vmatmul.f32.gmra.mxu1 %v4106_v21  ;;  %v4321_v9 = vpop.f32.mrf.mxu1 }
 0x281   : > { %4898 = vst [vmem:[#allocation36_spill] sm:$0xff] %v4321_v9 }
 0x282   : > { %v1096_v8 = vpop.f32.mrf.mxu3 }
 0x283   : > { %1722 = vmatmul.f32.gmra.mxu2 %v4300_v19  ;;  %v4304_v41 = vadd.f32 %v1096_v8, %v4894_v6  ;;  %v4337_v6 = vld [vmem:[#allocation2 + $0x182] sm:$0xff] }
 0x287   : > { %2108 = vmatmul.f32.gmra.mxu0 %v4895_v38  ;;  %1146 = vmatmul.f32.gmra.mxu3 %v4300_v19  ;;  %v4330_v45 = vpop.f32.mrf.mxu0  ;;  %v4902_v38 = vld [vmem:[#allocation43_spill] sm:$0xff] }
 0x288   : > { %2263 = vmatmul.f32.gmra.mxu1 %v4119_v62  ;;  %v4335_v8 = vpop.f32.mrf.mxu1 }
 0x289   : > { %4901 = vst [vmem:[#allocation64_spill] sm:$0xff] %v4335_v8 }
 0x28a   : > { %v1099_v21 = vpop.f32.mrf.mxu3 }
 0x28b   : > { %1725 = vmatmul.f32.gmra.mxu2 %v4311_v20  ;;  %v4317_v7 = vadd.f32 %v1099_v21, %v4896_v26  ;;  %v1771_v26 = vld [vmem:[#allocation2 + $0x30] sm:$0xff] }
 0x28f   : > { %2111 = vmatmul.f32.gmra.mxu0 %v4897_v58  ;;  %1149 = vmatmul.f32.gmra.mxu3 %v4311_v20  ;;  %v4343_v58 = vpop.f32.mrf.mxu0 }
 0x290   : > { %2266 = vmatmul.f32.gmra.mxu1 %v4133_v53  ;;  %v4353_v3 = vpop.f32.mrf.mxu1 }
 0x291   : > { %4905 = vst [vmem:[#allocation37_spill] sm:$0xff] %v4353_v3 }
 0x292   : > { %v1102_v62 = vpop.f32.mrf.mxu3 }
 0x293   : > { %1728 = vmatmul.f32.gmra.mxu2 %v4324_v12  ;;  %v4328_v32 = vadd.f32 %v1102_v62, %v4899_v15  ;;  %v4903_v62 = vld [vmem:[#allocation77_spill] sm:$0xff]  ;;  %v4347_v15 = vld [vmem:[#allocation2 + $0x18a] sm:$0xff] }
 0x297   : > { %2114 = vmatmul.f32.gmra.mxu0 %v4900_v28  ;;  %1152 = vmatmul.f32.gmra.mxu3 %v4324_v12  ;;  %v4904_v28 = vld [vmem:[#allocation45_spill] sm:$0xff] }
 0x298   : > { %2269 = vmatmul.f32.gmra.mxu1 %v4148_v18 }
 0x29a   : > { %v1105_v53 = vpop.f32.mrf.mxu3 }
 0x29b   : > { %1731 = vmatmul.f32.gmra.mxu2 %v4337_v6  ;;  %v4341_v21 = vadd.f32 %v1105_v53, %v4902_v38  ;;  %v1772_v53 = vld [vmem:[#allocation2 + $0x38] sm:$0xff] }
 0x29f   : > { %2117 = vmatmul.f32.gmra.mxu0 %v4903_v62  ;;  %1836 = vmatmul.f32.vlgmr.msra.gmra.mxu3 %v1771_v26  ;;  %v4359_v26 = vpop.f32.mrf.mxu1 }
 0x2a0   : > { %2272 = vmatmul.f32.gmra.mxu1 %v4164_v2  ;;  %4907 = vst [vmem:[#allocation68_spill] sm:$0xff] %v4359_v26  ;;  %v1773_v2 = vld [vmem:[#allocation2 + $0x48] sm:$0xff]  ;;  %v4912_v26 = vld [vmem:[#allocation52_spill] sm:$0xff] }
 0x2a2   : > { %v1108_v18 = vpop.f32.mrf.mxu3 }
 0x2a3   : > { %1734 = vmatmul.f32.gmra.mxu2 %v4347_v15  ;;  %v4351_v50 = vadd.f32 %v1108_v18, %v4904_v28  ;;  %v1774_v28 = vld [vmem:[#allocation2 + $0x50] sm:$0xff] }
 0x2a7   : > { %1839 = vmatmul.f32.gmra.mxu3 %v1772_v53  ;;  %v4365_v3 = vpop.f32.mrf.mxu1  ;;  %v4910_v53 = vld [vmem:[#allocation50_spill] sm:$0xff] }
 0x2a8   : > { %2275 = vmatmul.f32.gmra.mxu1 %v4179_v42  ;;  %4909 = vst [vmem:[#allocation39_spill] sm:$0xff] %v4365_v3 }
 0x2aa   : > { %v1111_v38 = vpop.f32.mrf.mxu3 }
 0x2ab   : > { %v4357_v62 = vadd.f32 %v1111_v38, %v4906_v36  ;;  %v1775_v38 = vld [vmem:[#allocation2 + $0x60] sm:$0xff] }
 0x2af   : > { %1842 = vmatmul.f32.gmra.mxu3 %v1773_v2  ;;  %v4372_v2 = vpop.f32.mrf.mxu1 }
 0x2b0   : > { %2278 = vmatmul.f32.gmra.mxu1 %v4197_v5  ;;  %4911 = vst [vmem:[#allocation71_spill] sm:$0xff] %v4372_v2 }
 0x2b2   : > { %v1114_v55 = vpop.f32.mrf.mxu3 }
 0x2b3   : > { %v4363_v18 = vadd.f32 %v1114_v55, %v4908_v4  ;;  %v1776_v55 = vld [vmem:[#allocation2 + $0x68] sm:$0xff] }
 0x2b7   : > { %1845 = vmatmul.f32.gmra.mxu3 %v1774_v28 }
 0x2b8   : > { %2281 = vmatmul.f32.gmra.mxu1 %v4210_v51  ;;  %v4913_v51 = vld [vmem:[#allocation54_spill] sm:$0xff] }
 0x2ba   : > { %v1117_v42 = vpop.f32.mrf.mxu3 }
 0x2bb   : > { %v4369_v36 = vadd.f32 %v1117_v42, %v4910_v53  ;;  %v4381_v42 = vpop.f32.mrf.mxu1  ;;  %v1777_v53 = vld [vmem:[#allocation2 + $0x78] sm:$0xff] }
 0x2bc   : > { %4914 = vst [vmem:[#allocation41_spill] sm:$0xff] %v4381_v42 }
 0x2bf   : > { %1848 = vmatmul.f32.gmra.mxu3 %v1775_v38  ;;  %v4915_v38 = vld [vmem:[#allocation55_spill] sm:$0xff] }
 0x2c0   : > { %2284 = vmatmul.f32.gmra.mxu1 %v4228_v47 }
 0x2c2   : > { %v1120_v5 = vpop.f32.mrf.mxu3 }
 0x2c3   : > { %v4375_v4 = vadd.f32 %v1120_v5, %v4912_v26  ;;  %v2225_v26 = vpop.f32.mrf.mxu1  ;;  %v1778_v5 = vld [vmem:[#allocation2 + $0x80] sm:$0xff] }
 0x2c7   : > { %1851 = vmatmul.f32.gmra.mxu3 %v1776_v55  ;;  %v4916_v55 = vld [vmem:[#allocation58_spill] sm:$0xff] }
 0x2c8   : > { %2287 = vmatmul.f32.gmra.mxu1 %v4241_v63 }
 0x2ca   : > { %v1123_v28 = vpop.f32.mrf.mxu3 }
 0x2cb   : > { %v4379_v3 = vadd.f32 %v1123_v28, %v4913_v51  ;;  %v1779_v28 = vld [vmem:[#allocation2 + $0x90] sm:$0xff]  ;;  %v2228_v51 = vpop.f32.mrf.mxu1 }
 0x2cf   : > { %1854 = vmatmul.f32.gmra.mxu3 %v1777_v53 }
 0x2d0   : > { %2290 = vmatmul.f32.gmra.mxu1 %v4260_v30  ;;  %v4917_v30 = vld [vmem:[#allocation60_spill] sm:$0xff] }
 0x2d2   : > { %v1126_v47 = vpop.f32.mrf.mxu3 }
 0x2d3   : > { %v4385_v2 = vadd.f32 %v1126_v47, %v4915_v38  ;;  %v1780_v47 = vld [vmem:[#allocation2 + $0x98] sm:$0xff]  ;;  %v2231_v38 = vpop.f32.mrf.mxu1 }
 0x2d7   : > { %1857 = vmatmul.f32.gmra.mxu3 %v1778_v5 }
 0x2d8   : > { %2293 = vmatmul.f32.gmra.mxu1 %v4273_v37  ;;  %v4918_v37 = vld [vmem:[#allocation63_spill] sm:$0xff] }
 0x2da   : > { %v1129_v63 = vpop.f32.mrf.mxu3 }
 0x2db   : > { %v4389_v8 = vadd.f32 %v1129_v63, %v4916_v55  ;;  %v1781_v63 = vld [vmem:[#allocation2 + $0xa8] sm:$0xff]  ;;  %v4403_v9 = vpop.f32.mrf.mxu1 }
 0x2df   : > { %1860 = vmatmul.f32.gmra.mxu3 %v1779_v28  ;;  %v4919_v28 = vld [vmem:[#allocation67_spill] sm:$0xff] }
 0x2e0   : > { %2296 = vmatmul.f32.gmra.mxu1 %v4287_v22 }
 0x2e2   : > { %v1132_v53 = vpop.f32.mrf.mxu3 }
 0x2e3   : > { %v4393_v42 = vadd.f32 %v1132_v53, %v4917_v30  ;;  %v1782_v53 = vld [vmem:[#allocation2 + $0xb0] sm:$0xff]  ;;  %v4921_v30 = vld [vmem:[#allocation70_spill] sm:$0xff] }
 0x2e7   : > { %1863 = vmatmul.f32.gmra.mxu3 %v1780_v47 }
 0x2e8   : > { %2299 = vmatmul.f32.gmra.mxu1 %v4300_v19 }
 0x2ea   : > { %v1135_v5 = vpop.f32.mrf.mxu3 }
 0x2eb   : > { %v4397_v43 = vadd.f32 %v1135_v5, %v4918_v37  ;;  %v4409_v5 = vpop.f32.mrf.mxu1  ;;  %v1783_v37 = vld [vmem:[#allocation2 + $0xc0] sm:$0xff] }
 0x2ef   : > { %1866 = vmatmul.f32.gmra.mxu3 %v1781_v63  ;;  %v4923_v63 = vld [vmem:[#allocation75_spill] sm:$0xff] }
 0x2f0   : > { %2302 = vmatmul.f32.gmra.mxu1 %v4311_v20 }
 0x2f2   : > { %v1138_v55 = vpop.f32.mrf.mxu3 }
 0x2f3   : > { %v4401_v22 = vadd.f32 %v1138_v55, %v4919_v28  ;;  %v1784_v28 = vld [vmem:[#allocation2 + $0xc8] sm:$0xff] }
 0x2f5   : > { %4920 = vst [vmem:[#allocation73_spill] sm:$0xff] %v4401_v22  ;;  %v4415_v22 = vpop.f32.mrf.mxu1 }
 0x2f7   : > { %1869 = vmatmul.f32.gmra.mxu3 %v1782_v53  ;;  %v4925_v53 = vld [vmem:[#allocation78_spill] sm:$0xff] }
 0x2f8   : > { %2305 = vmatmul.f32.gmra.mxu1 %v4324_v12 }
 0x2fa   : > { %v1141_v19 = vpop.f32.mrf.mxu3 }
 0x2fb   : > { %v4407_v47 = vadd.f32 %v1141_v19, %v4921_v30  ;;  %v1785_v30 = vld [vmem:[#allocation2 + $0xd8] sm:$0xff] }
 0x2fd   : > { %4922 = vst [vmem:[#allocation43_spill] sm:$0xff] %v4407_v47 }
 0x2ff   : > { %1872 = vmatmul.f32.gmra.mxu3 %v1783_v37 }
 0x300   : > { %2308 = vmatmul.f32.gmra.mxu1 %v4337_v6  ;;  %v1786_v6 = vld [vmem:[#allocation2 + $0xe0] sm:$0xff] }
 0x302   : > { %v1144_v20 = vpop.f32.mrf.mxu3 }
 0x303   : > { %v4413_v55 = vadd.f32 %v1144_v20, %v4923_v63 }
 0x305   : > { %4924 = vst [vmem:[#allocation77_spill] sm:$0xff] %v4413_v55  ;;  %v2049_v55 = vpop.f32.mrf.mxu0 }
 0x307   : > { %1875 = vmatmul.f32.gmra.mxu3 %v1784_v28  ;;  %v1787_v28 = vld [vmem:[#allocation2 + $0xf0] sm:$0xff] }
 0x308   : > { %2311 = vmatmul.f32.gmra.mxu1 %v4347_v15 }
 0x30a   : > { %v1147_v12 = vpop.f32.mrf.mxu3 }
 0x30b   : > { %v4419_v19 = vadd.f32 %v1147_v12, %v4925_v53  ;;  %v2243_v12 = vpop.f32.mrf.mxu1 }
 0x30d   : > { %4926 = vst [vmem:[#allocation45_spill] sm:$0xff] %v4419_v19 }
 0x30f   : > { %1878 = vmatmul.f32.gmra.mxu3 %v1785_v30  ;;  %v1788_v30 = vld [vmem:[#allocation2 + $0xf8] sm:$0xff] }
 0x312   : > { %v1150_v47 = vpop.f32.mrf.mxu3 }
 0x313   : > { %v4422_v37 = vadd.f32 %v1150_v47, %v4111_v23 }
 0x317   : > { %1881 = vmatmul.f32.gmra.mxu3 %v1786_v6 }
 0x31a   : > { %v1153_v20 = vpop.f32.mrf.mxu3 }
 0x31b   : > { %v4425_v63 = vadd.f32 %v1153_v20, %v4124_v48  ;;  %v2052_v48 = vpop.f32.mrf.mxu0  ;;  %v2246_v20 = vpop.f32.mrf.mxu1 }
 0x31d   : > { %4927 = vst [vmem:[#allocation46_spill] sm:$0xff] %v4425_v63 }
 0x31f   : > { %1884 = vmatmul.f32.gmra.mxu3 %v1787_v28  ;;  %v1789_v28 = vld [vmem:[#allocation2 + $0x108] sm:$0xff] }
 0x322   : > { %v1837_v15 = vpop.f32.mrf.mxu3 }
 0x323   : > { %v1933_v31 = vadd.f32 %v1837_v15, %v4140_v29  ;;  %v1666_v29 = vpop.f32.mrf.mxu2  ;;  %v2055_v15 = vpop.f32.mrf.mxu0 }
 0x325   : > { %v2127_v53 = vadd.f32 %v4266_v27, %v1933_v31 }
 0x327   : > { %1887 = vmatmul.f32.gmra.mxu3 %v1788_v30  ;;  %v2321_v19 = vadd.f32 %v2225_v26, %v2127_v53 }
 0x329   : > { %2385 = vrot.lane.b32.xlu0 %v2321_v19, %s2860_s6  ;;  %v1790_v19 = vld [vmem:[#allocation2 + $0x110] sm:$0xff] }
 0x32a   : > { %v1840_v23 = vpop.f32.mrf.mxu3 }
 0x32b   : > { %v1934_v47 = vadd.f32 %v1840_v23, %v4155_v60  ;;  %v2249_v60 = vpop.f32.mrf.mxu1 }
 0x32d   : > { %v2128_v6 = vadd.f32 %v4279_v40, %v1934_v47  ;;  %v1669_v40 = vpop.f32.mrf.mxu2  ;;  %v1791_v47 = vld [vmem:[#allocation2 + $0x120] sm:$0xff] }
 0x32f   : > { %1890 = vmatmul.f32.gmra.mxu3 %v1789_v28  ;;  %v2322_v63 = vadd.f32 %v2228_v51, %v2128_v6 }
 0x331   : > { %2387 = vrot.lane.b32.xlu0 %v2322_v63, %s2860_s6 }
 0x332   : > { %v1843_v31 = vpop.f32.mrf.mxu3 }
 0x333   : > { %v1935_v27 = vadd.f32 %v1843_v31, %v4171_v1  ;;  %v2058_v1 = vpop.f32.mrf.mxu0 }
 0x335   : > { %v2129_v26 = vadd.f32 %v4298_v35, %v1935_v27  ;;  %v2252_v35 = vpop.f32.mrf.mxu1  ;;  %v1672_v28 = vpop.f32.mrf.mxu2  ;;  %v1792_v27 = vld [vmem:[#allocation2 + $0x128] sm:$0xff] }
 0x337   : > { %1893 = vmatmul.f32.gmra.mxu3 %v1790_v19  ;;  %v2323_v53 = vadd.f32 %v2231_v38, %v2129_v26 }
 0x339   : > { %2389 = vrot.lane.b32.xlu1 %v2323_v53, %s2860_s6 }
 0x33a   : > { %v1846_v30 = vpop.f32.mrf.mxu3 }
 0x33b   : > { %v1936_v23 = vadd.f32 %v1846_v30, %v4186_v17 }
 0x33d   : > { %v2130_v51 = vadd.f32 %v4313_v39, %v1936_v23  ;;  %v2061_v39 = vpop.f32.mrf.mxu0  ;;  %v4445_v19 = vpop.f32.mrf.mxu1 }
 0x33e   : > { %v4448_v30 = vpop.f32.mrf.mxu2 }
 0x33f   : > { %1896 = vmatmul.f32.gmra.mxu3 %v1791_v47  ;;  %v2324_v63 = vadd.f32 %v4403_v9, %v2130_v51 }
 0x341   : > { %2391 = vrot.lane.b32.xlu1 %v2324_v63, %s2860_s6 }
 0x342   : > { %v1849_v6 = vpop.f32.mrf.mxu3 }
 0x343   : > { %v1937_v38 = vadd.f32 %v1849_v6, %v4204_v11  ;;  %v1793_v11 = vld [vmem:[#allocation2 + $0x138] sm:$0xff] }
 0x345   : > { %v2131_v31 = vadd.f32 %v4330_v45, %v1937_v38  ;;  %v4453_v51 = vpop.f32.mrf.mxu0  ;;  %v4455_v63 = vpop.f32.mrf.mxu1 }
 0x347   : > { %1899 = vmatmul.f32.gmra.mxu3 %v1792_v27  ;;  %v2325_v17 = vadd.f32 %v4409_v5, %v2131_v31 }
 0x349   : > { %2393 = vrot.lane.b32.xlu2 %v2325_v17, %s2860_s6 }
 0x34a   : > { %v1852_v26 = vpop.f32.mrf.mxu3 }
 0x34b   : > { %v1938_v9 = vadd.f32 %v1852_v26, %v4217_v0  ;;  %v1794_v0 = vld [vmem:[#allocation2 + $0x140] sm:$0xff]  ;;  %v1795_v26 = vld [vmem:[#allocation2 + $0x150] sm:$0xff] }
 0x34d   : > { %v2132_v53 = vadd.f32 %v4343_v58, %v1938_v9  ;;  %v4457_v58 = vpop.f32.mrf.mxu2 }
 0x34f   : > { %1902 = vmatmul.f32.gmra.mxu3 %v1793_v11  ;;  %v2326_v45 = vadd.f32 %v4415_v22, %v2132_v53  ;;  %v4928_v22 = vld [vmem:[#allocation34_spill] sm:$0xff]  ;;  %v4466_v11 = vpop.f32.mrf.mxu1 }
 0x350   : > { %v1358_v31 = vadd.f32 %v4928_v22, %v4247_v33  ;;  %v4930_v33 = vld [vmem:[#allocation35_spill] sm:$0xff] }
 0x351   : > { %2395 = vrot.lane.b32.xlu2 %v2326_v45, %s2860_s6 }
 0x352   : > { %v1855_v23 = vpop.f32.mrf.mxu3 }
 0x353   : > { %v1939_v5 = vadd.f32 %v1855_v23, %v4235_v52  ;;  %v4463_v52 = vpop.f32.mrf.mxu0 }
 0x355   : > { %v2133_v47 = vadd.f32 %v2049_v55, %v1939_v5  ;;  %v4929_v55 = vld [vmem:[#allocation57_spill] sm:$0xff]  ;;  %v4469_v45 = vpop.f32.mrf.mxu2  ;;  %v1359_v5 = vadd.f32 %v4930_v33, %v4264_v13  ;;  %v4934_v33 = vld [vmem:[#allocation40_spill] sm:$0xff] }
 0x356   : > { %v1552_v9 = vadd.f32 %v4929_v55, %v1358_v31  ;;  %v1797_v55 = vld [vmem:[#allocation2 + $0x168] sm:$0xff] }
 0x357   : > { %1905 = vmatmul.f32.gmra.mxu3 %v1794_v0  ;;  %v2327_v6 = vadd.f32 %v2243_v12, %v2133_v47  ;;  %v1796_v47 = vld [vmem:[#allocation2 + $0x158] sm:$0xff]  ;;  %v4931_v0 = vld [vmem:[#allocation61_spill] sm:$0xff] }
 0x358   : > { %v1746_v12 = vadd.f32 %v1666_v29, %v1552_v9  ;;  %v4477_v29 = vpop.f32.mrf.mxu1  ;;  %v4933_v9 = vld [vmem:[#allocation65_spill] sm:$0xff] }
 0x359   : > { %2397 = vrot.lane.b32.xlu0 %v2327_v6, %s2860_s6  ;;  %v1553_v6 = vadd.f32 %v4931_v0, %v1359_v5  ;;  %v1361_v5 = vadd.f32 %v4934_v33, %v4291_v54  ;;  %v1798_v0 = vld [vmem:[#allocation2 + $0x170] sm:$0xff]  ;;  %v4936_v54 = vld [vmem:[#allocation42_spill] sm:$0xff] }
 0x35a   : > { %v1858_v38 = vpop.f32.mrf.mxu3 }
 0x35b   : > { %v1940_v27 = vadd.f32 %v1858_v38, %v4250_v24  ;;  %v4474_v22 = vpop.f32.mrf.mxu0 }
 0x35d   : > { %v2134_v17 = vadd.f32 %v2052_v48, %v1940_v27  ;;  %v4932_v27 = vld [vmem:[#allocation38_spill] sm:$0xff]  ;;  %v4481_v13 = vpop.f32.mrf.mxu2 }
 0x35f   : > { %1908 = vmatmul.f32.gmra.mxu3 %v1795_v26  ;;  %v2328_v53 = vadd.f32 %v2246_v20, %v2134_v17  ;;  %v1747_v20 = vadd.f32 %v1669_v40, %v1553_v6  ;;  %v1360_v17 = vadd.f32 %v4932_v27, %v4277_v61  ;;  %v1362_v27 = vadd.f32 %v4936_v54, %v4304_v41 }
 0x360   : > { %v2267_v61 = vpop.f32.mrf.mxu1 }
 0x361   : > { %2399 = vrot.lane.b32.xlu1 %v2328_v53, %s2860_s6  ;;  %v1554_v53 = vadd.f32 %v4933_v9, %v1360_v17 }
 0x362   : > { %v1861_v23 = vpop.f32.mrf.mxu3 }
 0x363   : > { %v1941_v24 = vadd.f32 %v1861_v23, %v1746_v12  ;;  %v1748_v12 = vadd.f32 %v1672_v28, %v1554_v53  ;;  %v4485_v40 = vpop.f32.mrf.mxu0  ;;  %v2189_v28 = vld [vmem:[#allocation2 + $0x19a] sm:$0xff] }
 0x364   : > { %2314 = vmatmul.f32.gmra.mxu1 %v2189_v28 }
 0x365   : > { %v2135_v48 = vadd.f32 %v2055_v15, %v1941_v24 }
 0x367   : > { %1911 = vmatmul.f32.gmra.mxu3 %v1796_v47  ;;  %v2329_v38 = vadd.f32 %v2249_v60, %v2135_v48  ;;  %v1687_v47 = vpop.f32.mrf.mxu2 }
 0x369   : > { %2401 = vrot.lane.b32.xlu2 %v2329_v38, %s2860_s6 }
 0x36a   : > { %v1864_v31 = vpop.f32.mrf.mxu3 }
 0x36b   : > { %v1942_v26 = vadd.f32 %v1864_v31, %v1747_v20  ;;  %v2076_v17 = vpop.f32.mrf.mxu0 }
 0x36d   : > { %v2136_v15 = vadd.f32 %v2058_v1, %v1942_v26  ;;  %v4935_v1 = vld [vmem:[#allocation69_spill] sm:$0xff] }
 0x36e   : > { %v1555_v6 = vadd.f32 %v4935_v1, %v1361_v5  ;;  %v4939_v1 = vld [vmem:[#allocation79_spill] sm:$0xff] }
 0x36f   : > { %1914 = vmatmul.f32.gmra.mxu3 %v1797_v55  ;;  %v2330_v60 = vadd.f32 %v2252_v35, %v2136_v15  ;;  %v1995_v35 = vld [vmem:[#allocation2 + $0x199] sm:$0xff]  ;;  %v4496_v15 = vpop.f32.mrf.mxu1 }
 0x370   : > { %2120 = vmatmul.f32.gmra.mxu0 %v1995_v35  ;;  %v1749_v20 = vadd.f32 %v4448_v30, %v1555_v6  ;;  %v1799_v55 = vld [vmem:[#allocation2 + $0x180] sm:$0xff] }
 0x371   : > { %2403 = vrot.lane.b32.xlu0 %v2330_v60, %s2860_s6  ;;  %v1690_v60 = vpop.f32.mrf.mxu2  ;;  %v1996_v30 = vld [vmem:[#allocation2 + $0x1a1] sm:$0xff] }
 0x372   : > { %v1867_v23 = vpop.f32.mrf.mxu3 }
 0x373   : > { %v1943_v24 = vadd.f32 %v1867_v23, %v1748_v12  ;;  %v2190_v12 = vld [vmem:[#allocation2 + $0x1a2] sm:$0xff] }
 0x374   : > { %2317 = vmatmul.f32.gmra.mxu1 %v2190_v12 }
 0x375   : > { %v2137_v48 = vadd.f32 %v2061_v39, %v1943_v24 }
 0x377   : > { %1917 = vmatmul.f32.gmra.mxu3 %v1798_v0  ;;  %v2331_v38 = vadd.f32 %v4445_v19, %v2137_v48  ;;  %v4937_v19 = vld [vmem:[#allocation74_spill] sm:$0xff]  ;;  %v2079_v48 = vpop.f32.mrf.mxu0 }
 0x378   : > { %v1556_v9 = vadd.f32 %v4937_v19, %v1362_v27  ;;  %2123 = vmatmul.f32.gmra.mxu0 %v1996_v30  ;;  %v1800_v0 = vld [vmem:[#allocation2 + $0x188] sm:$0xff]  ;;  %v2849_v27 = vld [vmem:[#allocation2] sm:$0xff] }
 0x379   : > { %2405 = vrot.lane.b32.xlu1 %v2331_v38, %s2860_s6  ;;  %v2273_v38 = vpop.f32.mrf.mxu1  ;;  %v1693_v35 = vpop.f32.mrf.mxu2  ;;  %v4941_v19 = vld [vmem:[#allocation49_spill] sm:$0xff] }
 0x37a   : > { %v1870_v31 = vpop.f32.mrf.mxu3  ;;  %v1750_v23 = vadd.f32 %v4457_v58, %v1556_v9 }
 0x37b   : > { %v1944_v39 = vadd.f32 %v1870_v31, %v1749_v20  ;;  %v4940_v20 = vld [vmem:[#allocation47_spill] sm:$0xff] }
 0x37d   : > { %v2138_v26 = vadd.f32 %v4453_v51, %v1944_v39  ;;  %v4938_v51 = vld [vmem:[#allocation44_spill] sm:$0xff] }
 0x37e   : > { %v1363_v33 = vadd.f32 %v4938_v51, %v4317_v7  ;;  %v1364_v7 = vadd.f32 %v4940_v20, %v4328_v32  ;;  %v1365_v32 = vadd.f32 %v4941_v19, %v4341_v21  ;;  %v4942_v21 = vld [vmem:[#allocation51_spill] sm:$0xff] }
 0x37f   : > { %1920 = vmatmul.f32.gmra.mxu3 %v1799_v55  ;;  %v2332_v53 = vadd.f32 %v4455_v63, %v2138_v26 }
 0x380   : > { %v1557_v63 = vadd.f32 %v4939_v1, %v1363_v33  ;;  %v1558_v54 = vadd.f32 %v4117_v16, %v1364_v7 }
 0x381   : > { %2407 = vrot.lane.b32.xlu2 %v2332_v53, %s2860_s6  ;;  %v4520_v53 = vpop.f32.mrf.mxu2 }
 0x382   : > { %v1873_v41 = vpop.f32.mrf.mxu3  ;;  %v1751_v58 = vadd.f32 %v4469_v45, %v1557_v63  ;;  %v1752_v26 = vadd.f32 %v4481_v13, %v1558_v54  ;;  %v4516_v45 = vpop.f32.mrf.mxu1 }
 0x383   : > { %v1945_v5 = vadd.f32 %v1873_v41, %v1750_v23  ;;  %v1366_v23 = vadd.f32 %v4942_v21, %v4351_v50 }
 0x385   : > { %v2139_v24 = vadd.f32 %v4463_v52, %v1945_v5  ;;  %v2850_v5 = vld [vmem:[%s2937_s20] sm:$0xff]  ;;  %v1560_v50 = vadd.f32 %v4153_v44, %v1366_v23 }
 0x387   : > { %1923 = vmatmul.f32.gmra.mxu3 %v1800_v0  ;;  %v2333_v6 = vadd.f32 %v4466_v11, %v2139_v24  ;;  %v2082_v11 = vpop.f32.mrf.mxu0  ;;  %v1754_v1 = vadd.f32 %v1690_v60, %v1560_v50 }
 0x389   : > { %2409 = vrot.lane.b32.xlu0 %v2333_v6, %s2860_s6  ;;  %v4943_v6 = vld [vmem:[#allocation53_spill] sm:$0xff] }
 0x38a   : > { %v1876_v28 = vpop.f32.mrf.mxu3  ;;  %v4529_v33 = vpop.f32.mrf.mxu1 }
 0x38b   : > { %v1946_v31 = vadd.f32 %v1876_v28, %v1751_v58  ;;  %v1367_v58 = vadd.f32 %v4943_v6, %v4357_v62 }
 0x38d   : > { %v2140_v52 = vadd.f32 %v4474_v22, %v1946_v31  ;;  %v1559_v22 = vadd.f32 %v4137_v49, %v1365_v32 }
 0x38f   : > { %1926 = vmatmul.f32.gmra.mxu3 %v2849_v27  ;;  %v2334_v39 = vadd.f32 %v4477_v29, %v2140_v52  ;;  %v1753_v13 = vadd.f32 %v1687_v47, %v1559_v22  ;;  %v4525_v30 = vpop.f32.mrf.mxu0  ;;  %v1699_v47 = vpop.f32.mrf.mxu2 }
 0x391   : > { %2411 = vrot.lane.b32.xlu1 %v2334_v39, %s2860_s6 }
 0x392   : > { %v1879_v55 = vpop.f32.mrf.mxu3  ;;  %v2282_v54 = vpop.f32.mrf.mxu1 }
 0x393   : > { %v1947_v9 = vadd.f32 %v1879_v55, %v1752_v26  ;;  %v4945_v26 = vld [vmem:[#allocation10_spill] sm:$0xff]  ;;  %v1561_v55 = vadd.f32 %v4175_v57, %v1367_v58 }
 0x395   : > { %v2141_v16 = vadd.f32 %v4485_v40, %v1947_v9  ;;  %v1755_v9 = vadd.f32 %v1693_v35, %v1561_v55 }
 0x397   : > { %1929 = vmatmul.f32.gmra.mxu3 %v2849_v27  ;;  %v2335_v29 = vadd.f32 %v2267_v61, %v2141_v16  ;;  %v2088_v7 = vpop.f32.mrf.mxu0  ;;  %v4944_v27 = vld [vmem:[#allocation4_spill] sm:$0xff]  ;;  %v1702_v32 = vpop.f32.mrf.mxu2 }
 0x399   : > { %2413 = vrot.lane.b32.xlu2 %v2335_v29, %s2860_s6 }
 0x39a   : > { %v1882_v12 = vpop.f32.mrf.mxu3 }
 0x39b   : > { %v1948_v41 = vadd.f32 %v1882_v12, %v1753_v13  ;;  %v2386_v51 = vpop.permute.xlu0 %2385 }
 0x39c   : > { %v2482_v49 = vsel %vm2481_vm0, 0.0, %v2386_v51  ;;  %v4947_v51 = vld [vmem:[#allocation6_spill] sm:$0xff] }
 0x39d   : > { %v2142_v40 = vadd.f32 %v2076_v17, %v1948_v41  ;;  %v2515_v61 = vsel %vm2514_vm1, %v2482_v49, 0.0 }
 0x39e   : > { %v2547_v24 = vadd.f32 %v2850_v5, %v2515_v61 }
 0x39f   : > { %v2336_v0 = vadd.f32 %v4496_v15, %v2142_v40  ;;  %v2091_v41 = vpop.f32.mrf.mxu0  ;;  %v4948_v40 = vld [vmem:[#allocation12_spill] sm:$0xff] }
 0x3a0   : > { %2579 = vst [vmem:[%s4537_s10] sm:$0xff] %v2547_v24  ;;  %v2285_v24 = vpop.f32.mrf.mxu1 }
 0x3a1   : > { %2415 = vrot.lane.b32.xlu0 %v2336_v0, %s2860_s6 }
 0x3a2   : > { %v1885_v63 = vpop.f32.mrf.mxu3 }
 0x3a3   : > { %v1949_v28 = vadd.f32 %v1885_v63, %v1754_v1  ;;  %v2388_v17 = vpop.permute.xlu0 %2387  ;;  %v2394_v20 = vpop.permute.xlu2 %2393  ;;  %v4949_v1 = vld [vmem:[#allocation59_spill] sm:$0xff] }
 0x3a4   : > { %v2483_v31 = vsel %vm2481_vm0, 0.0, %v2388_v17  ;;  %v2486_v44 = vsel %vm2481_vm0, 0.0, %v2394_v20  ;;  %v1369_v63 = vadd.f32 %v4949_v1, %v4369_v36  ;;  %v4950_v17 = vld [vmem:[#allocation8_spill] sm:$0xff] }
 0x3a5   : > { %v2143_v52 = vadd.f32 %v2079_v48, %v1949_v28  ;;  %v2516_v15 = vsel %vm2514_vm1, %v2483_v31, 0.0  ;;  %v2519_v60 = vsel %vm2514_vm1, %v2486_v44, 0.0  ;;  %v4946_v48 = vld [vmem:[#allocation56_spill] sm:$0xff] }
 0x3a6   : > { %v2548_v39 = vadd.f32 %v2516_v15, %v4944_v27  ;;  %v2551_v62 = vadd.f32 %v2519_v60, %v4945_v26  ;;  %v1368_v22 = vadd.f32 %v4946_v48, %v4363_v18  ;;  %v4951_v60 = vld [vmem:[#allocation62_spill] sm:$0xff] }
 0x3a7   : > { %v2337_v19 = vadd.f32 %v2273_v38, %v2143_v52  ;;  %v2094_v44 = vpop.f32.mrf.mxu0  ;;  %v1370_v27 = vadd.f32 %v4951_v60, %v4375_v4 }
 0x3a8   : > { %2580 = vst [vmem:[%s4537_s10 + $0x8] sm:$0xff] %v2548_v39  ;;  %v1562_v18 = vadd.f32 %v4195_v25, %v1368_v22  ;;  %v2288_v36 = vpop.f32.mrf.mxu1 }
 0x3a9   : > { %2583 = vst [vmem:[%s4537_s10 + $0x20] sm:$0xff] %v2551_v62  ;;  %2417 = vrot.lane.b32.xlu1 %v2337_v19, %s2860_s6  ;;  %v1564_v62 = vadd.f32 %v4233_v46, %v1370_v27  ;;  %v4953_v46 = vld [vmem:[#allocation18_spill] sm:$0xff] }
 0x3aa   : > { %v1888_v16 = vpop.f32.mrf.mxu3  ;;  %v1756_v50 = vadd.f32 %v4520_v53, %v1562_v18  ;;  %v1563_v53 = vadd.f32 %v4214_v59, %v1369_v63 }
 0x3ab   : > { %v1950_v29 = vadd.f32 %v1888_v16, %v1755_v9  ;;  %v2390_v13 = vpop.permute.xlu1 %2389  ;;  %v2396_v12 = vpop.permute.xlu2 %2395  ;;  %v1758_v59 = vadd.f32 %v1702_v32, %v1564_v62 }
 0x3ac   : > { %v2484_v21 = vsel %vm2481_vm0, 0.0, %v2390_v13  ;;  %v2487_v57 = vsel %vm2481_vm0, 0.0, %v2396_v12  ;;  %v1757_v52 = vadd.f32 %v1699_v47, %v1563_v53  ;;  %v4952_v47 = vld [vmem:[#allocation66_spill] sm:$0xff] }
 0x3ad   : > { %v2144_v38 = vadd.f32 %v2082_v11, %v1950_v29  ;;  %v2517_v23 = vsel %vm2514_vm1, %v2484_v21, 0.0  ;;  %v2520_v35 = vsel %vm2514_vm1, %v2487_v57, 0.0  ;;  %v1705_v11 = vpop.f32.mrf.mxu2  ;;  %v1371_v9 = vadd.f32 %v4952_v47, %v4379_v3  ;;  %v4954_v57 = vld [vmem:[#allocation72_spill] sm:$0xff] }
 0x3ae   : > { %v2549_v49 = vadd.f32 %v2517_v23, %v4947_v51  ;;  %v2552_v61 = vadd.f32 %v2520_v35, %v4948_v40 }
 0x3af   : > { %v2338_v5 = vadd.f32 %v4516_v45, %v2144_v38  ;;  %v1565_v32 = vadd.f32 %v4257_v34, %v1371_v9  ;;  %v1372_v38 = vadd.f32 %v4954_v57, %v4385_v2  ;;  %v4955_v34 = vld [vmem:[#allocation14_spill] sm:$0xff]  ;;  %v4960_v9 = vld [vmem:[#allocation81_spill] sm:$0xff] }
 0x3b0   : > { %2581 = vst [vmem:[%s4537_s10 + $0x10] sm:$0xff] %v2549_v49  ;;  %v2291_v22 = vpop.f32.mrf.mxu1  ;;  %v4963_v57 = vld [vmem:[#allocation73_spill] sm:$0xff] }
 0x3b1   : > { %2584 = vst [vmem:[%s4537_s10 + $0x28] sm:$0xff] %v2552_v61  ;;  %2419 = vrot.lane.b32.xlu2 %v2338_v5, %s2860_s6  ;;  %v1759_v21 = vadd.f32 %v1705_v11, %v1565_v32  ;;  %v1566_v5 = vadd.f32 %v4271_v56, %v1372_v38  ;;  %v4957_v56 = vld [vmem:[#allocation16_spill] sm:$0xff]  ;;  %v4964_v38 = vld [vmem:[#allocation82_spill] sm:$0xff] }
 0x3b2   : > { %v1891_v0 = vpop.f32.mrf.mxu3 }
 0x3b3   : > { %v1951_v6 = vadd.f32 %v1891_v0, %v1756_v50  ;;  %v2392_v58 = vpop.permute.xlu1 %2391  ;;  %v4956_v0 = vld [vmem:[#allocation76_spill] sm:$0xff] }
 0x3b4   : > { %v2485_v28 = vsel %vm2481_vm0, 0.0, %v2392_v58  ;;  %v1373_v1 = vadd.f32 %v4956_v0, %v4389_v8 }
 0x3b5   : > { %v2145_v25 = vadd.f32 %v4525_v30, %v1951_v6  ;;  %v2518_v45 = vsel %vm2514_vm1, %v2485_v28, 0.0  ;;  %v1708_v30 = vpop.f32.mrf.mxu2 }
 0x3b6   : > { %v2550_v20 = vadd.f32 %v2518_v45, %v4950_v17  ;;  %v1760_v11 = vadd.f32 %v1708_v30, %v1566_v5 }
 0x3b7   : > { %v2339_v31 = vadd.f32 %v4529_v33, %v2145_v25  ;;  %v2097_v33 = vpop.f32.mrf.mxu0 }
 0x3b8   : > { %2582 = vst [vmem:[%s4537_s10 + $0x18] sm:$0xff] %v2550_v20  ;;  %v2294_v61 = vpop.f32.mrf.mxu1  ;;  %v1567_v20 = vadd.f32 %v4293_v14, %v1373_v1  ;;  %v4959_v14 = vld [vmem:[#allocation24_spill] sm:$0xff]  ;;  %v4967_v1 = vld [vmem:[#allocation43_spill] sm:$0xff] }
 0x3b9   : > { %2421 = vrot.lane.b32.xlu0 %v2339_v31, %s2860_s6 }
 0x3ba   : > { %v1894_v15 = vpop.f32.mrf.mxu3 }
 0x3bb   : > { %v1952_v39 = vadd.f32 %v1894_v15, %v1757_v52 }
 0x3bd   : > { %v2146_v26 = vadd.f32 %v2088_v7, %v1952_v39  ;;  %v1711_v13 = vpop.f32.mrf.mxu2 }
 0x3bf   : > { %v2340_v55 = vadd.f32 %v2282_v54, %v2146_v26 }
 0x3c0   : > { %v2297_v31 = vpop.f32.mrf.mxu1 }
 0x3c1   : > { %2423 = vrot.lane.b32.xlu1 %v2340_v55, %s2860_s6 }
 0x3c2   : > { %v1897_v19 = vpop.f32.mrf.mxu3 }
 0x3c3   : > { %v1953_v16 = vadd.f32 %v1897_v19, %v1758_v59  ;;  %v2402_v48 = vpop.permute.xlu2 %2401 }
 0x3c4   : > { %v2490_v4 = vsel %vm2481_vm0, 0.0, %v2402_v48 }
 0x3c5   : > { %v2147_v29 = vadd.f32 %v2091_v41, %v1953_v16  ;;  %v2523_v7 = vsel %vm2514_vm1, %v2490_v4, 0.0  ;;  %v2100_v41 = vpop.f32.mrf.mxu0  ;;  %v1714_v50 = vpop.f32.mrf.mxu2  ;;  %v1375_v16 = vadd.f32 %v4960_v9, %v4397_v43 }
 0x3c6   : > { %v2555_v54 = vadd.f32 %v2523_v7, %v4953_v46 }
 0x3c7   : > { %v2341_v12 = vadd.f32 %v2285_v24, %v2147_v29 }
 0x3c8   : > { %2587 = vst [vmem:[%s4537_s10 + $0x40] sm:$0xff] %v2555_v54  ;;  %v2300_v47 = vpop.f32.mrf.mxu1  ;;  %v4962_v54 = vld [vmem:[#allocation36_spill] sm:$0xff] }
 0x3c9   : > { %2425 = vrot.lane.b32.xlu2 %v2341_v12, %s2860_s6  ;;  %v1569_v32 = vadd.f32 %v4962_v54, %v1375_v16 }
 0x3ca   : > { %v1900_v3 = vpop.f32.mrf.mxu3 }
 0x3cb   : > { %v1954_v23 = vadd.f32 %v1900_v3, %v1759_v21  ;;  %v2398_v35 = vpop.permute.xlu0 %2397 }
 0x3cc   : > { %v2488_v51 = vsel %vm2481_vm0, 0.0, %v2398_v35 }
 0x3cd   : > { %v2148_v49 = vadd.f32 %v2094_v44, %v1954_v23  ;;  %v2521_v40 = vsel %vm2514_vm1, %v2488_v51, 0.0  ;;  %v2103_v45 = vpop.f32.mrf.mxu0  ;;  %v1761_v44 = vadd.f32 %v1711_v13, %v1567_v20  ;;  %v1717_v8 = vpop.f32.mrf.mxu2  ;;  %v4961_v13 = vld [vmem:[#allocation20_spill] sm:$0xff]  ;;  %v1376_v23 = vadd.f32 %v4964_v38, %v4963_v57  ;;  %v4978_v57 = vld [vmem:[#allocation39_spill] sm:$0xff] }
 0x3ce   : > { %v2553_v18 = vadd.f32 %v2521_v40, %v4955_v34  ;;  %v1763_v21 = vadd.f32 %v1717_v8, %v1569_v32 }
 0x3cf   : > { %v2342_v24 = vadd.f32 %v2288_v36, %v2148_v49  ;;  %v4958_v36 = vld [vmem:[#allocation80_spill] sm:$0xff] }
 0x3d0   : > { %2585 = vst [vmem:[%s4537_s10 + $0x30] sm:$0xff] %v2553_v18  ;;  %v1374_v15 = vadd.f32 %v4958_v36, %v4393_v42  ;;  %v2303_v51 = vpop.f32.mrf.mxu1  ;;  %v4965_v18 = vld [vmem:[#allocation22_spill] sm:$0xff] }
 0x3d1   : > { %2427 = vrot.lane.b32.xlu0 %v2342_v24, %s2860_s6  ;;  %v4966_v24 = vld [vmem:[#allocation64_spill] sm:$0xff] }
 0x3d2   : > { %v1903_v2 = vpop.f32.mrf.mxu3  ;;  %v1568_v55 = vadd.f32 %v4306_v10, %v1374_v15 }
 0x3d3   : > { %v1955_v63 = vadd.f32 %v1903_v2, %v1760_v11  ;;  %v2400_v6 = vpop.permute.xlu1 %2399 }
 0x3d4   : > { %v2489_v58 = vsel %vm2481_vm0, 0.0, %v2400_v6  ;;  %v1762_v19 = vadd.f32 %v1714_v50, %v1568_v55  ;;  %v1570_v50 = vadd.f32 %v4966_v24, %v1376_v23 }
 0x3d5   : > { %v2149_v28 = vadd.f32 %v2097_v33, %v1955_v63  ;;  %v2522_v25 = vsel %vm2514_vm1, %v2489_v58, 0.0  ;;  %v2106_v33 = vpop.f32.mrf.mxu0  ;;  %v1720_v4 = vpop.f32.mrf.mxu2  ;;  %v4968_v63 = vld [vmem:[#allocation83_spill] sm:$0xff] }
 0x3d6   : > { %v2554_v17 = vadd.f32 %v2522_v25, %v4957_v56  ;;  %v1764_v2 = vadd.f32 %v1720_v4, %v1570_v50  ;;  %v1377_v6 = vadd.f32 %v4968_v63, %v4967_v1  ;;  %v4981_v1 = vld [vmem:[#allocation71_spill] sm:$0xff] }
 0x3d7   : > { %v2343_v53 = vadd.f32 %v2291_v22, %v2149_v28 }
 0x3d8   : > { %2586 = vst [vmem:[%s4537_s10 + $0x38] sm:$0xff] %v2554_v17  ;;  %v2306_v20 = vpop.f32.mrf.mxu1 }
 0x3d9   : > { %2429 = vrot.lane.b32.xlu1 %v2343_v53, %s2860_s6  ;;  %v4969_v53 = vld [vmem:[#allocation30_spill] sm:$0xff] }
 0x3da   : > { %v1906_v52 = vpop.f32.mrf.mxu3 }
 0x3db   : > { %v1956_v60 = vadd.f32 %v1906_v52, %v1761_v44  ;;  %v2408_v27 = vpop.permute.xlu2 %2407  ;;  %v4970_v44 = vld [vmem:[#allocation37_spill] sm:$0xff] }
 0x3dc   : > { %v2493_v39 = vsel %vm2481_vm0, 0.0, %v2408_v27  ;;  %v1571_v8 = vadd.f32 %v4970_v44, %v1377_v6  ;;  %v4971_v27 = vld [vmem:[#allocation77_spill] sm:$0xff] }
 0x3dd   : > { %v2150_v30 = vadd.f32 %v2100_v41, %v1956_v60  ;;  %v2526_v26 = vsel %vm2514_vm1, %v2493_v39, 0.0  ;;  %v2109_v3 = vpop.f32.mrf.mxu0  ;;  %v1723_v34 = vpop.f32.mrf.mxu2  ;;  %v4972_v39 = vld [vmem:[#allocation84_spill] sm:$0xff] }
 0x3de   : > { %v2558_v62 = vadd.f32 %v2526_v26, %v4959_v14  ;;  %v1765_v15 = vadd.f32 %v1723_v34, %v1571_v8 }
 0x3df   : > { %v2344_v59 = vadd.f32 %v2294_v61, %v2150_v30  ;;  %v1378_v30 = vadd.f32 %v4972_v39, %v4971_v27 }
 0x3e0   : > { %2590 = vst [vmem:[%s4537_s10 + $0x58] sm:$0xff] %v2558_v62 }
 0x3e1   : > { %2431 = vrot.lane.b32.xlu2 %v2344_v59, %s2860_s6 }
 0x3e2   : > { %v1909_v42 = vpop.f32.mrf.mxu3 }
 0x3e3   : > { %v1957_v48 = vadd.f32 %v1909_v42, %v1762_v19  ;;  %v2404_v22 = vpop.permute.xlu0 %2403  ;;  %v4973_v19 = vld [vmem:[#allocation26_spill] sm:$0xff]  ;;  %v4974_v42 = vld [vmem:[#allocation68_spill] sm:$0xff] }
 0x3e4   : > { %v2491_v29 = vsel %vm2481_vm0, 0.0, %v2404_v22  ;;  %v1572_v9 = vadd.f32 %v4974_v42, %v1378_v30  ;;  %v4986_v42 = vld [vmem:[#allocation3_spill] sm:$0xff] }
 0x3e5   : > { %v2151_v7 = vadd.f32 %v2103_v45, %v1957_v48  ;;  %v2524_v10 = vsel %vm2514_vm1, %v2491_v29, 0.0  ;;  %v2112_v25 = vpop.f32.mrf.mxu0  ;;  %v1726_v36 = vpop.f32.mrf.mxu2 }
 0x3e6   : > { %v2556_v46 = vadd.f32 %v2524_v10, %v4961_v13  ;;  %v2309_v48 = vpop.f32.mrf.mxu1  ;;  %v1766_v22 = vadd.f32 %v1726_v36, %v1572_v9  ;;  %v4976_v10 = vld [vmem:[#allocation85_spill] sm:$0xff]  ;;  %v4984_v36 = vld [vmem:[#allocation32_spill] sm:$0xff] }
 0x3e7   : > { %v2345_v12 = vadd.f32 %v2297_v31, %v2151_v7  ;;  %v4975_v7 = vld [vmem:[#allocation45_spill] sm:$0xff] }
 0x3e8   : > { %2588 = vst [vmem:[%s4537_s10 + $0x48] sm:$0xff] %v2556_v46  ;;  %v1379_v13 = vadd.f32 %v4976_v10, %v4975_v7 }
 0x3e9   : > { %2433 = vrot.lane.b32.xlu0 %v2345_v12, %s2860_s6 }
 0x3ea   : > { %v1912_v43 = vpop.f32.mrf.mxu3  ;;  %v1573_v38 = vadd.f32 %v4978_v57, %v1379_v13 }
 0x3eb   : > { %v1958_v35 = vadd.f32 %v1912_v43, %v1763_v21  ;;  %v2406_v41 = vpop.permute.xlu1 %2405 }
 0x3ec   : > { %v2492_v49 = vsel %vm2481_vm0, 0.0, %v2406_v41 }
 0x3ed   : > { %v2152_v40 = vadd.f32 %v2106_v33, %v1958_v35  ;;  %v2525_v61 = vsel %vm2514_vm1, %v2492_v49, 0.0  ;;  %v2115_v33 = vpop.f32.mrf.mxu0  ;;  %v1729_v4 = vpop.f32.mrf.mxu2 }
 0x3ee   : > { %v2557_v5 = vadd.f32 %v2525_v61, %v4965_v18  ;;  %v1767_v41 = vadd.f32 %v1729_v4, %v1573_v38 }
 0x3ef   : > { %v2346_v11 = vadd.f32 %v2300_v47, %v2152_v40  ;;  %v4979_v40 = vld [vmem:[#allocation86_spill] sm:$0xff] }
 0x3f0   : > { %2589 = vst [vmem:[%s4537_s10 + $0x50] sm:$0xff] %v2557_v5  ;;  %v1380_v61 = vadd.f32 %v4979_v40, %v4422_v37 }
 0x3f1   : > { %2435 = vrot.lane.b32.xlu1 %v2346_v11, %s2860_s6 }
 0x3f2   : > { %v1915_v0 = vpop.f32.mrf.mxu3  ;;  %v1574_v63 = vadd.f32 %v4981_v1, %v1380_v61 }
 0x3f3   : > { %v1959_v58 = vadd.f32 %v1915_v0, %v1764_v2  ;;  %v2414_v28 = vpop.permute.xlu2 %2413  ;;  %v4980_v2 = vld [vmem:[#allocation5_spill] sm:$0xff] }
 0x3f4   : > { %v2496_v45 = vsel %vm2481_vm0, 0.0, %v2414_v28 }
 0x3f5   : > { %v2153_v56 = vadd.f32 %v2109_v3, %v1959_v58  ;;  %v2529_v17 = vsel %vm2514_vm1, %v2496_v45, 0.0  ;;  %v4977_v3 = vld [vmem:[#allocation28_spill] sm:$0xff]  ;;  %v2118_v35 = vpop.f32.mrf.mxu0  ;;  %v1732_v5 = vpop.f32.mrf.mxu2  ;;  %v4982_v45 = vld [vmem:[#allocation46_spill] sm:$0xff] }
 0x3f6   : > { %v2561_v31 = vadd.f32 %v2529_v17, %v4969_v53  ;;  %v1768_v28 = vadd.f32 %v1732_v5, %v1574_v63 }
 0x3f7   : > { %v2347_v52 = vadd.f32 %v2303_v51, %v2153_v56  ;;  %v2312_v51 = vpop.f32.mrf.mxu1  ;;  %v4983_v56 = vld [vmem:[#allocation87_spill] sm:$0xff] }
 0x3f8   : > { %2593 = vst [vmem:[%s4537_s10 + $0x70] sm:$0xff] %v2561_v31  ;;  %v1381_v17 = vadd.f32 %v4983_v56, %v4982_v45  ;;  %v4994_v45 = vld [vmem:[#allocation19_spill] sm:$0xff] }
 0x3f9   : > { %2437 = vrot.lane.b32.xlu2 %v2347_v52, %s2860_s6 }
 0x3fa   : > { %v1918_v60 = vpop.f32.mrf.mxu3 }
 0x3fb   : > { %v1960_v26 = vadd.f32 %v1918_v60, %v1765_v15  ;;  %v2410_v14 = vpop.permute.xlu0 %2409  ;;  %v4985_v60 = vld [vmem:[#allocation41_spill] sm:$0xff] }
 0x3fc   : > { %v2494_v62 = vsel %vm2481_vm0, 0.0, %v2410_v14  ;;  %v1575_v27 = vadd.f32 %v4985_v60, %v1381_v17 }
 0x3fd   : > { %v2154_v55 = vadd.f32 %v2112_v25, %v1960_v26  ;;  %v2527_v59 = vsel %vm2514_vm1, %v2494_v62, 0.0  ;;  %v2121_v58 = vpop.f32.mrf.mxu0  ;;  %v1735_v52 = vpop.f32.mrf.mxu2 }
 0x3fe   : > { %v2559_v47 = vadd.f32 %v2527_v59, %v4973_v19  ;;  %v1769_v30 = vadd.f32 %v1735_v52, %v1575_v27 }
 0x3ff   : > { %v2348_v16 = vadd.f32 %v2306_v20, %v2154_v55  ;;  %v2315_v25 = vpop.f32.mrf.mxu1 }
 0x400   : > { %2591 = vst [vmem:[%s4537_s10 + $0x60] sm:$0xff] %v2559_v47 }
 0x401   : > { %2439 = vrot.lane.b32.xlu0 %v2348_v16, %s2860_s6 }
 0x402   : > { %v1921_v29 = vpop.f32.mrf.mxu3 }
 0x403   : > { %v1961_v46 = vadd.f32 %v1921_v29, %v1766_v22  ;;  %v2412_v54 = vpop.permute.xlu1 %2411  ;;  %v4987_v29 = vld [vmem:[#allocation11_spill] sm:$0xff] }
 0x404   : > { %v2495_v32 = vsel %vm2481_vm0, 0.0, %v2412_v54  ;;  %v4988_v54 = vld [vmem:[#allocation7_spill] sm:$0xff] }
 0x405   : > { %v2155_v12 = vadd.f32 %v2115_v33, %v1961_v46  ;;  %v2528_v21 = vsel %vm2514_vm1, %v2495_v32, 0.0  ;;  %v2124_v14 = vpop.f32.mrf.mxu0 }
 0x406   : > { %v2560_v43 = vadd.f32 %v2528_v21, %v4977_v3 }
 0x407   : > { %v2349_v23 = vadd.f32 %v2309_v48, %v2155_v12  ;;  %v2318_v33 = vpop.f32.mrf.mxu1 }
 0x408   : > { %2592 = vst [vmem:[%s4537_s10 + $0x68] sm:$0xff] %v2560_v43  ;;  %v4989_v43 = vld [vmem:[#allocation9_spill] sm:$0xff] }
 0x409   : > { %2441 = vrot.lane.b32.xlu1 %v2349_v23, %s2860_s6 }
 0x40a   : > { %v1924_v49 = vpop.f32.mrf.mxu3 }
 0x40b   : > { %v1962_v34 = vadd.f32 %v1924_v49, %v1767_v41  ;;  %v2420_v18 = vpop.permute.xlu2 %2419  ;;  %v4990_v41 = vld [vmem:[#allocation17_spill] sm:$0xff] }
 0x40c   : > { %v2499_v24 = vsel %vm2481_vm0, 0.0, %v2420_v18 }
 0x40d   : > { %v2156_v50 = vadd.f32 %v2118_v35, %v1962_v34  ;;  %v2532_v11 = vsel %vm2514_vm1, %v2499_v24, 0.0  ;;  %v4991_v34 = vld [vmem:[#allocation13_spill] sm:$0xff] }
 0x40e   : > { %v2564_v0 = vadd.f32 %v2532_v11, %v4980_v2  ;;  %v4992_v11 = vld [vmem:[#allocation15_spill] sm:$0xff] }
 0x40f   : > { %v2350_v6 = vadd.f32 %v2312_v51, %v2156_v50 }
 0x410   : > { %2596 = vst [vmem:[%s4537_s10 + $0x88] sm:$0xff] %v2564_v0 }
 0x411   : > { %2443 = vrot.lane.b32.xlu2 %v2350_v6, %s2860_s6  ;;  %v4993_v6 = vld [vmem:[#allocation23_spill] sm:$0xff] }
 0x412   : > { %v1927_v37 = vpop.f32.mrf.mxu3 }
 0x413   : > { %v1963_v20 = vadd.f32 %v1927_v37, %v1768_v28  ;;  %v2416_v53 = vpop.permute.xlu0 %2415 }
 0x414   : > { %v2497_v31 = vsel %vm2481_vm0, 0.0, %v2416_v53 }
 0x415   : > { %v2530_v44 = vsel %vm2514_vm1, %v2497_v31, 0.0  ;;  %v2157_v8 = vadd.f32 %v2121_v58, %v1963_v20  ;;  %v4995_v31 = vld [vmem:[#allocation21_spill] sm:$0xff] }
 0x416   : > { %v2562_v15 = vadd.f32 %v2530_v44, %v4984_v36 }
 0x417   : > { %v2351_v39 = vadd.f32 %v2315_v25, %v2157_v8 }
 0x418   : > { %2594 = vst [vmem:[%s4537_s10 + $0x78] sm:$0xff] %v2562_v15  ;;  %v4996_v15 = vld [vmem:[#allocation29_spill] sm:$0xff] }
 0x419   : > { %2445 = vrot.lane.b32.xlu0 %v2351_v39, %s2860_s6 }
 0x41a   : > { %v1930_v26 = vpop.f32.mrf.mxu3 }
 0x41b   : > { %v1964_v62 = vadd.f32 %v1930_v26, %v1769_v30  ;;  %v2418_v55 = vpop.permute.xlu1 %2417  ;;  %v4997_v26 = vld [vmem:[#allocation25_spill] sm:$0xff] }
 0x41c   : > { %v2498_v59 = vsel %vm2481_vm0, 0.0, %v2418_v55 }
 0x41d   : > { %v2531_v19 = vsel %vm2514_vm1, %v2498_v59, 0.0  ;;  %v2158_v47 = vadd.f32 %v2124_v14, %v1964_v62 }
 0x41e   : > { %v2563_v9 = vadd.f32 %v2531_v19, %v4986_v42 }
 0x41f   : > { %v2352_v16 = vadd.f32 %v2318_v33, %v2158_v47  ;;  %v4998_v33 = vld [vmem:[#allocation27_spill] sm:$0xff] }
 0x420   : > { %2595 = vst [vmem:[%s4537_s10 + $0x80] sm:$0xff] %v2563_v9 }
 0x421   : > { %2447 = vrot.lane.b32.xlu1 %v2352_v16, %s2860_s6  ;;  %v4999_v16 = vld [vmem:[#allocation31_spill] sm:$0xff] }
 0x423   : > { %v2426_v48 = vpop.permute.xlu2 %2425 }
 0x424   : > { %v2502_v22 = vsel %vm2481_vm0, 0.0, %v2426_v48 }
 0x425   : > { %v2535_v4 = vsel %vm2514_vm1, %v2502_v22, 0.0 }
 0x426   : > { %v2567_v7 = vadd.f32 %v2535_v4, %v4987_v29 }
 0x428   : > { %2599 = vst [vmem:[%s4537_s10 + $0xa0] sm:$0xff] %v2567_v7  ;;  %v5000_v7 = vld [vmem:[#allocation33_spill] sm:$0xff] }
 0x42b   : > { %v2422_v10 = vpop.permute.xlu0 %2421 }
 0x42c   : > { %v2500_v13 = vsel %vm2481_vm0, 0.0, %v2422_v10 }
 0x42d   : > { %v2533_v46 = vsel %vm2514_vm1, %v2500_v13, 0.0 }
 0x42e   : > { %v2565_v32 = vadd.f32 %v2533_v46, %v4988_v54 }
 0x430   : > { %2597 = vst [vmem:[%s4537_s10 + $0x90] sm:$0xff] %v2565_v32 }
 0x433   : > { %v2424_v12 = vpop.permute.xlu1 %2423 }
 0x434   : > { %v2501_v21 = vsel %vm2481_vm0, 0.0, %v2424_v12 }
 0x435   : > { %v2534_v3 = vsel %vm2514_vm1, %v2501_v21, 0.0 }
 0x436   : > { %v2566_v57 = vadd.f32 %v2534_v3, %v4989_v43 }
 0x438   : > { %2598 = vst [vmem:[%s4537_s10 + $0x98] sm:$0xff] %v2566_v57 }
 0x43b   : > { %v2432_v38 = vpop.permute.xlu2 %2431 }
 0x43c   : > { %v2505_v23 = vsel %vm2481_vm0, 0.0, %v2432_v38 }
 0x43d   : > { %v2538_v35 = vsel %vm2514_vm1, %v2505_v23, 0.0 }
 0x43e   : > { %v2570_v51 = vadd.f32 %v2538_v35, %v4990_v41 }
 0x440   : > { %2602 = vst [vmem:[%s4537_s10 + $0xb8] sm:$0xff] %v2570_v51 }
 0x443   : > { %v2428_v49 = vpop.permute.xlu0 %2427 }
 0x444   : > { %v2503_v40 = vsel %vm2481_vm0, 0.0, %v2428_v49 }
 0x445   : > { %v2536_v61 = vsel %vm2514_vm1, %v2503_v40, 0.0 }
 0x446   : > { %v2568_v18 = vadd.f32 %v2536_v61, %v4991_v34 }
 0x448   : > { %2600 = vst [vmem:[%s4537_s10 + $0xa8] sm:$0xff] %v2568_v18 }
 0x44b   : > { %v2430_v5 = vpop.permute.xlu1 %2429 }
 0x44c   : > { %v2504_v24 = vsel %vm2481_vm0, 0.0, %v2430_v5 }
 0x44d   : > { %v2537_v50 = vsel %vm2514_vm1, %v2504_v24, 0.0 }
 0x44e   : > { %v2569_v2 = vadd.f32 %v2537_v50, %v4992_v11 }
 0x450   : > { %2601 = vst [vmem:[%s4537_s10 + $0xb0] sm:$0xff] %v2569_v2 }
 0x453   : > { %v2438_v0 = vpop.permute.xlu2 %2437 }
 0x454   : > { %v2508_v1 = vsel %vm2481_vm0, 0.0, %v2438_v0 }
 0x455   : > { %v2541_v63 = vsel %vm2514_vm1, %v2508_v1, 0.0 }
 0x456   : > { %v2573_v58 = vadd.f32 %v2541_v63, %v4993_v6 }
 0x458   : > { %2605 = vst [vmem:[%s4537_s10 + $0xd0] sm:$0xff] %v2573_v58 }
 0x45b   : > { %v2434_v28 = vpop.permute.xlu0 %2433 }
 0x45c   : > { %v2506_v37 = vsel %vm2481_vm0, 0.0, %v2434_v28 }
 0x45d   : > { %v2539_v25 = vsel %vm2514_vm1, %v2506_v37, 0.0 }
 0x45e   : > { %v2571_v56 = vadd.f32 %v2539_v25, %v4994_v45 }
 0x460   : > { %2603 = vst [vmem:[%s4537_s10 + $0xc0] sm:$0xff] %v2571_v56 }
 0x463   : > { %v2436_v17 = vpop.permute.xlu1 %2435 }
 0x464   : > { %v2507_v20 = vsel %vm2481_vm0, 0.0, %v2436_v17 }
 0x465   : > { %v2540_v53 = vsel %vm2514_vm1, %v2507_v20, 0.0 }
 0x466   : > { %v2572_v44 = vadd.f32 %v2540_v53, %v4995_v31 }
 0x468   : > { %2604 = vst [vmem:[%s4537_s10 + $0xc8] sm:$0xff] %v2572_v44 }
 0x46b   : > { %v2444_v8 = vpop.permute.xlu2 %2443 }
 0x46c   : > { %v2511_v52 = vsel %vm2481_vm0, 0.0, %v2444_v8 }
 0x46d   : > { %v2544_v36 = vsel %vm2514_vm1, %v2511_v52, 0.0 }
 0x46e   : > { %v2576_v60 = vadd.f32 %v2544_v36, %v4996_v15 }
 0x470   : > { %2608 = vst [vmem:[%s4537_s10 + $0xe8] sm:$0xff] %v2576_v60 }
 0x473   : > { %v2440_v27 = vpop.permute.xlu0 %2439 }
 0x474   : > { %v2509_v39 = vsel %vm2481_vm0, 0.0, %v2440_v27 }
 0x475   : > { %v2542_v30 = vsel %vm2514_vm1, %v2509_v39, 0.0 }
 0x476   : > { %v2574_v14 = vadd.f32 %v2542_v30, %v4997_v26 }
 0x478   : > { %2606 = vst [vmem:[%s4537_s10 + $0xd8] sm:$0xff] %v2574_v14 }
 0x47b   : > { %v2442_v62 = vpop.permute.xlu1 %2441 }
 0x47c   : > { %v2510_v55 = vsel %vm2481_vm0, 0.0, %v2442_v62 }
 0x47d   : > { %v2543_v59 = vsel %vm2514_vm1, %v2510_v55, 0.0 }
 0x47e   : > { %v2575_v19 = vadd.f32 %v2543_v59, %v4998_v33 }
 0x480   : > { %2607 = vst [vmem:[%s4537_s10 + $0xe0] sm:$0xff] %v2575_v19 }
 0x48b   : > { %v2446_v47 = vpop.permute.xlu0 %2445 }
 0x48c   : > { %v2512_v42 = vsel %vm2481_vm0, 0.0, %v2446_v47 }
 0x48d   : > { %v2545_v9 = vsel %vm2514_vm1, %v2512_v42, 0.0 }
 0x48e   : > { %v2577_v48 = vadd.f32 %v2545_v9, %v4999_v16 }
 0x490   : > { %2609 = vst [vmem:[%s4537_s10 + $0xf0] sm:$0xff] %v2577_v48 }
 0x493   : > { %v2448_v22 = vpop.permute.xlu1 %2447 }
 0x494   : > { %v2513_v4 = vsel %vm2481_vm0, 0.0, %v2448_v22 }
 0x495   : > { %v2546_v29 = vsel %vm2514_vm1, %v2513_v4, 0.0 }
 0x496   : > { %v2578_v10 = vadd.f32 %v2546_v29, %v5000_v7 }
 0x498   : > { %2610 = vst [vmem:[%s4537_s10 + $0xf8] sm:$0xff] %v2578_v10 }
 0x499 PF: > { %s15_s18 = sadd.s32 1, %s2857_s18  }
 0x49a   : > { %p12_p4 = scmp.ge.s32.totalorder %s15_s18, 4  }
 0x49c   :  { %14 = sbr.rel (!%p12_p4) target bundleno = 1 (0x1), region = 80 }

// kernel: dense_block_pallas.5
= control target key start
LH: loop header
LB: loop body
LE: loop exit
PB: predicated region body
PF: predicated region fallthrough
CT: control target
= control target key end

     0   :  { %s2891_s18 = smov 0   ;;  %s4737_s0 = inlined_call_operand.vmem [shape: f32[2,16,16,128], index: 0, kind: input, shape index: {}, may-alias: {0,5}]   ;;  %s4738_s1 = inlined_call_operand.vmem [shape: f32[2,128], index: 1, kind: input, shape index: {}]   ;;  %s4739_s2 = inlined_call_operand.vmem [shape: f32[128,128], index: 2, kind: input, shape index: {}]   ;;  %s4740_s3 = inlined_call_operand.vmem [shape: f32[2,128], index: 3, kind: input, shape index: {}]   ;;  %s4741_s4 = inlined_call_operand.vmem [shape: f32[9,128,4], index: 4, kind: input, shape index: {}]   ;;  %s4742_s5 = inlined_call_operand.vmem [shape: f32[2,16,16,128], index: 5, kind: output, shape index: {}, may-alias: {0,5}]  }
   0x1 LB: > { %s2666_s19 = sadd.s32 4294967295, %s2857_s18   ;;  %p2670_p0 = scmp.ge.s32.totalorder %s2857_s18, 1  ;;  %s2857_s18 = sphi %s2891_s18, %s15_s18  }
   0x2   : > { %p187_p1 = scmp.lt.s32.totalorder %s2857_s18, 3 }
   0x4   : > { %p188_p2 = pnand %p2670_p0, %p187_p1 }
   0x6   : > { %191 = sbr.rel (%p188_p2) target bundleno = 1177 (0x499), region = 40 }
   0xb   : > { %v371_v0 = vld [vmem:[%s4739_s2 + $0x78] sm:$0xff]  ;;  %v370_v1 = vld [vmem:[%s4739_s2 + $0x70] sm:$0xff]  ;;  %v369_v2 = vld [vmem:[%s4739_s2 + $0x68] sm:$0xff]  ;;  %p215_p3 = scmp.lt.s32.totalorder %s2666_s19, 1  ;;  %s2860_s6 = smov 12   ;;  %vm2481_vm0 = vcmask 97280  }
   0xc   : > { %372 = vmatpush.msra.mxu0 %v371_v0  ;;  %2807 = vmatpush.msra.mxu2 %v371_v0  ;;  %v368_v3 = vld [vmem:[%s4739_s2 + $0x60] sm:$0xff]  ;;  %v367_v4 = vld [vmem:[%s4739_s2 + $0x58] sm:$0xff]  ;;  %v366_v5 = vld [vmem:[%s4739_s2 + $0x50] sm:$0xff]  ;;  %vm2514_vm1 = vcmask 130048  }
   0xd   : > { %s5002_s19 = smov (!%p215_p3, %s2666_s19), 1  ;;  %v365_v6 = vld [vmem:[%s4739_s2 + $0x48] sm:$0xff]  ;;  %v364_v7 = vld [vmem:[%s4739_s2 + $0x40] sm:$0xff]  ;;  %v363_v9 = vld [vmem:[%s4739_s2 + $0x38] sm:$0xff] }
   0xe   : > { %373 = vmatpush.msra.mxu0 %v370_v1  ;;  %2808 = vmatpush.msra.mxu2 %v370_v1  ;;  %s2805_s9 = sshll.u32 %s5002_s19, 8  ;;  %v257_v8 = vld [vmem:[%s4738_s1] sm:$0x3]  ;;  %v362_v10 = vld [vmem:[%s4739_s2 + $0x30] sm:$0xff]  ;;  %v361_v14 = vld [vmem:[%s4739_s2 + $0x28] sm:$0xff] }
   0xf   : > { %s2937_s20 = scalar_lea.vmem %s4737_s0, %s2805_s9  ;;  %v2942_v11 = vperm.slane %v257_v8, 0  ;;  %v360_v15 = vld [vmem:[%s4739_s2 + $0x20] sm:$0xff]  ;;  %v2955_v17 = vperm.slane %v257_v8, 1  ;;  %v359_v19 = vld [vmem:[%s4739_s2 + $0x18] sm:$0xff]  ;;  %v358_v20 = vld [vmem:[%s4739_s2 + $0x10] sm:$0xff]  ;;  %s4537_s10 = scalar_lea.vmem %s4742_s5, %s2805_s9 }
  0x10   : > { %374 = vmatpush.msra.mxu0 %v369_v2  ;;  %2809 = vmatpush.msra.mxu2 %v369_v2  ;;  %v225_v12 = vld [vmem:[%s2937_s20] sm:$0xff]  ;;  %v2968_v23 = vld [vmem:[%s2937_s20 + $0x8] sm:$0xff]  ;;  %v2986_v33 = vld [vmem:[%s2937_s20 + $0x10] sm:$0xff] }
  0x11   : > { %v2946_v13 = vld [vmem:[%s2937_s20 + $0x80] sm:$0xff]  ;;  %v259_v16 = vmul.f32 %v2942_v11, %v225_v12  ;;  %4794 = vst [vmem:[#allocation4_spill] sm:$0xff] %v2968_v23  ;;  %v2971_v24 = vld [vmem:[%s2937_s20 + $0x88] sm:$0xff]  ;;  %v260_v29 = vmul.f32 %v2942_v11, %v2968_v23  ;;  %v2989_v34 = vld [vmem:[%s2937_s20 + $0x90] sm:$0xff]  ;;  %v261_v37 = vmul.f32 %v2942_v11, %v2986_v33 }
  0x12   : > { %375 = vmatpush.msra.mxu0 %v368_v3  ;;  %2810 = vmatpush.msra.mxu2 %v368_v3  ;;  %4793 = vst [vmem:[#allocation3_spill] sm:$0xff] %v2946_v13  ;;  %v275_v18 = vmul.f32 %v2942_v11, %v2946_v13  ;;  %v357_v25 = vld [vmem:[%s4739_s2 + $0x8] sm:$0xff]  ;;  %v356_v26 = vld [vmem:[%s4739_s2] sm:$0xff]  ;;  %v276_v30 = vmul.f32 %v2942_v11, %v2971_v24  ;;  %v2998_v41 = vld [vmem:[%s2937_s20 + $0x18] sm:$0xff] }
  0x13   : > { %v292_v21 = vadd.f32 %v2955_v17, %v259_v16  ;;  %4795 = vst [vmem:[#allocation5_spill] sm:$0xff] %v2971_v24  ;;  %v293_v31 = vadd.f32 %v2955_v17, %v260_v29  ;;  %v277_v38 = vmul.f32 %v2942_v11, %v2989_v34  ;;  %v294_v39 = vadd.f32 %v2955_v17, %v261_v37  ;;  %v3001_v42 = vld [vmem:[%s2937_s20 + $0x98] sm:$0xff]  ;;  %v3010_v49 = vld [vmem:[%s2937_s20 + $0x20] sm:$0xff]  ;;  %v3022_v57 = vld [vmem:[%s2937_s20 + $0x28] sm:$0xff] }
  0x14   : > { %376 = vmatpush.msra.mxu0 %v367_v4  ;;  %2811 = vmatpush.msra.mxu2 %v367_v4  ;;  %v308_v22 = vadd.f32 %v2955_v17, %v275_v18  ;;  %v309_v32 = vadd.f32 %v2955_v17, %v276_v30  ;;  %4796 = vst [vmem:[#allocation6_spill] sm:$0xff] %v2986_v33  ;;  %v3013_v50 = vld [vmem:[%s2937_s20 + $0xa0] sm:$0xff]  ;;  %v3025_v58 = vld [vmem:[%s2937_s20 + $0xa8] sm:$0xff]  ;;  %v3034_v1 = vld [vmem:[%s2937_s20 + $0x30] sm:$0xff] }
  0x15   : > { %v324_v27 = vmax.f32 %v292_v21, 0.0  ;;  %4797 = vst [vmem:[#allocation7_spill] sm:$0xff] %v2989_v34  ;;  %v325_v35 = vmax.f32 %v293_v31, 0.0  ;;  %v310_v40 = vadd.f32 %v2955_v17, %v277_v38  ;;  %v326_v43 = vmax.f32 %v294_v39, 0.0  ;;  %v3037_v2 = vld [vmem:[%s2937_s20 + $0xb0] sm:$0xff]  ;;  %v3061_v21 = vld [vmem:[%s2937_s20 + $0xc0] sm:$0xff] }
  0x16   : > { %377 = vmatpush.msra.mxu0 %v366_v5  ;;  %2812 = vmatpush.msra.mxu2 %v366_v5  ;;  %v340_v28 = vmax.f32 %v308_v22, 0.0  ;;  %v341_v36 = vmax.f32 %v309_v32, 0.0  ;;  %4798 = vst [vmem:[#allocation8_spill] sm:$0xff] %v2998_v41  ;;  %v262_v45 = vmul.f32 %v2942_v11, %v2998_v41  ;;  %v278_v46 = vmul.f32 %v2942_v11, %v3001_v42  ;;  %v2689_v29 = vld [vmem:[%s4741_s4 + $0xf0] sm:$0xff]  ;;  %v2688_v32 = vld [vmem:[%s4741_s4 + $0xe8] sm:$0xff]  ;;  %v2687_v37 = vld [vmem:[%s4741_s4 + $0xe0] sm:$0xff] }
  0x17   : > { %4799 = vst [vmem:[#allocation9_spill] sm:$0xff] %v3001_v42  ;;  %v342_v44 = vmax.f32 %v310_v40, 0.0  ;;  %v263_v53 = vmul.f32 %v2942_v11, %v3010_v49  ;;  %v279_v54 = vmul.f32 %v2942_v11, %v3013_v50  ;;  %v264_v61 = vmul.f32 %v2942_v11, %v3022_v57 }
  0x18   : > { %378 = vmatpush.msra.mxu0 %v365_v6  ;;  %2813 = vmatpush.msra.mxu2 %v365_v6  ;;  %v295_v47 = vadd.f32 %v2955_v17, %v262_v45  ;;  %v311_v48 = vadd.f32 %v2955_v17, %v278_v46  ;;  %4800 = vst [vmem:[#allocation10_spill] sm:$0xff] %v3010_v49  ;;  %v2685_v45 = vld [vmem:[%s4741_s4 + $0xd0] sm:$0xff] }
  0x19   : > { %4801 = vst [vmem:[#allocation11_spill] sm:$0xff] %v3013_v50  ;;  %v296_v55 = vadd.f32 %v2955_v17, %v263_v53  ;;  %v312_v56 = vadd.f32 %v2955_v17, %v279_v54  ;;  %v280_v62 = vmul.f32 %v2942_v11, %v3025_v58  ;;  %v297_v63 = vadd.f32 %v2955_v17, %v264_v61  ;;  %v3109_v53 = vld [vmem:[%s2937_s20 + $0xd0] sm:$0xff]  ;;  %v716_v54 = vld [vmem:[%s4741_s4 + $0x68] sm:$0xff] }
  0x1a   : > { %379 = vmatpush.msra.mxu0 %v364_v7  ;;  %2814 = vmatpush.msra.mxu2 %v364_v7  ;;  %v327_v51 = vmax.f32 %v295_v47, 0.0  ;;  %v343_v52 = vmax.f32 %v311_v48, 0.0  ;;  %4802 = vst [vmem:[#allocation12_spill] sm:$0xff] %v3022_v57  ;;  %v265_v5 = vmul.f32 %v2942_v11, %v3034_v1  ;;  %v281_v6 = vmul.f32 %v2942_v11, %v3037_v2  ;;  %v718_v48 = vld [vmem:[%s4741_s4 + $0x78] sm:$0xff] }
  0x1b   : > { %4803 = vst [vmem:[#allocation13_spill] sm:$0xff] %v3025_v58  ;;  %v328_v59 = vmax.f32 %v296_v55, 0.0  ;;  %v344_v60 = vmax.f32 %v312_v56, 0.0  ;;  %v313_v0 = vadd.f32 %v2955_v17, %v280_v62  ;;  %v329_v3 = vmax.f32 %v297_v63, 0.0  ;;  %v2684_v55 = vld [vmem:[%s4741_s4 + $0xc8] sm:$0xff]  ;;  %v2683_v56 = vld [vmem:[%s4741_s4 + $0xc0] sm:$0xff] }
  0x1c   : > { %380 = vmatpush.msra.mxu0 %v363_v9  ;;  %2815 = vmatpush.msra.mxu2 %v363_v9  ;;  %4804 = vst [vmem:[#allocation14_spill] sm:$0xff] %v3034_v1  ;;  %v298_v7 = vadd.f32 %v2955_v17, %v265_v5  ;;  %v314_v8 = vadd.f32 %v2955_v17, %v281_v6  ;;  %v3046_v9 = vld [vmem:[%s2937_s20 + $0x38] sm:$0xff]  ;;  %v715_v63 = vld [vmem:[%s4741_s4 + $0x60] sm:$0xff] }
  0x1d   : > { %4805 = vst [vmem:[#allocation15_spill] sm:$0xff] %v3037_v2  ;;  %v345_v4 = vmax.f32 %v313_v0, 0.0  ;;  %v285_v62 = vmul.f32 %v2942_v11, %v3109_v53  ;;  %v2682_v0 = vld [vmem:[%s4741_s4 + $0xb8] sm:$0xff] }
  0x1e   : > { %381 = vmatpush.msra.mxu0 %v362_v10  ;;  %2816 = vmatpush.msra.mxu2 %v362_v10  ;;  %4806 = vst [vmem:[#allocation16_spill] sm:$0xff] %v3046_v9  ;;  %v3049_v10 = vld [vmem:[%s2937_s20 + $0xb8] sm:$0xff]  ;;  %v330_v12 = vmax.f32 %v298_v7, 0.0 }
  0x1f   : > { %4807 = vst [vmem:[#allocation17_spill] sm:$0xff] %v3049_v10  ;;  %v282_v16 = vmul.f32 %v2942_v11, %v3049_v10  ;;  %v318_v5 = vadd.f32 %v2955_v17, %v285_v62  ;;  %v3136_v6 = vld [vmem:[%s2937_s20 + $0x58] sm:$0xff] }
  0x20   : > { %382 = vmatpush.msra.mxu0 %v361_v14  ;;  %2817 = vmatpush.msra.mxu2 %v361_v14  ;;  %v346_v14 = vmax.f32 %v314_v8, 0.0  ;;  %4809 = vst [vmem:[#allocation19_spill] sm:$0xff] %v3061_v21  ;;  %v714_v7 = vld [vmem:[%s4741_s4 + $0x58] sm:$0xff]  ;;  %v713_v8 = vld [vmem:[%s4741_s4 + $0x50] sm:$0xff] }
  0x21   : > { %4813 = vst [vmem:[#allocation23_spill] sm:$0xff] %v3109_v53 }
  0x22   : > { %383 = vmatpush.msra.mxu0 %v360_v15  ;;  %2818 = vmatpush.msra.mxu2 %v360_v15  ;;  %v266_v15 = vmul.f32 %v2942_v11, %v3046_v9  ;;  %4814 = vst [vmem:[#allocation24_spill] sm:$0xff] %v3136_v6 }
  0x24   : > { %384 = vmatpush.msra.mxu0 %v359_v19  ;;  %2819 = vmatpush.msra.mxu2 %v359_v19  ;;  %v299_v18 = vadd.f32 %v2955_v17, %v266_v15  ;;  %v315_v19 = vadd.f32 %v2955_v17, %v282_v16  ;;  %v2721_v15 = vld [vmem:[%s4741_s4 + $0x1f0] sm:$0xff]  ;;  %v712_v16 = vld [vmem:[%s4741_s4 + $0x48] sm:$0xff] }
  0x26   : > { %385 = vmatpush.msra.mxu0 %v358_v20  ;;  %2820 = vmatpush.msra.mxu2 %v358_v20  ;;  %v3058_v20 = vld [vmem:[%s2937_s20 + $0x40] sm:$0xff]  ;;  %v331_v22 = vmax.f32 %v299_v18, 0.0  ;;  %v2680_v18 = vld [vmem:[%s4741_s4 + $0xa8] sm:$0xff] }
  0x27   : > { %4808 = vst [vmem:[#allocation18_spill] sm:$0xff] %v3058_v20 }
  0x28   : > { %386 = vmatpush.msra.mxu0 %v357_v25  ;;  %2821 = vmatpush.msra.mxu2 %v357_v25  ;;  %v347_v25 = vmax.f32 %v315_v19, 0.0  ;;  %v2679_v19 = vld [vmem:[%s4741_s4 + $0xa0] sm:$0xff] }
  0x2a   : > { %387 = vmatpush.msra.mxu0 %v356_v26  ;;  %2822 = vmatpush.msra.mxu2 %v356_v26  ;;  %v267_v26 = vmul.f32 %v2942_v11, %v3058_v20 }
  0x2b   : > { %388 = vmatmul.f32.vlgmr.msra.gmra.mxu0 %v324_v27  ;;  %436 = vmatmul.f32.vlgmr.msra.gmra.mxu2 %v340_v28  ;;  %v283_v27 = vmul.f32 %v2942_v11, %v3061_v21  ;;  %v2690_v28 = vld [vmem:[%s4741_s4 + $0xf8] sm:$0xff] }
  0x2c   : > { %768 = vmatpush.msra.mxu1 %v2690_v28  ;;  %2823 = vmatpush.msra.mxu3 %v2690_v28  ;;  %v300_v30 = vadd.f32 %v2955_v17, %v267_v26  ;;  %v270_v26 = vmul.f32 %v2942_v11, %v3136_v6  ;;  %v711_v28 = vld [vmem:[%s4741_s4 + $0x40] sm:$0xff] }
  0x2d   : > { %v316_v31 = vadd.f32 %v2955_v17, %v283_v27  ;;  %881 = vmatpush.msrb.mxu2 %v718_v48  ;;  %v2676_v48 = vld [vmem:[%s4741_s4 + $0x88] sm:$0xff] }
  0x2e   : > { %769 = vmatpush.msra.mxu1 %v2689_v29  ;;  %2824 = vmatpush.msra.mxu3 %v2689_v29  ;;  %v332_v38 = vmax.f32 %v300_v30, 0.0  ;;  %v2678_v29 = vld [vmem:[%s4741_s4 + $0x98] sm:$0xff]  ;;  %v2859_v30 = vmov 0.0  }
  0x2f   : > { %v348_v39 = vmax.f32 %v316_v31, 0.0  ;;  %584 = vst [vmem:[#allocation2] sm:$0xff] %v2859_v30  ;;  %v2677_v31 = vld [vmem:[%s4741_s4 + $0x90] sm:$0xff] }
  0x30   : > { %770 = vmatpush.msra.mxu1 %v2688_v32  ;;  %2825 = vmatpush.msra.mxu3 %v2688_v32  ;;  %585 = vst [vmem:[#allocation2 + $0x8] sm:$0xff] %v2859_v30  ;;  %v303_v32 = vadd.f32 %v2955_v17, %v270_v26  ;;  %v703_v26 = vld [vmem:[%s4741_s4] sm:$0xff] }
  0x31   : > { %586 = vst [vmem:[#allocation2 + $0x10] sm:$0x3] %v2859_v30 }
  0x32   : > { %771 = vmatpush.msra.mxu1 %v2687_v37  ;;  %2826 = vmatpush.msra.mxu3 %v2687_v37  ;;  %587 = vst [vmem:[#allocation2 + $0x18] sm:$0xff] %v2859_v30 }
  0x33   : > { %391 = vmatmul.f32.gmra.mxu0 %v325_v35  ;;  %439 = vmatmul.f32.gmra.mxu2 %v341_v36  ;;  %v3079_v35 = vld [vmem:[%s2937_s20 + $0x48] sm:$0xff]  ;;  %588 = vst [vmem:[#allocation2 + $0x20] sm:$0xff] %v2859_v30 }
  0x34   : > { %4810 = vst [vmem:[#allocation20_spill] sm:$0xff] %v3079_v35  ;;  %v3082_v36 = vld [vmem:[%s2937_s20 + $0xc8] sm:$0xff]  ;;  %v268_v40 = vmul.f32 %v2942_v11, %v3079_v35 }
  0x35   : > { %4811 = vst [vmem:[#allocation21_spill] sm:$0xff] %v3082_v36 }
  0x36   : > { %v301_v46 = vadd.f32 %v2955_v17, %v268_v40  ;;  %v709_v40 = vld [vmem:[%s4741_s4 + $0x30] sm:$0xff]  ;;  %589 = vst [vmem:[#allocation2 + $0x28] sm:$0x3] %v2859_v30 }
  0x37   : > { %590 = vst [vmem:[#allocation2 + $0x30] sm:$0xff] %v2859_v30  ;;  %v719_v62 = vld [vmem:[#allocation2 + $0x1] sm:$0xff] }
  0x38   : > { %591 = vst [vmem:[#allocation2 + $0x38] sm:$0xff] %v2859_v30 }
  0x39   : > { %592 = vst [vmem:[#allocation2 + $0x40] sm:$0x3] %v2859_v30 }
  0x3a   : > { %593 = vst [vmem:[#allocation2 + $0x48] sm:$0xff] %v2859_v30 }
  0x3b   : > { %394 = vmatmul.f32.gmra.mxu0 %v326_v43  ;;  %442 = vmatmul.f32.gmra.mxu2 %v342_v44  ;;  %v284_v43 = vmul.f32 %v2942_v11, %v3082_v36  ;;  %v2686_v44 = vld [vmem:[%s4741_s4 + $0xd8] sm:$0xff]  ;;  %594 = vst [vmem:[#allocation2 + $0x50] sm:$0xff] %v2859_v30 }
  0x3c   : > { %772 = vmatpush.msra.mxu1 %v2686_v44  ;;  %2827 = vmatpush.msra.mxu3 %v2686_v44  ;;  %v3195_v44 = vld [vmem:[%s2937_s20 + $0xe0] sm:$0xff]  ;;  %595 = vst [vmem:[#allocation2 + $0x58] sm:$0x3] %v2859_v30 }
  0x3d   : > { %v317_v47 = vadd.f32 %v2955_v17, %v284_v43  ;;  %v3192_v43 = vld [vmem:[%s2937_s20 + $0x60] sm:$0xff]  ;;  %4817 = vst [vmem:[#allocation27_spill] sm:$0xff] %v3195_v44 }
  0x3e   : > { %773 = vmatpush.msra.mxu1 %v2685_v45  ;;  %2828 = vmatpush.msra.mxu3 %v2685_v45  ;;  %4816 = vst [vmem:[#allocation26_spill] sm:$0xff] %v3192_v43  ;;  %v2719_v45 = vld [vmem:[%s4741_s4 + $0x1e0] sm:$0xff] }
  0x3f   : > { %596 = vst [vmem:[#allocation2 + $0x60] sm:$0xff] %v2859_v30 }
  0x40   : > { %774 = vmatpush.msra.mxu1 %v2684_v55  ;;  %2829 = vmatpush.msra.mxu3 %v2684_v55  ;;  %597 = vst [vmem:[#allocation2 + $0x68] sm:$0xff] %v2859_v30 }
  0x41   : > { %598 = vst [vmem:[#allocation2 + $0x70] sm:$0x3] %v2859_v30 }
  0x42   : > { %775 = vmatpush.msra.mxu1 %v2683_v56  ;;  %2830 = vmatpush.msra.mxu3 %v2683_v56  ;;  %v271_v56 = vmul.f32 %v2942_v11, %v3192_v43  ;;  %599 = vst [vmem:[#allocation2 + $0x78] sm:$0xff] %v2859_v30 }
  0x43   : > { %397 = vmatmul.f32.gmra.mxu0 %v327_v51  ;;  %445 = vmatmul.f32.gmra.mxu2 %v343_v52  ;;  %v717_v51 = vld [vmem:[%s4741_s4 + $0x70] sm:$0xff]  ;;  %600 = vst [vmem:[#allocation2 + $0x80] sm:$0xff] %v2859_v30 }
  0x44   : > { %v3106_v52 = vld [vmem:[%s2937_s20 + $0x50] sm:$0xff]  ;;  %882 = vmatpush.msrb.mxu2 %v717_v51  ;;  %776 = vmatpush.msra.mxu1 %v2682_v0  ;;  %v2675_v51 = vld [vmem:[%s4741_s4 + $0x80] sm:$0xff]  ;;  %601 = vst [vmem:[#allocation2 + $0x88] sm:$0x3] %v2859_v30 }
  0x45   : > { %4812 = vst [vmem:[#allocation22_spill] sm:$0xff] %v3106_v52  ;;  %v269_v61 = vmul.f32 %v2942_v11, %v3106_v52  ;;  %2831 = vmatpush.msra.mxu3 %v2682_v0 }
  0x46   : > { %883 = vmatpush.msrb.mxu2 %v716_v54  ;;  %v335_v54 = vmax.f32 %v303_v32, 0.0  ;;  %602 = vst [vmem:[#allocation2 + $0x90] sm:$0xff] %v2859_v30  ;;  %v2712_v32 = vld [vmem:[%s4741_s4 + $0x1a8] sm:$0xff] }
  0x47   : > { %603 = vst [vmem:[#allocation2 + $0x98] sm:$0xff] %v2859_v30 }
  0x48   : > { %884 = vmatpush.msrb.mxu2 %v715_v63  ;;  %v304_v63 = vadd.f32 %v2955_v17, %v271_v56  ;;  %604 = vst [vmem:[#allocation2 + $0xa0] sm:$0x3] %v2859_v30  ;;  %v2708_v56 = vld [vmem:[%s4741_s4 + $0x188] sm:$0xff] }
  0x49   : > { %605 = vst [vmem:[#allocation2 + $0xa8] sm:$0xff] %v2859_v30 }
  0x4a   : > { %885 = vmatpush.msrb.mxu2 %v714_v7  ;;  %v3242_v7 = vld [vmem:[%s2937_s20 + $0x68] sm:$0xff]  ;;  %606 = vst [vmem:[#allocation2 + $0xb0] sm:$0xff] %v2859_v30 }
  0x4b   : > { %400 = vmatmul.f32.gmra.mxu0 %v328_v59  ;;  %448 = vmatmul.f32.gmra.mxu2 %v344_v60  ;;  %v333_v59 = vmax.f32 %v301_v46, 0.0  ;;  %v349_v60 = vmax.f32 %v317_v47, 0.0  ;;  %v708_v46 = vld [vmem:[%s4741_s4 + $0x28] sm:$0xff]  ;;  %v2718_v47 = vld [vmem:[%s4741_s4 + $0x1d8] sm:$0xff]  ;;  %4818 = vst [vmem:[#allocation28_spill] sm:$0xff] %v3242_v7 }
  0x4c   : > { %886 = vmatpush.msrb.mxu2 %v713_v8  ;;  %v3245_v8 = vld [vmem:[%s2937_s20 + $0xe8] sm:$0xff]  ;;  %607 = vst [vmem:[#allocation2 + $0xb8] sm:$0x3] %v2859_v30 }
  0x4d   : > { %4819 = vst [vmem:[#allocation29_spill] sm:$0xff] %v3245_v8 }
  0x4e   : > { %887 = vmatpush.msrb.mxu2 %v712_v16  ;;  %608 = vst [vmem:[#allocation2 + $0xc0] sm:$0xff] %v2859_v30 }
  0x4f   : > { %609 = vst [vmem:[#allocation2 + $0xc8] sm:$0xff] %v2859_v30 }
  0x50   : > { %888 = vmatpush.msrb.mxu2 %v711_v28  ;;  %v720_v28 = vld [vmem:[#allocation2 + $0x9] sm:$0xff]  ;;  %610 = vst [vmem:[#allocation2 + $0xd0] sm:$0x3] %v2859_v30 }
  0x51   : > { %611 = vst [vmem:[#allocation2 + $0xd8] sm:$0xff] %v2859_v30 }
  0x52   : > { %612 = vst [vmem:[#allocation2 + $0xe0] sm:$0xff] %v2859_v30 }
  0x53   : > { %403 = vmatmul.f32.gmra.mxu0 %v329_v3  ;;  %451 = vmatmul.f32.gmra.mxu2 %v345_v4  ;;  %v2681_v3 = vld [vmem:[%s4741_s4 + $0xb0] sm:$0xff]  ;;  %v302_v4 = vadd.f32 %v2955_v17, %v269_v61  ;;  %613 = vst [vmem:[#allocation2 + $0xe8] sm:$0x3] %v2859_v30 }
  0x54   : > { %777 = vmatpush.msra.mxu1 %v2681_v3  ;;  %2832 = vmatpush.msra.mxu3 %v2681_v3  ;;  %v2717_v61 = vld [vmem:[%s4741_s4 + $0x1d0] sm:$0xff]  ;;  %v706_v3 = vld [vmem:[%s4741_s4 + $0x18] sm:$0xff]  ;;  %614 = vst [vmem:[#allocation2 + $0xf0] sm:$0xff] %v2859_v30 }
  0x55   : > { %615 = vst [vmem:[#allocation2 + $0xf8] sm:$0xff] %v2859_v30 }
  0x56   : > { %778 = vmatpush.msra.mxu1 %v2680_v18  ;;  %2833 = vmatpush.msra.mxu3 %v2680_v18  ;;  %v272_v18 = vmul.f32 %v2942_v11, %v3242_v7  ;;  %616 = vst [vmem:[#allocation2 + $0x100] sm:$0x3] %v2859_v30 }
  0x57   : > { %617 = vst [vmem:[#allocation2 + $0x108] sm:$0xff] %v2859_v30 }
  0x58   : > { %779 = vmatpush.msra.mxu1 %v2679_v19  ;;  %2834 = vmatpush.msra.mxu3 %v2679_v19  ;;  %v288_v19 = vmul.f32 %v2942_v11, %v3245_v8  ;;  %618 = vst [vmem:[#allocation2 + $0x110] sm:$0xff] %v2859_v30 }
  0x59   : > { %619 = vst [vmem:[#allocation2 + $0x118] sm:$0x3] %v2859_v30 }
  0x5a   : > { %780 = vmatpush.msra.mxu1 %v2678_v29  ;;  %2835 = vmatpush.msra.mxu3 %v2678_v29  ;;  %v305_v29 = vadd.f32 %v2955_v17, %v272_v18  ;;  %620 = vst [vmem:[#allocation2 + $0x120] sm:$0xff] %v2859_v30 }
  0x5b   : > { %406 = vmatmul.f32.gmra.mxu0 %v330_v12  ;;  %454 = vmatmul.f32.gmra.mxu2 %v346_v14  ;;  %v3145_v12 = vld [vmem:[%s2937_s20 + $0xd8] sm:$0xff]  ;;  %621 = vst [vmem:[#allocation2 + $0x128] sm:$0xff] %v2859_v30 }
  0x5c   : > { %4815 = vst [vmem:[#allocation25_spill] sm:$0xff] %v3145_v12  ;;  %v2722_v14 = vld [vmem:[%s4741_s4 + $0x1f8] sm:$0xff]  ;;  %v286_v27 = vmul.f32 %v2942_v11, %v3145_v12  ;;  %781 = vmatpush.msra.mxu1 %v2677_v31  ;;  %2836 = vmatpush.msra.mxu3 %v2677_v31  ;;  %v321_v31 = vadd.f32 %v2955_v17, %v288_v19 }
  0x5d   : > { %1237 = vmatpush.msrb.mxu0 %v2722_v14  ;;  %v2715_v14 = vld [vmem:[%s4741_s4 + $0x1c0] sm:$0xff]  ;;  %622 = vst [vmem:[#allocation2 + $0x130] sm:$0x3] %v2859_v30 }
  0x5e   : > { %v319_v37 = vadd.f32 %v2955_v17, %v286_v27  ;;  %782 = vmatpush.msra.mxu1 %v2676_v48  ;;  %2837 = vmatpush.msra.mxu3 %v2676_v48  ;;  %v2713_v27 = vld [vmem:[%s4741_s4 + $0x1b0] sm:$0xff]  ;;  %v2710_v48 = vld [vmem:[%s4741_s4 + $0x198] sm:$0xff]  ;;  %623 = vst [vmem:[#allocation2 + $0x138] sm:$0xff] %v2859_v30 }
  0x5f   : > { %1238 = vmatpush.msrb.mxu0 %v2721_v15  ;;  %v336_v15 = vmax.f32 %v304_v63, 0.0  ;;  %624 = vst [vmem:[#allocation2 + $0x140] sm:$0xff] %v2859_v30 }
  0x60   : > { %v351_v55 = vmax.f32 %v319_v37, 0.0  ;;  %783 = vmatpush.msra.mxu1 %v2675_v51  ;;  %2838 = vmatpush.msra.mxu3 %v2675_v51  ;;  %v3280_v37 = vld [vmem:[%s2937_s20 + $0x70] sm:$0xff]  ;;  %625 = vst [vmem:[#allocation2 + $0x148] sm:$0x3] %v2859_v30 }
  0x61   : > { %784 = vmatmul.f32.vlgmr.msra.gmra.mxu1 %v719_v62  ;;  %4820 = vst [vmem:[#allocation30_spill] sm:$0xff] %v3280_v37  ;;  %v2709_v51 = vld [vmem:[%s4741_s4 + $0x190] sm:$0xff] }
  0x62   : > { %626 = vst [vmem:[#allocation2 + $0x150] sm:$0xff] %v2859_v30 }
  0x63   : > { %409 = vmatmul.f32.gmra.mxu0 %v331_v22  ;;  %457 = vmatmul.f32.gmra.mxu2 %v347_v25  ;;  %v334_v22 = vmax.f32 %v302_v4, 0.0  ;;  %v350_v25 = vmax.f32 %v318_v5, 0.0  ;;  %v2716_v4 = vld [vmem:[%s4741_s4 + $0x1c8] sm:$0xff]  ;;  %v705_v5 = vld [vmem:[%s4741_s4 + $0x10] sm:$0xff]  ;;  %627 = vst [vmem:[#allocation2 + $0x158] sm:$0xff] %v2859_v30 }
  0x64   : > { %628 = vst [vmem:[#allocation2 + $0x160] sm:$0x3] %v2859_v30 }
  0x65   : > { %629 = vst [vmem:[#allocation2 + $0x168] sm:$0xff] %v2859_v30 }
  0x66   : > { %630 = vst [vmem:[#allocation2 + $0x170] sm:$0xff] %v2859_v30 }
  0x67   : > { %631 = vst [vmem:[#allocation2 + $0x178] sm:$0x3] %v2859_v30 }
  0x68   : > { %632 = vst [vmem:[#allocation2 + $0x180] sm:$0xff] %v2859_v30 }
  0x69   : > { %787 = vmatmul.f32.gmra.mxu1 %v720_v28  ;;  %633 = vst [vmem:[#allocation2 + $0x188] sm:$0xff] %v2859_v30 }
  0x6a   : > { %634 = vst [vmem:[#allocation2 + $0x190] sm:$0x3] %v2859_v30 }
  0x6b   : > { %412 = vmatmul.f32.gmra.mxu0 %v332_v38  ;;  %460 = vmatmul.f32.gmra.mxu2 %v348_v39  ;;  %v710_v38 = vld [vmem:[%s4741_s4 + $0x38] sm:$0xff]  ;;  %v2720_v39 = vld [vmem:[%s4741_s4 + $0x1e8] sm:$0xff]  ;;  %635 = vst [vmem:[#allocation2 + $0x198] sm:$0xff] %v2859_v30 }
  0x6c   : > { %889 = vmatpush.msrb.mxu2 %v710_v38  ;;  %1239 = vmatpush.msrb.mxu0 %v2720_v39  ;;  %v3283_v38 = vld [vmem:[%s2937_s20 + $0xf0] sm:$0xff]  ;;  %v2711_v39 = vld [vmem:[%s4741_s4 + $0x1a0] sm:$0xff]  ;;  %636 = vst [vmem:[#allocation2 + $0x1a0] sm:$0xff] %v2859_v30 }
  0x6d   : > { %4821 = vst [vmem:[#allocation31_spill] sm:$0xff] %v3283_v38 }
  0x6e   : > { %890 = vmatpush.msrb.mxu2 %v709_v40  ;;  %1240 = vmatpush.msrb.mxu0 %v2719_v45  ;;  %v337_v40 = vmax.f32 %v305_v29, 0.0  ;;  %v353_v45 = vmax.f32 %v321_v31, 0.0  ;;  %637 = vst [vmem:[#allocation2 + $0x1a8] sm:$0x3] %v2859_v30 }
  0x70   : > { %891 = vmatpush.msrb.mxu2 %v708_v46  ;;  %1241 = vmatpush.msrb.mxu0 %v2718_v47  ;;  %v273_v46 = vmul.f32 %v2942_v11, %v3280_v37  ;;  %v289_v47 = vmul.f32 %v2942_v11, %v3283_v38 }
  0x72   : > { %1242 = vmatpush.msrb.mxu0 %v2717_v61  ;;  %v2707_v61 = vld [vmem:[%s4741_s4 + $0x180] sm:$0xff] }
  0x73   : > { %415 = vmatmul.f32.gmra.mxu0 %v333_v59  ;;  %463 = vmatmul.f32.gmra.mxu2 %v349_v60  ;;  %v287_v59 = vmul.f32 %v2942_v11, %v3195_v44  ;;  %v707_v60 = vld [vmem:[%s4741_s4 + $0x20] sm:$0xff] }
  0x74   : > { %892 = vmatpush.msrb.mxu2 %v707_v60  ;;  %1243 = vmatpush.msrb.mxu0 %v2716_v4  ;;  %v3315_v60 = vld [vmem:[%s2937_s20 + $0xf8] sm:$0xff] }
  0x75   : > { %v320_v0 = vadd.f32 %v2955_v17, %v287_v59  ;;  %v3312_v59 = vld [vmem:[%s2937_s20 + $0x78] sm:$0xff]  ;;  %4823 = vst [vmem:[#allocation33_spill] sm:$0xff] %v3315_v60 }
  0x76   : > { %893 = vmatpush.msrb.mxu2 %v706_v3  ;;  %1244 = vmatpush.msrb.mxu0 %v2715_v14  ;;  %4822 = vst [vmem:[#allocation32_spill] sm:$0xff] %v3312_v59  ;;  %v290_v3 = vmul.f32 %v2942_v11, %v3315_v60 }
  0x77   : > { %v352_v16 = vmax.f32 %v320_v0, 0.0  ;;  %v274_v0 = vmul.f32 %v2942_v11, %v3312_v59 }
  0x78   : > { %894 = vmatpush.msrb.mxu2 %v705_v5  ;;  %v323_v5 = vadd.f32 %v2955_v17, %v290_v3 }
  0x79   : > { %v307_v4 = vadd.f32 %v2955_v17, %v274_v0 }
  0x7a   : > { %v355_v14 = vmax.f32 %v323_v5, 0.0 }
  0x7b   : > { %418 = vmatmul.f32.gmra.mxu0 %v334_v22  ;;  %466 = vmatmul.f32.gmra.mxu2 %v350_v25  ;;  %v704_v22 = vld [vmem:[%s4741_s4 + $0x8] sm:$0xff]  ;;  %v2714_v25 = vld [vmem:[%s4741_s4 + $0x1b8] sm:$0xff]  ;;  %v339_v11 = vmax.f32 %v307_v4, 0.0 }
  0x7c   : > { %895 = vmatpush.msrb.mxu2 %v704_v22  ;;  %1245 = vmatpush.msrb.mxu0 %v2714_v25 }
  0x7e   : > { %896 = vmatpush.msrb.mxu2 %v703_v26  ;;  %1246 = vmatpush.msrb.mxu0 %v2713_v27 }
  0x80   : > { %1247 = vmatpush.msrb.mxu0 %v2712_v32 }
  0x82   : > { %1248 = vmatpush.msrb.mxu0 %v2711_v39 }
  0x83   : > { %421 = vmatmul.f32.gmra.mxu0 %v335_v54  ;;  %469 = vmatmul.f32.gmra.mxu2 %v351_v55  ;;  %v306_v54 = vadd.f32 %v2955_v17, %v273_v46  ;;  %v322_v55 = vadd.f32 %v2955_v17, %v289_v47  ;;  %v485_v17 = vld [vmem:[%s4740_s3] sm:$0x3] }
  0x84   : > { %1249 = vmatpush.msrb.mxu0 %v2710_v48 }
  0x85   : > { %v338_v62 = vmax.f32 %v306_v54, 0.0  ;;  %v354_v63 = vmax.f32 %v322_v55, 0.0 }
  0x86   : > { %1250 = vmatpush.msrb.mxu0 %v2709_v51 }
  0x88   : > { %1251 = vmatpush.msrb.mxu0 %v2708_v56 }
  0x8a   : > { %1252 = vmatpush.msrb.mxu0 %v2707_v61 }
  0x8b   : > { %424 = vmatmul.f32.gmra.mxu0 %v336_v15  ;;  %472 = vmatmul.f32.gmra.mxu2 %v352_v16  ;;  %v3347_v15 = vperm.slane %v485_v17, 0  ;;  %v3351_v16 = vperm.slane %v485_v17, 1 }
  0x93   : > { %427 = vmatmul.f32.gmra.mxu0 %v337_v40  ;;  %475 = vmatmul.f32.gmra.mxu2 %v353_v45 }
  0x9b   : > { %430 = vmatmul.f32.gmra.mxu0 %v338_v62  ;;  %478 = vmatmul.f32.gmra.mxu2 %v354_v63 }
  0xa3   : > { %433 = vmatmul.f32.gmra.mxu0 %v339_v11  ;;  %481 = vmatmul.f32.gmra.mxu2 %v355_v14 }
  0xa8   : > { %v389_v18 = vpop.f32.mrf.mxu0 }
  0xa9   : > { %v487_v19 = vmul.f32 %v3347_v15, %v389_v18 }
  0xab   : > { %v520_v22 = vadd.f32 %v3351_v16, %v487_v19  ;;  %897 = vmatmul.f32.vlgmr.msrb.gmra.mxu2 %v2859_v30 }
  0xad   : > { %v3361_v25 = vmax.f32 %v520_v22, 0.0 }
  0xae   : > { %v437_v26 = vpop.f32.mrf.mxu2 }
  0xaf   : > { %639 = vst [vmem:[#allocation2 + $0x19] sm:$0xff] %v3361_v25  ;;  %v503_v27 = vmul.f32 %v3347_v15, %v437_v26  ;;  %790 = vmatmul.f32.gmra.mxu1 %v3361_v25 }
  0xb0   : > { %v392_v28 = vpop.f32.mrf.mxu0 }
  0xb1   : > { %v3367_v29 = vadd.f32 %v3351_v16, %v503_v27  ;;  %v488_v31 = vmul.f32 %v3347_v15, %v392_v28 }
  0xb3   : > { %v4752_v32 = vmax.f32 %v3367_v29, 0.0  ;;  %v521_v39 = vadd.f32 %v3351_v16, %v488_v31  ;;  %900 = vmatmul.f32.gmra.mxu2 %v2859_v30 }
  0xb5   : > { %655 = vst [vmem:[#allocation2 + $0xd9] sm:$0xff] %v4752_v32  ;;  %v3375_v40 = vmax.f32 %v521_v39, 0.0 }
  0xb6   : > { %v440_v45 = vpop.f32.mrf.mxu2  ;;  %v1188_v46 = vld [vmem:[#allocation2 + $0x18] sm:$0xff] }
  0xb7   : > { %640 = vst [vmem:[#allocation2 + $0x21] sm:$0xff] %v3375_v40  ;;  %v504_v47 = vmul.f32 %v3347_v15, %v440_v45  ;;  %1253 = vmatmul.f32.vlgmr.msrb.gmra.mxu0 %v1188_v46  ;;  %793 = vmatmul.f32.gmra.mxu1 %v3375_v40 }
  0xb8   : > { %v395_v48 = vpop.f32.mrf.mxu0 }
  0xb9   : > { %v3381_v51 = vadd.f32 %v3351_v16, %v504_v47  ;;  %v489_v30 = vmul.f32 %v3347_v15, %v395_v48 }
  0xbb   : > { %v4751_v54 = vmax.f32 %v3381_v51, 0.0  ;;  %v522_v55 = vadd.f32 %v3351_v16, %v489_v30  ;;  %903 = vmatmul.f32.gmra.mxu2 %v1188_v46 }
  0xbd   : > { %656 = vst [vmem:[#allocation2 + $0xe1] sm:$0xff] %v4751_v54  ;;  %v3388_v56 = vmax.f32 %v522_v55, 0.0 }
  0xbe   : > { %v443_v61 = vpop.f32.mrf.mxu2  ;;  %v1189_v62 = vld [vmem:[#allocation2 + $0x20] sm:$0xff] }
  0xbf   : > { %641 = vst [vmem:[#allocation2 + $0x31] sm:$0xff] %v3388_v56  ;;  %v505_v63 = vmul.f32 %v3347_v15, %v443_v61  ;;  %1256 = vmatmul.f32.gmra.mxu0 %v1189_v62  ;;  %796 = vmatmul.f32.gmra.mxu1 %v3388_v56 }
  0xc0   : > { %v398_v0 = vpop.f32.mrf.mxu0 }
  0xc1   : > { %v3394_v3 = vadd.f32 %v3351_v16, %v505_v63  ;;  %v490_v4 = vmul.f32 %v3347_v15, %v398_v0 }
  0xc3   : > { %v4749_v5 = vmax.f32 %v3394_v3, 0.0  ;;  %v523_v11 = vadd.f32 %v3351_v16, %v490_v4  ;;  %906 = vmatmul.f32.gmra.mxu2 %v1189_v62 }
  0xc5   : > { %657 = vst [vmem:[#allocation2 + $0xf1] sm:$0xff] %v4749_v5  ;;  %v3401_v14 = vmax.f32 %v523_v11, 0.0  ;;  %v2724_v5 = vld [vmem:[%s4741_s4 + $0x208] sm:$0xff] }
  0xc6   : > { %v446_v17 = vpop.f32.mrf.mxu2  ;;  %v1190_v18 = vld [vmem:[#allocation2 + $0x30] sm:$0xff] }
  0xc7   : > { %642 = vst [vmem:[#allocation2 + $0x39] sm:$0xff] %v3401_v14  ;;  %v506_v19 = vmul.f32 %v3347_v15, %v446_v17  ;;  %1259 = vmatmul.f32.gmra.mxu0 %v1190_v18  ;;  %799 = vmatmul.f32.gmra.mxu1 %v3401_v14  ;;  %v1965_v59 = vld [vmem:[#allocation2 + $0x31] sm:$0xff] }
  0xc8   : > { %v401_v22 = vpop.f32.mrf.mxu0 }
  0xc9   : > { %v3407_v26 = vadd.f32 %v3351_v16, %v506_v19  ;;  %v491_v27 = vmul.f32 %v3347_v15, %v401_v22 }
  0xcb   : > { %v4748_v28 = vmax.f32 %v3407_v26, 0.0  ;;  %v524_v31 = vadd.f32 %v3351_v16, %v491_v27  ;;  %909 = vmatmul.f32.gmra.mxu2 %v1190_v18 }
  0xcd   : > { %658 = vst [vmem:[#allocation2 + $0xf9] sm:$0xff] %v4748_v28  ;;  %v3414_v39 = vmax.f32 %v524_v31, 0.0 }
  0xce   : > { %v449_v45 = vpop.f32.mrf.mxu2  ;;  %v1191_v46 = vld [vmem:[#allocation2 + $0x38] sm:$0xff] }
  0xcf   : > { %643 = vst [vmem:[#allocation2 + $0x49] sm:$0xff] %v3414_v39  ;;  %v507_v47 = vmul.f32 %v3347_v15, %v449_v45  ;;  %1262 = vmatmul.f32.gmra.mxu0 %v1191_v46  ;;  %802 = vmatmul.f32.gmra.mxu1 %v3414_v39  ;;  %v3917_v43 = vld [vmem:[#allocation2 + $0x3a] sm:$0xff] }
  0xd0   : > { %v404_v48 = vpop.f32.mrf.mxu0 }
  0xd1   : > { %v3420_v30 = vadd.f32 %v3351_v16, %v507_v47  ;;  %v492_v55 = vmul.f32 %v3347_v15, %v404_v48  ;;  %v2738_v48 = vld [vmem:[%s4741_s4 + $0x278] sm:$0xff] }
  0xd2   : > { %1431 = vmatpush.msrb.mxu1 %v2738_v48 }
  0xd3   : > { %v4746_v61 = vmax.f32 %v3420_v30, 0.0  ;;  %v525_v62 = vadd.f32 %v3351_v16, %v492_v55  ;;  %912 = vmatmul.f32.gmra.mxu2 %v1191_v46 }
  0xd5   : > { %659 = vst [vmem:[#allocation2 + $0x109] sm:$0xff] %v4746_v61  ;;  %v3427_v63 = vmax.f32 %v525_v62, 0.0  ;;  %v2728_v61 = vld [vmem:[%s4741_s4 + $0x228] sm:$0xff] }
  0xd6   : > { %v452_v0 = vpop.f32.mrf.mxu2  ;;  %v1192_v4 = vld [vmem:[#allocation2 + $0x48] sm:$0xff] }
  0xd7   : > { %644 = vst [vmem:[#allocation2 + $0x51] sm:$0xff] %v3427_v63  ;;  %v508_v11 = vmul.f32 %v3347_v15, %v452_v0  ;;  %1265 = vmatmul.f32.gmra.mxu0 %v1192_v4  ;;  %805 = vmatmul.f32.gmra.mxu1 %v3427_v63 }
  0xd8   : > { %v407_v17 = vpop.f32.mrf.mxu0 }
  0xd9   : > { %v3433_v18 = vadd.f32 %v3351_v16, %v508_v11  ;;  %v493_v19 = vmul.f32 %v3347_v15, %v407_v17 }
  0xdb   : > { %v4745_v22 = vmax.f32 %v3433_v18, 0.0  ;;  %v526_v27 = vadd.f32 %v3351_v16, %v493_v19  ;;  %915 = vmatmul.f32.gmra.mxu2 %v1192_v4  ;;  %v2737_v4 = vld [vmem:[%s4741_s4 + $0x270] sm:$0xff]  ;;  %v2736_v19 = vld [vmem:[%s4741_s4 + $0x268] sm:$0xff] }
  0xdc   : > { %1432 = vmatpush.msrb.mxu1 %v2737_v4  ;;  %v3911_v7 = vld [vmem:[#allocation2 + $0x109] sm:$0xff] }
  0xdd   : > { %660 = vst [vmem:[#allocation2 + $0x111] sm:$0xff] %v4745_v22  ;;  %v3440_v31 = vmax.f32 %v526_v27, 0.0 }
  0xde   : > { %v455_v45 = vpop.f32.mrf.mxu2  ;;  %v1193_v46 = vld [vmem:[#allocation2 + $0x50] sm:$0xff]  ;;  %1433 = vmatpush.msrb.mxu1 %v2736_v19 }
  0xdf   : > { %645 = vst [vmem:[#allocation2 + $0x61] sm:$0xff] %v3440_v31  ;;  %v509_v47 = vmul.f32 %v3347_v15, %v455_v45  ;;  %1268 = vmatmul.f32.gmra.mxu0 %v1193_v46  ;;  %808 = vmatmul.f32.gmra.mxu1 %v3440_v31  ;;  %v2735_v45 = vld [vmem:[%s4741_s4 + $0x260] sm:$0xff]  ;;  %v2733_v19 = vld [vmem:[%s4741_s4 + $0x250] sm:$0xff] }
  0xe0   : > { %v410_v55 = vpop.f32.mrf.mxu0  ;;  %1434 = vmatpush.msrb.mxu1 %v2735_v45  ;;  %v3933_v9 = vld [vmem:[#allocation2 + $0x4a] sm:$0xff]  ;;  %v3947_v57 = vld [vmem:[#allocation2 + $0x52] sm:$0xff] }
  0xe1   : > { %v3449_v62 = vadd.f32 %v3351_v16, %v509_v47  ;;  %v494_v0 = vmul.f32 %v3347_v15, %v410_v55  ;;  %v2734_v55 = vld [vmem:[%s4741_s4 + $0x258] sm:$0xff] }
  0xe2   : > { %1435 = vmatpush.msrb.mxu1 %v2734_v55  ;;  %v2731_v55 = vld [vmem:[%s4741_s4 + $0x240] sm:$0xff] }
  0xe3   : > { %v4743_v11 = vmax.f32 %v3449_v62, 0.0  ;;  %v527_v17 = vadd.f32 %v3351_v16, %v494_v0  ;;  %918 = vmatmul.f32.gmra.mxu2 %v1193_v46 }
  0xe4   : > { %1436 = vmatpush.msrb.mxu1 %v2733_v19  ;;  %v3925_v35 = vld [vmem:[#allocation2 + $0x111] sm:$0xff] }
  0xe5   : > { %661 = vst [vmem:[#allocation2 + $0x121] sm:$0xff] %v4743_v11  ;;  %v3462_v27 = vmax.f32 %v527_v17, 0.0  ;;  %v2732_v11 = vld [vmem:[%s4741_s4 + $0x248] sm:$0xff] }
  0xe6   : > { %v458_v47 = vpop.f32.mrf.mxu2  ;;  %v1194_v48 = vld [vmem:[#allocation2 + $0x60] sm:$0xff]  ;;  %1437 = vmatpush.msrb.mxu1 %v2732_v11  ;;  %v2730_v11 = vld [vmem:[%s4741_s4 + $0x238] sm:$0xff] }
  0xe7   : > { %646 = vst [vmem:[#allocation2 + $0x69] sm:$0xff] %v3462_v27  ;;  %v510_v46 = vmul.f32 %v3347_v15, %v458_v47  ;;  %1271 = vmatmul.f32.gmra.mxu0 %v1194_v48  ;;  %811 = vmatmul.f32.gmra.mxu1 %v3462_v27 }
  0xe8   : > { %v413_v0 = vpop.f32.mrf.mxu0  ;;  %1438 = vmatpush.msrb.mxu1 %v2731_v55  ;;  %v2729_v55 = vld [vmem:[%s4741_s4 + $0x230] sm:$0xff] }
  0xe9   : > { %v3474_v4 = vadd.f32 %v3351_v16, %v510_v46  ;;  %v495_v17 = vmul.f32 %v3347_v15, %v413_v0 }
  0xea   : > { %1439 = vmatpush.msrb.mxu1 %v2730_v11  ;;  %v2727_v11 = vld [vmem:[%s4741_s4 + $0x220] sm:$0xff] }
  0xeb   : > { %v4744_v45 = vmax.f32 %v3474_v4, 0.0  ;;  %v528_v47 = vadd.f32 %v3351_v16, %v495_v17  ;;  %921 = vmatmul.f32.gmra.mxu2 %v1194_v48 }
  0xec   : > { %1440 = vmatpush.msrb.mxu1 %v2729_v55  ;;  %v3941_v41 = vld [vmem:[#allocation2 + $0x121] sm:$0xff] }
  0xed   : > { %662 = vst [vmem:[#allocation2 + $0x129] sm:$0xff] %v4744_v45  ;;  %v3487_v46 = vmax.f32 %v528_v47, 0.0 }
  0xee   : > { %v461_v0 = vpop.f32.mrf.mxu2  ;;  %v1195_v19 = vld [vmem:[#allocation2 + $0x68] sm:$0xff]  ;;  %1441 = vmatpush.msrb.mxu1 %v2728_v61  ;;  %v2726_v61 = vld [vmem:[%s4741_s4 + $0x218] sm:$0xff] }
  0xef   : > { %647 = vst [vmem:[#allocation2 + $0x79] sm:$0xff] %v3487_v46  ;;  %v511_v48 = vmul.f32 %v3347_v15, %v461_v0  ;;  %1274 = vmatmul.f32.gmra.mxu0 %v1195_v19  ;;  %814 = vmatmul.f32.gmra.mxu1 %v3487_v46 }
  0xf0   : > { %v416_v17 = vpop.f32.mrf.mxu0  ;;  %1442 = vmatpush.msrb.mxu1 %v2727_v11  ;;  %v2725_v11 = vld [vmem:[%s4741_s4 + $0x210] sm:$0xff] }
  0xf1   : > { %v3499_v47 = vadd.f32 %v3351_v16, %v511_v48  ;;  %v496_v45 = vmul.f32 %v3347_v15, %v416_v17 }
  0xf2   : > { %1443 = vmatpush.msrb.mxu1 %v2726_v61  ;;  %v2723_v61 = vld [vmem:[%s4741_s4 + $0x200] sm:$0xff] }
  0xf3   : > { %v4747_v0 = vmax.f32 %v3499_v47, 0.0  ;;  %v529_v22 = vadd.f32 %v3351_v16, %v496_v45  ;;  %924 = vmatmul.f32.gmra.mxu2 %v1195_v19 }
  0xf4   : > { %1444 = vmatpush.msrb.mxu1 %v2725_v11 }
  0xf5   : > { %663 = vst [vmem:[#allocation2 + $0x139] sm:$0xff] %v4747_v0  ;;  %v3512_v48 = vmax.f32 %v529_v22, 0.0 }
  0xf6   : > { %v464_v17 = vpop.f32.mrf.mxu2  ;;  %v1196_v55 = vld [vmem:[#allocation2 + $0x78] sm:$0xff]  ;;  %1445 = vmatpush.msrb.mxu1 %v2724_v5 }
  0xf7   : > { %648 = vst [vmem:[#allocation2 + $0x81] sm:$0xff] %v3512_v48  ;;  %v512_v45 = vmul.f32 %v3347_v15, %v464_v17  ;;  %1277 = vmatmul.f32.gmra.mxu0 %v1196_v55  ;;  %817 = vmatmul.f32.gmra.mxu1 %v3512_v48 }
  0xf8   : > { %v419_v22 = vpop.f32.mrf.mxu0  ;;  %1446 = vmatpush.msrb.mxu1 %v2723_v61 }
  0xf9   : > { %v3524_v19 = vadd.f32 %v3351_v16, %v512_v45  ;;  %v497_v0 = vmul.f32 %v3347_v15, %v419_v22 }
  0xfb   : > { %v4750_v17 = vmax.f32 %v3524_v19, 0.0  ;;  %v530_v28 = vadd.f32 %v3351_v16, %v497_v0  ;;  %927 = vmatmul.f32.gmra.mxu2 %v1196_v55 }
  0xfd   : > { %664 = vst [vmem:[#allocation2 + $0x141] sm:$0xff] %v4750_v17  ;;  %v3537_v45 = vmax.f32 %v530_v28, 0.0 }
  0xfe   : > { %v467_v22 = vpop.f32.mrf.mxu2  ;;  %v1197_v11 = vld [vmem:[#allocation2 + $0x80] sm:$0xff] }
  0xff   : > { %649 = vst [vmem:[#allocation2 + $0x91] sm:$0xff] %v3537_v45  ;;  %v513_v0 = vmul.f32 %v3347_v15, %v467_v22  ;;  %1280 = vmatmul.f32.gmra.mxu0 %v1197_v11  ;;  %820 = vmatmul.f32.gmra.mxu1 %v3537_v45 }
 0x100   : > { %v422_v5 = vpop.f32.mrf.mxu0 }
 0x101   : > { %v3546_v55 = vadd.f32 %v3351_v16, %v513_v0  ;;  %v498_v28 = vmul.f32 %v3347_v15, %v422_v5 }
 0x103   : > { %v4754_v17 = vmax.f32 %v3546_v55, 0.0  ;;  %v531_v54 = vadd.f32 %v3351_v16, %v498_v28  ;;  %930 = vmatmul.f32.gmra.mxu2 %v1197_v11 }
 0x105   : > { %665 = vst [vmem:[#allocation2 + $0x151] sm:$0xff] %v4754_v17  ;;  %v3553_v61 = vmax.f32 %v531_v54, 0.0 }
 0x106   : > { %v470_v22 = vpop.f32.mrf.mxu2  ;;  %v1198_v32 = vld [vmem:[#allocation2 + $0x90] sm:$0xff] }
 0x107   : > { %650 = vst [vmem:[#allocation2 + $0x99] sm:$0xff] %v3553_v61  ;;  %v514_v60 = vmul.f32 %v3347_v15, %v470_v22  ;;  %1283 = vmatmul.f32.gmra.mxu0 %v1198_v32  ;;  %823 = vmatmul.f32.gmra.mxu1 %v3553_v61  ;;  %v2706_v22 = vld [vmem:[%s4741_s4 + $0x178] sm:$0xff] }
 0x108   : > { %v425_v0 = vpop.f32.mrf.mxu0  ;;  %1043 = vmatpush.msrb.mxu3 %v2706_v22 }
 0x109   : > { %v3559_v5 = vadd.f32 %v3351_v16, %v514_v60  ;;  %v499_v11 = vmul.f32 %v3347_v15, %v425_v0 }
 0x10b   : > { %v4757_v28 = vmax.f32 %v3559_v5, 0.0  ;;  %v532_v54 = vadd.f32 %v3351_v16, %v499_v11  ;;  %933 = vmatmul.f32.gmra.mxu2 %v1198_v32  ;;  %v2705_v32 = vld [vmem:[%s4741_s4 + $0x170] sm:$0xff] }
 0x10c   : > { %1044 = vmatpush.msrb.mxu3 %v2705_v32 }
 0x10d   : > { %666 = vst [vmem:[#allocation2 + $0x159] sm:$0xff] %v4757_v28  ;;  %v3566_v17 = vmax.f32 %v532_v54, 0.0 }
 0x10e   : > { %v473_v38 = vpop.f32.mrf.mxu2  ;;  %v1199_v44 = vld [vmem:[#allocation2 + $0x98] sm:$0xff] }
 0x10f   : > { %651 = vst [vmem:[#allocation2 + $0xa9] sm:$0xff] %v3566_v17  ;;  %v515_v60 = vmul.f32 %v3347_v15, %v473_v38  ;;  %1286 = vmatmul.f32.gmra.mxu0 %v1199_v44  ;;  %826 = vmatmul.f32.gmra.mxu1 %v3566_v17 }
 0x110   : > { %v428_v0 = vpop.f32.mrf.mxu0 }
 0x111   : > { %v3578_v11 = vadd.f32 %v3351_v16, %v515_v60  ;;  %v500_v54 = vmul.f32 %v3347_v15, %v428_v0  ;;  %v2704_v60 = vld [vmem:[%s4741_s4 + $0x168] sm:$0xff] }
 0x112   : > { %1045 = vmatpush.msrb.mxu3 %v2704_v60 }
 0x113   : > { %v4760_v22 = vmax.f32 %v3578_v11, 0.0  ;;  %v533_v28 = vadd.f32 %v3351_v16, %v500_v54  ;;  %936 = vmatmul.f32.gmra.mxu2 %v1199_v44  ;;  %v3593_v44 = vpop.f32.mrf.mxu1 }
 0x115   : > { %667 = vst [vmem:[#allocation2 + $0x169] sm:$0xff] %v4760_v22  ;;  %v3585_v38 = vmax.f32 %v533_v28, 0.0 }
 0x116   : > { %v476_v12 = vpop.f32.mrf.mxu2  ;;  %v1200_v8 = vld [vmem:[#allocation2 + $0xa8] sm:$0xff] }
 0x117   : > { %652 = vst [vmem:[#allocation2 + $0xb1] sm:$0xff] %v3585_v38  ;;  %v516_v32 = vmul.f32 %v3347_v15, %v476_v12  ;;  %1289 = vmatmul.f32.gmra.mxu0 %v1200_v8  ;;  %829 = vmatmul.f32.gmra.mxu1 %v3585_v38 }
 0x118   : > { %v431_v0 = vpop.f32.mrf.mxu0 }
 0x119   : > { %v3596_v28 = vadd.f32 %v3351_v16, %v516_v32  ;;  %v501_v54 = vmul.f32 %v3347_v15, %v431_v0  ;;  %v2703_v32 = vld [vmem:[%s4741_s4 + $0x160] sm:$0xff] }
 0x11a   : > { %1046 = vmatpush.msrb.mxu3 %v2703_v32 }
 0x11b   : > { %v4764_v22 = vmax.f32 %v3596_v28, 0.0  ;;  %v534_v12 = vadd.f32 %v3351_v16, %v501_v54  ;;  %939 = vmatmul.f32.gmra.mxu2 %v1200_v8 }
 0x11d   : > { %668 = vst [vmem:[#allocation2 + $0x171] sm:$0xff] %v4764_v22  ;;  %v3603_v36 = vmax.f32 %v534_v12, 0.0  ;;  %v788_v12 = vpop.f32.mrf.mxu1 }
 0x11e   : > { %v479_v21 = vpop.f32.mrf.mxu2  ;;  %v1201_v53 = vld [vmem:[#allocation2 + $0xb0] sm:$0xff] }
 0x11f   : > { %653 = vst [vmem:[#allocation2 + $0xc1] sm:$0xff] %v3603_v36  ;;  %v517_v60 = vmul.f32 %v3347_v15, %v479_v21  ;;  %1292 = vmatmul.f32.gmra.mxu0 %v1201_v53  ;;  %832 = vmatmul.f32.vlgmr.msra.gmra.mxu3 %v3603_v36 }
 0x120   : > { %v434_v0 = vpop.f32.mrf.mxu0  ;;  %1447 = vmatmul.f32.vlgmr.msrb.gmra.mxu1 %v3361_v25  ;;  %v2702_v25 = vld [vmem:[%s4741_s4 + $0x158] sm:$0xff] }
 0x121   : > { %v550_v8 = vadd.f32 %v3351_v16, %v517_v60  ;;  %v502_v54 = vmul.f32 %v3347_v15, %v434_v0  ;;  %1047 = vmatpush.msrb.mxu3 %v2702_v25 }
 0x123   : > { %v582_v22 = vmax.f32 %v550_v8, 0.0  ;;  %v535_v2 = vadd.f32 %v3351_v16, %v502_v54  ;;  %942 = vmatmul.f32.gmra.mxu2 %v1201_v53  ;;  %v4825_v8 = vmax.f32 %v3381_v51, 0.0  ;;  %v2699_v51 = vld [vmem:[%s4741_s4 + $0x140] sm:$0xff] }
 0x125   : > { %669 = vst [vmem:[#allocation2 + $0x181] sm:$0xff] %v582_v22  ;;  %v3615_v21 = vmax.f32 %v535_v2, 0.0 }
 0x126   : > { %v482_v58 = vpop.f32.mrf.mxu2  ;;  %v1202_v10 = vld [vmem:[#allocation2 + $0xc0] sm:$0xff] }
 0x127   : > { %654 = vst [vmem:[#allocation2 + $0xc9] sm:$0xff] %v3615_v21  ;;  %v518_v42 = vmul.f32 %v3347_v15, %v482_v58  ;;  %1295 = vmatmul.f32.gmra.mxu0 %v1202_v10  ;;  %835 = vmatmul.f32.gmra.mxu3 %v3615_v21  ;;  %v4824_v58 = vmax.f32 %v3367_v29, 0.0  ;;  %v2701_v15 = vld [vmem:[%s4741_s4 + $0x150] sm:$0xff]  ;;  %v2700_v29 = vld [vmem:[%s4741_s4 + $0x148] sm:$0xff] }
 0x128   : > { %1450 = vmatmul.f32.gmra.mxu1 %v3375_v40  ;;  %1048 = vmatpush.msrb.mxu3 %v2701_v15 }
 0x129   : > { %v551_v53 = vadd.f32 %v3351_v16, %v518_v42 }
 0x12a   : > { %1049 = vmatpush.msrb.mxu3 %v2700_v29  ;;  %v1207_v29 = vld [vmem:[#allocation2 + $0xf8] sm:$0xff] }
 0x12b   : > { %v583_v2 = vmax.f32 %v551_v53, 0.0  ;;  %945 = vmatmul.f32.gmra.mxu2 %v1202_v10  ;;  %v1204_v10 = vld [vmem:[#allocation2 + $0xd8] sm:$0xff]  ;;  %v1205_v53 = vld [vmem:[#allocation2 + $0xe0] sm:$0xff] }
 0x12c   : > { %v791_v22 = vpop.f32.mrf.mxu1  ;;  %1050 = vmatpush.msrb.mxu3 %v2699_v51 }
 0x12d   : > { %670 = vst [vmem:[#allocation2 + $0x189] sm:$0xff] %v583_v2 }
 0x12e   : > { %v3625_v60 = vpop.f32.mrf.mxu2  ;;  %v1203_v32 = vld [vmem:[#allocation2 + $0xc8] sm:$0xff] }
 0x12f   : > { %1298 = vmatmul.f32.gmra.mxu0 %v1203_v32  ;;  %838 = vmatmul.f32.gmra.mxu3 %v4824_v58 }
 0x130   : > { %1453 = vmatmul.f32.gmra.mxu1 %v3388_v56 }
 0x133   : > { %948 = vmatmul.f32.gmra.mxu2 %v1203_v32  ;;  %v1206_v32 = vld [vmem:[#allocation2 + $0xf0] sm:$0xff] }
 0x134   : > { %v3633_v42 = vpop.f32.mrf.mxu0  ;;  %v794_v16 = vpop.f32.mrf.mxu1 }
 0x136   : > { %v901_v40 = vpop.f32.mrf.mxu2 }
 0x137   : > { %v3635_v0 = vadd.f32 %v901_v40, %v788_v12  ;;  %1301 = vmatmul.f32.gmra.mxu0 %v1204_v10  ;;  %841 = vmatmul.f32.gmra.mxu3 %v4825_v8  ;;  %v4826_v12 = vmax.f32 %v3394_v3, 0.0  ;;  %v2698_v3 = vld [vmem:[%s4741_s4 + $0x138] sm:$0xff] }
 0x138   : > { %1456 = vmatmul.f32.gmra.mxu1 %v3401_v14  ;;  %1051 = vmatpush.msrb.mxu3 %v2698_v3 }
 0x13b   : > { %951 = vmatmul.f32.gmra.mxu2 %v1204_v10 }
 0x13c   : > { %v3643_v56 = vpop.f32.mrf.mxu0  ;;  %v797_v54 = vpop.f32.mrf.mxu1 }
 0x13e   : > { %v904_v25 = vpop.f32.mrf.mxu2 }
 0x13f   : > { %v3645_v2 = vadd.f32 %v904_v25, %v791_v22  ;;  %1304 = vmatmul.f32.gmra.mxu0 %v1205_v53  ;;  %844 = vmatmul.f32.gmra.mxu3 %v4826_v12  ;;  %v4827_v22 = vmax.f32 %v3407_v26, 0.0  ;;  %v2697_v26 = vld [vmem:[%s4741_s4 + $0x130] sm:$0xff] }
 0x140   : > { %1459 = vmatmul.f32.gmra.mxu1 %v3414_v39  ;;  %1052 = vmatpush.msrb.mxu3 %v2697_v26 }
 0x143   : > { %954 = vmatmul.f32.gmra.mxu2 %v1205_v53 }
 0x144   : > { %v3653_v14 = vpop.f32.mrf.mxu0  ;;  %v800_v58 = vpop.f32.mrf.mxu1 }
 0x146   : > { %v907_v15 = vpop.f32.mrf.mxu2 }
 0x147   : > { %v3655_v10 = vadd.f32 %v907_v15, %v794_v16  ;;  %1307 = vmatmul.f32.gmra.mxu0 %v1206_v32  ;;  %847 = vmatmul.f32.gmra.mxu3 %v4827_v22  ;;  %v4828_v16 = vmax.f32 %v3420_v30, 0.0  ;;  %v2696_v30 = vld [vmem:[%s4741_s4 + $0x128] sm:$0xff]  ;;  %v1209_v22 = vld [vmem:[#allocation2 + $0x110] sm:$0xff] }
 0x148   : > { %1462 = vmatmul.f32.gmra.mxu1 %v3427_v63  ;;  %v1208_v63 = vld [vmem:[#allocation2 + $0x108] sm:$0xff]  ;;  %1053 = vmatpush.msrb.mxu3 %v2696_v30 }
 0x14b   : > { %957 = vmatmul.f32.gmra.mxu2 %v1206_v32 }
 0x14c   : > { %v3663_v39 = vpop.f32.mrf.mxu0  ;;  %v803_v40 = vpop.f32.mrf.mxu1 }
 0x14e   : > { %v910_v8 = vpop.f32.mrf.mxu2 }
 0x14f   : > { %v3665_v25 = vadd.f32 %v910_v8, %v797_v54  ;;  %1310 = vmatmul.f32.gmra.mxu0 %v1207_v29  ;;  %850 = vmatmul.f32.gmra.mxu3 %v4828_v16  ;;  %v4829_v54 = vmax.f32 %v3433_v18, 0.0  ;;  %v2695_v18 = vld [vmem:[%s4741_s4 + $0x120] sm:$0xff] }
 0x150   : > { %1465 = vmatmul.f32.gmra.mxu1 %v3440_v31  ;;  %1054 = vmatpush.msrb.mxu3 %v2695_v18 }
 0x153   : > { %960 = vmatmul.f32.gmra.mxu2 %v1207_v29 }
 0x154   : > { %v806_v53 = vpop.f32.mrf.mxu1  ;;  %v3673_v12 = vpop.f32.mrf.mxu0 }
 0x156   : > { %v913_v51 = vpop.f32.mrf.mxu2 }
 0x157   : > { %v3675_v32 = vadd.f32 %v913_v51, %v800_v58  ;;  %1313 = vmatmul.f32.gmra.mxu0 %v1208_v63  ;;  %853 = vmatmul.f32.gmra.mxu3 %v4829_v54  ;;  %v4830_v58 = vmax.f32 %v3449_v62, 0.0  ;;  %v2694_v62 = vld [vmem:[%s4741_s4 + $0x118] sm:$0xff]  ;;  %v1211_v54 = vld [vmem:[#allocation2 + $0x128] sm:$0xff] }
 0x158   : > { %1468 = vmatmul.f32.gmra.mxu1 %v3462_v27  ;;  %v1210_v27 = vld [vmem:[#allocation2 + $0x120] sm:$0xff]  ;;  %1055 = vmatpush.msrb.mxu3 %v2694_v62  ;;  %v4833_v62 = vmax.f32 %v3524_v19, 0.0  ;;  %v2785_v19 = vld [vmem:[%s4741_s4 + $0x3f0] sm:$0xff] }
 0x15b   : > { %963 = vmatmul.f32.gmra.mxu2 %v1208_v63 }
 0x15c   : > { %v809_v31 = vpop.f32.mrf.mxu1  ;;  %v3683_v3 = vpop.f32.mrf.mxu0 }
 0x15e   : > { %v916_v15 = vpop.f32.mrf.mxu2 }
 0x15f   : > { %v3685_v8 = vadd.f32 %v916_v15, %v803_v40  ;;  %1316 = vmatmul.f32.gmra.mxu0 %v1209_v22  ;;  %856 = vmatmul.f32.gmra.mxu3 %v4830_v58  ;;  %v4831_v40 = vmax.f32 %v3474_v4, 0.0  ;;  %v2753_v4 = vld [vmem:[%s4741_s4 + $0x2f0] sm:$0xff] }
 0x160   : > { %1471 = vmatmul.f32.gmra.mxu1 %v3487_v46  ;;  %v2693_v15 = vld [vmem:[%s4741_s4 + $0x110] sm:$0xff] }
 0x161   : > { %1056 = vmatpush.msrb.mxu3 %v2693_v15 }
 0x163   : > { %966 = vmatmul.f32.gmra.mxu2 %v1209_v22  ;;  %v2752_v22 = vld [vmem:[%s4741_s4 + $0x2e8] sm:$0xff] }
 0x164   : > { %v812_v29 = vpop.f32.mrf.mxu1  ;;  %v3701_v63 = vpop.f32.mrf.mxu0 }
 0x166   : > { %v919_v16 = vpop.f32.mrf.mxu2 }
 0x167   : > { %v3693_v26 = vadd.f32 %v919_v16, %v806_v53  ;;  %1319 = vmatmul.f32.gmra.mxu0 %v1210_v27  ;;  %859 = vmatmul.f32.gmra.mxu3 %v4831_v40  ;;  %v2754_v53 = vld [vmem:[%s4741_s4 + $0x2f8] sm:$0xff] }
 0x168   : > { %1474 = vmatmul.f32.gmra.mxu1 %v3512_v48  ;;  %1625 = vmatpush.msra.mxu2 %v2754_v53  ;;  %v4832_v48 = vmax.f32 %v3499_v47, 0.0  ;;  %v1212_v47 = vld [vmem:[#allocation2 + $0x138] sm:$0xff]  ;;  %v2692_v53 = vld [vmem:[%s4741_s4 + $0x108] sm:$0xff] }
 0x169   : > { %1057 = vmatpush.msrb.mxu3 %v2692_v53  ;;  %v2744_v53 = vld [vmem:[%s4741_s4 + $0x2a8] sm:$0xff] }
 0x16a   : > { %1626 = vmatpush.msra.mxu2 %v2753_v4 }
 0x16b   : > { %969 = vmatmul.f32.gmra.mxu2 %v1210_v27  ;;  %v2750_v27 = vld [vmem:[%s4741_s4 + $0x2d8] sm:$0xff] }
 0x16c   : > { %v815_v46 = vpop.f32.mrf.mxu1  ;;  %1627 = vmatpush.msra.mxu2 %v2752_v22  ;;  %v3723_v58 = vpop.f32.mrf.mxu0  ;;  %v1213_v22 = vld [vmem:[#allocation2 + $0x140] sm:$0xff] }
 0x16e   : > { %v922_v51 = vpop.f32.mrf.mxu2 }
 0x16f   : > { %v3709_v30 = vadd.f32 %v922_v51, %v809_v31  ;;  %1322 = vmatmul.f32.gmra.mxu0 %v1211_v54  ;;  %862 = vmatmul.f32.gmra.mxu3 %v4832_v48  ;;  %v2751_v31 = vld [vmem:[%s4741_s4 + $0x2e0] sm:$0xff]  ;;  %v2748_v51 = vld [vmem:[%s4741_s4 + $0x2c8] sm:$0xff] }
 0x170   : > { %1477 = vmatmul.f32.gmra.mxu1 %v3537_v45  ;;  %1628 = vmatpush.msra.mxu2 %v2751_v31  ;;  %v2749_v45 = vld [vmem:[%s4741_s4 + $0x2d0] sm:$0xff]  ;;  %v2784_v48 = vld [vmem:[%s4741_s4 + $0x3e8] sm:$0xff] }
 0x172   : > { %1629 = vmatpush.msra.mxu2 %v2750_v27  ;;  %v2783_v27 = vld [vmem:[%s4741_s4 + $0x3e0] sm:$0xff] }
 0x173   : > { %972 = vmatmul.f32.gmra.mxu2 %v1211_v54  ;;  %v2747_v54 = vld [vmem:[%s4741_s4 + $0x2c0] sm:$0xff] }
 0x174   : > { %v818_v18 = vpop.f32.mrf.mxu1  ;;  %1630 = vmatpush.msra.mxu2 %v2749_v45  ;;  %v3757_v15 = vpop.f32.mrf.mxu0 }
 0x175   : > { %4834 = vst [vmem:[#allocation34_spill] sm:$0xff] %v3757_v15  ;;  %v3987_v15 = vld [vmem:[#allocation2 + $0x141] sm:$0xff] }
 0x176   : > { %v925_v16 = vpop.f32.mrf.mxu2  ;;  %1631 = vmatpush.msra.mxu2 %v2748_v51  ;;  %v2782_v51 = vld [vmem:[%s4741_s4 + $0x3d8] sm:$0xff] }
 0x177   : > { %v3731_v40 = vadd.f32 %v925_v16, %v812_v29  ;;  %1325 = vmatmul.f32.gmra.mxu0 %v1212_v47  ;;  %865 = vmatmul.f32.gmra.mxu3 %v4833_v62  ;;  %v2786_v29 = vld [vmem:[%s4741_s4 + $0x3f8] sm:$0xff]  ;;  %v2691_v16 = vld [vmem:[%s4741_s4 + $0x100] sm:$0xff]  ;;  %v4835_v62 = vmax.f32 %v3546_v55, 0.0  ;;  %v2781_v55 = vld [vmem:[%s4741_s4 + $0x3d0] sm:$0xff] }
 0x178   : > { %1480 = vmatmul.f32.gmra.mxu1 %v3553_v61  ;;  %2014 = vmatpush.msra.mxu0 %v2786_v29  ;;  %v2746_v61 = vld [vmem:[%s4741_s4 + $0x2b8] sm:$0xff]  ;;  %v1214_v29 = vld [vmem:[#allocation2 + $0x150] sm:$0xff] }
 0x179   : > { %1632 = vmatpush.msra.mxu2 %v2747_v54  ;;  %1058 = vmatpush.msrb.mxu3 %v2691_v16  ;;  %v2780_v54 = vld [vmem:[%s4741_s4 + $0x3c8] sm:$0xff]  ;;  %v2770_v16 = vld [vmem:[%s4741_s4 + $0x378] sm:$0xff] }
 0x17a   : > { %2015 = vmatpush.msra.mxu0 %v2785_v19  ;;  %v2742_v19 = vld [vmem:[%s4741_s4 + $0x298] sm:$0xff] }
 0x17b   : > { %975 = vmatmul.f32.gmra.mxu2 %v1212_v47  ;;  %v2745_v47 = vld [vmem:[%s4741_s4 + $0x2b0] sm:$0xff]  ;;  %1820 = vmatpush.msra.mxu3 %v2770_v16 }
 0x17c   : > { %v821_v4 = vpop.f32.mrf.mxu1  ;;  %2016 = vmatpush.msra.mxu0 %v2784_v48  ;;  %1633 = vmatpush.msra.mxu2 %v2746_v61  ;;  %v2741_v48 = vld [vmem:[%s4741_s4 + $0x290] sm:$0xff] }
 0x17e   : > { %v928_v31 = vpop.f32.mrf.mxu2  ;;  %1634 = vmatpush.msra.mxu2 %v2745_v47  ;;  %2017 = vmatpush.msra.mxu0 %v2783_v27  ;;  %v4838_v47 = vmax.f32 %v3559_v5, 0.0  ;;  %v2779_v27 = vld [vmem:[%s4741_s4 + $0x3c0] sm:$0xff]  ;;  %v2778_v5 = vld [vmem:[%s4741_s4 + $0x3b8] sm:$0xff] }
 0x17f   : > { %v3768_v45 = vadd.f32 %v928_v31, %v815_v46  ;;  %1328 = vmatmul.f32.gmra.mxu0 %v1213_v22  ;;  %868 = vmatmul.f32.gmra.mxu3 %v4835_v62  ;;  %v2743_v46 = vld [vmem:[%s4741_s4 + $0x2a0] sm:$0xff] }
 0x180   : > { %1483 = vmatmul.f32.gmra.mxu1 %v3566_v17  ;;  %1635 = vmatpush.msra.mxu2 %v2744_v53  ;;  %v2739_v62 = vld [vmem:[%s4741_s4 + $0x280] sm:$0xff] }
 0x181   : > { %2018 = vmatpush.msra.mxu0 %v2782_v51  ;;  %v2776_v51 = vld [vmem:[%s4741_s4 + $0x3a8] sm:$0xff] }
 0x182   : > { %1636 = vmatpush.msra.mxu2 %v2743_v46 }
 0x183   : > { %978 = vmatmul.f32.gmra.mxu2 %v1213_v22  ;;  %2019 = vmatpush.msra.mxu0 %v2781_v55  ;;  %v3794_v22 = vpop.f32.mrf.mxu0  ;;  %v1215_v55 = vld [vmem:[#allocation2 + $0x158] sm:$0xff] }
 0x184   : > { %v824_v17 = vpop.f32.mrf.mxu1  ;;  %1637 = vmatpush.msra.mxu2 %v2742_v19  ;;  %4836 = vst [vmem:[#allocation35_spill] sm:$0xff] %v3794_v22  ;;  %v4840_v19 = vmax.f32 %v3578_v11, 0.0  ;;  %v2773_v11 = vld [vmem:[%s4741_s4 + $0x390] sm:$0xff] }
 0x185   : > { %2020 = vmatpush.msra.mxu0 %v2780_v54  ;;  %v2775_v54 = vld [vmem:[%s4741_s4 + $0x3a0] sm:$0xff] }
 0x186   : > { %v931_v61 = vpop.f32.mrf.mxu2  ;;  %1638 = vmatpush.msra.mxu2 %v2741_v48 }
 0x187   : > { %v3796_v31 = vadd.f32 %v931_v61, %v818_v18  ;;  %1331 = vmatmul.f32.gmra.mxu0 %v1214_v29  ;;  %871 = vmatmul.f32.gmra.mxu3 %v4838_v47  ;;  %v2740_v18 = vld [vmem:[%s4741_s4 + $0x288] sm:$0xff]  ;;  %v2802_v61 = vld [vmem:[%s4741_s4 + $0x478] sm:$0xff] }
 0x188   : > { %1486 = vmatmul.f32.gmra.mxu1 %v3585_v38  ;;  %2021 = vmatpush.msra.mxu0 %v2779_v27  ;;  %v2777_v38 = vld [vmem:[%s4741_s4 + $0x3b0] sm:$0xff]  ;;  %v1216_v47 = vld [vmem:[#allocation2 + $0x168] sm:$0xff] }
 0x189   : > { %4837 = vst [vmem:[#allocation36_spill] sm:$0xff] %v3796_v31  ;;  %1639 = vmatpush.msra.mxu2 %v2740_v18  ;;  %2208 = vmatpush.msra.mxu1 %v2802_v61 }
 0x18a   : > { %2022 = vmatpush.msra.mxu0 %v2778_v5  ;;  %v4843_v5 = vmax.f32 %v3596_v28, 0.0 }
 0x18b   : > { %981 = vmatmul.f32.gmra.mxu2 %v1214_v29  ;;  %v3833_v48 = vpop.f32.mrf.mxu0 }
 0x18c   : > { %v827_v53 = vpop.f32.mrf.mxu1  ;;  %1640 = vmatpush.msra.mxu2 %v2739_v62  ;;  %2023 = vmatpush.msra.mxu0 %v2777_v38  ;;  %4841 = vst [vmem:[#allocation38_spill] sm:$0xff] %v3833_v48  ;;  %v2771_v62 = vld [vmem:[%s4741_s4 + $0x380] sm:$0xff]  ;;  %v2769_v38 = vld [vmem:[%s4741_s4 + $0x370] sm:$0xff] }
 0x18d   : > { %1821 = vmatpush.msra.mxu3 %v2769_v38  ;;  %v1576_v38 = vld [vmem:[#allocation2 + $0x1a] sm:$0xff] }
 0x18e   : > { %v934_v46 = vpop.f32.mrf.mxu2  ;;  %2024 = vmatpush.msra.mxu0 %v2776_v51 }
 0x18f   : > { %v3822_v29 = vadd.f32 %v934_v46, %v821_v4  ;;  %1334 = vmatmul.f32.gmra.mxu0 %v1215_v55  ;;  %874 = vmatmul.f32.gmra.mxu3 %v4840_v19  ;;  %v2774_v4 = vld [vmem:[%s4741_s4 + $0x398] sm:$0xff] }
 0x190   : > { %1489 = vmatmul.f32.gmra.mxu1 %v3603_v36  ;;  %2025 = vmatpush.msra.mxu0 %v2775_v54  ;;  %v2772_v36 = vld [vmem:[%s4741_s4 + $0x388] sm:$0xff]  ;;  %v3861_v54 = vld [vmem:[#allocation2 + $0xd9] sm:$0xff] }
 0x191   : > { %4839 = vst [vmem:[#allocation37_spill] sm:$0xff] %v3822_v29 }
 0x192   : > { %2026 = vmatpush.msra.mxu0 %v2774_v4  ;;  %v1218_v4 = vld [vmem:[#allocation2 + $0x180] sm:$0xff] }
 0x193   : > { %984 = vmatmul.f32.gmra.mxu2 %v1215_v55  ;;  %v3855_v51 = vpop.f32.mrf.mxu0  ;;  %v1217_v55 = vld [vmem:[#allocation2 + $0x170] sm:$0xff] }
 0x194   : > { %v830_v27 = vpop.f32.mrf.mxu1  ;;  %2027 = vmatpush.msra.mxu0 %v2773_v11  ;;  %4844 = vst [vmem:[#allocation40_spill] sm:$0xff] %v3855_v51  ;;  %v995_v11 = vld [vmem:[#allocation2 + $0xa] sm:$0xff] }
 0x195   : > { %v3979_v51 = vld [vmem:[#allocation2 + $0x6a] sm:$0xff] }
 0x196   : > { %v937_v16 = vpop.f32.mrf.mxu2  ;;  %2028 = vmatpush.msra.mxu0 %v2772_v36 }
 0x197   : > { %v3844_v18 = vadd.f32 %v937_v16, %v824_v17  ;;  %1337 = vmatmul.f32.gmra.mxu0 %v1216_v47  ;;  %877 = vmatmul.f32.gmra.mxu3 %v4843_v5  ;;  %v994_v17 = vld [vmem:[#allocation2 + $0x2] sm:$0xff] }
 0x198   : > { %1492 = vmatmul.f32.gmra.mxu1 %v3615_v21  ;;  %2029 = vmatpush.msra.mxu0 %v2771_v62  ;;  %v2801_v21 = vld [vmem:[%s4741_s4 + $0x470] sm:$0xff]  ;;  %v3873_v5 = vld [vmem:[#allocation2 + $0xe1] sm:$0xff] }
 0x199   : > { %4842 = vst [vmem:[#allocation39_spill] sm:$0xff] %v3844_v18  ;;  %2209 = vmatpush.msra.mxu1 %v2801_v21  ;;  %v2768_v62 = vld [vmem:[%s4741_s4 + $0x368] sm:$0xff] }
 0x19a   : > { %1822 = vmatpush.msra.mxu3 %v2768_v62  ;;  %v1577_v62 = vld [vmem:[#allocation2 + $0x22] sm:$0xff] }
 0x19b   : > { %987 = vmatmul.f32.gmra.mxu2 %v1216_v47  ;;  %v3867_v47 = vpop.f32.mrf.mxu0 }
 0x19c   : > { %4846 = vst [vmem:[#allocation42_spill] sm:$0xff] %v3867_v47 }
 0x19d   : > { %v3857_v46 = vpop.f32.mrf.mxu1 }
 0x19e   : > { %v940_v28 = vpop.f32.mrf.mxu2 }
 0x19f   : > { %v3859_v19 = vadd.f32 %v940_v28, %v827_v53  ;;  %1340 = vmatmul.f32.gmra.mxu0 %v1217_v55  ;;  %1059 = vmatmul.f32.vlgmr.msrb.gmra.mxu3 %v994_v17  ;;  %v1219_v28 = vld [vmem:[#allocation2 + $0x188] sm:$0xff] }
 0x1a0   : > { %1495 = vmatmul.f32.gmra.mxu1 %v3861_v54 }
 0x1a1   : > { %4845 = vst [vmem:[#allocation41_spill] sm:$0xff] %v3859_v19  ;;  %v2762_v19 = vld [vmem:[%s4741_s4 + $0x338] sm:$0xff] }
 0x1a2   : > { %v833_v61 = vpop.f32.mrf.mxu3 }
 0x1a3   : > { %990 = vmatmul.f32.gmra.mxu2 %v1217_v55 }
 0x1a5   : > { %v3869_v36 = vpop.f32.mrf.mxu1 }
 0x1a6   : > { %v943_v53 = vpop.f32.mrf.mxu2 }
 0x1a7   : > { %v3871_v16 = vadd.f32 %v943_v53, %v830_v27  ;;  %1343 = vmatmul.f32.gmra.mxu0 %v1218_v4  ;;  %1062 = vmatmul.f32.gmra.mxu3 %v995_v11  ;;  %v3881_v27 = vpop.f32.mrf.mxu0  ;;  %v3885_v11 = vld [vmem:[#allocation2 + $0xf1] sm:$0xff]  ;;  %v2800_v53 = vld [vmem:[%s4741_s4 + $0x468] sm:$0xff] }
 0x1a8   : > { %1498 = vmatmul.f32.gmra.mxu1 %v3873_v5  ;;  %4848 = vst [vmem:[#allocation44_spill] sm:$0xff] %v3881_v27  ;;  %v3971_v27 = vld [vmem:[#allocation2 + $0x139] sm:$0xff] }
 0x1a9   : > { %4847 = vst [vmem:[#allocation43_spill] sm:$0xff] %v3871_v16  ;;  %2210 = vmatpush.msra.mxu1 %v2800_v53  ;;  %v3903_v53 = vld [vmem:[#allocation2 + $0x32] sm:$0xff] }
 0x1aa   : > { %v836_v17 = vpop.f32.mrf.mxu3 }
 0x1ab   : > { %1641 = vmatmul.f32.vlgmr.msra.gmra.mxu2 %v1576_v38 }
 0x1ad   : > { %v3879_v55 = vpop.f32.mrf.mxu1 }
 0x1ae   : > { %v946_v21 = vpop.f32.mrf.mxu2 }
 0x1af   : > { %v3883_v4 = vadd.f32 %v946_v21, %v833_v61  ;;  %1346 = vmatmul.f32.gmra.mxu0 %v1219_v28  ;;  %1065 = vmatmul.f32.gmra.mxu3 %v1576_v38  ;;  %v3895_v38 = vld [vmem:[#allocation2 + $0xf9] sm:$0xff]  ;;  %v3901_v21 = vpop.f32.mrf.mxu0 }
 0x1b0   : > { %1501 = vmatmul.f32.gmra.mxu1 %v3885_v11  ;;  %v2767_v28 = vld [vmem:[%s4741_s4 + $0x360] sm:$0xff]  ;;  %4851 = vst [vmem:[#allocation47_spill] sm:$0xff] %v3901_v21 }
 0x1b1   : > { %4849 = vst [vmem:[#allocation45_spill] sm:$0xff] %v3883_v4  ;;  %1823 = vmatpush.msra.mxu3 %v2767_v28  ;;  %v2799_v28 = vld [vmem:[%s4741_s4 + $0x460] sm:$0xff]  ;;  %v4054_v4 = vld [vmem:[#allocation2 + $0x169] sm:$0xff] }
 0x1b2   : > { %v839_v34 = vpop.f32.mrf.mxu3  ;;  %2211 = vmatpush.msra.mxu1 %v2799_v28  ;;  %v2766_v28 = vld [vmem:[%s4741_s4 + $0x358] sm:$0xff]  ;;  %4872 = vst [vmem:[#allocation68_spill] sm:$0xff] %v4054_v4 }
 0x1b3   : > { %1644 = vmatmul.f32.gmra.mxu2 %v1577_v62  ;;  %1824 = vmatpush.msra.mxu3 %v2766_v28  ;;  %v2798_v28 = vld [vmem:[%s4741_s4 + $0x458] sm:$0xff] }
 0x1b4   : > { %2212 = vmatpush.msra.mxu1 %v2798_v28  ;;  %v2765_v28 = vld [vmem:[%s4741_s4 + $0x350] sm:$0xff] }
 0x1b5   : > { %v3891_v50 = vpop.f32.mrf.mxu1  ;;  %1825 = vmatpush.msra.mxu3 %v2765_v28  ;;  %v2797_v28 = vld [vmem:[%s4741_s4 + $0x450] sm:$0xff] }
 0x1b6   : > { %v949_v13 = vpop.f32.mrf.mxu2  ;;  %2213 = vmatpush.msra.mxu1 %v2797_v28  ;;  %v2764_v28 = vld [vmem:[%s4741_s4 + $0x348] sm:$0xff] }
 0x1b7   : > { %v3893_v61 = vadd.f32 %v949_v13, %v836_v17  ;;  %2030 = vmatmul.f32.vlgmr.msra.gmra.mxu0 %v1965_v59  ;;  %1068 = vmatmul.f32.gmra.mxu3 %v1577_v62  ;;  %v1966_v17 = vld [vmem:[#allocation2 + $0x39] sm:$0xff]  ;;  %v3919_v52 = vpop.f32.mrf.mxu0 }
 0x1b8   : > { %1504 = vmatmul.f32.gmra.mxu1 %v3895_v38  ;;  %4853 = vst [vmem:[#allocation49_spill] sm:$0xff] %v3919_v52  ;;  %v3963_v52 = vld [vmem:[#allocation2 + $0x62] sm:$0xff]  ;;  %1826 = vmatpush.msra.mxu3 %v2764_v28  ;;  %v4007_v28 = vld [vmem:[#allocation2 + $0x151] sm:$0xff] }
 0x1b9   : > { %4850 = vst [vmem:[#allocation46_spill] sm:$0xff] %v3893_v61  ;;  %v2789_v61 = vld [vmem:[%s4741_s4 + $0x410] sm:$0xff] }
 0x1ba   : > { %v842_v24 = vpop.f32.mrf.mxu3 }
 0x1bb   : > { %1647 = vmatmul.f32.gmra.mxu2 %v3903_v53 }
 0x1bd   : > { %v3906_v59 = vpop.f32.mrf.mxu1 }
 0x1be   : > { %v952_v13 = vpop.f32.mrf.mxu2 }
 0x1bf   : > { %v3908_v62 = vadd.f32 %v952_v13, %v839_v34  ;;  %2033 = vmatmul.f32.gmra.mxu0 %v1966_v17  ;;  %1071 = vmatmul.f32.gmra.mxu3 %v3903_v53  ;;  %v1967_v13 = vld [vmem:[#allocation2 + $0x49] sm:$0xff] }
 0x1c0   : > { %1507 = vmatmul.f32.gmra.mxu1 %v3911_v7 }
 0x1c1   : > { %4852 = vst [vmem:[#allocation48_spill] sm:$0xff] %v3908_v62  ;;  %v4029_v62 = vld [vmem:[#allocation2 + $0x159] sm:$0xff] }
 0x1c2   : > { %v845_v37 = vpop.f32.mrf.mxu3  ;;  %4868 = vst [vmem:[#allocation64_spill] sm:$0xff] %v4029_v62 }
 0x1c3   : > { %1650 = vmatmul.f32.gmra.mxu2 %v3917_v43 }
 0x1c5   : > { %v3930_v6 = vpop.f32.mrf.mxu1 }
 0x1c6   : > { %v955_v34 = vpop.f32.mrf.mxu2 }
 0x1c7   : > { %v3922_v17 = vadd.f32 %v955_v34, %v842_v24  ;;  %2036 = vmatmul.f32.gmra.mxu0 %v1967_v13  ;;  %1074 = vmatmul.f32.gmra.mxu3 %v3917_v43  ;;  %v3936_v24 = vpop.f32.mrf.mxu0  ;;  %v1968_v13 = vld [vmem:[#allocation2 + $0x51] sm:$0xff] }
 0x1c8   : > { %1510 = vmatmul.f32.gmra.mxu1 %v3925_v35  ;;  %4855 = vst [vmem:[#allocation51_spill] sm:$0xff] %v3936_v24  ;;  %v3957_v24 = vld [vmem:[#allocation2 + $0x129] sm:$0xff] }
 0x1c9   : > { %4854 = vst [vmem:[#allocation50_spill] sm:$0xff] %v3922_v17 }
 0x1ca   : > { %v848_v1 = vpop.f32.mrf.mxu3 }
 0x1cb   : > { %1653 = vmatmul.f32.gmra.mxu2 %v3933_v9 }
 0x1cd   : > { %v3949_v33 = vpop.f32.mrf.mxu1 }
 0x1ce   : > { %v958_v34 = vpop.f32.mrf.mxu2 }
 0x1cf   : > { %v3938_v20 = vadd.f32 %v958_v34, %v845_v37  ;;  %2039 = vmatmul.f32.gmra.mxu0 %v1968_v13  ;;  %1077 = vmatmul.f32.gmra.mxu3 %v3933_v9  ;;  %v1969_v34 = vld [vmem:[#allocation2 + $0x61] sm:$0xff]  ;;  %v3952_v13 = vpop.f32.mrf.mxu0 }
 0x1d0   : > { %1513 = vmatmul.f32.gmra.mxu1 %v3941_v41  ;;  %4857 = vst [vmem:[#allocation53_spill] sm:$0xff] %v3952_v13 }
 0x1d1   : > { %4856 = vst [vmem:[#allocation52_spill] sm:$0xff] %v3938_v20  ;;  %v4015_v20 = vld [vmem:[#allocation2 + $0x82] sm:$0xff] }
 0x1d2   : > { %v851_v49 = vpop.f32.mrf.mxu3 }
 0x1d3   : > { %1656 = vmatmul.f32.gmra.mxu2 %v3947_v57 }
 0x1d5   : > { %v3966_v13 = vpop.f32.mrf.mxu1 }
 0x1d6   : > { %v961_v37 = vpop.f32.mrf.mxu2 }
 0x1d7   : > { %v3954_v23 = vadd.f32 %v961_v37, %v848_v1  ;;  %2042 = vmatmul.f32.gmra.mxu0 %v1969_v34  ;;  %1080 = vmatmul.f32.gmra.mxu3 %v3947_v57  ;;  %v1970_v37 = vld [vmem:[#allocation2 + $0x69] sm:$0xff]  ;;  %v3977_v47 = vpop.f32.mrf.mxu0 }
 0x1d8   : > { %1516 = vmatmul.f32.gmra.mxu1 %v3957_v24  ;;  %4860 = vst [vmem:[#allocation56_spill] sm:$0xff] %v3977_v47  ;;  %v3993_v47 = vld [vmem:[#allocation2 + $0x7a] sm:$0xff] }
 0x1d9   : > { %4858 = vst [vmem:[#allocation54_spill] sm:$0xff] %v3954_v23 }
 0x1da   : > { %v854_v21 = vpop.f32.mrf.mxu3 }
 0x1db   : > { %1659 = vmatmul.f32.gmra.mxu2 %v3963_v52 }
 0x1de   : > { %v964_v1 = vpop.f32.mrf.mxu2 }
 0x1df   : > { %v3968_v34 = vadd.f32 %v964_v1, %v851_v49  ;;  %2045 = vmatmul.f32.gmra.mxu0 %v1970_v37  ;;  %1083 = vmatmul.f32.gmra.mxu3 %v3963_v52  ;;  %v3982_v49 = vpop.f32.mrf.mxu1  ;;  %v1971_v37 = vld [vmem:[#allocation2 + $0x79] sm:$0xff] }
 0x1e0   : > { %1519 = vmatmul.f32.gmra.mxu1 %v3971_v27  ;;  %4861 = vst [vmem:[#allocation57_spill] sm:$0xff] %v3982_v49  ;;  %v3995_v49 = vpop.f32.mrf.mxu0 }
 0x1e1   : > { %4859 = vst [vmem:[#allocation55_spill] sm:$0xff] %v3968_v34 }
 0x1e2   : > { %v857_v48 = vpop.f32.mrf.mxu3  ;;  %4863 = vst [vmem:[#allocation59_spill] sm:$0xff] %v3995_v49 }
 0x1e3   : > { %1662 = vmatmul.f32.gmra.mxu2 %v3979_v51 }
 0x1e6   : > { %v967_v1 = vpop.f32.mrf.mxu2 }
 0x1e7   : > { %v3984_v22 = vadd.f32 %v967_v1, %v854_v21  ;;  %2048 = vmatmul.f32.gmra.mxu0 %v1971_v37  ;;  %1086 = vmatmul.f32.gmra.mxu3 %v3979_v51  ;;  %v2796_v21 = vld [vmem:[%s4741_s4 + $0x448] sm:$0xff]  ;;  %v4009_v49 = vpop.f32.mrf.mxu1 }
 0x1e8   : > { %1522 = vmatmul.f32.gmra.mxu1 %v3987_v15  ;;  %v1972_v37 = vld [vmem:[#allocation2 + $0x81] sm:$0xff]  ;;  %4865 = vst [vmem:[#allocation61_spill] sm:$0xff] %v4009_v49  ;;  %v1973_v49 = vld [vmem:[#allocation2 + $0x91] sm:$0xff] }
 0x1e9   : > { %4862 = vst [vmem:[#allocation58_spill] sm:$0xff] %v3984_v22  ;;  %2214 = vmatpush.msra.mxu1 %v2796_v21  ;;  %v2795_v22 = vld [vmem:[%s4741_s4 + $0x440] sm:$0xff]  ;;  %v2794_v21 = vld [vmem:[%s4741_s4 + $0x438] sm:$0xff] }
 0x1ea   : > { %v860_v34 = vpop.f32.mrf.mxu3 }
 0x1eb   : > { %1665 = vmatmul.f32.gmra.mxu2 %v3993_v47  ;;  %2215 = vmatpush.msra.mxu1 %v2795_v22 }
 0x1ed   : > { %2216 = vmatpush.msra.mxu1 %v2794_v21  ;;  %v2763_v21 = vld [vmem:[%s4741_s4 + $0x340] sm:$0xff] }
 0x1ee   : > { %v970_v1 = vpop.f32.mrf.mxu2  ;;  %1827 = vmatpush.msra.mxu3 %v2763_v21  ;;  %v1974_v21 = vld [vmem:[#allocation2 + $0x99] sm:$0xff] }
 0x1ef   : > { %v4004_v23 = vadd.f32 %v970_v1, %v857_v48  ;;  %2051 = vmatmul.f32.gmra.mxu0 %v1972_v37  ;;  %1089 = vmatmul.f32.gmra.mxu3 %v3993_v47  ;;  %v2793_v48 = vld [vmem:[%s4741_s4 + $0x430] sm:$0xff]  ;;  %v4021_v1 = vpop.f32.mrf.mxu0 }
 0x1f0   : > { %1525 = vmatmul.f32.gmra.mxu1 %v4007_v28  ;;  %4866 = vst [vmem:[#allocation62_spill] sm:$0xff] %v4021_v1  ;;  %v4038_v1 = vpop.f32.mrf.mxu1  ;;  %1828 = vmatpush.msra.mxu3 %v2762_v19  ;;  %v4090_v19 = vld [vmem:[#allocation2 + $0xb2] sm:$0xff] }
 0x1f1   : > { %4864 = vst [vmem:[#allocation60_spill] sm:$0xff] %v4004_v23  ;;  %2217 = vmatpush.msra.mxu1 %v2793_v48  ;;  %v2792_v23 = vld [vmem:[%s4741_s4 + $0x428] sm:$0xff]  ;;  %v2791_v48 = vld [vmem:[%s4741_s4 + $0x420] sm:$0xff] }
 0x1f2   : > { %v863_v17 = vpop.f32.mrf.mxu3  ;;  %4869 = vst [vmem:[#allocation65_spill] sm:$0xff] %v4038_v1 }
 0x1f3   : > { %1668 = vmatmul.f32.gmra.mxu2 %v4015_v20  ;;  %2218 = vmatpush.msra.mxu1 %v2792_v23 }
 0x1f5   : > { %2219 = vmatpush.msra.mxu1 %v2791_v48  ;;  %v2788_v48 = vld [vmem:[%s4741_s4 + $0x408] sm:$0xff] }
 0x1f6   : > { %v973_v37 = vpop.f32.mrf.mxu2 }
 0x1f7   : > { %v4026_v22 = vadd.f32 %v973_v37, %v860_v34  ;;  %2054 = vmatmul.f32.gmra.mxu0 %v1973_v49  ;;  %1092 = vmatmul.f32.gmra.mxu3 %v4015_v20  ;;  %v4040_v34 = vld [vmem:[#allocation2 + $0x92] sm:$0xff]  ;;  %v4049_v23 = vpop.f32.mrf.mxu0 }
 0x1f8   : > { %1528 = vmatmul.f32.gmra.mxu1 %v4029_v62  ;;  %v2790_v37 = vld [vmem:[%s4741_s4 + $0x418] sm:$0xff]  ;;  %4870 = vst [vmem:[#allocation66_spill] sm:$0xff] %v4049_v23  ;;  %v1975_v23 = vld [vmem:[#allocation2 + $0xa9] sm:$0xff] }
 0x1f9   : > { %4867 = vst [vmem:[#allocation63_spill] sm:$0xff] %v4026_v22  ;;  %2220 = vmatpush.msra.mxu1 %v2790_v37  ;;  %v4060_v37 = vld [vmem:[#allocation2 + $0x9a] sm:$0xff] }
 0x1fa   : > { %v866_v49 = vpop.f32.mrf.mxu3 }
 0x1fb   : > { %1671 = vmatmul.f32.gmra.mxu2 %v4040_v34  ;;  %2221 = vmatpush.msra.mxu1 %v2789_v61  ;;  %v4071_v61 = vld [vmem:[#allocation2 + $0x171] sm:$0xff] }
 0x1fc   : > { %4875 = vst [vmem:[#allocation71_spill] sm:$0xff] %v4071_v61 }
 0x1fd   : > { %2222 = vmatpush.msra.mxu1 %v2788_v48 }
 0x1fe   : > { %v976_v22 = vpop.f32.mrf.mxu2 }
 0x1ff   : > { %v4051_v1 = vadd.f32 %v976_v22, %v863_v17  ;;  %2057 = vmatmul.f32.gmra.mxu0 %v1974_v21  ;;  %1095 = vmatmul.f32.gmra.mxu3 %v4040_v34  ;;  %v2787_v17 = vld [vmem:[%s4741_s4 + $0x400] sm:$0xff]  ;;  %v4066_v22 = vpop.f32.mrf.mxu1  ;;  %v4077_v48 = vpop.f32.mrf.mxu0 }
 0x200   : > { %1531 = vmatmul.f32.gmra.mxu1 %v4054_v4  ;;  %4873 = vst [vmem:[#allocation69_spill] sm:$0xff] %v4066_v22  ;;  %v4079_v22 = vld [vmem:[#allocation2 + $0xaa] sm:$0xff] }
 0x201   : > { %4871 = vst [vmem:[#allocation67_spill] sm:$0xff] %v4051_v1  ;;  %2223 = vmatpush.msra.mxu1 %v2787_v17  ;;  %v4095_v4 = vld [vmem:[#allocation2 + $0x189] sm:$0xff] }
 0x202   : > { %v869_v16 = vpop.f32.mrf.mxu3  ;;  %4876 = vst [vmem:[#allocation72_spill] sm:$0xff] %v4077_v48 }
 0x203   : > { %1674 = vmatmul.f32.gmra.mxu2 %v4060_v37  ;;  %4881 = vst [vmem:[#allocation77_spill] sm:$0xff] %v4095_v4 }
 0x206   : > { %v979_v21 = vpop.f32.mrf.mxu2 }
 0x207   : > { %v4068_v1 = vadd.f32 %v979_v21, %v866_v49  ;;  %2060 = vmatmul.f32.gmra.mxu0 %v1975_v23  ;;  %1098 = vmatmul.f32.gmra.mxu3 %v4060_v37  ;;  %v4082_v49 = vld [vmem:[#allocation2 + $0x181] sm:$0xff]  ;;  %v4084_v23 = vpop.f32.mrf.mxu1 }
 0x208   : > { %1534 = vmatmul.f32.gmra.mxu1 %v4071_v61  ;;  %4877 = vst [vmem:[#allocation73_spill] sm:$0xff] %v4082_v49  ;;  %v4092_v61 = vpop.f32.mrf.mxu0 }
 0x209   : > { %4874 = vst [vmem:[#allocation70_spill] sm:$0xff] %v4068_v1  ;;  %v1976_v1 = vld [vmem:[#allocation2 + $0xb1] sm:$0xff] }
 0x20a   : > { %v872_v17 = vpop.f32.mrf.mxu3  ;;  %4878 = vst [vmem:[#allocation74_spill] sm:$0xff] %v4084_v23  ;;  %v1977_v23 = vld [vmem:[#allocation2 + $0xc1] sm:$0xff] }
 0x20b   : > { %1677 = vmatmul.f32.gmra.mxu2 %v4079_v22  ;;  %4880 = vst [vmem:[#allocation76_spill] sm:$0xff] %v4092_v61 }
 0x20e   : > { %v982_v21 = vpop.f32.mrf.mxu2 }
 0x20f   : > { %v4086_v18 = vadd.f32 %v982_v21, %v869_v16  ;;  %2063 = vmatmul.f32.gmra.mxu0 %v1976_v1  ;;  %1101 = vmatmul.f32.gmra.mxu3 %v4079_v22  ;;  %v2761_v16 = vld [vmem:[%s4741_s4 + $0x330] sm:$0xff]  ;;  %v4103_v1 = vpop.f32.mrf.mxu1  ;;  %v4106_v21 = vld [vmem:[#allocation2 + $0xc2] sm:$0xff] }
 0x210   : > { %1537 = vmatmul.f32.gmra.mxu1 %v4082_v49  ;;  %4883 = vst [vmem:[#allocation79_spill] sm:$0xff] %v4103_v1  ;;  %1829 = vmatpush.msra.mxu3 %v2761_v16  ;;  %v899_v1 = vadd.f32 %v3625_v60, %v3593_v44  ;;  %v2760_v44 = vld [vmem:[%s4741_s4 + $0x328] sm:$0xff] }
 0x211   : > { %4879 = vst [vmem:[#allocation75_spill] sm:$0xff] %v4086_v18  ;;  %v4109_v18 = vpop.f32.mrf.mxu0 }
 0x212   : > { %v875_v48 = vpop.f32.mrf.mxu3  ;;  %4884 = vst [vmem:[#allocation80_spill] sm:$0xff] %v4109_v18  ;;  %1830 = vmatpush.msra.mxu3 %v2760_v44 }
 0x213   : > { %1680 = vmatmul.f32.gmra.mxu2 %v4090_v19 }
 0x216   : > { %v985_v29 = vpop.f32.mrf.mxu2 }
 0x217   : > { %v4097_v62 = vadd.f32 %v985_v29, %v872_v17  ;;  %2066 = vmatmul.f32.gmra.mxu0 %v1977_v23  ;;  %1104 = vmatmul.f32.gmra.mxu3 %v4090_v19  ;;  %v1978_v17 = vld [vmem:[#allocation2 + $0xc9] sm:$0xff]  ;;  %v4117_v16 = vpop.f32.mrf.mxu1 }
 0x218   : > { %1540 = vmatmul.f32.gmra.mxu1 %v4095_v4 }
 0x219   : > { %4882 = vst [vmem:[#allocation78_spill] sm:$0xff] %v4097_v62  ;;  %v4119_v62 = vld [vmem:[#allocation2 + $0xca] sm:$0xff]  ;;  %v4122_v31 = vpop.f32.mrf.mxu0 }
 0x21a   : > { %v878_v61 = vpop.f32.mrf.mxu3  ;;  %4885 = vst [vmem:[#allocation81_spill] sm:$0xff] %v4122_v31 }
 0x21b   : > { %1683 = vmatmul.f32.gmra.mxu2 %v4106_v21 }
 0x21e   : > { %v988_v29 = vpop.f32.mrf.mxu2 }
 0x21f   : > { %v4111_v23 = vadd.f32 %v988_v29, %v875_v48  ;;  %2069 = vmatmul.f32.gmra.mxu0 %v1978_v17  ;;  %1107 = vmatmul.f32.gmra.mxu3 %v4106_v21 }
 0x220   : > { %2224 = vmatmul.f32.vlgmr.msra.gmra.mxu1 %v3903_v53  ;;  %v4133_v53 = vld [vmem:[#allocation2 + $0xda] sm:$0xff] }
 0x222   : > { %v1060_v4 = vpop.f32.mrf.mxu3 }
 0x223   : > { %1686 = vmatmul.f32.gmra.mxu2 %v4119_v62  ;;  %v1156_v18 = vadd.f32 %v1060_v4, %v899_v1 }
 0x225   : > { %v1350_v60 = vadd.f32 %v3633_v42, %v1156_v18  ;;  %v4148_v18 = vld [vmem:[#allocation2 + $0xe2] sm:$0xff] }
 0x226   : > { %v991_v49 = vpop.f32.mrf.mxu2 }
 0x227   : > { %v4124_v48 = vadd.f32 %v991_v49, %v878_v61  ;;  %2072 = vmatmul.f32.gmra.mxu0 %v3861_v54  ;;  %1110 = vmatmul.f32.gmra.mxu3 %v4119_v62  ;;  %v4137_v49 = vpop.f32.mrf.mxu1  ;;  %v1544_v54 = vadd.f32 %v3857_v46, %v1350_v60 }
 0x228   : > { %2227 = vmatmul.f32.gmra.mxu1 %v3917_v43  ;;  %v4145_v43 = vpop.f32.mrf.mxu0 }
 0x229   : > { %4886 = vst [vmem:[#allocation82_spill] sm:$0xff] %v4145_v43 }
 0x22a   : > { %v1063_v4 = vpop.f32.mrf.mxu3 }
 0x22b   : > { %1689 = vmatmul.f32.gmra.mxu2 %v4133_v53  ;;  %v1157_v61 = vadd.f32 %v1063_v4, %v3635_v0 }
 0x22d   : > { %v1351_v42 = vadd.f32 %v3643_v56, %v1157_v61 }
 0x22e   : > { %v1642_v1 = vpop.f32.mrf.mxu2 }
 0x22f   : > { %v4140_v29 = vadd.f32 %v1642_v1, %v1544_v54  ;;  %2075 = vmatmul.f32.gmra.mxu0 %v3873_v5  ;;  %1113 = vmatmul.f32.gmra.mxu3 %v4133_v53  ;;  %v1545_v17 = vadd.f32 %v3869_v36, %v1351_v42  ;;  %v4153_v44 = vpop.f32.mrf.mxu1  ;;  %v4179_v42 = vld [vmem:[#allocation2 + $0xfa] sm:$0xff] }
 0x230   : > { %2230 = vmatmul.f32.gmra.mxu1 %v3933_v9  ;;  %v2759_v9 = vld [vmem:[%s4741_s4 + $0x320] sm:$0xff]  ;;  %v4166_v4 = vpop.f32.mrf.mxu0 }
 0x231   : > { %1831 = vmatpush.msra.mxu3 %v2759_v9  ;;  %4887 = vst [vmem:[#allocation83_spill] sm:$0xff] %v4166_v4  ;;  %v4908_v4 = vld [vmem:[#allocation48_spill] sm:$0xff] }
 0x232   : > { %v1066_v0 = vpop.f32.mrf.mxu3 }
 0x233   : > { %1692 = vmatmul.f32.gmra.mxu2 %v4148_v18  ;;  %v1158_v46 = vadd.f32 %v1066_v0, %v3645_v2  ;;  %v4164_v2 = vld [vmem:[#allocation2 + $0xf2] sm:$0xff] }
 0x235   : > { %v1352_v56 = vadd.f32 %v3653_v14, %v1158_v46 }
 0x236   : > { %v1645_v5 = vpop.f32.mrf.mxu2 }
 0x237   : > { %v4155_v60 = vadd.f32 %v1645_v5, %v1545_v17  ;;  %2078 = vmatmul.f32.gmra.mxu0 %v3885_v11  ;;  %1116 = vmatmul.f32.gmra.mxu3 %v4148_v18  ;;  %v1546_v61 = vadd.f32 %v3879_v55, %v1352_v56  ;;  %v4197_v5 = vld [vmem:[#allocation2 + $0x10a] sm:$0xff] }
 0x238   : > { %2233 = vmatmul.f32.gmra.mxu1 %v3947_v57  ;;  %v4175_v57 = vpop.f32.mrf.mxu1  ;;  %v4183_v55 = vpop.f32.mrf.mxu0 }
 0x239   : > { %4888 = vst [vmem:[#allocation84_spill] sm:$0xff] %v4183_v55 }
 0x23a   : > { %v1069_v36 = vpop.f32.mrf.mxu3 }
 0x23b   : > { %1695 = vmatmul.f32.gmra.mxu2 %v4164_v2  ;;  %v1159_v11 = vadd.f32 %v1069_v36, %v3655_v10 }
 0x23d   : > { %v1353_v14 = vadd.f32 %v3663_v39, %v1159_v11 }
 0x23e   : > { %v1648_v54 = vpop.f32.mrf.mxu2 }
 0x23f   : > { %v4171_v1 = vadd.f32 %v1648_v54, %v1546_v61  ;;  %2081 = vmatmul.f32.gmra.mxu0 %v3895_v38  ;;  %1119 = vmatmul.f32.gmra.mxu3 %v4164_v2  ;;  %v1547_v46 = vadd.f32 %v3891_v50, %v1353_v14 }
 0x240   : > { %2236 = vmatmul.f32.gmra.mxu1 %v3963_v52  ;;  %v2758_v52 = vld [vmem:[%s4741_s4 + $0x318] sm:$0xff]  ;;  %v4202_v36 = vpop.f32.mrf.mxu0 }
 0x241   : > { %1832 = vmatpush.msra.mxu3 %v2758_v52  ;;  %4889 = vst [vmem:[#allocation85_spill] sm:$0xff] %v4202_v36  ;;  %v4906_v36 = vld [vmem:[#allocation46_spill] sm:$0xff] }
 0x242   : > { %v1072_v0 = vpop.f32.mrf.mxu3 }
 0x243   : > { %1698 = vmatmul.f32.gmra.mxu2 %v4179_v42  ;;  %v1160_v10 = vadd.f32 %v1072_v0, %v3665_v25  ;;  %v4195_v25 = vpop.f32.mrf.mxu1 }
 0x245   : > { %v1354_v39 = vadd.f32 %v3673_v12, %v1160_v10 }
 0x246   : > { %v1651_v38 = vpop.f32.mrf.mxu2 }
 0x247   : > { %v4186_v17 = vadd.f32 %v1651_v38, %v1547_v46  ;;  %2084 = vmatmul.f32.gmra.mxu0 %v3911_v7  ;;  %1122 = vmatmul.f32.gmra.mxu3 %v4179_v42  ;;  %v1548_v9 = vadd.f32 %v3906_v59, %v1354_v39 }
 0x248   : > { %2239 = vmatmul.f32.gmra.mxu1 %v3979_v51  ;;  %v4210_v51 = vld [vmem:[#allocation2 + $0x112] sm:$0xff] }
 0x24a   : > { %v1075_v50 = vpop.f32.mrf.mxu3 }
 0x24b   : > { %1701 = vmatmul.f32.gmra.mxu2 %v4197_v5  ;;  %v1161_v7 = vadd.f32 %v1075_v50, %v3675_v32  ;;  %v4214_v59 = vpop.f32.mrf.mxu1 }
 0x24d   : > { %v1355_v12 = vadd.f32 %v3683_v3, %v1161_v7  ;;  %v4225_v3 = vpop.f32.mrf.mxu0 }
 0x24e   : > { %v1654_v56 = vpop.f32.mrf.mxu2  ;;  %4890 = vst [vmem:[#allocation86_spill] sm:$0xff] %v4225_v3 }
 0x24f   : > { %v4204_v11 = vadd.f32 %v1654_v56, %v1548_v9  ;;  %2087 = vmatmul.f32.gmra.mxu0 %v3925_v35  ;;  %1125 = vmatmul.f32.gmra.mxu3 %v4197_v5  ;;  %v1549_v54 = vadd.f32 %v3930_v6, %v1355_v12  ;;  %v2757_v35 = vld [vmem:[%s4741_s4 + $0x310] sm:$0xff] }
 0x250   : > { %2242 = vmatmul.f32.gmra.mxu1 %v3993_v47  ;;  %1833 = vmatpush.msra.mxu3 %v2757_v35  ;;  %v4228_v47 = vld [vmem:[#allocation2 + $0x122] sm:$0xff] }
 0x252   : > { %v1078_v61 = vpop.f32.mrf.mxu3 }
 0x253   : > { %1704 = vmatmul.f32.gmra.mxu2 %v4210_v51  ;;  %v1162_v32 = vadd.f32 %v1078_v61, %v3685_v8  ;;  %v4233_v46 = vpop.f32.mrf.mxu1 }
 0x255   : > { %v1356_v8 = vadd.f32 %v3701_v63, %v1162_v32  ;;  %v4241_v63 = vld [vmem:[#allocation2 + $0x12a] sm:$0xff]  ;;  %v4243_v50 = vpop.f32.mrf.mxu0 }
 0x256   : > { %v1657_v14 = vpop.f32.mrf.mxu2  ;;  %4891 = vst [vmem:[#allocation87_spill] sm:$0xff] %v4243_v50 }
 0x257   : > { %v4217_v0 = vadd.f32 %v1657_v14, %v1549_v54  ;;  %2090 = vmatmul.f32.gmra.mxu0 %v3941_v41  ;;  %1128 = vmatmul.f32.gmra.mxu3 %v4210_v51  ;;  %v1550_v10 = vadd.f32 %v3949_v33, %v1356_v8 }
 0x258   : > { %2245 = vmatmul.f32.gmra.mxu1 %v4015_v20 }
 0x25a   : > { %v1081_v6 = vpop.f32.mrf.mxu3 }
 0x25b   : > { %1707 = vmatmul.f32.gmra.mxu2 %v4228_v47  ;;  %v1163_v41 = vadd.f32 %v1081_v6, %v3693_v26  ;;  %v4894_v6 = vld [vmem:[#allocation37_spill] sm:$0xff] }
 0x25d   : > { %v1357_v20 = vadd.f32 %v3723_v58, %v1163_v41  ;;  %v2756_v58 = vld [vmem:[%s4741_s4 + $0x308] sm:$0xff] }
 0x25e   : > { %v1660_v38 = vpop.f32.mrf.mxu2  ;;  %1834 = vmatpush.msra.mxu3 %v2756_v58  ;;  %v4897_v58 = vld [vmem:[#allocation71_spill] sm:$0xff] }
 0x25f   : > { %v4235_v52 = vadd.f32 %v1660_v38, %v1550_v10  ;;  %2093 = vmatmul.f32.gmra.mxu0 %v3957_v24  ;;  %1131 = vmatmul.f32.gmra.mxu3 %v4228_v47  ;;  %v1551_v26 = vadd.f32 %v3966_v13, %v1357_v20  ;;  %v4895_v38 = vld [vmem:[#allocation68_spill] sm:$0xff]  ;;  %v4311_v20 = vld [vmem:[#allocation2 + $0x16a] sm:$0xff] }
 0x260   : > { %2248 = vmatmul.f32.gmra.mxu1 %v4040_v34  ;;  %v4257_v34 = vpop.f32.mrf.mxu1 }
 0x262   : > { %v1084_v39 = vpop.f32.mrf.mxu3 }
 0x263   : > { %1710 = vmatmul.f32.gmra.mxu2 %v4241_v63  ;;  %v4247_v33 = vadd.f32 %v1084_v39, %v3709_v30  ;;  %v4260_v30 = vld [vmem:[#allocation2 + $0x13a] sm:$0xff] }
 0x266   : > { %v1663_v7 = vpop.f32.mrf.mxu2 }
 0x267   : > { %v4250_v24 = vadd.f32 %v1663_v7, %v1551_v26  ;;  %2096 = vmatmul.f32.gmra.mxu0 %v3971_v27  ;;  %1134 = vmatmul.f32.gmra.mxu3 %v4241_v63  ;;  %v4266_v27 = vpop.f32.mrf.mxu0  ;;  %v4896_v26 = vld [vmem:[#allocation39_spill] sm:$0xff] }
 0x268   : > { %2251 = vmatmul.f32.gmra.mxu1 %v4060_v37  ;;  %v4271_v56 = vpop.f32.mrf.mxu1  ;;  %v4273_v37 = vld [vmem:[#allocation2 + $0x142] sm:$0xff] }
 0x26a   : > { %v1087_v9 = vpop.f32.mrf.mxu3 }
 0x26b   : > { %1713 = vmatmul.f32.gmra.mxu2 %v4260_v30  ;;  %v4264_v13 = vadd.f32 %v1087_v9, %v3731_v40 }
 0x26f   : > { %2099 = vmatmul.f32.gmra.mxu0 %v3987_v15  ;;  %1137 = vmatmul.f32.gmra.mxu3 %v4260_v30  ;;  %v4279_v40 = vpop.f32.mrf.mxu0  ;;  %v2755_v15 = vld [vmem:[%s4741_s4 + $0x300] sm:$0xff] }
 0x270   : > { %2254 = vmatmul.f32.gmra.mxu1 %v4079_v22  ;;  %1835 = vmatpush.msra.mxu3 %v2755_v15  ;;  %v4287_v22 = vld [vmem:[#allocation2 + $0x152] sm:$0xff]  ;;  %v4293_v14 = vpop.f32.mrf.mxu1  ;;  %v4899_v15 = vld [vmem:[#allocation41_spill] sm:$0xff] }
 0x272   : > { %v1090_v12 = vpop.f32.mrf.mxu3 }
 0x273   : > { %1716 = vmatmul.f32.gmra.mxu2 %v4273_v37  ;;  %v4277_v61 = vadd.f32 %v1090_v12, %v3768_v45  ;;  %v4892_v45 = vld [vmem:[#allocation36_spill] sm:$0xff] }
 0x274   : > { %v4324_v12 = vld [vmem:[#allocation2 + $0x172] sm:$0xff] }
 0x277   : > { %2102 = vmatmul.f32.gmra.mxu0 %v4007_v28  ;;  %1140 = vmatmul.f32.gmra.mxu3 %v4273_v37  ;;  %v4893_v28 = vld [vmem:[#allocation64_spill] sm:$0xff]  ;;  %v4298_v35 = vpop.f32.mrf.mxu0 }
 0x278   : > { %2257 = vmatmul.f32.gmra.mxu1 %v4090_v19  ;;  %v4300_v19 = vld [vmem:[#allocation2 + $0x15a] sm:$0xff]  ;;  %v4306_v10 = vpop.f32.mrf.mxu1 }
 0x27a   : > { %v1093_v32 = vpop.f32.mrf.mxu3 }
 0x27b   : > { %1719 = vmatmul.f32.gmra.mxu2 %v4287_v22  ;;  %v4291_v54 = vadd.f32 %v1093_v32, %v4892_v45 }
 0x27f   : > { %2105 = vmatmul.f32.gmra.mxu0 %v4893_v28  ;;  %1143 = vmatmul.f32.gmra.mxu3 %v4287_v22  ;;  %v4313_v39 = vpop.f32.mrf.mxu0  ;;  %v4900_v28 = vld [vmem:[#allocation73_spill] sm:$0xff] }
 0x280   : > { %2260 = vmatmul.f32.gmra.mxu1 %v4106_v21  ;;  %v4321_v9 = vpop.f32.mrf.mxu1 }
 0x281   : > { %4898 = vst [vmem:[#allocation36_spill] sm:$0xff] %v4321_v9 }
 0x282   : > { %v1096_v8 = vpop.f32.mrf.mxu3 }
 0x283   : > { %1722 = vmatmul.f32.gmra.mxu2 %v4300_v19  ;;  %v4304_v41 = vadd.f32 %v1096_v8, %v4894_v6  ;;  %v4337_v6 = vld [vmem:[#allocation2 + $0x182] sm:$0xff] }
 0x287   : > { %2108 = vmatmul.f32.gmra.mxu0 %v4895_v38  ;;  %1146 = vmatmul.f32.gmra.mxu3 %v4300_v19  ;;  %v4330_v45 = vpop.f32.mrf.mxu0  ;;  %v4902_v38 = vld [vmem:[#allocation43_spill] sm:$0xff] }
 0x288   : > { %2263 = vmatmul.f32.gmra.mxu1 %v4119_v62  ;;  %v4335_v8 = vpop.f32.mrf.mxu1 }
 0x289   : > { %4901 = vst [vmem:[#allocation64_spill] sm:$0xff] %v4335_v8 }
 0x28a   : > { %v1099_v21 = vpop.f32.mrf.mxu3 }
 0x28b   : > { %1725 = vmatmul.f32.gmra.mxu2 %v4311_v20  ;;  %v4317_v7 = vadd.f32 %v1099_v21, %v4896_v26  ;;  %v1771_v26 = vld [vmem:[#allocation2 + $0x30] sm:$0xff] }
 0x28f   : > { %2111 = vmatmul.f32.gmra.mxu0 %v4897_v58  ;;  %1149 = vmatmul.f32.gmra.mxu3 %v4311_v20  ;;  %v4343_v58 = vpop.f32.mrf.mxu0 }
 0x290   : > { %2266 = vmatmul.f32.gmra.mxu1 %v4133_v53  ;;  %v4353_v3 = vpop.f32.mrf.mxu1 }
 0x291   : > { %4905 = vst [vmem:[#allocation37_spill] sm:$0xff] %v4353_v3 }
 0x292   : > { %v1102_v62 = vpop.f32.mrf.mxu3 }
 0x293   : > { %1728 = vmatmul.f32.gmra.mxu2 %v4324_v12  ;;  %v4328_v32 = vadd.f32 %v1102_v62, %v4899_v15  ;;  %v4903_v62 = vld [vmem:[#allocation77_spill] sm:$0xff]  ;;  %v4347_v15 = vld [vmem:[#allocation2 + $0x18a] sm:$0xff] }
 0x297   : > { %2114 = vmatmul.f32.gmra.mxu0 %v4900_v28  ;;  %1152 = vmatmul.f32.gmra.mxu3 %v4324_v12  ;;  %v4904_v28 = vld [vmem:[#allocation45_spill] sm:$0xff] }
 0x298   : > { %2269 = vmatmul.f32.gmra.mxu1 %v4148_v18 }
 0x29a   : > { %v1105_v53 = vpop.f32.mrf.mxu3 }
 0x29b   : > { %1731 = vmatmul.f32.gmra.mxu2 %v4337_v6  ;;  %v4341_v21 = vadd.f32 %v1105_v53, %v4902_v38  ;;  %v1772_v53 = vld [vmem:[#allocation2 + $0x38] sm:$0xff] }
 0x29f   : > { %2117 = vmatmul.f32.gmra.mxu0 %v4903_v62  ;;  %1836 = vmatmul.f32.vlgmr.msra.gmra.mxu3 %v1771_v26  ;;  %v4359_v26 = vpop.f32.mrf.mxu1 }
 0x2a0   : > { %2272 = vmatmul.f32.gmra.mxu1 %v4164_v2  ;;  %4907 = vst [vmem:[#allocation68_spill] sm:$0xff] %v4359_v26  ;;  %v1773_v2 = vld [vmem:[#allocation2 + $0x48] sm:$0xff]  ;;  %v4912_v26 = vld [vmem:[#allocation52_spill] sm:$0xff] }
 0x2a2   : > { %v1108_v18 = vpop.f32.mrf.mxu3 }
 0x2a3   : > { %1734 = vmatmul.f32.gmra.mxu2 %v4347_v15  ;;  %v4351_v50 = vadd.f32 %v1108_v18, %v4904_v28  ;;  %v1774_v28 = vld [vmem:[#allocation2 + $0x50] sm:$0xff] }
 0x2a7   : > { %1839 = vmatmul.f32.gmra.mxu3 %v1772_v53  ;;  %v4365_v3 = vpop.f32.mrf.mxu1  ;;  %v4910_v53 = vld [vmem:[#allocation50_spill] sm:$0xff] }
 0x2a8   : > { %2275 = vmatmul.f32.gmra.mxu1 %v4179_v42  ;;  %4909 = vst [vmem:[#allocation39_spill] sm:$0xff] %v4365_v3 }
 0x2aa   : > { %v1111_v38 = vpop.f32.mrf.mxu3 }
 0x2ab   : > { %v4357_v62 = vadd.f32 %v1111_v38, %v4906_v36  ;;  %v1775_v38 = vld [vmem:[#allocation2 + $0x60] sm:$0xff] }
 0x2af   : > { %1842 = vmatmul.f32.gmra.mxu3 %v1773_v2  ;;  %v4372_v2 = vpop.f32.mrf.mxu1 }
 0x2b0   : > { %2278 = vmatmul.f32.gmra.mxu1 %v4197_v5  ;;  %4911 = vst [vmem:[#allocation71_spill] sm:$0xff] %v4372_v2 }
 0x2b2   : > { %v1114_v55 = vpop.f32.mrf.mxu3 }
 0x2b3   : > { %v4363_v18 = vadd.f32 %v1114_v55, %v4908_v4  ;;  %v1776_v55 = vld [vmem:[#allocation2 + $0x68] sm:$0xff] }
 0x2b7   : > { %1845 = vmatmul.f32.gmra.mxu3 %v1774_v28 }
 0x2b8   : > { %2281 = vmatmul.f32.gmra.mxu1 %v4210_v51  ;;  %v4913_v51 = vld [vmem:[#allocation54_spill] sm:$0xff] }
 0x2ba   : > { %v1117_v42 = vpop.f32.mrf.mxu3 }
 0x2bb   : > { %v4369_v36 = vadd.f32 %v1117_v42, %v4910_v53  ;;  %v4381_v42 = vpop.f32.mrf.mxu1  ;;  %v1777_v53 = vld [vmem:[#allocation2 + $0x78] sm:$0xff] }
 0x2bc   : > { %4914 = vst [vmem:[#allocation41_spill] sm:$0xff] %v4381_v42 }
 0x2bf   : > { %1848 = vmatmul.f32.gmra.mxu3 %v1775_v38  ;;  %v4915_v38 = vld [vmem:[#allocation55_spill] sm:$0xff] }
 0x2c0   : > { %2284 = vmatmul.f32.gmra.mxu1 %v4228_v47 }
 0x2c2   : > { %v1120_v5 = vpop.f32.mrf.mxu3 }
 0x2c3   : > { %v4375_v4 = vadd.f32 %v1120_v5, %v4912_v26  ;;  %v2225_v26 = vpop.f32.mrf.mxu1  ;;  %v1778_v5 = vld [vmem:[#allocation2 + $0x80] sm:$0xff] }
 0x2c7   : > { %1851 = vmatmul.f32.gmra.mxu3 %v1776_v55  ;;  %v4916_v55 = vld [vmem:[#allocation58_spill] sm:$0xff] }
 0x2c8   : > { %2287 = vmatmul.f32.gmra.mxu1 %v4241_v63 }
 0x2ca   : > { %v1123_v28 = vpop.f32.mrf.mxu3 }
 0x2cb   : > { %v4379_v3 = vadd.f32 %v1123_v28, %v4913_v51  ;;  %v1779_v28 = vld [vmem:[#allocation2 + $0x90] sm:$0xff]  ;;  %v2228_v51 = vpop.f32.mrf.mxu1 }
 0x2cf   : > { %1854 = vmatmul.f32.gmra.mxu3 %v1777_v53 }
 0x2d0   : > { %2290 = vmatmul.f32.gmra.mxu1 %v4260_v30  ;;  %v4917_v30 = vld [vmem:[#allocation60_spill] sm:$0xff] }
 0x2d2   : > { %v1126_v47 = vpop.f32.mrf.mxu3 }
 0x2d3   : > { %v4385_v2 = vadd.f32 %v1126_v47, %v4915_v38  ;;  %v1780_v47 = vld [vmem:[#allocation2 + $0x98] sm:$0xff]  ;;  %v2231_v38 = vpop.f32.mrf.mxu1 }
 0x2d7   : > { %1857 = vmatmul.f32.gmra.mxu3 %v1778_v5 }
 0x2d8   : > { %2293 = vmatmul.f32.gmra.mxu1 %v4273_v37  ;;  %v4918_v37 = vld [vmem:[#allocation63_spill] sm:$0xff] }
 0x2da   : > { %v1129_v63 = vpop.f32.mrf.mxu3 }
 0x2db   : > { %v4389_v8 = vadd.f32 %v1129_v63, %v4916_v55  ;;  %v1781_v63 = vld [vmem:[#allocation2 + $0xa8] sm:$0xff]  ;;  %v4403_v9 = vpop.f32.mrf.mxu1 }
 0x2df   : > { %1860 = vmatmul.f32.gmra.mxu3 %v1779_v28  ;;  %v4919_v28 = vld [vmem:[#allocation67_spill] sm:$0xff] }
 0x2e0   : > { %2296 = vmatmul.f32.gmra.mxu1 %v4287_v22 }
 0x2e2   : > { %v1132_v53 = vpop.f32.mrf.mxu3 }
 0x2e3   : > { %v4393_v42 = vadd.f32 %v1132_v53, %v4917_v30  ;;  %v1782_v53 = vld [vmem:[#allocation2 + $0xb0] sm:$0xff]  ;;  %v4921_v30 = vld [vmem:[#allocation70_spill] sm:$0xff] }
 0x2e7   : > { %1863 = vmatmul.f32.gmra.mxu3 %v1780_v47 }
 0x2e8   : > { %2299 = vmatmul.f32.gmra.mxu1 %v4300_v19 }
 0x2ea   : > { %v1135_v5 = vpop.f32.mrf.mxu3 }
 0x2eb   : > { %v4397_v43 = vadd.f32 %v1135_v5, %v4918_v37  ;;  %v4409_v5 = vpop.f32.mrf.mxu1  ;;  %v1783_v37 = vld [vmem:[#allocation2 + $0xc0] sm:$0xff] }
 0x2ef   : > { %1866 = vmatmul.f32.gmra.mxu3 %v1781_v63  ;;  %v4923_v63 = vld [vmem:[#allocation75_spill] sm:$0xff] }
 0x2f0   : > { %2302 = vmatmul.f32.gmra.mxu1 %v4311_v20 }
 0x2f2   : > { %v1138_v55 = vpop.f32.mrf.mxu3 }
 0x2f3   : > { %v4401_v22 = vadd.f32 %v1138_v55, %v4919_v28  ;;  %v1784_v28 = vld [vmem:[#allocation2 + $0xc8] sm:$0xff] }
 0x2f5   : > { %4920 = vst [vmem:[#allocation73_spill] sm:$0xff] %v4401_v22  ;;  %v4415_v22 = vpop.f32.mrf.mxu1 }
 0x2f7   : > { %1869 = vmatmul.f32.gmra.mxu3 %v1782_v53  ;;  %v4925_v53 = vld [vmem:[#allocation78_spill] sm:$0xff] }
 0x2f8   : > { %2305 = vmatmul.f32.gmra.mxu1 %v4324_v12 }
 0x2fa   : > { %v1141_v19 = vpop.f32.mrf.mxu3 }
 0x2fb   : > { %v4407_v47 = vadd.f32 %v1141_v19, %v4921_v30  ;;  %v1785_v30 = vld [vmem:[#allocation2 + $0xd8] sm:$0xff] }
 0x2fd   : > { %4922 = vst [vmem:[#allocation43_spill] sm:$0xff] %v4407_v47 }
 0x2ff   : > { %1872 = vmatmul.f32.gmra.mxu3 %v1783_v37 }
 0x300   : > { %2308 = vmatmul.f32.gmra.mxu1 %v4337_v6  ;;  %v1786_v6 = vld [vmem:[#allocation2 + $0xe0] sm:$0xff] }
 0x302   : > { %v1144_v20 = vpop.f32.mrf.mxu3 }
 0x303   : > { %v4413_v55 = vadd.f32 %v1144_v20, %v4923_v63 }
 0x305   : > { %4924 = vst [vmem:[#allocation77_spill] sm:$0xff] %v4413_v55  ;;  %v2049_v55 = vpop.f32.mrf.mxu0 }
 0x307   : > { %1875 = vmatmul.f32.gmra.mxu3 %v1784_v28  ;;  %v1787_v28 = vld [vmem:[#allocation2 + $0xf0] sm:$0xff] }
 0x308   : > { %2311 = vmatmul.f32.gmra.mxu1 %v4347_v15 }
 0x30a   : > { %v1147_v12 = vpop.f32.mrf.mxu3 }
 0x30b   : > { %v4419_v19 = vadd.f32 %v1147_v12, %v4925_v53  ;;  %v2243_v12 = vpop.f32.mrf.mxu1 }
 0x30d   : > { %4926 = vst [vmem:[#allocation45_spill] sm:$0xff] %v4419_v19 }
 0x30f   : > { %1878 = vmatmul.f32.gmra.mxu3 %v1785_v30  ;;  %v1788_v30 = vld [vmem:[#allocation2 + $0xf8] sm:$0xff] }
 0x312   : > { %v1150_v47 = vpop.f32.mrf.mxu3 }
 0x313   : > { %v4422_v37 = vadd.f32 %v1150_v47, %v4111_v23 }
 0x317   : > { %1881 = vmatmul.f32.gmra.mxu3 %v1786_v6 }
 0x31a   : > { %v1153_v20 = vpop.f32.mrf.mxu3 }
 0x31b   : > { %v4425_v63 = vadd.f32 %v1153_v20, %v4124_v48  ;;  %v2052_v48 = vpop.f32.mrf.mxu0  ;;  %v2246_v20 = vpop.f32.mrf.mxu1 }
 0x31d   : > { %4927 = vst [vmem:[#allocation46_spill] sm:$0xff] %v4425_v63 }
 0x31f   : > { %1884 = vmatmul.f32.gmra.mxu3 %v1787_v28  ;;  %v1789_v28 = vld [vmem:[#allocation2 + $0x108] sm:$0xff] }
 0x322   : > { %v1837_v15 = vpop.f32.mrf.mxu3 }
 0x323   : > { %v1933_v31 = vadd.f32 %v1837_v15, %v4140_v29  ;;  %v1666_v29 = vpop.f32.mrf.mxu2  ;;  %v2055_v15 = vpop.f32.mrf.mxu0 }
 0x325   : > { %v2127_v53 = vadd.f32 %v4266_v27, %v1933_v31 }
 0x327   : > { %1887 = vmatmul.f32.gmra.mxu3 %v1788_v30  ;;  %v2321_v19 = vadd.f32 %v2225_v26, %v2127_v53 }
 0x329   : > { %2385 = vrot.lane.b32.xlu0 %v2321_v19, %s2860_s6  ;;  %v1790_v19 = vld [vmem:[#allocation2 + $0x110] sm:$0xff] }
 0x32a   : > { %v1840_v23 = vpop.f32.mrf.mxu3 }
 0x32b   : > { %v1934_v47 = vadd.f32 %v1840_v23, %v4155_v60  ;;  %v2249_v60 = vpop.f32.mrf.mxu1 }
 0x32d   : > { %v2128_v6 = vadd.f32 %v4279_v40, %v1934_v47  ;;  %v1669_v40 = vpop.f32.mrf.mxu2  ;;  %v1791_v47 = vld [vmem:[#allocation2 + $0x120] sm:$0xff] }
 0x32f   : > { %1890 = vmatmul.f32.gmra.mxu3 %v1789_v28  ;;  %v2322_v63 = vadd.f32 %v2228_v51, %v2128_v6 }
 0x331   : > { %2387 = vrot.lane.b32.xlu0 %v2322_v63, %s2860_s6 }
 0x332   : > { %v1843_v31 = vpop.f32.mrf.mxu3 }
 0x333   : > { %v1935_v27 = vadd.f32 %v1843_v31, %v4171_v1  ;;  %v2058_v1 = vpop.f32.mrf.mxu0 }
 0x335   : > { %v2129_v26 = vadd.f32 %v4298_v35, %v1935_v27  ;;  %v2252_v35 = vpop.f32.mrf.mxu1  ;;  %v1672_v28 = vpop.f32.mrf.mxu2  ;;  %v1792_v27 = vld [vmem:[#allocation2 + $0x128] sm:$0xff] }
 0x337   : > { %1893 = vmatmul.f32.gmra.mxu3 %v1790_v19  ;;  %v2323_v53 = vadd.f32 %v2231_v38, %v2129_v26 }
 0x339   : > { %2389 = vrot.lane.b32.xlu1 %v2323_v53, %s2860_s6 }
 0x33a   : > { %v1846_v30 = vpop.f32.mrf.mxu3 }
 0x33b   : > { %v1936_v23 = vadd.f32 %v1846_v30, %v4186_v17 }
 0x33d   : > { %v2130_v51 = vadd.f32 %v4313_v39, %v1936_v23  ;;  %v2061_v39 = vpop.f32.mrf.mxu0  ;;  %v4445_v19 = vpop.f32.mrf.mxu1 }
 0x33e   : > { %v4448_v30 = vpop.f32.mrf.mxu2 }
 0x33f   : > { %1896 = vmatmul.f32.gmra.mxu3 %v1791_v47  ;;  %v2324_v63 = vadd.f32 %v4403_v9, %v2130_v51 }
 0x341   : > { %2391 = vrot.lane.b32.xlu1 %v2324_v63, %s2860_s6 }
 0x342   : > { %v1849_v6 = vpop.f32.mrf.mxu3 }
 0x343   : > { %v1937_v38 = vadd.f32 %v1849_v6, %v4204_v11  ;;  %v1793_v11 = vld [vmem:[#allocation2 + $0x138] sm:$0xff] }
 0x345   : > { %v2131_v31 = vadd.f32 %v4330_v45, %v1937_v38  ;;  %v4453_v51 = vpop.f32.mrf.mxu0  ;;  %v4455_v63 = vpop.f32.mrf.mxu1 }
 0x347   : > { %1899 = vmatmul.f32.gmra.mxu3 %v1792_v27  ;;  %v2325_v17 = vadd.f32 %v4409_v5, %v2131_v31 }
 0x349   : > { %2393 = vrot.lane.b32.xlu2 %v2325_v17, %s2860_s6 }
 0x34a   : > { %v1852_v26 = vpop.f32.mrf.mxu3 }
 0x34b   : > { %v1938_v9 = vadd.f32 %v1852_v26, %v4217_v0  ;;  %v1794_v0 = vld [vmem:[#allocation2 + $0x140] sm:$0xff]  ;;  %v1795_v26 = vld [vmem:[#allocation2 + $0x150] sm:$0xff] }
 0x34d   : > { %v2132_v53 = vadd.f32 %v4343_v58, %v1938_v9  ;;  %v4457_v58 = vpop.f32.mrf.mxu2 }
 0x34f   : > { %1902 = vmatmul.f32.gmra.mxu3 %v1793_v11  ;;  %v2326_v45 = vadd.f32 %v4415_v22, %v2132_v53  ;;  %v4928_v22 = vld [vmem:[#allocation34_spill] sm:$0xff]  ;;  %v4466_v11 = vpop.f32.mrf.mxu1 }
 0x350   : > { %v1358_v31 = vadd.f32 %v4928_v22, %v4247_v33  ;;  %v4930_v33 = vld [vmem:[#allocation35_spill] sm:$0xff] }
 0x351   : > { %2395 = vrot.lane.b32.xlu2 %v2326_v45, %s2860_s6 }
 0x352   : > { %v1855_v23 = vpop.f32.mrf.mxu3 }
 0x353   : > { %v1939_v5 = vadd.f32 %v1855_v23, %v4235_v52  ;;  %v4463_v52 = vpop.f32.mrf.mxu0 }
 0x355   : > { %v2133_v47 = vadd.f32 %v2049_v55, %v1939_v5  ;;  %v4929_v55 = vld [vmem:[#allocation57_spill] sm:$0xff]  ;;  %v4469_v45 = vpop.f32.mrf.mxu2  ;;  %v1359_v5 = vadd.f32 %v4930_v33, %v4264_v13  ;;  %v4934_v33 = vld [vmem:[#allocation40_spill] sm:$0xff] }
 0x356   : > { %v1552_v9 = vadd.f32 %v4929_v55, %v1358_v31  ;;  %v1797_v55 = vld [vmem:[#allocation2 + $0x168] sm:$0xff] }
 0x357   : > { %1905 = vmatmul.f32.gmra.mxu3 %v1794_v0  ;;  %v2327_v6 = vadd.f32 %v2243_v12, %v2133_v47  ;;  %v1796_v47 = vld [vmem:[#allocation2 + $0x158] sm:$0xff]  ;;  %v4931_v0 = vld [vmem:[#allocation61_spill] sm:$0xff] }
 0x358   : > { %v1746_v12 = vadd.f32 %v1666_v29, %v1552_v9  ;;  %v4477_v29 = vpop.f32.mrf.mxu1  ;;  %v4933_v9 = vld [vmem:[#allocation65_spill] sm:$0xff] }
 0x359   : > { %2397 = vrot.lane.b32.xlu0 %v2327_v6, %s2860_s6  ;;  %v1553_v6 = vadd.f32 %v4931_v0, %v1359_v5  ;;  %v1361_v5 = vadd.f32 %v4934_v33, %v4291_v54  ;;  %v1798_v0 = vld [vmem:[#allocation2 + $0x170] sm:$0xff]  ;;  %v4936_v54 = vld [vmem:[#allocation42_spill] sm:$0xff] }
 0x35a   : > { %v1858_v38 = vpop.f32.mrf.mxu3 }
 0x35b   : > { %v1940_v27 = vadd.f32 %v1858_v38, %v4250_v24  ;;  %v4474_v22 = vpop.f32.mrf.mxu0 }
 0x35d   : > { %v2134_v17 = vadd.f32 %v2052_v48, %v1940_v27  ;;  %v4932_v27 = vld [vmem:[#allocation38_spill] sm:$0xff]  ;;  %v4481_v13 = vpop.f32.mrf.mxu2 }
 0x35f   : > { %1908 = vmatmul.f32.gmra.mxu3 %v1795_v26  ;;  %v2328_v53 = vadd.f32 %v2246_v20, %v2134_v17  ;;  %v1747_v20 = vadd.f32 %v1669_v40, %v1553_v6  ;;  %v1360_v17 = vadd.f32 %v4932_v27, %v4277_v61  ;;  %v1362_v27 = vadd.f32 %v4936_v54, %v4304_v41 }
 0x360   : > { %v2267_v61 = vpop.f32.mrf.mxu1 }
 0x361   : > { %2399 = vrot.lane.b32.xlu1 %v2328_v53, %s2860_s6  ;;  %v1554_v53 = vadd.f32 %v4933_v9, %v1360_v17 }
 0x362   : > { %v1861_v23 = vpop.f32.mrf.mxu3 }
 0x363   : > { %v1941_v24 = vadd.f32 %v1861_v23, %v1746_v12  ;;  %v1748_v12 = vadd.f32 %v1672_v28, %v1554_v53  ;;  %v4485_v40 = vpop.f32.mrf.mxu0  ;;  %v2189_v28 = vld [vmem:[#allocation2 + $0x19a] sm:$0xff] }
 0x364   : > { %2314 = vmatmul.f32.gmra.mxu1 %v2189_v28 }
 0x365   : > { %v2135_v48 = vadd.f32 %v2055_v15, %v1941_v24 }
 0x367   : > { %1911 = vmatmul.f32.gmra.mxu3 %v1796_v47  ;;  %v2329_v38 = vadd.f32 %v2249_v60, %v2135_v48  ;;  %v1687_v47 = vpop.f32.mrf.mxu2 }
 0x369   : > { %2401 = vrot.lane.b32.xlu2 %v2329_v38, %s2860_s6 }
 0x36a   : > { %v1864_v31 = vpop.f32.mrf.mxu3 }
 0x36b   : > { %v1942_v26 = vadd.f32 %v1864_v31, %v1747_v20  ;;  %v2076_v17 = vpop.f32.mrf.mxu0 }
 0x36d   : > { %v2136_v15 = vadd.f32 %v2058_v1, %v1942_v26  ;;  %v4935_v1 = vld [vmem:[#allocation69_spill] sm:$0xff] }
 0x36e   : > { %v1555_v6 = vadd.f32 %v4935_v1, %v1361_v5  ;;  %v4939_v1 = vld [vmem:[#allocation79_spill] sm:$0xff] }
 0x36f   : > { %1914 = vmatmul.f32.gmra.mxu3 %v1797_v55  ;;  %v2330_v60 = vadd.f32 %v2252_v35, %v2136_v15  ;;  %v1995_v35 = vld [vmem:[#allocation2 + $0x199] sm:$0xff]  ;;  %v4496_v15 = vpop.f32.mrf.mxu1 }
 0x370   : > { %2120 = vmatmul.f32.gmra.mxu0 %v1995_v35  ;;  %v1749_v20 = vadd.f32 %v4448_v30, %v1555_v6  ;;  %v1799_v55 = vld [vmem:[#allocation2 + $0x180] sm:$0xff] }
 0x371   : > { %2403 = vrot.lane.b32.xlu0 %v2330_v60, %s2860_s6  ;;  %v1690_v60 = vpop.f32.mrf.mxu2  ;;  %v1996_v30 = vld [vmem:[#allocation2 + $0x1a1] sm:$0xff] }
 0x372   : > { %v1867_v23 = vpop.f32.mrf.mxu3 }
 0x373   : > { %v1943_v24 = vadd.f32 %v1867_v23, %v1748_v12  ;;  %v2190_v12 = vld [vmem:[#allocation2 + $0x1a2] sm:$0xff] }
 0x374   : > { %2317 = vmatmul.f32.gmra.mxu1 %v2190_v12 }
 0x375   : > { %v2137_v48 = vadd.f32 %v2061_v39, %v1943_v24 }
 0x377   : > { %1917 = vmatmul.f32.gmra.mxu3 %v1798_v0  ;;  %v2331_v38 = vadd.f32 %v4445_v19, %v2137_v48  ;;  %v4937_v19 = vld [vmem:[#allocation74_spill] sm:$0xff]  ;;  %v2079_v48 = vpop.f32.mrf.mxu0 }
 0x378   : > { %v1556_v9 = vadd.f32 %v4937_v19, %v1362_v27  ;;  %2123 = vmatmul.f32.gmra.mxu0 %v1996_v30  ;;  %v1800_v0 = vld [vmem:[#allocation2 + $0x188] sm:$0xff]  ;;  %v2849_v27 = vld [vmem:[#allocation2] sm:$0xff] }
 0x379   : > { %2405 = vrot.lane.b32.xlu1 %v2331_v38, %s2860_s6  ;;  %v2273_v38 = vpop.f32.mrf.mxu1  ;;  %v1693_v35 = vpop.f32.mrf.mxu2  ;;  %v4941_v19 = vld [vmem:[#allocation49_spill] sm:$0xff] }
 0x37a   : > { %v1870_v31 = vpop.f32.mrf.mxu3  ;;  %v1750_v23 = vadd.f32 %v4457_v58, %v1556_v9 }
 0x37b   : > { %v1944_v39 = vadd.f32 %v1870_v31, %v1749_v20  ;;  %v4940_v20 = vld [vmem:[#allocation47_spill] sm:$0xff] }
 0x37d   : > { %v2138_v26 = vadd.f32 %v4453_v51, %v1944_v39  ;;  %v4938_v51 = vld [vmem:[#allocation44_spill] sm:$0xff] }
 0x37e   : > { %v1363_v33 = vadd.f32 %v4938_v51, %v4317_v7  ;;  %v1364_v7 = vadd.f32 %v4940_v20, %v4328_v32  ;;  %v1365_v32 = vadd.f32 %v4941_v19, %v4341_v21  ;;  %v4942_v21 = vld [vmem:[#allocation51_spill] sm:$0xff] }
 0x37f   : > { %1920 = vmatmul.f32.gmra.mxu3 %v1799_v55  ;;  %v2332_v53 = vadd.f32 %v4455_v63, %v2138_v26 }
 0x380   : > { %v1557_v63 = vadd.f32 %v4939_v1, %v1363_v33  ;;  %v1558_v54 = vadd.f32 %v4117_v16, %v1364_v7 }
 0x381   : > { %2407 = vrot.lane.b32.xlu2 %v2332_v53, %s2860_s6  ;;  %v4520_v53 = vpop.f32.mrf.mxu2 }
 0x382   : > { %v1873_v41 = vpop.f32.mrf.mxu3  ;;  %v1751_v58 = vadd.f32 %v4469_v45, %v1557_v63  ;;  %v1752_v26 = vadd.f32 %v4481_v13, %v1558_v54  ;;  %v4516_v45 = vpop.f32.mrf.mxu1 }
 0x383   : > { %v1945_v5 = vadd.f32 %v1873_v41, %v1750_v23  ;;  %v1366_v23 = vadd.f32 %v4942_v21, %v4351_v50 }
 0x385   : > { %v2139_v24 = vadd.f32 %v4463_v52, %v1945_v5  ;;  %v2850_v5 = vld [vmem:[%s2937_s20] sm:$0xff]  ;;  %v1560_v50 = vadd.f32 %v4153_v44, %v1366_v23 }
 0x387   : > { %1923 = vmatmul.f32.gmra.mxu3 %v1800_v0  ;;  %v2333_v6 = vadd.f32 %v4466_v11, %v2139_v24  ;;  %v2082_v11 = vpop.f32.mrf.mxu0  ;;  %v1754_v1 = vadd.f32 %v1690_v60, %v1560_v50 }
 0x389   : > { %2409 = vrot.lane.b32.xlu0 %v2333_v6, %s2860_s6  ;;  %v4943_v6 = vld [vmem:[#allocation53_spill] sm:$0xff] }
 0x38a   : > { %v1876_v28 = vpop.f32.mrf.mxu3  ;;  %v4529_v33 = vpop.f32.mrf.mxu1 }
 0x38b   : > { %v1946_v31 = vadd.f32 %v1876_v28, %v1751_v58  ;;  %v1367_v58 = vadd.f32 %v4943_v6, %v4357_v62 }
 0x38d   : > { %v2140_v52 = vadd.f32 %v4474_v22, %v1946_v31  ;;  %v1559_v22 = vadd.f32 %v4137_v49, %v1365_v32 }
 0x38f   : > { %1926 = vmatmul.f32.gmra.mxu3 %v2849_v27  ;;  %v2334_v39 = vadd.f32 %v4477_v29, %v2140_v52  ;;  %v1753_v13 = vadd.f32 %v1687_v47, %v1559_v22  ;;  %v4525_v30 = vpop.f32.mrf.mxu0  ;;  %v1699_v47 = vpop.f32.mrf.mxu2 }
 0x391   : > { %2411 = vrot.lane.b32.xlu1 %v2334_v39, %s2860_s6 }
 0x392   : > { %v1879_v55 = vpop.f32.mrf.mxu3  ;;  %v2282_v54 = vpop.f32.mrf.mxu1 }
 0x393   : > { %v1947_v9 = vadd.f32 %v1879_v55, %v1752_v26  ;;  %v4945_v26 = vld [vmem:[#allocation10_spill] sm:$0xff]  ;;  %v1561_v55 = vadd.f32 %v4175_v57, %v1367_v58 }
 0x395   : > { %v2141_v16 = vadd.f32 %v4485_v40, %v1947_v9  ;;  %v1755_v9 = vadd.f32 %v1693_v35, %v1561_v55 }
 0x397   : > { %1929 = vmatmul.f32.gmra.mxu3 %v2849_v27  ;;  %v2335_v29 = vadd.f32 %v2267_v61, %v2141_v16  ;;  %v2088_v7 = vpop.f32.mrf.mxu0  ;;  %v4944_v27 = vld [vmem:[#allocation4_spill] sm:$0xff]  ;;  %v1702_v32 = vpop.f32.mrf.mxu2 }
 0x399   : > { %2413 = vrot.lane.b32.xlu2 %v2335_v29, %s2860_s6 }
 0x39a   : > { %v1882_v12 = vpop.f32.mrf.mxu3 }
 0x39b   : > { %v1948_v41 = vadd.f32 %v1882_v12, %v1753_v13  ;;  %v2386_v51 = vpop.permute.xlu0 %2385 }
 0x39c   : > { %v2482_v49 = vsel %vm2481_vm0, 0.0, %v2386_v51  ;;  %v4947_v51 = vld [vmem:[#allocation6_spill] sm:$0xff] }
 0x39d   : > { %v2142_v40 = vadd.f32 %v2076_v17, %v1948_v41  ;;  %v2515_v61 = vsel %vm2514_vm1, %v2482_v49, 0.0 }
 0x39e   : > { %v2547_v24 = vadd.f32 %v2850_v5, %v2515_v61 }
 0x39f   : > { %v2336_v0 = vadd.f32 %v4496_v15, %v2142_v40  ;;  %v2091_v41 = vpop.f32.mrf.mxu0  ;;  %v4948_v40 = vld [vmem:[#allocation12_spill] sm:$0xff] }
 0x3a0   : > { %2579 = vst [vmem:[%s4537_s10] sm:$0xff] %v2547_v24  ;;  %v2285_v24 = vpop.f32.mrf.mxu1 }
 0x3a1   : > { %2415 = vrot.lane.b32.xlu0 %v2336_v0, %s2860_s6 }
 0x3a2   : > { %v1885_v63 = vpop.f32.mrf.mxu3 }
 0x3a3   : > { %v1949_v28 = vadd.f32 %v1885_v63, %v1754_v1  ;;  %v2388_v17 = vpop.permute.xlu0 %2387  ;;  %v2394_v20 = vpop.permute.xlu2 %2393  ;;  %v4949_v1 = vld [vmem:[#allocation59_spill] sm:$0xff] }
 0x3a4   : > { %v2483_v31 = vsel %vm2481_vm0, 0.0, %v2388_v17  ;;  %v2486_v44 = vsel %vm2481_vm0, 0.0, %v2394_v20  ;;  %v1369_v63 = vadd.f32 %v4949_v1, %v4369_v36  ;;  %v4950_v17 = vld [vmem:[#allocation8_spill] sm:$0xff] }
 0x3a5   : > { %v2143_v52 = vadd.f32 %v2079_v48, %v1949_v28  ;;  %v2516_v15 = vsel %vm2514_vm1, %v2483_v31, 0.0  ;;  %v2519_v60 = vsel %vm2514_vm1, %v2486_v44, 0.0  ;;  %v4946_v48 = vld [vmem:[#allocation56_spill] sm:$0xff] }
 0x3a6   : > { %v2548_v39 = vadd.f32 %v2516_v15, %v4944_v27  ;;  %v2551_v62 = vadd.f32 %v2519_v60, %v4945_v26  ;;  %v1368_v22 = vadd.f32 %v4946_v48, %v4363_v18  ;;  %v4951_v60 = vld [vmem:[#allocation62_spill] sm:$0xff] }
 0x3a7   : > { %v2337_v19 = vadd.f32 %v2273_v38, %v2143_v52  ;;  %v2094_v44 = vpop.f32.mrf.mxu0  ;;  %v1370_v27 = vadd.f32 %v4951_v60, %v4375_v4 }
 0x3a8   : > { %2580 = vst [vmem:[%s4537_s10 + $0x8] sm:$0xff] %v2548_v39  ;;  %v1562_v18 = vadd.f32 %v4195_v25, %v1368_v22  ;;  %v2288_v36 = vpop.f32.mrf.mxu1 }
 0x3a9   : > { %2583 = vst [vmem:[%s4537_s10 + $0x20] sm:$0xff] %v2551_v62  ;;  %2417 = vrot.lane.b32.xlu1 %v2337_v19, %s2860_s6  ;;  %v1564_v62 = vadd.f32 %v4233_v46, %v1370_v27  ;;  %v4953_v46 = vld [vmem:[#allocation18_spill] sm:$0xff] }
 0x3aa   : > { %v1888_v16 = vpop.f32.mrf.mxu3  ;;  %v1756_v50 = vadd.f32 %v4520_v53, %v1562_v18  ;;  %v1563_v53 = vadd.f32 %v4214_v59, %v1369_v63 }
 0x3ab   : > { %v1950_v29 = vadd.f32 %v1888_v16, %v1755_v9  ;;  %v2390_v13 = vpop.permute.xlu1 %2389  ;;  %v2396_v12 = vpop.permute.xlu2 %2395  ;;  %v1758_v59 = vadd.f32 %v1702_v32, %v1564_v62 }
 0x3ac   : > { %v2484_v21 = vsel %vm2481_vm0, 0.0, %v2390_v13  ;;  %v2487_v57 = vsel %vm2481_vm0, 0.0, %v2396_v12  ;;  %v1757_v52 = vadd.f32 %v1699_v47, %v1563_v53  ;;  %v4952_v47 = vld [vmem:[#allocation66_spill] sm:$0xff] }
 0x3ad   : > { %v2144_v38 = vadd.f32 %v2082_v11, %v1950_v29  ;;  %v2517_v23 = vsel %vm2514_vm1, %v2484_v21, 0.0  ;;  %v2520_v35 = vsel %vm2514_vm1, %v2487_v57, 0.0  ;;  %v1705_v11 = vpop.f32.mrf.mxu2  ;;  %v1371_v9 = vadd.f32 %v4952_v47, %v4379_v3  ;;  %v4954_v57 = vld [vmem:[#allocation72_spill] sm:$0xff] }
 0x3ae   : > { %v2549_v49 = vadd.f32 %v2517_v23, %v4947_v51  ;;  %v2552_v61 = vadd.f32 %v2520_v35, %v4948_v40 }
 0x3af   : > { %v2338_v5 = vadd.f32 %v4516_v45, %v2144_v38  ;;  %v1565_v32 = vadd.f32 %v4257_v34, %v1371_v9  ;;  %v1372_v38 = vadd.f32 %v4954_v57, %v4385_v2  ;;  %v4955_v34 = vld [vmem:[#allocation14_spill] sm:$0xff]  ;;  %v4960_v9 = vld [vmem:[#allocation81_spill] sm:$0xff] }
 0x3b0   : > { %2581 = vst [vmem:[%s4537_s10 + $0x10] sm:$0xff] %v2549_v49  ;;  %v2291_v22 = vpop.f32.mrf.mxu1  ;;  %v4963_v57 = vld [vmem:[#allocation73_spill] sm:$0xff] }
 0x3b1   : > { %2584 = vst [vmem:[%s4537_s10 + $0x28] sm:$0xff] %v2552_v61  ;;  %2419 = vrot.lane.b32.xlu2 %v2338_v5, %s2860_s6  ;;  %v1759_v21 = vadd.f32 %v1705_v11, %v1565_v32  ;;  %v1566_v5 = vadd.f32 %v4271_v56, %v1372_v38  ;;  %v4957_v56 = vld [vmem:[#allocation16_spill] sm:$0xff]  ;;  %v4964_v38 = vld [vmem:[#allocation82_spill] sm:$0xff] }
 0x3b2   : > { %v1891_v0 = vpop.f32.mrf.mxu3 }
 0x3b3   : > { %v1951_v6 = vadd.f32 %v1891_v0, %v1756_v50  ;;  %v2392_v58 = vpop.permute.xlu1 %2391  ;;  %v4956_v0 = vld [vmem:[#allocation76_spill] sm:$0xff] }
 0x3b4   : > { %v2485_v28 = vsel %vm2481_vm0, 0.0, %v2392_v58  ;;  %v1373_v1 = vadd.f32 %v4956_v0, %v4389_v8 }
 0x3b5   : > { %v2145_v25 = vadd.f32 %v4525_v30, %v1951_v6  ;;  %v2518_v45 = vsel %vm2514_vm1, %v2485_v28, 0.0  ;;  %v1708_v30 = vpop.f32.mrf.mxu2 }
 0x3b6   : > { %v2550_v20 = vadd.f32 %v2518_v45, %v4950_v17  ;;  %v1760_v11 = vadd.f32 %v1708_v30, %v1566_v5 }
 0x3b7   : > { %v2339_v31 = vadd.f32 %v4529_v33, %v2145_v25  ;;  %v2097_v33 = vpop.f32.mrf.mxu0 }
 0x3b8   : > { %2582 = vst [vmem:[%s4537_s10 + $0x18] sm:$0xff] %v2550_v20  ;;  %v2294_v61 = vpop.f32.mrf.mxu1  ;;  %v1567_v20 = vadd.f32 %v4293_v14, %v1373_v1  ;;  %v4959_v14 = vld [vmem:[#allocation24_spill] sm:$0xff]  ;;  %v4967_v1 = vld [vmem:[#allocation43_spill] sm:$0xff] }
 0x3b9   : > { %2421 = vrot.lane.b32.xlu0 %v2339_v31, %s2860_s6 }
 0x3ba   : > { %v1894_v15 = vpop.f32.mrf.mxu3 }
 0x3bb   : > { %v1952_v39 = vadd.f32 %v1894_v15, %v1757_v52 }
 0x3bd   : > { %v2146_v26 = vadd.f32 %v2088_v7, %v1952_v39  ;;  %v1711_v13 = vpop.f32.mrf.mxu2 }
 0x3bf   : > { %v2340_v55 = vadd.f32 %v2282_v54, %v2146_v26 }
 0x3c0   : > { %v2297_v31 = vpop.f32.mrf.mxu1 }
 0x3c1   : > { %2423 = vrot.lane.b32.xlu1 %v2340_v55, %s2860_s6 }
 0x3c2   : > { %v1897_v19 = vpop.f32.mrf.mxu3 }
 0x3c3   : > { %v1953_v16 = vadd.f32 %v1897_v19, %v1758_v59  ;;  %v2402_v48 = vpop.permute.xlu2 %2401 }
 0x3c4   : > { %v2490_v4 = vsel %vm2481_vm0, 0.0, %v2402_v48 }
 0x3c5   : > { %v2147_v29 = vadd.f32 %v2091_v41, %v1953_v16  ;;  %v2523_v7 = vsel %vm2514_vm1, %v2490_v4, 0.0  ;;  %v2100_v41 = vpop.f32.mrf.mxu0  ;;  %v1714_v50 = vpop.f32.mrf.mxu2  ;;  %v1375_v16 = vadd.f32 %v4960_v9, %v4397_v43 }
 0x3c6   : > { %v2555_v54 = vadd.f32 %v2523_v7, %v4953_v46 }
 0x3c7   : > { %v2341_v12 = vadd.f32 %v2285_v24, %v2147_v29 }
 0x3c8   : > { %2587 = vst [vmem:[%s4537_s10 + $0x40] sm:$0xff] %v2555_v54  ;;  %v2300_v47 = vpop.f32.mrf.mxu1  ;;  %v4962_v54 = vld [vmem:[#allocation36_spill] sm:$0xff] }
 0x3c9   : > { %2425 = vrot.lane.b32.xlu2 %v2341_v12, %s2860_s6  ;;  %v1569_v32 = vadd.f32 %v4962_v54, %v1375_v16 }
 0x3ca   : > { %v1900_v3 = vpop.f32.mrf.mxu3 }
 0x3cb   : > { %v1954_v23 = vadd.f32 %v1900_v3, %v1759_v21  ;;  %v2398_v35 = vpop.permute.xlu0 %2397 }
 0x3cc   : > { %v2488_v51 = vsel %vm2481_vm0, 0.0, %v2398_v35 }
 0x3cd   : > { %v2148_v49 = vadd.f32 %v2094_v44, %v1954_v23  ;;  %v2521_v40 = vsel %vm2514_vm1, %v2488_v51, 0.0  ;;  %v2103_v45 = vpop.f32.mrf.mxu0  ;;  %v1761_v44 = vadd.f32 %v1711_v13, %v1567_v20  ;;  %v1717_v8 = vpop.f32.mrf.mxu2  ;;  %v4961_v13 = vld [vmem:[#allocation20_spill] sm:$0xff]  ;;  %v1376_v23 = vadd.f32 %v4964_v38, %v4963_v57  ;;  %v4978_v57 = vld [vmem:[#allocation39_spill] sm:$0xff] }
 0x3ce   : > { %v2553_v18 = vadd.f32 %v2521_v40, %v4955_v34  ;;  %v1763_v21 = vadd.f32 %v1717_v8, %v1569_v32 }
 0x3cf   : > { %v2342_v24 = vadd.f32 %v2288_v36, %v2148_v49  ;;  %v4958_v36 = vld [vmem:[#allocation80_spill] sm:$0xff] }
 0x3d0   : > { %2585 = vst [vmem:[%s4537_s10 + $0x30] sm:$0xff] %v2553_v18  ;;  %v1374_v15 = vadd.f32 %v4958_v36, %v4393_v42  ;;  %v2303_v51 = vpop.f32.mrf.mxu1  ;;  %v4965_v18 = vld [vmem:[#allocation22_spill] sm:$0xff] }
 0x3d1   : > { %2427 = vrot.lane.b32.xlu0 %v2342_v24, %s2860_s6  ;;  %v4966_v24 = vld [vmem:[#allocation64_spill] sm:$0xff] }
 0x3d2   : > { %v1903_v2 = vpop.f32.mrf.mxu3  ;;  %v1568_v55 = vadd.f32 %v4306_v10, %v1374_v15 }
 0x3d3   : > { %v1955_v63 = vadd.f32 %v1903_v2, %v1760_v11  ;;  %v2400_v6 = vpop.permute.xlu1 %2399 }
 0x3d4   : > { %v2489_v58 = vsel %vm2481_vm0, 0.0, %v2400_v6  ;;  %v1762_v19 = vadd.f32 %v1714_v50, %v1568_v55  ;;  %v1570_v50 = vadd.f32 %v4966_v24, %v1376_v23 }
 0x3d5   : > { %v2149_v28 = vadd.f32 %v2097_v33, %v1955_v63  ;;  %v2522_v25 = vsel %vm2514_vm1, %v2489_v58, 0.0  ;;  %v2106_v33 = vpop.f32.mrf.mxu0  ;;  %v1720_v4 = vpop.f32.mrf.mxu2  ;;  %v4968_v63 = vld [vmem:[#allocation83_spill] sm:$0xff] }
 0x3d6   : > { %v2554_v17 = vadd.f32 %v2522_v25, %v4957_v56  ;;  %v1764_v2 = vadd.f32 %v1720_v4, %v1570_v50  ;;  %v1377_v6 = vadd.f32 %v4968_v63, %v4967_v1  ;;  %v4981_v1 = vld [vmem:[#allocation71_spill] sm:$0xff] }
 0x3d7   : > { %v2343_v53 = vadd.f32 %v2291_v22, %v2149_v28 }
 0x3d8   : > { %2586 = vst [vmem:[%s4537_s10 + $0x38] sm:$0xff] %v2554_v17  ;;  %v2306_v20 = vpop.f32.mrf.mxu1 }
 0x3d9   : > { %2429 = vrot.lane.b32.xlu1 %v2343_v53, %s2860_s6  ;;  %v4969_v53 = vld [vmem:[#allocation30_spill] sm:$0xff] }
 0x3da   : > { %v1906_v52 = vpop.f32.mrf.mxu3 }
 0x3db   : > { %v1956_v60 = vadd.f32 %v1906_v52, %v1761_v44  ;;  %v2408_v27 = vpop.permute.xlu2 %2407  ;;  %v4970_v44 = vld [vmem:[#allocation37_spill] sm:$0xff] }
 0x3dc   : > { %v2493_v39 = vsel %vm2481_vm0, 0.0, %v2408_v27  ;;  %v1571_v8 = vadd.f32 %v4970_v44, %v1377_v6  ;;  %v4971_v27 = vld [vmem:[#allocation77_spill] sm:$0xff] }
 0x3dd   : > { %v2150_v30 = vadd.f32 %v2100_v41, %v1956_v60  ;;  %v2526_v26 = vsel %vm2514_vm1, %v2493_v39, 0.0  ;;  %v2109_v3 = vpop.f32.mrf.mxu0  ;;  %v1723_v34 = vpop.f32.mrf.mxu2  ;;  %v4972_v39 = vld [vmem:[#allocation84_spill] sm:$0xff] }
 0x3de   : > { %v2558_v62 = vadd.f32 %v2526_v26, %v4959_v14  ;;  %v1765_v15 = vadd.f32 %v1723_v34, %v1571_v8 }
 0x3df   : > { %v2344_v59 = vadd.f32 %v2294_v61, %v2150_v30  ;;  %v1378_v30 = vadd.f32 %v4972_v39, %v4971_v27 }
 0x3e0   : > { %2590 = vst [vmem:[%s4537_s10 + $0x58] sm:$0xff] %v2558_v62 }
 0x3e1   : > { %2431 = vrot.lane.b32.xlu2 %v2344_v59, %s2860_s6 }
 0x3e2   : > { %v1909_v42 = vpop.f32.mrf.mxu3 }
 0x3e3   : > { %v1957_v48 = vadd.f32 %v1909_v42, %v1762_v19  ;;  %v2404_v22 = vpop.permute.xlu0 %2403  ;;  %v4973_v19 = vld [vmem:[#allocation26_spill] sm:$0xff]  ;;  %v4974_v42 = vld [vmem:[#allocation68_spill] sm:$0xff] }
 0x3e4   : > { %v2491_v29 = vsel %vm2481_vm0, 0.0, %v2404_v22  ;;  %v1572_v9 = vadd.f32 %v4974_v42, %v1378_v30  ;;  %v4986_v42 = vld [vmem:[#allocation3_spill] sm:$0xff] }
 0x3e5   : > { %v2151_v7 = vadd.f32 %v2103_v45, %v1957_v48  ;;  %v2524_v10 = vsel %vm2514_vm1, %v2491_v29, 0.0  ;;  %v2112_v25 = vpop.f32.mrf.mxu0  ;;  %v1726_v36 = vpop.f32.mrf.mxu2 }
 0x3e6   : > { %v2556_v46 = vadd.f32 %v2524_v10, %v4961_v13  ;;  %v2309_v48 = vpop.f32.mrf.mxu1  ;;  %v1766_v22 = vadd.f32 %v1726_v36, %v1572_v9  ;;  %v4976_v10 = vld [vmem:[#allocation85_spill] sm:$0xff]  ;;  %v4984_v36 = vld [vmem:[#allocation32_spill] sm:$0xff] }
 0x3e7   : > { %v2345_v12 = vadd.f32 %v2297_v31, %v2151_v7  ;;  %v4975_v7 = vld [vmem:[#allocation45_spill] sm:$0xff] }
 0x3e8   : > { %2588 = vst [vmem:[%s4537_s10 + $0x48] sm:$0xff] %v2556_v46  ;;  %v1379_v13 = vadd.f32 %v4976_v10, %v4975_v7 }
 0x3e9   : > { %2433 = vrot.lane.b32.xlu0 %v2345_v12, %s2860_s6 }
 0x3ea   : > { %v1912_v43 = vpop.f32.mrf.mxu3  ;;  %v1573_v38 = vadd.f32 %v4978_v57, %v1379_v13 }
 0x3eb   : > { %v1958_v35 = vadd.f32 %v1912_v43, %v1763_v21  ;;  %v2406_v41 = vpop.permute.xlu1 %2405 }
 0x3ec   : > { %v2492_v49 = vsel %vm2481_vm0, 0.0, %v2406_v41 }
 0x3ed   : > { %v2152_v40 = vadd.f32 %v2106_v33, %v1958_v35  ;;  %v2525_v61 = vsel %vm2514_vm1, %v2492_v49, 0.0  ;;  %v2115_v33 = vpop.f32.mrf.mxu0  ;;  %v1729_v4 = vpop.f32.mrf.mxu2 }
 0x3ee   : > { %v2557_v5 = vadd.f32 %v2525_v61, %v4965_v18  ;;  %v1767_v41 = vadd.f32 %v1729_v4, %v1573_v38 }
 0x3ef   : > { %v2346_v11 = vadd.f32 %v2300_v47, %v2152_v40  ;;  %v4979_v40 = vld [vmem:[#allocation86_spill] sm:$0xff] }
 0x3f0   : > { %2589 = vst [vmem:[%s4537_s10 + $0x50] sm:$0xff] %v2557_v5  ;;  %v1380_v61 = vadd.f32 %v4979_v40, %v4422_v37 }
 0x3f1   : > { %2435 = vrot.lane.b32.xlu1 %v2346_v11, %s2860_s6 }
 0x3f2   : > { %v1915_v0 = vpop.f32.mrf.mxu3  ;;  %v1574_v63 = vadd.f32 %v4981_v1, %v1380_v61 }
 0x3f3   : > { %v1959_v58 = vadd.f32 %v1915_v0, %v1764_v2  ;;  %v2414_v28 = vpop.permute.xlu2 %2413  ;;  %v4980_v2 = vld [vmem:[#allocation5_spill] sm:$0xff] }
 0x3f4   : > { %v2496_v45 = vsel %vm2481_vm0, 0.0, %v2414_v28 }
 0x3f5   : > { %v2153_v56 = vadd.f32 %v2109_v3, %v1959_v58  ;;  %v2529_v17 = vsel %vm2514_vm1, %v2496_v45, 0.0  ;;  %v4977_v3 = vld [vmem:[#allocation28_spill] sm:$0xff]  ;;  %v2118_v35 = vpop.f32.mrf.mxu0  ;;  %v1732_v5 = vpop.f32.mrf.mxu2  ;;  %v4982_v45 = vld [vmem:[#allocation46_spill] sm:$0xff] }
 0x3f6   : > { %v2561_v31 = vadd.f32 %v2529_v17, %v4969_v53  ;;  %v1768_v28 = vadd.f32 %v1732_v5, %v1574_v63 }
 0x3f7   : > { %v2347_v52 = vadd.f32 %v2303_v51, %v2153_v56  ;;  %v2312_v51 = vpop.f32.mrf.mxu1  ;;  %v4983_v56 = vld [vmem:[#allocation87_spill] sm:$0xff] }
 0x3f8   : > { %2593 = vst [vmem:[%s4537_s10 + $0x70] sm:$0xff] %v2561_v31  ;;  %v1381_v17 = vadd.f32 %v4983_v56, %v4982_v45  ;;  %v4994_v45 = vld [vmem:[#allocation19_spill] sm:$0xff] }
 0x3f9   : > { %2437 = vrot.lane.b32.xlu2 %v2347_v52, %s2860_s6 }
 0x3fa   : > { %v1918_v60 = vpop.f32.mrf.mxu3 }
 0x3fb   : > { %v1960_v26 = vadd.f32 %v1918_v60, %v1765_v15  ;;  %v2410_v14 = vpop.permute.xlu0 %2409  ;;  %v4985_v60 = vld [vmem:[#allocation41_spill] sm:$0xff] }
 0x3fc   : > { %v2494_v62 = vsel %vm2481_vm0, 0.0, %v2410_v14  ;;  %v1575_v27 = vadd.f32 %v4985_v60, %v1381_v17 }
 0x3fd   : > { %v2154_v55 = vadd.f32 %v2112_v25, %v1960_v26  ;;  %v2527_v59 = vsel %vm2514_vm1, %v2494_v62, 0.0  ;;  %v2121_v58 = vpop.f32.mrf.mxu0  ;;  %v1735_v52 = vpop.f32.mrf.mxu2 }
 0x3fe   : > { %v2559_v47 = vadd.f32 %v2527_v59, %v4973_v19  ;;  %v1769_v30 = vadd.f32 %v1735_v52, %v1575_v27 }
 0x3ff   : > { %v2348_v16 = vadd.f32 %v2306_v20, %v2154_v55  ;;  %v2315_v25 = vpop.f32.mrf.mxu1 }
 0x400   : > { %2591 = vst [vmem:[%s4537_s10 + $0x60] sm:$0xff] %v2559_v47 }
 0x401   : > { %2439 = vrot.lane.b32.xlu0 %v2348_v16, %s2860_s6 }
 0x402   : > { %v1921_v29 = vpop.f32.mrf.mxu3 }
 0x403   : > { %v1961_v46 = vadd.f32 %v1921_v29, %v1766_v22  ;;  %v2412_v54 = vpop.permute.xlu1 %2411  ;;  %v4987_v29 = vld [vmem:[#allocation11_spill] sm:$0xff] }
 0x404   : > { %v2495_v32 = vsel %vm2481_vm0, 0.0, %v2412_v54  ;;  %v4988_v54 = vld [vmem:[#allocation7_spill] sm:$0xff] }
 0x405   : > { %v2155_v12 = vadd.f32 %v2115_v33, %v1961_v46  ;;  %v2528_v21 = vsel %vm2514_vm1, %v2495_v32, 0.0  ;;  %v2124_v14 = vpop.f32.mrf.mxu0 }
 0x406   : > { %v2560_v43 = vadd.f32 %v2528_v21, %v4977_v3 }
 0x407   : > { %v2349_v23 = vadd.f32 %v2309_v48, %v2155_v12  ;;  %v2318_v33 = vpop.f32.mrf.mxu1 }
 0x408   : > { %2592 = vst [vmem:[%s4537_s10 + $0x68] sm:$0xff] %v2560_v43  ;;  %v4989_v43 = vld [vmem:[#allocation9_spill] sm:$0xff] }
 0x409   : > { %2441 = vrot.lane.b32.xlu1 %v2349_v23, %s2860_s6 }
 0x40a   : > { %v1924_v49 = vpop.f32.mrf.mxu3 }
 0x40b   : > { %v1962_v34 = vadd.f32 %v1924_v49, %v1767_v41  ;;  %v2420_v18 = vpop.permute.xlu2 %2419  ;;  %v4990_v41 = vld [vmem:[#allocation17_spill] sm:$0xff] }
 0x40c   : > { %v2499_v24 = vsel %vm2481_vm0, 0.0, %v2420_v18 }
 0x40d   : > { %v2156_v50 = vadd.f32 %v2118_v35, %v1962_v34  ;;  %v2532_v11 = vsel %vm2514_vm1, %v2499_v24, 0.0  ;;  %v4991_v34 = vld [vmem:[#allocation13_spill] sm:$0xff] }
 0x40e   : > { %v2564_v0 = vadd.f32 %v2532_v11, %v4980_v2  ;;  %v4992_v11 = vld [vmem:[#allocation15_spill] sm:$0xff] }
 0x40f   : > { %v2350_v6 = vadd.f32 %v2312_v51, %v2156_v50 }
 0x410   : > { %2596 = vst [vmem:[%s4537_s10 + $0x88] sm:$0xff] %v2564_v0 }
 0x411   : > { %2443 = vrot.lane.b32.xlu2 %v2350_v6, %s2860_s6  ;;  %v4993_v6 = vld [vmem:[#allocation23_spill] sm:$0xff] }
 0x412   : > { %v1927_v37 = vpop.f32.mrf.mxu3 }
 0x413   : > { %v1963_v20 = vadd.f32 %v1927_v37, %v1768_v28  ;;  %v2416_v53 = vpop.permute.xlu0 %2415 }
 0x414   : > { %v2497_v31 = vsel %vm2481_vm0, 0.0, %v2416_v53 }
 0x415   : > { %v2530_v44 = vsel %vm2514_vm1, %v2497_v31, 0.0  ;;  %v2157_v8 = vadd.f32 %v2121_v58, %v1963_v20  ;;  %v4995_v31 = vld [vmem:[#allocation21_spill] sm:$0xff] }
 0x416   : > { %v2562_v15 = vadd.f32 %v2530_v44, %v4984_v36 }
 0x417   : > { %v2351_v39 = vadd.f32 %v2315_v25, %v2157_v8 }
 0x418   : > { %2594 = vst [vmem:[%s4537_s10 + $0x78] sm:$0xff] %v2562_v15  ;;  %v4996_v15 = vld [vmem:[#allocation29_spill] sm:$0xff] }
 0x419   : > { %2445 = vrot.lane.b32.xlu0 %v2351_v39, %s2860_s6 }
 0x41a   : > { %v1930_v26 = vpop.f32.mrf.mxu3 }
 0x41b   : > { %v1964_v62 = vadd.f32 %v1930_v26, %v1769_v30  ;;  %v2418_v55 = vpop.permute.xlu1 %2417  ;;  %v4997_v26 = vld [vmem:[#allocation25_spill] sm:$0xff] }
 0x41c   : > { %v2498_v59 = vsel %vm2481_vm0, 0.0, %v2418_v55 }
 0x41d   : > { %v2531_v19 = vsel %vm2514_vm1, %v2498_v59, 0.0  ;;  %v2158_v47 = vadd.f32 %v2124_v14, %v1964_v62 }
 0x41e   : > { %v2563_v9 = vadd.f32 %v2531_v19, %v4986_v42 }
 0x41f   : > { %v2352_v16 = vadd.f32 %v2318_v33, %v2158_v47  ;;  %v4998_v33 = vld [vmem:[#allocation27_spill] sm:$0xff] }
 0x420   : > { %2595 = vst [vmem:[%s4537_s10 + $0x80] sm:$0xff] %v2563_v9 }
 0x421   : > { %2447 = vrot.lane.b32.xlu1 %v2352_v16, %s2860_s6  ;;  %v4999_v16 = vld [vmem:[#allocation31_spill] sm:$0xff] }
 0x423   : > { %v2426_v48 = vpop.permute.xlu2 %2425 }
 0x424   : > { %v2502_v22 = vsel %vm2481_vm0, 0.0, %v2426_v48 }
 0x425   : > { %v2535_v4 = vsel %vm2514_vm1, %v2502_v22, 0.0 }
 0x426   : > { %v2567_v7 = vadd.f32 %v2535_v4, %v4987_v29 }
 0x428   : > { %2599 = vst [vmem:[%s4537_s10 + $0xa0] sm:$0xff] %v2567_v7  ;;  %v5000_v7 = vld [vmem:[#allocation33_spill] sm:$0xff] }
 0x42b   : > { %v2422_v10 = vpop.permute.xlu0 %2421 }
 0x42c   : > { %v2500_v13 = vsel %vm2481_vm0, 0.0, %v2422_v10 }
 0x42d   : > { %v2533_v46 = vsel %vm2514_vm1, %v2500_v13, 0.0 }
 0x42e   : > { %v2565_v32 = vadd.f32 %v2533_v46, %v4988_v54 }
 0x430   : > { %2597 = vst [vmem:[%s4537_s10 + $0x90] sm:$0xff] %v2565_v32 }
 0x433   : > { %v2424_v12 = vpop.permute.xlu1 %2423 }
 0x434   : > { %v2501_v21 = vsel %vm2481_vm0, 0.0, %v2424_v12 }
 0x435   : > { %v2534_v3 = vsel %vm2514_vm1, %v2501_v21, 0.0 }
 0x436   : > { %v2566_v57 = vadd.f32 %v2534_v3, %v4989_v43 }
 0x438   : > { %2598 = vst [vmem:[%s4537_s10 + $0x98] sm:$0xff] %v2566_v57 }
 0x43b   : > { %v2432_v38 = vpop.permute.xlu2 %2431 }
 0x43c   : > { %v2505_v23 = vsel %vm2481_vm0, 0.0, %v2432_v38 }
 0x43d   : > { %v2538_v35 = vsel %vm2514_vm1, %v2505_v23, 0.0 }
 0x43e   : > { %v2570_v51 = vadd.f32 %v2538_v35, %v4990_v41 }
 0x440   : > { %2602 = vst [vmem:[%s4537_s10 + $0xb8] sm:$0xff] %v2570_v51 }
 0x443   : > { %v2428_v49 = vpop.permute.xlu0 %2427 }
 0x444   : > { %v2503_v40 = vsel %vm2481_vm0, 0.0, %v2428_v49 }
 0x445   : > { %v2536_v61 = vsel %vm2514_vm1, %v2503_v40, 0.0 }
 0x446   : > { %v2568_v18 = vadd.f32 %v2536_v61, %v4991_v34 }
 0x448   : > { %2600 = vst [vmem:[%s4537_s10 + $0xa8] sm:$0xff] %v2568_v18 }
 0x44b   : > { %v2430_v5 = vpop.permute.xlu1 %2429 }
 0x44c   : > { %v2504_v24 = vsel %vm2481_vm0, 0.0, %v2430_v5 }
 0x44d   : > { %v2537_v50 = vsel %vm2514_vm1, %v2504_v24, 0.0 }
 0x44e   : > { %v2569_v2 = vadd.f32 %v2537_v50, %v4992_v11 }
 0x450   : > { %2601 = vst [vmem:[%s4537_s10 + $0xb0] sm:$0xff] %v2569_v2 }
 0x453   : > { %v2438_v0 = vpop.permute.xlu2 %2437 }
 0x454   : > { %v2508_v1 = vsel %vm2481_vm0, 0.0, %v2438_v0 }
 0x455   : > { %v2541_v63 = vsel %vm2514_vm1, %v2508_v1, 0.0 }
 0x456   : > { %v2573_v58 = vadd.f32 %v2541_v63, %v4993_v6 }
 0x458   : > { %2605 = vst [vmem:[%s4537_s10 + $0xd0] sm:$0xff] %v2573_v58 }
 0x45b   : > { %v2434_v28 = vpop.permute.xlu0 %2433 }
 0x45c   : > { %v2506_v37 = vsel %vm2481_vm0, 0.0, %v2434_v28 }
 0x45d   : > { %v2539_v25 = vsel %vm2514_vm1, %v2506_v37, 0.0 }
 0x45e   : > { %v2571_v56 = vadd.f32 %v2539_v25, %v4994_v45 }
 0x460   : > { %2603 = vst [vmem:[%s4537_s10 + $0xc0] sm:$0xff] %v2571_v56 }
 0x463   : > { %v2436_v17 = vpop.permute.xlu1 %2435 }
 0x464   : > { %v2507_v20 = vsel %vm2481_vm0, 0.0, %v2436_v17 }
 0x465   : > { %v2540_v53 = vsel %vm2514_vm1, %v2507_v20, 0.0 }
 0x466   : > { %v2572_v44 = vadd.f32 %v2540_v53, %v4995_v31 }
 0x468   : > { %2604 = vst [vmem:[%s4537_s10 + $0xc8] sm:$0xff] %v2572_v44 }
 0x46b   : > { %v2444_v8 = vpop.permute.xlu2 %2443 }
 0x46c   : > { %v2511_v52 = vsel %vm2481_vm0, 0.0, %v2444_v8 }
 0x46d   : > { %v2544_v36 = vsel %vm2514_vm1, %v2511_v52, 0.0 }
 0x46e   : > { %v2576_v60 = vadd.f32 %v2544_v36, %v4996_v15 }
 0x470   : > { %2608 = vst [vmem:[%s4537_s10 + $0xe8] sm:$0xff] %v2576_v60 }
 0x473   : > { %v2440_v27 = vpop.permute.xlu0 %2439 }
 0x474   : > { %v2509_v39 = vsel %vm2481_vm0, 0.0, %v2440_v27 }
 0x475   : > { %v2542_v30 = vsel %vm2514_vm1, %v2509_v39, 0.0 }
 0x476   : > { %v2574_v14 = vadd.f32 %v2542_v30, %v4997_v26 }
 0x478   : > { %2606 = vst [vmem:[%s4537_s10 + $0xd8] sm:$0xff] %v2574_v14 }
 0x47b   : > { %v2442_v62 = vpop.permute.xlu1 %2441 }
 0x47c   : > { %v2510_v55 = vsel %vm2481_vm0, 0.0, %v2442_v62 }
 0x47d   : > { %v2543_v59 = vsel %vm2514_vm1, %v2510_v55, 0.0 }
 0x47e   : > { %v2575_v19 = vadd.f32 %v2543_v59, %v4998_v33 }
 0x480   : > { %2607 = vst [vmem:[%s4537_s10 + $0xe0] sm:$0xff] %v2575_v19 }
 0x48b   : > { %v2446_v47 = vpop.permute.xlu0 %2445 }
 0x48c   : > { %v2512_v42 = vsel %vm2481_vm0, 0.0, %v2446_v47 }
 0x48d   : > { %v2545_v9 = vsel %vm2514_vm1, %v2512_v42, 0.0 }
 0x48e   : > { %v2577_v48 = vadd.f32 %v2545_v9, %v4999_v16 }
 0x490   : > { %2609 = vst [vmem:[%s4537_s10 + $0xf0] sm:$0xff] %v2577_v48 }
 0x493   : > { %v2448_v22 = vpop.permute.xlu1 %2447 }
 0x494   : > { %v2513_v4 = vsel %vm2481_vm0, 0.0, %v2448_v22 }
 0x495   : > { %v2546_v29 = vsel %vm2514_vm1, %v2513_v4, 0.0 }
 0x496   : > { %v2578_v10 = vadd.f32 %v2546_v29, %v5000_v7 }
 0x498   : > { %2610 = vst [vmem:[%s4537_s10 + $0xf8] sm:$0xff] %v2578_v10 }
 0x499 PF: > { %s15_s18 = sadd.s32 1, %s2857_s18  }
 0x49a   : > { %p12_p4 = scmp.ge.s32.totalorder %s15_s18, 4  }
 0x49c   :  { %14 = sbr.rel (!%p12_p4) target bundleno = 1 (0x1), region = 80 }

</bundles_post_ra>
